<compile_context>
chip_gen: v7x
topology: tpu7x:2x2x1
jax: 0.10.0
libtpu: 0.0.40
codegen_flags: <defaults>
</compile_context>

<pallas_src>
import math
import numpy as np
import jax
import jax.numpy as jnp
from jax import lax
from jax.experimental import pallas as pl
from jax.experimental.pallas import tpu as pltpu


def _upsample_matrix(n_in, n_out):
    """Bilinear (align_corners=True) interpolation matrix, shape (n_out, n_in)."""
    m = np.zeros((n_out, n_in), dtype=np.float32)
    if n_in == 1:
        m[:, 0] = 1.0
        return m
    src = np.arange(n_out, dtype=np.float64) * (n_in - 1) / (n_out - 1)
    i0 = np.clip(np.floor(src).astype(np.int64), 0, n_in - 2)
    w = (src - i0).astype(np.float32)
    m[np.arange(n_out), i0] += 1.0 - w
    m[np.arange(n_out), i0 + 1] += w
    return m


def _upsample_taps(n_in, n_out):
    """Per-output-index (i0, frac) for bilinear align_corners=True upsample."""
    if n_in == 1:
        return [0] * n_out, [0.0] * n_out
    src = np.arange(n_out, dtype=np.float64) * (n_in - 1) / (n_out - 1)
    i0 = np.clip(np.floor(src).astype(np.int64), 0, n_in - 2)
    fr = (src - i0).astype(np.float32)
    return [int(v) for v in i0], [float(v) for v in fr]


def _pick_vmem_limit_bytes():
    """Per-chip scoped-VMEM limit: capacity minus headroom (64 MiB on v7x)."""
    cap = 64 * 1024 * 1024
    try:
        cap = int(getattr(pltpu.get_tpu_info(), "vmem_capacity_bytes", cap))
    except Exception:
        pass
    return max(16 * 1024 * 1024, min(cap - 16 * 1024 * 1024, 112 * 1024 * 1024))


def psp_upsample(x_nchw, w_hwio, b, alpha, out_dtype=jnp.float32):
    """Bilinear x2 upsample (align_corners=True) -> Conv2d(3x3, pad=1) -> PReLU."""
    n, cin, h, w = x_nchw.shape
    kh, kw_, wcin, cout = w_hwio.shape
    assert (kh, kw_) == (3, 3) and wcin == cin
    hout, wout = 2 * h, 2 * w
    nh = hout                          # rows per output column (q) inside one grid step
    R = wout * nh                      # output positions per batch element, rows (q, p)
    PAD = ((nh + 1 + 15) // 16) * 16   # zero rows each side of the scratch
    # the row-shift im2col scheme relies on PAD >= nh + 1 and rows ordered (q, p)
    assert PAD >= nh + 1 and PAD % 16 == 0

    # ---- host-side constants (tiny: O(H^2) and O(9*Cin*Cout)) ----
    uh = jnp.asarray(_upsample_matrix(h, hout)).astype(jnp.bfloat16)           # (2H, H)
    wi0, wfr = _upsample_taps(w, wout)                                         # width taps
    wmat = jnp.asarray(np.asarray(w_hwio, np.float32).reshape(9 * cin, cout)
                       ).astype(jnp.bfloat16)                                  # (9Cin, Cout)
    b_tiled = jnp.asarray(np.tile(np.asarray(b, np.float32), wout)[None, :])   # (1, 2W*Cout)
    alpha_arr = jnp.asarray([[np.float32(alpha)]])                             # (1,1) SMEM

    def kernel(x_ref, uh_ref, wmat_ref, b_ref, alpha_ref, o_ref, up_ref):
        # ---- height upsample: ONE bf16 matmul, f32 accumulation ----
        t = jnp.dot(uh_ref[...], x_ref[...],
                    preferred_element_type=jnp.float32)                # (2H, W*Cin) f32

        # ---- zero scratch pad regions (valid region fully overwritten below) ----
        up_ref[0:PAD, :] = jnp.zeros((PAD, cin), jnp.bfloat16)
        up_ref[PAD + R:PAD + R + PAD, :] = jnp.zeros((PAD, cin), jnp.bfloat16)

        # ---- width upsample fused with (w,c)-lanes -> channel-minor conversion,
        #      written straight into the pre-padded bf16 scratch, rows (q, p) ----
        for q in range(wout):
            i0, fr = wi0[q], wfr[q]
            c0 = t[:, i0 * cin:(i0 + 1) * cin]
            if w == 1 or fr == 0.0:
                piece = c0
            else:
                c1 = t[:, (i0 + 1) * cin:(i0 + 2) * cin]
                piece = c0 * (1.0 - fr) + c1 * fr
            up_ref[PAD + q * nh:PAD + (q + 1) * nh, :] = piece.astype(jnp.bfloat16)

        # ---- 3x3 conv (zero pad 1) as ONE bf16 matmul against the tap weights ----
        # 3 dh-shifted (sublane-misaligned) bf16 copies covering rows [-nh, R+nh);
        # the dw shifts below are +-nh, sublane-aligned when nh % 8 == 0.
        base = PAD - nh
        ext = R + 2 * nh
        p_ext = lax.broadcasted_iota(jnp.int32, (ext, 1), 0) % nh       # output-row p

        shifted = []
        for dh in range(3):
            s = up_ref[base + (dh - 1):base + (dh - 1) + ext, :]        # (ext, Cin) bf16
            if dh == 0:
                s = jnp.where(p_ext != 0, s, 0.0)          # tap reads p - 1
            elif dh == 2:
                s = jnp.where(p_ext != nh - 1, s, 0.0)     # tap reads p + 1
            shifted.append(s)

        taps = [shifted[dh][dw * nh:dw * nh + R, :]                     # tap (dh, dw)
                for dh in range(3) for dw in range(3)]
        patches = jnp.concatenate(taps, axis=1)                         # (R, 9*Cin) bf16
        conv = jnp.dot(patches, wmat_ref[...],
                       preferred_element_type=jnp.float32)              # (R, Cout) f32

        # ---- per-q column stores into the lane-dense (2H, 2W*Cout) output block ----
        for q in range(wout):
            o_ref[:, q * cout:(q + 1) * cout] = (
                conv[q * nh:(q + 1) * nh, :].astype(o_ref.dtype))

        # ---- bias + PReLU once on the dense output block ----
        y = o_ref[...].astype(jnp.float32) + b_ref[...]
        a = alpha_ref[0, 0]
        o_ref[...] = jnp.where(y > 0, y, y * a).astype(o_ref.dtype)

    # NCHW -> flattened NHWC rows=(n, h), lanes=(w, c); bf16 for the MXU
    x_flat = (jnp.transpose(x_nchw, (0, 2, 3, 1))
              .reshape(n * h, w * cin).astype(jnp.bfloat16))

    flops = (2 * n * hout * h * (w * cin)          # height-upsample matmul
             + 3 * n * hout * wout * cin           # width lerp
             + 2 * n * R * 9 * cin * cout)         # conv matmul
    bytes_accessed = (x_flat.size * 2 + uh.size * 2 + wmat.size * 2
                      + b_tiled.size * 4
                      + n * hout * wout * cout * jnp.dtype(out_dtype).itemsize)

    grid_spec = pltpu.PrefetchScalarGridSpec(
        num_scalar_prefetch=0,
        grid=(n,),
        in_specs=[
            pl.BlockSpec((h, w * cin), lambda bi: (bi, 0)),             # x, per batch
            pl.BlockSpec((hout, h), lambda bi: (0, 0)),                 # uh (resident)
            pl.BlockSpec((9 * cin, cout), lambda bi: (0, 0)),           # conv weights
            pl.BlockSpec((1, wout * cout), lambda bi: (0, 0)),          # bias, lane-dense
            pl.BlockSpec((1, 1), lambda bi: (0, 0),
                         memory_space=pltpu.MemorySpace.SMEM),          # PReLU alpha
        ],
        out_specs=pl.BlockSpec((hout, wout * cout), lambda bi: (bi, 0)),
        scratch_shapes=[pltpu.VMEM((R + 2 * PAD, cin), jnp.bfloat16)],  # padded upsample
    )

    out_flat = pl.pallas_call(
        kernel,
        out_shape=jax.ShapeDtypeStruct((n * hout, wout * cout), out_dtype),
        grid_spec=grid_spec,
        compiler_params=pltpu.CompilerParams(
            dimension_semantics=("parallel",),
            vmem_limit_bytes=_pick_vmem_limit_bytes()),
        cost_estimate=pl.CostEstimate(flops=flops, transcendentals=0,
                                      bytes_accessed=int(bytes_accessed)),
    )(x_flat, uh, wmat, b_tiled, alpha_arr)

    # rows are (n, p), lanes are (q, cout)  ->  NCHW
    return out_flat.reshape(n, hout, wout, cout).transpose(0, 3, 1, 2)


def psp_upsample_ref(x_nchw, w_hwio, b, alpha):
    """Pure-JAX reference modelling the kernel's bf16 staging exactly:
    bf16-rounded inputs / interp matrices / conv weights, and a bf16 rounding of
    the upsampled activation before the conv (as the kernel's im2col does)."""
    n, cin, h, w = x_nchw.shape
    r = lambda v: v.astype(jnp.bfloat16).astype(jnp.float32)
    uh = r(jnp.asarray(_upsample_matrix(h, 2 * h)))
    uw = r(jnp.asarray(_upsample_matrix(w, 2 * w)))
    up = jnp.einsum('ph,nchw,qw->ncpq', uh, r(x_nchw), uw,
                    precision=lax.Precision.HIGHEST)
    up = r(up)
    w_oihw = r(jnp.transpose(w_hwio, (3, 2, 0, 1)))
    out = lax.conv_general_dilated(up, w_oihw, (1, 1), ((1, 1), (1, 1)),
                                   dimension_numbers=('NCHW', 'OIHW', 'NCHW'),
                                   precision=lax.Precision.HIGHEST)
    out = out + b[None, :, None, None]
    return jnp.where(out > 0, out, alpha * out)


if __name__ == "__main__":
    N, Cin, Cout, H, W = 2, 4, 8, 16, 16

    key = jax.random.PRNGKey(0)
    kx, kw, kb = jax.random.split(key, 3)
    x = jax.random.normal(kx, (N, Cin, H, W), jnp.float32)

    # deterministic synthetic parameters (Conv2d(in=4, out=8, k=3, pad=1) + PReLU)
    bound = 1.0 / math.sqrt(Cin * 9)
    w_hwio = jax.random.uniform(kw, (3, 3, Cin, Cout), jnp.float32, -bound, bound)
    b = jax.random.uniform(kb, (Cout,), jnp.float32, -bound, bound)
    alpha = 0.25  # PyTorch PReLU default init

    out = psp_upsample(x, w_hwio, b, alpha)
    out = jax.block_until_ready(out)
    assert out.shape == (N, Cout, 2 * H, 2 * W)

    ref = psp_upsample_ref(x, w_hwio, b, alpha)
    np.testing.assert_allclose(np.asarray(out), np.asarray(ref), rtol=2e-2, atol=2e-2)
    print("KERNEL_OK")
</pallas_src>

<mosaic_0001>
module attributes {stable_mosaic.version = 11 : i64} {
  func.func @kernel(%arg0: i32, %arg1: memref<16x64xbf16, #tpu.memory_space<vmem>>, %arg2: memref<32x16xbf16, #tpu.memory_space<vmem>>, %arg3: memref<36x8xbf16, #tpu.memory_space<vmem>>, %arg4: memref<1x256xf32, #tpu.memory_space<vmem>>, %arg5: memref<1x1xf32, #tpu.memory_space<smem>>, %arg6: memref<32x256xf32, #tpu.memory_space<vmem>>, %arg7: memref<1120x4xbf16, #tpu.memory_space<vmem>>) attributes {dimension_semantics = [#tpu.dimension_semantics<parallel>], iteration_bounds = array<i64: 2>, scalar_prefetch = 0 : i64, scratch_operands = 1 : i64, tpu.core_type = #tpu.core_type<tc>, window_params = [{transform_indices = @transform_0, window_bounds = array<i64: 16, 64>}, {pipeline_mode = #tpu.pipeline_mode<synchronous>, transform_indices = @transform_1, window_bounds = array<i64: 32, 16>}, {pipeline_mode = #tpu.pipeline_mode<synchronous>, transform_indices = @transform_2, window_bounds = array<i64: 36, 8>}, {pipeline_mode = #tpu.pipeline_mode<synchronous>, transform_indices = @transform_3, window_bounds = array<i64: 1, 256>}, {transform_indices = @transform_4, window_bounds = array<i64: 1, 1>}, {transform_indices = @transform_5, window_bounds = array<i64: 32, 256>}]} {
    %c0 = arith.constant 0 : index
    %c0_0 = arith.constant 0 : index
    %0 = vector.load %arg2[%c0, %c0_0] : memref<32x16xbf16, #tpu.memory_space<vmem>>, vector<32x16xbf16>
    %c0_1 = arith.constant 0 : index
    %c0_2 = arith.constant 0 : index
    %1 = vector.load %arg1[%c0_1, %c0_2] : memref<16x64xbf16, #tpu.memory_space<vmem>>, vector<16x64xbf16>
    %cst = arith.constant dense<0.000000e+00> : vector<32x64xf32>
    %2 = tpu.matmul %0, %1, %cst {dimension_numbers = #tpu.dot_dimension_numbers<[1], [0], [0], [1], [0, 0, 1, 1], [], []>} : vector<32x16xbf16>, vector<16x64xbf16>, vector<32x64xf32> -> vector<32x64xf32>
    %cst_3 = arith.constant 0.000000e+00 : bf16
    %3 = vector.broadcast %cst_3 : bf16 to vector<48x4xbf16>
    %c0_4 = arith.constant 0 : index
    %c0_5 = arith.constant 0 : index
    %4 = vector.load %arg7[%c0_4, %c0_5] : memref<1120x4xbf16, #tpu.memory_space<vmem>>, vector<48x4xbf16>
    tpu.vector_store %arg7[%c0_4, %c0_5], %3 {strides = array<i32>} : memref<1120x4xbf16, #tpu.memory_space<vmem>>, vector<48x4xbf16>,
    %cst_6 = arith.constant 0.000000e+00 : bf16
    %5 = vector.broadcast %cst_6 : bf16 to vector<48x4xbf16>
    %c1072 = arith.constant 1072 : index
    %c0_7 = arith.constant 0 : index
    %6 = vector.load %arg7[%c1072, %c0_7] : memref<1120x4xbf16, #tpu.memory_space<vmem>>, vector<48x4xbf16>
    tpu.vector_store %arg7[%c1072, %c0_7], %5 {strides = array<i32>} : memref<1120x4xbf16, #tpu.memory_space<vmem>>, vector<48x4xbf16>,
    %7 = vector.extract_strided_slice %2 {offsets = [0, 0], sizes = [32, 4], strides = [1, 1]} : vector<32x64xf32> to vector<32x4xf32>
    %8 = arith.truncf %7 : vector<32x4xf32> to vector<32x4xbf16>
    %c48 = arith.constant 48 : index
    %c0_8 = arith.constant 0 : index
    %9 = vector.load %arg7[%c48, %c0_8] : memref<1120x4xbf16, #tpu.memory_space<vmem>>, vector<32x4xbf16>
    tpu.vector_store %arg7[%c48, %c0_8], %8 {strides = array<i32>} : memref<1120x4xbf16, #tpu.memory_space<vmem>>, vector<32x4xbf16>,
    %10 = vector.extract_strided_slice %2 {offsets = [0, 0], sizes = [32, 4], strides = [1, 1]} : vector<32x64xf32> to vector<32x4xf32>
    %11 = vector.extract_strided_slice %2 {offsets = [0, 4], sizes = [32, 4], strides = [1, 1]} : vector<32x64xf32> to vector<32x4xf32>
    %cst_9 = arith.constant 5.161290e-01 : f32
    %12 = vector.broadcast %cst_9 : f32 to vector<32x4xf32>
    %13 = arith.mulf %10, %12 : vector<32x4xf32>
    %cst_10 = arith.constant 0.483870953 : f32
    %14 = vector.broadcast %cst_10 : f32 to vector<32x4xf32>
    %15 = arith.mulf %11, %14 : vector<32x4xf32>
    %16 = arith.addf %13, %15 : vector<32x4xf32>
    %17 = arith.truncf %16 : vector<32x4xf32> to vector<32x4xbf16>
    %c80 = arith.constant 80 : index
    %c0_11 = arith.constant 0 : index
    %18 = vector.load %arg7[%c80, %c0_11] : memref<1120x4xbf16, #tpu.memory_space<vmem>>, vector<32x4xbf16>
    tpu.vector_store %arg7[%c80, %c0_11], %17 {strides = array<i32>} : memref<1120x4xbf16, #tpu.memory_space<vmem>>, vector<32x4xbf16>,
    %19 = vector.extract_strided_slice %2 {offsets = [0, 0], sizes = [32, 4], strides = [1, 1]} : vector<32x64xf32> to vector<32x4xf32>
    %20 = vector.extract_strided_slice %2 {offsets = [0, 4], sizes = [32, 4], strides = [1, 1]} : vector<32x64xf32> to vector<32x4xf32>
    %cst_12 = arith.constant 0.0322580934 : f32
    %21 = vector.broadcast %cst_12 : f32 to vector<32x4xf32>
    %22 = arith.mulf %19, %21 : vector<32x4xf32>
    %cst_13 = arith.constant 0.967741906 : f32
    %23 = vector.broadcast %cst_13 : f32 to vector<32x4xf32>
    %24 = arith.mulf %20, %23 : vector<32x4xf32>
    %25 = arith.addf %22, %24 : vector<32x4xf32>
    %26 = arith.truncf %25 : vector<32x4xf32> to vector<32x4xbf16>
    %c112 = arith.constant 112 : index
    %c0_14 = arith.constant 0 : index
    %27 = vector.load %arg7[%c112, %c0_14] : memref<1120x4xbf16, #tpu.memory_space<vmem>>, vector<32x4xbf16>
    tpu.vector_store %arg7[%c112, %c0_14], %26 {strides = array<i32>} : memref<1120x4xbf16, #tpu.memory_space<vmem>>, vector<32x4xbf16>,
    %28 = vector.extract_strided_slice %2 {offsets = [0, 4], sizes = [32, 4], strides = [1, 1]} : vector<32x64xf32> to vector<32x4xf32>
    %29 = vector.extract_strided_slice %2 {offsets = [0, 8], sizes = [32, 4], strides = [1, 1]} : vector<32x64xf32> to vector<32x4xf32>
    %cst_15 = arith.constant 0.54838711 : f32
    %30 = vector.broadcast %cst_15 : f32 to vector<32x4xf32>
    %31 = arith.mulf %28, %30 : vector<32x4xf32>
    %cst_16 = arith.constant 0.45161289 : f32
    %32 = vector.broadcast %cst_16 : f32 to vector<32x4xf32>
    %33 = arith.mulf %29, %32 : vector<32x4xf32>
    %34 = arith.addf %31, %33 : vector<32x4xf32>
    %35 = arith.truncf %34 : vector<32x4xf32> to vector<32x4xbf16>
    %c144 = arith.constant 144 : index
    %c0_17 = arith.constant 0 : index
    %36 = vector.load %arg7[%c144, %c0_17] : memref<1120x4xbf16, #tpu.memory_space<vmem>>, vector<32x4xbf16>
    tpu.vector_store %arg7[%c144, %c0_17], %35 {strides = array<i32>} : memref<1120x4xbf16, #tpu.memory_space<vmem>>, vector<32x4xbf16>,
    %37 = vector.extract_strided_slice %2 {offsets = [0, 4], sizes = [32, 4], strides = [1, 1]} : vector<32x64xf32> to vector<32x4xf32>
    %38 = vector.extract_strided_slice %2 {offsets = [0, 8], sizes = [32, 4], strides = [1, 1]} : vector<32x64xf32> to vector<32x4xf32>
    %cst_18 = arith.constant 0.0645161271 : f32
    %39 = vector.broadcast %cst_18 : f32 to vector<32x4xf32>
    %40 = arith.mulf %37, %39 : vector<32x4xf32>
    %cst_19 = arith.constant 0.935483872 : f32
    %41 = vector.broadcast %cst_19 : f32 to vector<32x4xf32>
    %42 = arith.mulf %38, %41 : vector<32x4xf32>
    %43 = arith.addf %40, %42 : vector<32x4xf32>
    %44 = arith.truncf %43 : vector<32x4xf32> to vector<32x4xbf16>
    %c176 = arith.constant 176 : index
    %c0_20 = arith.constant 0 : index
    %45 = vector.load %arg7[%c176, %c0_20] : memref<1120x4xbf16, #tpu.memory_space<vmem>>, vector<32x4xbf16>
    tpu.vector_store %arg7[%c176, %c0_20], %44 {strides = array<i32>} : memref<1120x4xbf16, #tpu.memory_space<vmem>>, vector<32x4xbf16>,
    %46 = vector.extract_strided_slice %2 {offsets = [0, 8], sizes = [32, 4], strides = [1, 1]} : vector<32x64xf32> to vector<32x4xf32>
    %47 = vector.extract_strided_slice %2 {offsets = [0, 12], sizes = [32, 4], strides = [1, 1]} : vector<32x64xf32> to vector<32x4xf32>
    %cst_21 = arith.constant 0.580645204 : f32
    %48 = vector.broadcast %cst_21 : f32 to vector<32x4xf32>
    %49 = arith.mulf %46, %48 : vector<32x4xf32>
    %cst_22 = arith.constant 0.419354826 : f32
    %50 = vector.broadcast %cst_22 : f32 to vector<32x4xf32>
    %51 = arith.mulf %47, %50 : vector<32x4xf32>
    %52 = arith.addf %49, %51 : vector<32x4xf32>
    %53 = arith.truncf %52 : vector<32x4xf32> to vector<32x4xbf16>
    %c208 = arith.constant 208 : index
    %c0_23 = arith.constant 0 : index
    %54 = vector.load %arg7[%c208, %c0_23] : memref<1120x4xbf16, #tpu.memory_space<vmem>>, vector<32x4xbf16>
    tpu.vector_store %arg7[%c208, %c0_23], %53 {strides = array<i32>} : memref<1120x4xbf16, #tpu.memory_space<vmem>>, vector<32x4xbf16>,
    %55 = vector.extract_strided_slice %2 {offsets = [0, 8], sizes = [32, 4], strides = [1, 1]} : vector<32x64xf32> to vector<32x4xf32>
    %56 = vector.extract_strided_slice %2 {offsets = [0, 12], sizes = [32, 4], strides = [1, 1]} : vector<32x64xf32> to vector<32x4xf32>
    %cst_24 = arith.constant 0.0967742204 : f32
    %57 = vector.broadcast %cst_24 : f32 to vector<32x4xf32>
    %58 = arith.mulf %55, %57 : vector<32x4xf32>
    %cst_25 = arith.constant 0.903225779 : f32
    %59 = vector.broadcast %cst_25 : f32 to vector<32x4xf32>
    %60 = arith.mulf %56, %59 : vector<32x4xf32>
    %61 = arith.addf %58, %60 : vector<32x4xf32>
    %62 = arith.truncf %61 : vector<32x4xf32> to vector<32x4xbf16>
    %c240 = arith.constant 240 : index
    %c0_26 = arith.constant 0 : index
    %63 = vector.load %arg7[%c240, %c0_26] : memref<1120x4xbf16, #tpu.memory_space<vmem>>, vector<32x4xbf16>
    tpu.vector_store %arg7[%c240, %c0_26], %62 {strides = array<i32>} : memref<1120x4xbf16, #tpu.memory_space<vmem>>, vector<32x4xbf16>,
    %64 = vector.extract_strided_slice %2 {offsets = [0, 12], sizes = [32, 4], strides = [1, 1]} : vector<32x64xf32> to vector<32x4xf32>
    %65 = vector.extract_strided_slice %2 {offsets = [0, 16], sizes = [32, 4], strides = [1, 1]} : vector<32x64xf32> to vector<32x4xf32>
    %cst_27 = arith.constant 0.612903237 : f32
    %66 = vector.broadcast %cst_27 : f32 to vector<32x4xf32>
    %67 = arith.mulf %64, %66 : vector<32x4xf32>
    %cst_28 = arith.constant 0.387096763 : f32
    %68 = vector.broadcast %cst_28 : f32 to vector<32x4xf32>
    %69 = arith.mulf %65, %68 : vector<32x4xf32>
    %70 = arith.addf %67, %69 : vector<32x4xf32>
    %71 = arith.truncf %70 : vector<32x4xf32> to vector<32x4xbf16>
    %c272 = arith.constant 272 : index
    %c0_29 = arith.constant 0 : index
    %72 = vector.load %arg7[%c272, %c0_29] : memref<1120x4xbf16, #tpu.memory_space<vmem>>, vector<32x4xbf16>
    tpu.vector_store %arg7[%c272, %c0_29], %71 {strides = array<i32>} : memref<1120x4xbf16, #tpu.memory_space<vmem>>, vector<32x4xbf16>,
    %73 = vector.extract_strided_slice %2 {offsets = [0, 12], sizes = [32, 4], strides = [1, 1]} : vector<32x64xf32> to vector<32x4xf32>
    %74 = vector.extract_strided_slice %2 {offsets = [0, 16], sizes = [32, 4], strides = [1, 1]} : vector<32x64xf32> to vector<32x4xf32>
    %cst_30 = arith.constant 0.129032254 : f32
    %75 = vector.broadcast %cst_30 : f32 to vector<32x4xf32>
    %76 = arith.mulf %73, %75 : vector<32x4xf32>
    %cst_31 = arith.constant 0.870967745 : f32
    %77 = vector.broadcast %cst_31 : f32 to vector<32x4xf32>
    %78 = arith.mulf %74, %77 : vector<32x4xf32>
    %79 = arith.addf %76, %78 : vector<32x4xf32>
    %80 = arith.truncf %79 : vector<32x4xf32> to vector<32x4xbf16>
    %c304 = arith.constant 304 : index
    %c0_32 = arith.constant 0 : index
    %81 = vector.load %arg7[%c304, %c0_32] : memref<1120x4xbf16, #tpu.memory_space<vmem>>, vector<32x4xbf16>
    tpu.vector_store %arg7[%c304, %c0_32], %80 {strides = array<i32>} : memref<1120x4xbf16, #tpu.memory_space<vmem>>, vector<32x4xbf16>,
    %82 = vector.extract_strided_slice %2 {offsets = [0, 16], sizes = [32, 4], strides = [1, 1]} : vector<32x64xf32> to vector<32x4xf32>
    %83 = vector.extract_strided_slice %2 {offsets = [0, 20], sizes = [32, 4], strides = [1, 1]} : vector<32x64xf32> to vector<32x4xf32>
    %cst_33 = arith.constant 0.645161271 : f32
    %84 = vector.broadcast %cst_33 : f32 to vector<32x4xf32>
    %85 = arith.mulf %82, %84 : vector<32x4xf32>
    %cst_34 = arith.constant 0.354838699 : f32
    %86 = vector.broadcast %cst_34 : f32 to vector<32x4xf32>
    %87 = arith.mulf %83, %86 : vector<32x4xf32>
    %88 = arith.addf %85, %87 : vector<32x4xf32>
    %89 = arith.truncf %88 : vector<32x4xf32> to vector<32x4xbf16>
    %c336 = arith.constant 336 : index
    %c0_35 = arith.constant 0 : index
    %90 = vector.load %arg7[%c336, %c0_35] : memref<1120x4xbf16, #tpu.memory_space<vmem>>, vector<32x4xbf16>
    tpu.vector_store %arg7[%c336, %c0_35], %89 {strides = array<i32>} : memref<1120x4xbf16, #tpu.memory_space<vmem>>, vector<32x4xbf16>,
    %91 = vector.extract_strided_slice %2 {offsets = [0, 16], sizes = [32, 4], strides = [1, 1]} : vector<32x64xf32> to vector<32x4xf32>
    %92 = vector.extract_strided_slice %2 {offsets = [0, 20], sizes = [32, 4], strides = [1, 1]} : vector<32x64xf32> to vector<32x4xf32>
    %cst_36 = arith.constant 0.161290348 : f32
    %93 = vector.broadcast %cst_36 : f32 to vector<32x4xf32>
    %94 = arith.mulf %91, %93 : vector<32x4xf32>
    %cst_37 = arith.constant 0.838709652 : f32
    %95 = vector.broadcast %cst_37 : f32 to vector<32x4xf32>
    %96 = arith.mulf %92, %95 : vector<32x4xf32>
    %97 = arith.addf %94, %96 : vector<32x4xf32>
    %98 = arith.truncf %97 : vector<32x4xf32> to vector<32x4xbf16>
    %c368 = arith.constant 368 : index
    %c0_38 = arith.constant 0 : index
    %99 = vector.load %arg7[%c368, %c0_38] : memref<1120x4xbf16, #tpu.memory_space<vmem>>, vector<32x4xbf16>
    tpu.vector_store %arg7[%c368, %c0_38], %98 {strides = array<i32>} : memref<1120x4xbf16, #tpu.memory_space<vmem>>, vector<32x4xbf16>,
    %100 = vector.extract_strided_slice %2 {offsets = [0, 20], sizes = [32, 4], strides = [1, 1]} : vector<32x64xf32> to vector<32x4xf32>
    %101 = vector.extract_strided_slice %2 {offsets = [0, 24], sizes = [32, 4], strides = [1, 1]} : vector<32x64xf32> to vector<32x4xf32>
    %cst_39 = arith.constant 0.677419364 : f32
    %102 = vector.broadcast %cst_39 : f32 to vector<32x4xf32>
    %103 = arith.mulf %100, %102 : vector<32x4xf32>
    %cst_40 = arith.constant 0.322580636 : f32
    %104 = vector.broadcast %cst_40 : f32 to vector<32x4xf32>
    %105 = arith.mulf %101, %104 : vector<32x4xf32>
    %106 = arith.addf %103, %105 : vector<32x4xf32>
    %107 = arith.truncf %106 : vector<32x4xf32> to vector<32x4xbf16>
    %c400 = arith.constant 400 : index
    %c0_41 = arith.constant 0 : index
    %108 = vector.load %arg7[%c400, %c0_41] : memref<1120x4xbf16, #tpu.memory_space<vmem>>, vector<32x4xbf16>
    tpu.vector_store %arg7[%c400, %c0_41], %107 {strides = array<i32>} : memref<1120x4xbf16, #tpu.memory_space<vmem>>, vector<32x4xbf16>,
    %109 = vector.extract_strided_slice %2 {offsets = [0, 20], sizes = [32, 4], strides = [1, 1]} : vector<32x64xf32> to vector<32x4xf32>
    %110 = vector.extract_strided_slice %2 {offsets = [0, 24], sizes = [32, 4], strides = [1, 1]} : vector<32x64xf32> to vector<32x4xf32>
    %cst_42 = arith.constant 0.193548381 : f32
    %111 = vector.broadcast %cst_42 : f32 to vector<32x4xf32>
    %112 = arith.mulf %109, %111 : vector<32x4xf32>
    %cst_43 = arith.constant 0.806451618 : f32
    %113 = vector.broadcast %cst_43 : f32 to vector<32x4xf32>
    %114 = arith.mulf %110, %113 : vector<32x4xf32>
    %115 = arith.addf %112, %114 : vector<32x4xf32>
    %116 = arith.truncf %115 : vector<32x4xf32> to vector<32x4xbf16>
    %c432 = arith.constant 432 : index
    %c0_44 = arith.constant 0 : index
    %117 = vector.load %arg7[%c432, %c0_44] : memref<1120x4xbf16, #tpu.memory_space<vmem>>, vector<32x4xbf16>
    tpu.vector_store %arg7[%c432, %c0_44], %116 {strides = array<i32>} : memref<1120x4xbf16, #tpu.memory_space<vmem>>, vector<32x4xbf16>,
    %118 = vector.extract_strided_slice %2 {offsets = [0, 24], sizes = [32, 4], strides = [1, 1]} : vector<32x64xf32> to vector<32x4xf32>
    %119 = vector.extract_strided_slice %2 {offsets = [0, 28], sizes = [32, 4], strides = [1, 1]} : vector<32x64xf32> to vector<32x4xf32>
    %cst_45 = arith.constant 0.709677458 : f32
    %120 = vector.broadcast %cst_45 : f32 to vector<32x4xf32>
    %121 = arith.mulf %118, %120 : vector<32x4xf32>
    %cst_46 = arith.constant 0.290322572 : f32
    %122 = vector.broadcast %cst_46 : f32 to vector<32x4xf32>
    %123 = arith.mulf %119, %122 : vector<32x4xf32>
    %124 = arith.addf %121, %123 : vector<32x4xf32>
    %125 = arith.truncf %124 : vector<32x4xf32> to vector<32x4xbf16>
    %c464 = arith.constant 464 : index
    %c0_47 = arith.constant 0 : index
    %126 = vector.load %arg7[%c464, %c0_47] : memref<1120x4xbf16, #tpu.memory_space<vmem>>, vector<32x4xbf16>
    tpu.vector_store %arg7[%c464, %c0_47], %125 {strides = array<i32>} : memref<1120x4xbf16, #tpu.memory_space<vmem>>, vector<32x4xbf16>,
    %127 = vector.extract_strided_slice %2 {offsets = [0, 24], sizes = [32, 4], strides = [1, 1]} : vector<32x64xf32> to vector<32x4xf32>
    %128 = vector.extract_strided_slice %2 {offsets = [0, 28], sizes = [32, 4], strides = [1, 1]} : vector<32x64xf32> to vector<32x4xf32>
    %cst_48 = arith.constant 0.225806475 : f32
    %129 = vector.broadcast %cst_48 : f32 to vector<32x4xf32>
    %130 = arith.mulf %127, %129 : vector<32x4xf32>
    %cst_49 = arith.constant 0.774193525 : f32
    %131 = vector.broadcast %cst_49 : f32 to vector<32x4xf32>
    %132 = arith.mulf %128, %131 : vector<32x4xf32>
    %133 = arith.addf %130, %132 : vector<32x4xf32>
    %134 = arith.truncf %133 : vector<32x4xf32> to vector<32x4xbf16>
    %c496 = arith.constant 496 : index
    %c0_50 = arith.constant 0 : index
    %135 = vector.load %arg7[%c496, %c0_50] : memref<1120x4xbf16, #tpu.memory_space<vmem>>, vector<32x4xbf16>
    tpu.vector_store %arg7[%c496, %c0_50], %134 {strides = array<i32>} : memref<1120x4xbf16, #tpu.memory_space<vmem>>, vector<32x4xbf16>,
    %136 = vector.extract_strided_slice %2 {offsets = [0, 28], sizes = [32, 4], strides = [1, 1]} : vector<32x64xf32> to vector<32x4xf32>
    %137 = vector.extract_strided_slice %2 {offsets = [0, 32], sizes = [32, 4], strides = [1, 1]} : vector<32x64xf32> to vector<32x4xf32>
    %cst_51 = arith.constant 0.741935492 : f32
    %138 = vector.broadcast %cst_51 : f32 to vector<32x4xf32>
    %139 = arith.mulf %136, %138 : vector<32x4xf32>
    %cst_52 = arith.constant 0.258064508 : f32
    %140 = vector.broadcast %cst_52 : f32 to vector<32x4xf32>
    %141 = arith.mulf %137, %140 : vector<32x4xf32>
    %142 = arith.addf %139, %141 : vector<32x4xf32>
    %143 = arith.truncf %142 : vector<32x4xf32> to vector<32x4xbf16>
    %c528 = arith.constant 528 : index
    %c0_53 = arith.constant 0 : index
    %144 = vector.load %arg7[%c528, %c0_53] : memref<1120x4xbf16, #tpu.memory_space<vmem>>, vector<32x4xbf16>
    tpu.vector_store %arg7[%c528, %c0_53], %143 {strides = array<i32>} : memref<1120x4xbf16, #tpu.memory_space<vmem>>, vector<32x4xbf16>,
    %145 = vector.extract_strided_slice %2 {offsets = [0, 28], sizes = [32, 4], strides = [1, 1]} : vector<32x64xf32> to vector<32x4xf32>
    %146 = vector.extract_strided_slice %2 {offsets = [0, 32], sizes = [32, 4], strides = [1, 1]} : vector<32x64xf32> to vector<32x4xf32>
    %cst_54 = arith.constant 0.258064508 : f32
    %147 = vector.broadcast %cst_54 : f32 to vector<32x4xf32>
    %148 = arith.mulf %145, %147 : vector<32x4xf32>
    %cst_55 = arith.constant 0.741935492 : f32
    %149 = vector.broadcast %cst_55 : f32 to vector<32x4xf32>
    %150 = arith.mulf %146, %149 : vector<32x4xf32>
    %151 = arith.addf %148, %150 : vector<32x4xf32>
    %152 = arith.truncf %151 : vector<32x4xf32> to vector<32x4xbf16>
    %c560 = arith.constant 560 : index
    %c0_56 = arith.constant 0 : index
    %153 = vector.load %arg7[%c560, %c0_56] : memref<1120x4xbf16, #tpu.memory_space<vmem>>, vector<32x4xbf16>
    tpu.vector_store %arg7[%c560, %c0_56], %152 {strides = array<i32>} : memref<1120x4xbf16, #tpu.memory_space<vmem>>, vector<32x4xbf16>,
    %154 = vector.extract_strided_slice %2 {offsets = [0, 32], sizes = [32, 4], strides = [1, 1]} : vector<32x64xf32> to vector<32x4xf32>
    %155 = vector.extract_strided_slice %2 {offsets = [0, 36], sizes = [32, 4], strides = [1, 1]} : vector<32x64xf32> to vector<32x4xf32>
    %cst_57 = arith.constant 0.774193525 : f32
    %156 = vector.broadcast %cst_57 : f32 to vector<32x4xf32>
    %157 = arith.mulf %154, %156 : vector<32x4xf32>
    %cst_58 = arith.constant 0.225806445 : f32
    %158 = vector.broadcast %cst_58 : f32 to vector<32x4xf32>
    %159 = arith.mulf %155, %158 : vector<32x4xf32>
    %160 = arith.addf %157, %159 : vector<32x4xf32>
    %161 = arith.truncf %160 : vector<32x4xf32> to vector<32x4xbf16>
    %c592 = arith.constant 592 : index
    %c0_59 = arith.constant 0 : index
    %162 = vector.load %arg7[%c592, %c0_59] : memref<1120x4xbf16, #tpu.memory_space<vmem>>, vector<32x4xbf16>
    tpu.vector_store %arg7[%c592, %c0_59], %161 {strides = array<i32>} : memref<1120x4xbf16, #tpu.memory_space<vmem>>, vector<32x4xbf16>,
    %163 = vector.extract_strided_slice %2 {offsets = [0, 32], sizes = [32, 4], strides = [1, 1]} : vector<32x64xf32> to vector<32x4xf32>
    %164 = vector.extract_strided_slice %2 {offsets = [0, 36], sizes = [32, 4], strides = [1, 1]} : vector<32x64xf32> to vector<32x4xf32>
    %cst_60 = arith.constant 0.290322602 : f32
    %165 = vector.broadcast %cst_60 : f32 to vector<32x4xf32>
    %166 = arith.mulf %163, %165 : vector<32x4xf32>
    %cst_61 = arith.constant 0.709677398 : f32
    %167 = vector.broadcast %cst_61 : f32 to vector<32x4xf32>
    %168 = arith.mulf %164, %167 : vector<32x4xf32>
    %169 = arith.addf %166, %168 : vector<32x4xf32>
    %170 = arith.truncf %169 : vector<32x4xf32> to vector<32x4xbf16>
    %c624 = arith.constant 624 : index
    %c0_62 = arith.constant 0 : index
    %171 = vector.load %arg7[%c624, %c0_62] : memref<1120x4xbf16, #tpu.memory_space<vmem>>, vector<32x4xbf16>
    tpu.vector_store %arg7[%c624, %c0_62], %170 {strides = array<i32>} : memref<1120x4xbf16, #tpu.memory_space<vmem>>, vector<32x4xbf16>,
    %172 = vector.extract_strided_slice %2 {offsets = [0, 36], sizes = [32, 4], strides = [1, 1]} : vector<32x64xf32> to vector<32x4xf32>
    %173 = vector.extract_strided_slice %2 {offsets = [0, 40], sizes = [32, 4], strides = [1, 1]} : vector<32x64xf32> to vector<32x4xf32>
    %cst_63 = arith.constant 0.806451618 : f32
    %174 = vector.broadcast %cst_63 : f32 to vector<32x4xf32>
    %175 = arith.mulf %172, %174 : vector<32x4xf32>
    %cst_64 = arith.constant 0.193548381 : f32
    %176 = vector.broadcast %cst_64 : f32 to vector<32x4xf32>
    %177 = arith.mulf %173, %176 : vector<32x4xf32>
    %178 = arith.addf %175, %177 : vector<32x4xf32>
    %179 = arith.truncf %178 : vector<32x4xf32> to vector<32x4xbf16>
    %c656 = arith.constant 656 : index
    %c0_65 = arith.constant 0 : index
    %180 = vector.load %arg7[%c656, %c0_65] : memref<1120x4xbf16, #tpu.memory_space<vmem>>, vector<32x4xbf16>
    tpu.vector_store %arg7[%c656, %c0_65], %179 {strides = array<i32>} : memref<1120x4xbf16, #tpu.memory_space<vmem>>, vector<32x4xbf16>,
    %181 = vector.extract_strided_slice %2 {offsets = [0, 36], sizes = [32, 4], strides = [1, 1]} : vector<32x64xf32> to vector<32x4xf32>
    %182 = vector.extract_strided_slice %2 {offsets = [0, 40], sizes = [32, 4], strides = [1, 1]} : vector<32x64xf32> to vector<32x4xf32>
    %cst_66 = arith.constant 0.322580636 : f32
    %183 = vector.broadcast %cst_66 : f32 to vector<32x4xf32>
    %184 = arith.mulf %181, %183 : vector<32x4xf32>
    %cst_67 = arith.constant 0.677419364 : f32
    %185 = vector.broadcast %cst_67 : f32 to vector<32x4xf32>
    %186 = arith.mulf %182, %185 : vector<32x4xf32>
    %187 = arith.addf %184, %186 : vector<32x4xf32>
    %188 = arith.truncf %187 : vector<32x4xf32> to vector<32x4xbf16>
    %c688 = arith.constant 688 : index
    %c0_68 = arith.constant 0 : index
    %189 = vector.load %arg7[%c688, %c0_68] : memref<1120x4xbf16, #tpu.memory_space<vmem>>, vector<32x4xbf16>
    tpu.vector_store %arg7[%c688, %c0_68], %188 {strides = array<i32>} : memref<1120x4xbf16, #tpu.memory_space<vmem>>, vector<32x4xbf16>,
    %190 = vector.extract_strided_slice %2 {offsets = [0, 40], sizes = [32, 4], strides = [1, 1]} : vector<32x64xf32> to vector<32x4xf32>
    %191 = vector.extract_strided_slice %2 {offsets = [0, 44], sizes = [32, 4], strides = [1, 1]} : vector<32x64xf32> to vector<32x4xf32>
    %cst_69 = arith.constant 0.838709712 : f32
    %192 = vector.broadcast %cst_69 : f32 to vector<32x4xf32>
    %193 = arith.mulf %190, %192 : vector<32x4xf32>
    %cst_70 = arith.constant 0.161290318 : f32
    %194 = vector.broadcast %cst_70 : f32 to vector<32x4xf32>
    %195 = arith.mulf %191, %194 : vector<32x4xf32>
    %196 = arith.addf %193, %195 : vector<32x4xf32>
    %197 = arith.truncf %196 : vector<32x4xf32> to vector<32x4xbf16>
    %c720 = arith.constant 720 : index
    %c0_71 = arith.constant 0 : index
    %198 = vector.load %arg7[%c720, %c0_71] : memref<1120x4xbf16, #tpu.memory_space<vmem>>, vector<32x4xbf16>
    tpu.vector_store %arg7[%c720, %c0_71], %197 {strides = array<i32>} : memref<1120x4xbf16, #tpu.memory_space<vmem>>, vector<32x4xbf16>,
    %199 = vector.extract_strided_slice %2 {offsets = [0, 40], sizes = [32, 4], strides = [1, 1]} : vector<32x64xf32> to vector<32x4xf32>
    %200 = vector.extract_strided_slice %2 {offsets = [0, 44], sizes = [32, 4], strides = [1, 1]} : vector<32x64xf32> to vector<32x4xf32>
    %cst_72 = arith.constant 0.354838729 : f32
    %201 = vector.broadcast %cst_72 : f32 to vector<32x4xf32>
    %202 = arith.mulf %199, %201 : vector<32x4xf32>
    %cst_73 = arith.constant 0.645161271 : f32
    %203 = vector.broadcast %cst_73 : f32 to vector<32x4xf32>
    %204 = arith.mulf %200, %203 : vector<32x4xf32>
    %205 = arith.addf %202, %204 : vector<32x4xf32>
    %206 = arith.truncf %205 : vector<32x4xf32> to vector<32x4xbf16>
    %c752 = arith.constant 752 : index
    %c0_74 = arith.constant 0 : index
    %207 = vector.load %arg7[%c752, %c0_74] : memref<1120x4xbf16, #tpu.memory_space<vmem>>, vector<32x4xbf16>
    tpu.vector_store %arg7[%c752, %c0_74], %206 {strides = array<i32>} : memref<1120x4xbf16, #tpu.memory_space<vmem>>, vector<32x4xbf16>,
    %208 = vector.extract_strided_slice %2 {offsets = [0, 44], sizes = [32, 4], strides = [1, 1]} : vector<32x64xf32> to vector<32x4xf32>
    %209 = vector.extract_strided_slice %2 {offsets = [0, 48], sizes = [32, 4], strides = [1, 1]} : vector<32x64xf32> to vector<32x4xf32>
    %cst_75 = arith.constant 0.870967745 : f32
    %210 = vector.broadcast %cst_75 : f32 to vector<32x4xf32>
    %211 = arith.mulf %208, %210 : vector<32x4xf32>
    %cst_76 = arith.constant 0.129032254 : f32
    %212 = vector.broadcast %cst_76 : f32 to vector<32x4xf32>
    %213 = arith.mulf %209, %212 : vector<32x4xf32>
    %214 = arith.addf %211, %213 : vector<32x4xf32>
    %215 = arith.truncf %214 : vector<32x4xf32> to vector<32x4xbf16>
    %c784 = arith.constant 784 : index
    %c0_77 = arith.constant 0 : index
    %216 = vector.load %arg7[%c784, %c0_77] : memref<1120x4xbf16, #tpu.memory_space<vmem>>, vector<32x4xbf16>
    tpu.vector_store %arg7[%c784, %c0_77], %215 {strides = array<i32>} : memref<1120x4xbf16, #tpu.memory_space<vmem>>, vector<32x4xbf16>,
    %217 = vector.extract_strided_slice %2 {offsets = [0, 44], sizes = [32, 4], strides = [1, 1]} : vector<32x64xf32> to vector<32x4xf32>
    %218 = vector.extract_strided_slice %2 {offsets = [0, 48], sizes = [32, 4], strides = [1, 1]} : vector<32x64xf32> to vector<32x4xf32>
    %cst_78 = arith.constant 0.387096763 : f32
    %219 = vector.broadcast %cst_78 : f32 to vector<32x4xf32>
    %220 = arith.mulf %217, %219 : vector<32x4xf32>
    %cst_79 = arith.constant 0.612903237 : f32
    %221 = vector.broadcast %cst_79 : f32 to vector<32x4xf32>
    %222 = arith.mulf %218, %221 : vector<32x4xf32>
    %223 = arith.addf %220, %222 : vector<32x4xf32>
    %224 = arith.truncf %223 : vector<32x4xf32> to vector<32x4xbf16>
    %c816 = arith.constant 816 : index
    %c0_80 = arith.constant 0 : index
    %225 = vector.load %arg7[%c816, %c0_80] : memref<1120x4xbf16, #tpu.memory_space<vmem>>, vector<32x4xbf16>
    tpu.vector_store %arg7[%c816, %c0_80], %224 {strides = array<i32>} : memref<1120x4xbf16, #tpu.memory_space<vmem>>, vector<32x4xbf16>,
    %226 = vector.extract_strided_slice %2 {offsets = [0, 48], sizes = [32, 4], strides = [1, 1]} : vector<32x64xf32> to vector<32x4xf32>
    %227 = vector.extract_strided_slice %2 {offsets = [0, 52], sizes = [32, 4], strides = [1, 1]} : vector<32x64xf32> to vector<32x4xf32>
    %cst_81 = arith.constant 0.903225779 : f32
    %228 = vector.broadcast %cst_81 : f32 to vector<32x4xf32>
    %229 = arith.mulf %226, %228 : vector<32x4xf32>
    %cst_82 = arith.constant 0.0967741906 : f32
    %230 = vector.broadcast %cst_82 : f32 to vector<32x4xf32>
    %231 = arith.mulf %227, %230 : vector<32x4xf32>
    %232 = arith.addf %229, %231 : vector<32x4xf32>
    %233 = arith.truncf %232 : vector<32x4xf32> to vector<32x4xbf16>
    %c848 = arith.constant 848 : index
    %c0_83 = arith.constant 0 : index
    %234 = vector.load %arg7[%c848, %c0_83] : memref<1120x4xbf16, #tpu.memory_space<vmem>>, vector<32x4xbf16>
    tpu.vector_store %arg7[%c848, %c0_83], %233 {strides = array<i32>} : memref<1120x4xbf16, #tpu.memory_space<vmem>>, vector<32x4xbf16>,
    %235 = vector.extract_strided_slice %2 {offsets = [0, 48], sizes = [32, 4], strides = [1, 1]} : vector<32x64xf32> to vector<32x4xf32>
    %236 = vector.extract_strided_slice %2 {offsets = [0, 52], sizes = [32, 4], strides = [1, 1]} : vector<32x64xf32> to vector<32x4xf32>
    %cst_84 = arith.constant 0.419354856 : f32
    %237 = vector.broadcast %cst_84 : f32 to vector<32x4xf32>
    %238 = arith.mulf %235, %237 : vector<32x4xf32>
    %cst_85 = arith.constant 0.580645144 : f32
    %239 = vector.broadcast %cst_85 : f32 to vector<32x4xf32>
    %240 = arith.mulf %236, %239 : vector<32x4xf32>
    %241 = arith.addf %238, %240 : vector<32x4xf32>
    %242 = arith.truncf %241 : vector<32x4xf32> to vector<32x4xbf16>
    %c880 = arith.constant 880 : index
    %c0_86 = arith.constant 0 : index
    %243 = vector.load %arg7[%c880, %c0_86] : memref<1120x4xbf16, #tpu.memory_space<vmem>>, vector<32x4xbf16>
    tpu.vector_store %arg7[%c880, %c0_86], %242 {strides = array<i32>} : memref<1120x4xbf16, #tpu.memory_space<vmem>>, vector<32x4xbf16>,
    %244 = vector.extract_strided_slice %2 {offsets = [0, 52], sizes = [32, 4], strides = [1, 1]} : vector<32x64xf32> to vector<32x4xf32>
    %245 = vector.extract_strided_slice %2 {offsets = [0, 56], sizes = [32, 4], strides = [1, 1]} : vector<32x64xf32> to vector<32x4xf32>
    %cst_87 = arith.constant 0.935483872 : f32
    %246 = vector.broadcast %cst_87 : f32 to vector<32x4xf32>
    %247 = arith.mulf %244, %246 : vector<32x4xf32>
    %cst_88 = arith.constant 0.0645161271 : f32
    %248 = vector.broadcast %cst_88 : f32 to vector<32x4xf32>
    %249 = arith.mulf %245, %248 : vector<32x4xf32>
    %250 = arith.addf %247, %249 : vector<32x4xf32>
    %251 = arith.truncf %250 : vector<32x4xf32> to vector<32x4xbf16>
    %c912 = arith.constant 912 : index
    %c0_89 = arith.constant 0 : index
    %252 = vector.load %arg7[%c912, %c0_89] : memref<1120x4xbf16, #tpu.memory_space<vmem>>, vector<32x4xbf16>
    tpu.vector_store %arg7[%c912, %c0_89], %251 {strides = array<i32>} : memref<1120x4xbf16, #tpu.memory_space<vmem>>, vector<32x4xbf16>,
    %253 = vector.extract_strided_slice %2 {offsets = [0, 52], sizes = [32, 4], strides = [1, 1]} : vector<32x64xf32> to vector<32x4xf32>
    %254 = vector.extract_strided_slice %2 {offsets = [0, 56], sizes = [32, 4], strides = [1, 1]} : vector<32x64xf32> to vector<32x4xf32>
    %cst_90 = arith.constant 0.45161289 : f32
    %255 = vector.broadcast %cst_90 : f32 to vector<32x4xf32>
    %256 = arith.mulf %253, %255 : vector<32x4xf32>
    %cst_91 = arith.constant 0.54838711 : f32
    %257 = vector.broadcast %cst_91 : f32 to vector<32x4xf32>
    %258 = arith.mulf %254, %257 : vector<32x4xf32>
    %259 = arith.addf %256, %258 : vector<32x4xf32>
    %260 = arith.truncf %259 : vector<32x4xf32> to vector<32x4xbf16>
    %c944 = arith.constant 944 : index
    %c0_92 = arith.constant 0 : index
    %261 = vector.load %arg7[%c944, %c0_92] : memref<1120x4xbf16, #tpu.memory_space<vmem>>, vector<32x4xbf16>
    tpu.vector_store %arg7[%c944, %c0_92], %260 {strides = array<i32>} : memref<1120x4xbf16, #tpu.memory_space<vmem>>, vector<32x4xbf16>,
    %262 = vector.extract_strided_slice %2 {offsets = [0, 56], sizes = [32, 4], strides = [1, 1]} : vector<32x64xf32> to vector<32x4xf32>
    %263 = vector.extract_strided_slice %2 {offsets = [0, 60], sizes = [32, 4], strides = [1, 1]} : vector<32x64xf32> to vector<32x4xf32>
    %cst_93 = arith.constant 0.967741966 : f32
    %264 = vector.broadcast %cst_93 : f32 to vector<32x4xf32>
    %265 = arith.mulf %262, %264 : vector<32x4xf32>
    %cst_94 = arith.constant 0.0322580636 : f32
    %266 = vector.broadcast %cst_94 : f32 to vector<32x4xf32>
    %267 = arith.mulf %263, %266 : vector<32x4xf32>
    %268 = arith.addf %265, %267 : vector<32x4xf32>
    %269 = arith.truncf %268 : vector<32x4xf32> to vector<32x4xbf16>
    %c976 = arith.constant 976 : index
    %c0_95 = arith.constant 0 : index
    %270 = vector.load %arg7[%c976, %c0_95] : memref<1120x4xbf16, #tpu.memory_space<vmem>>, vector<32x4xbf16>
    tpu.vector_store %arg7[%c976, %c0_95], %269 {strides = array<i32>} : memref<1120x4xbf16, #tpu.memory_space<vmem>>, vector<32x4xbf16>,
    %271 = vector.extract_strided_slice %2 {offsets = [0, 56], sizes = [32, 4], strides = [1, 1]} : vector<32x64xf32> to vector<32x4xf32>
    %272 = vector.extract_strided_slice %2 {offsets = [0, 60], sizes = [32, 4], strides = [1, 1]} : vector<32x64xf32> to vector<32x4xf32>
    %cst_96 = arith.constant 0.483870983 : f32
    %273 = vector.broadcast %cst_96 : f32 to vector<32x4xf32>
    %274 = arith.mulf %271, %273 : vector<32x4xf32>
    %cst_97 = arith.constant 5.161290e-01 : f32
    %275 = vector.broadcast %cst_97 : f32 to vector<32x4xf32>
    %276 = arith.mulf %272, %275 : vector<32x4xf32>
    %277 = arith.addf %274, %276 : vector<32x4xf32>
    %278 = arith.truncf %277 : vector<32x4xf32> to vector<32x4xbf16>
    %c1008 = arith.constant 1008 : index
    %c0_98 = arith.constant 0 : index
    %279 = vector.load %arg7[%c1008, %c0_98] : memref<1120x4xbf16, #tpu.memory_space<vmem>>, vector<32x4xbf16>
    tpu.vector_store %arg7[%c1008, %c0_98], %278 {strides = array<i32>} : memref<1120x4xbf16, #tpu.memory_space<vmem>>, vector<32x4xbf16>,
    %280 = vector.extract_strided_slice %2 {offsets = [0, 56], sizes = [32, 4], strides = [1, 1]} : vector<32x64xf32> to vector<32x4xf32>
    %281 = vector.extract_strided_slice %2 {offsets = [0, 60], sizes = [32, 4], strides = [1, 1]} : vector<32x64xf32> to vector<32x4xf32>
    %cst_99 = arith.constant 0.000000e+00 : f32
    %282 = vector.broadcast %cst_99 : f32 to vector<32x4xf32>
    %283 = arith.mulf %280, %282 : vector<32x4xf32>
    %cst_100 = arith.constant 1.000000e+00 : f32
    %284 = vector.broadcast %cst_100 : f32 to vector<32x4xf32>
    %285 = arith.mulf %281, %284 : vector<32x4xf32>
    %286 = arith.addf %283, %285 : vector<32x4xf32>
    %287 = arith.truncf %286 : vector<32x4xf32> to vector<32x4xbf16>
    %c1040 = arith.constant 1040 : index
    %c0_101 = arith.constant 0 : index
    %288 = vector.load %arg7[%c1040, %c0_101] : memref<1120x4xbf16, #tpu.memory_space<vmem>>, vector<32x4xbf16>
    tpu.vector_store %arg7[%c1040, %c0_101], %287 {strides = array<i32>} : memref<1120x4xbf16, #tpu.memory_space<vmem>>, vector<32x4xbf16>,
    %289 = tpu.iota {dimensions = array<i32: 0>} : vector<1088x1xi32>
    %c32_i32 = arith.constant 32 : i32
    %c0_i32 = arith.constant 0 : i32
    %290 = arith.cmpi eq, %c32_i32, %c0_i32 : i32
    %c1_i32 = arith.constant 1 : i32
    %291 = arith.select %290, %c1_i32, %c32_i32 : i32
    %292 = vector.broadcast %291 : i32 to vector<1088x1xi32>
    %293 = arith.remsi %289, %292 : vector<1088x1xi32>
    %c0_i32_102 = arith.constant 0 : i32
    %294 = vector.broadcast %c0_i32_102 : i32 to vector<1088x1xi32>
    %295 = arith.cmpi ne, %293, %294 : vector<1088x1xi32>
    %c0_i32_103 = arith.constant 0 : i32
    %296 = vector.broadcast %c0_i32_103 : i32 to vector<1088x1xi32>
    %297 = arith.cmpi slt, %293, %296 : vector<1088x1xi32>
    %c0_i32_104 = arith.constant 0 : i32
    %298 = arith.cmpi slt, %291, %c0_i32_104 : i32
    %299 = vector.broadcast %298 : i1 to vector<1088x1xi1>
    %300 = vector.broadcast %299 : vector<1088x1xi1> to vector<1088x1xi1>
    %301 = arith.xori %297, %300 : vector<1088x1xi1>
    %302 = arith.andi %301, %295 : vector<1088x1xi1>
    %303 = vector.broadcast %291 : i32 to vector<1088x1xi32>
    %304 = arith.addi %293, %303 : vector<1088x1xi32>
    %305 = arith.select %302, %304, %293 : vector<1088x1xi1>, vector<1088x1xi32>
    %c15 = arith.constant 15 : index
    %c0_105 = arith.constant 0 : index
    %306 = vector.load %arg7[%c15, %c0_105] : memref<1120x4xbf16, #tpu.memory_space<vmem>>, vector<1088x4xbf16>
    %c0_i32_106 = arith.constant 0 : i32
    %307 = vector.broadcast %c0_i32_106 : i32 to vector<1088x1xi32>
    %308 = arith.cmpi ne, %305, %307 : vector<1088x1xi32>
    %cst_107 = arith.constant 0.000000e+00 : f32
    %309 = arith.truncf %cst_107 : f32 to bf16
    %310 = vector.shape_cast %308 : vector<1088x1xi1> to vector<1088x1xi1>
    %311 = vector.broadcast %310 : vector<1088x1xi1> to vector<1088x4xi1>
    %312 = vector.broadcast %309 : bf16 to vector<1088x4xbf16>
    %313 = arith.select %311, %306, %312 : vector<1088x4xi1>, vector<1088x4xbf16>
    %c16 = arith.constant 16 : index
    %c0_108 = arith.constant 0 : index
    %314 = vector.load %arg7[%c16, %c0_108] : memref<1120x4xbf16, #tpu.memory_space<vmem>>, vector<1088x4xbf16>
    %c17 = arith.constant 17 : index
    %c0_109 = arith.constant 0 : index
    %315 = vector.load %arg7[%c17, %c0_109] : memref<1120x4xbf16, #tpu.memory_space<vmem>>, vector<1088x4xbf16>
    %c31_i32 = arith.constant 31 : i32
    %316 = vector.broadcast %c31_i32 : i32 to vector<1088x1xi32>
    %317 = arith.cmpi ne, %305, %316 : vector<1088x1xi32>
    %cst_110 = arith.constant 0.000000e+00 : f32
    %318 = arith.truncf %cst_110 : f32 to bf16
    %319 = vector.shape_cast %317 : vector<1088x1xi1> to vector<1088x1xi1>
    %320 = vector.broadcast %319 : vector<1088x1xi1> to vector<1088x4xi1>
    %321 = vector.broadcast %318 : bf16 to vector<1088x4xbf16>
    %322 = arith.select %320, %315, %321 : vector<1088x4xi1>, vector<1088x4xbf16>
    %323 = vector.extract_strided_slice %313 {offsets = [0, 0], sizes = [1024, 4], strides = [1, 1]} : vector<1088x4xbf16> to vector<1024x4xbf16>
    %324 = vector.extract_strided_slice %313 {offsets = [32, 0], sizes = [1024, 4], strides = [1, 1]} : vector<1088x4xbf16> to vector<1024x4xbf16>
    %325 = vector.extract_strided_slice %313 {offsets = [64, 0], sizes = [1024, 4], strides = [1, 1]} : vector<1088x4xbf16> to vector<1024x4xbf16>
    %326 = vector.extract_strided_slice %314 {offsets = [0, 0], sizes = [1024, 4], strides = [1, 1]} : vector<1088x4xbf16> to vector<1024x4xbf16>
    %327 = vector.extract_strided_slice %314 {offsets = [32, 0], sizes = [1024, 4], strides = [1, 1]} : vector<1088x4xbf16> to vector<1024x4xbf16>
    %328 = vector.extract_strided_slice %314 {offsets = [64, 0], sizes = [1024, 4], strides = [1, 1]} : vector<1088x4xbf16> to vector<1024x4xbf16>
    %329 = vector.extract_strided_slice %322 {offsets = [0, 0], sizes = [1024, 4], strides = [1, 1]} : vector<1088x4xbf16> to vector<1024x4xbf16>
    %330 = vector.extract_strided_slice %322 {offsets = [32, 0], sizes = [1024, 4], strides = [1, 1]} : vector<1088x4xbf16> to vector<1024x4xbf16>
    %331 = vector.extract_strided_slice %322 {offsets = [64, 0], sizes = [1024, 4], strides = [1, 1]} : vector<1088x4xbf16> to vector<1024x4xbf16>
    %332 = tpu.concatenate %323, %324, %325, %326, %327, %328, %329, %330, %331 in 1 : vector<1024x4xbf16>, vector<1024x4xbf16>, vector<1024x4xbf16>, vector<1024x4xbf16>, vector<1024x4xbf16>, vector<1024x4xbf16>, vector<1024x4xbf16>, vector<1024x4xbf16>, vector<1024x4xbf16> -> vector<1024x36xbf16>
    %c0_111 = arith.constant 0 : index
    %c0_112 = arith.constant 0 : index
    %333 = vector.load %arg3[%c0_111, %c0_112] : memref<36x8xbf16, #tpu.memory_space<vmem>>, vector<36x8xbf16>
    %cst_113 = arith.constant dense<0.000000e+00> : vector<1024x8xf32>
    %334 = tpu.matmul %332, %333, %cst_113 {dimension_numbers = #tpu.dot_dimension_numbers<[1], [0], [0], [1], [0, 0, 1, 1], [], []>} : vector<1024x36xbf16>, vector<36x8xbf16>, vector<1024x8xf32> -> vector<1024x8xf32>
    %335 = vector.extract_strided_slice %334 {offsets = [0, 0], sizes = [32, 8], strides = [1, 1]} : vector<1024x8xf32> to vector<32x8xf32>
    %c0_114 = arith.constant 0 : index
    %c0_115 = arith.constant 0 : index
    %336 = vector.load %arg6[%c0_114, %c0_115] : memref<32x256xf32, #tpu.memory_space<vmem>>, vector<32x8xf32>
    tpu.vector_store %arg6[%c0_114, %c0_115], %335 {strides = array<i32>} : memref<32x256xf32, #tpu.memory_space<vmem>>, vector<32x8xf32>,
    %337 = vector.extract_strided_slice %334 {offsets = [32, 0], sizes = [32, 8], strides = [1, 1]} : vector<1024x8xf32> to vector<32x8xf32>
    %c0_116 = arith.constant 0 : index
    %c8 = arith.constant 8 : index
    %338 = vector.load %arg6[%c0_116, %c8] : memref<32x256xf32, #tpu.memory_space<vmem>>, vector<32x8xf32>
    tpu.vector_store %arg6[%c0_116, %c8], %337 {strides = array<i32>} : memref<32x256xf32, #tpu.memory_space<vmem>>, vector<32x8xf32>,
    %339 = vector.extract_strided_slice %334 {offsets = [64, 0], sizes = [32, 8], strides = [1, 1]} : vector<1024x8xf32> to vector<32x8xf32>
    %c0_117 = arith.constant 0 : index
    %c16_118 = arith.constant 16 : index
    %340 = vector.load %arg6[%c0_117, %c16_118] : memref<32x256xf32, #tpu.memory_space<vmem>>, vector<32x8xf32>
    tpu.vector_store %arg6[%c0_117, %c16_118], %339 {strides = array<i32>} : memref<32x256xf32, #tpu.memory_space<vmem>>, vector<32x8xf32>,
    %341 = vector.extract_strided_slice %334 {offsets = [96, 0], sizes = [32, 8], strides = [1, 1]} : vector<1024x8xf32> to vector<32x8xf32>
    %c0_119 = arith.constant 0 : index
    %c24 = arith.constant 24 : index
    %342 = vector.load %arg6[%c0_119, %c24] : memref<32x256xf32, #tpu.memory_space<vmem>>, vector<32x8xf32>
    tpu.vector_store %arg6[%c0_119, %c24], %341 {strides = array<i32>} : memref<32x256xf32, #tpu.memory_space<vmem>>, vector<32x8xf32>,
    %343 = vector.extract_strided_slice %334 {offsets = [128, 0], sizes = [32, 8], strides = [1, 1]} : vector<1024x8xf32> to vector<32x8xf32>
    %c0_120 = arith.constant 0 : index
    %c32 = arith.constant 32 : index
    %344 = vector.load %arg6[%c0_120, %c32] : memref<32x256xf32, #tpu.memory_space<vmem>>, vector<32x8xf32>
    tpu.vector_store %arg6[%c0_120, %c32], %343 {strides = array<i32>} : memref<32x256xf32, #tpu.memory_space<vmem>>, vector<32x8xf32>,
    %345 = vector.extract_strided_slice %334 {offsets = [160, 0], sizes = [32, 8], strides = [1, 1]} : vector<1024x8xf32> to vector<32x8xf32>
    %c0_121 = arith.constant 0 : index
    %c40 = arith.constant 40 : index
    %346 = vector.load %arg6[%c0_121, %c40] : memref<32x256xf32, #tpu.memory_space<vmem>>, vector<32x8xf32>
    tpu.vector_store %arg6[%c0_121, %c40], %345 {strides = array<i32>} : memref<32x256xf32, #tpu.memory_space<vmem>>, vector<32x8xf32>,
    %347 = vector.extract_strided_slice %334 {offsets = [192, 0], sizes = [32, 8], strides = [1, 1]} : vector<1024x8xf32> to vector<32x8xf32>
    %c0_122 = arith.constant 0 : index
    %c48_123 = arith.constant 48 : index
    %348 = vector.load %arg6[%c0_122, %c48_123] : memref<32x256xf32, #tpu.memory_space<vmem>>, vector<32x8xf32>
    tpu.vector_store %arg6[%c0_122, %c48_123], %347 {strides = array<i32>} : memref<32x256xf32, #tpu.memory_space<vmem>>, vector<32x8xf32>,
    %349 = vector.extract_strided_slice %334 {offsets = [224, 0], sizes = [32, 8], strides = [1, 1]} : vector<1024x8xf32> to vector<32x8xf32>
    %c0_124 = arith.constant 0 : index
    %c56 = arith.constant 56 : index
    %350 = vector.load %arg6[%c0_124, %c56] : memref<32x256xf32, #tpu.memory_space<vmem>>, vector<32x8xf32>
    tpu.vector_store %arg6[%c0_124, %c56], %349 {strides = array<i32>} : memref<32x256xf32, #tpu.memory_space<vmem>>, vector<32x8xf32>,
    %351 = vector.extract_strided_slice %334 {offsets = [256, 0], sizes = [32, 8], strides = [1, 1]} : vector<1024x8xf32> to vector<32x8xf32>
    %c0_125 = arith.constant 0 : index
    %c64 = arith.constant 64 : index
    %352 = vector.load %arg6[%c0_125, %c64] : memref<32x256xf32, #tpu.memory_space<vmem>>, vector<32x8xf32>
    tpu.vector_store %arg6[%c0_125, %c64], %351 {strides = array<i32>} : memref<32x256xf32, #tpu.memory_space<vmem>>, vector<32x8xf32>,
    %353 = vector.extract_strided_slice %334 {offsets = [288, 0], sizes = [32, 8], strides = [1, 1]} : vector<1024x8xf32> to vector<32x8xf32>
    %c0_126 = arith.constant 0 : index
    %c72 = arith.constant 72 : index
    %354 = vector.load %arg6[%c0_126, %c72] : memref<32x256xf32, #tpu.memory_space<vmem>>, vector<32x8xf32>
    tpu.vector_store %arg6[%c0_126, %c72], %353 {strides = array<i32>} : memref<32x256xf32, #tpu.memory_space<vmem>>, vector<32x8xf32>,
    %355 = vector.extract_strided_slice %334 {offsets = [320, 0], sizes = [32, 8], strides = [1, 1]} : vector<1024x8xf32> to vector<32x8xf32>
    %c0_127 = arith.constant 0 : index
    %c80_128 = arith.constant 80 : index
    %356 = vector.load %arg6[%c0_127, %c80_128] : memref<32x256xf32, #tpu.memory_space<vmem>>, vector<32x8xf32>
    tpu.vector_store %arg6[%c0_127, %c80_128], %355 {strides = array<i32>} : memref<32x256xf32, #tpu.memory_space<vmem>>, vector<32x8xf32>,
    %357 = vector.extract_strided_slice %334 {offsets = [352, 0], sizes = [32, 8], strides = [1, 1]} : vector<1024x8xf32> to vector<32x8xf32>
    %c0_129 = arith.constant 0 : index
    %c88 = arith.constant 88 : index
    %358 = vector.load %arg6[%c0_129, %c88] : memref<32x256xf32, #tpu.memory_space<vmem>>, vector<32x8xf32>
    tpu.vector_store %arg6[%c0_129, %c88], %357 {strides = array<i32>} : memref<32x256xf32, #tpu.memory_space<vmem>>, vector<32x8xf32>,
    %359 = vector.extract_strided_slice %334 {offsets = [384, 0], sizes = [32, 8], strides = [1, 1]} : vector<1024x8xf32> to vector<32x8xf32>
    %c0_130 = arith.constant 0 : index
    %c96 = arith.constant 96 : index
    %360 = vector.load %arg6[%c0_130, %c96] : memref<32x256xf32, #tpu.memory_space<vmem>>, vector<32x8xf32>
    tpu.vector_store %arg6[%c0_130, %c96], %359 {strides = array<i32>} : memref<32x256xf32, #tpu.memory_space<vmem>>, vector<32x8xf32>,
    %361 = vector.extract_strided_slice %334 {offsets = [416, 0], sizes = [32, 8], strides = [1, 1]} : vector<1024x8xf32> to vector<32x8xf32>
    %c0_131 = arith.constant 0 : index
    %c104 = arith.constant 104 : index
    %362 = vector.load %arg6[%c0_131, %c104] : memref<32x256xf32, #tpu.memory_space<vmem>>, vector<32x8xf32>
    tpu.vector_store %arg6[%c0_131, %c104], %361 {strides = array<i32>} : memref<32x256xf32, #tpu.memory_space<vmem>>, vector<32x8xf32>,
    %363 = vector.extract_strided_slice %334 {offsets = [448, 0], sizes = [32, 8], strides = [1, 1]} : vector<1024x8xf32> to vector<32x8xf32>
    %c0_132 = arith.constant 0 : index
    %c112_133 = arith.constant 112 : index
    %364 = vector.load %arg6[%c0_132, %c112_133] : memref<32x256xf32, #tpu.memory_space<vmem>>, vector<32x8xf32>
    tpu.vector_store %arg6[%c0_132, %c112_133], %363 {strides = array<i32>} : memref<32x256xf32, #tpu.memory_space<vmem>>, vector<32x8xf32>,
    %365 = vector.extract_strided_slice %334 {offsets = [480, 0], sizes = [32, 8], strides = [1, 1]} : vector<1024x8xf32> to vector<32x8xf32>
    %c0_134 = arith.constant 0 : index
    %c120 = arith.constant 120 : index
    %366 = vector.load %arg6[%c0_134, %c120] : memref<32x256xf32, #tpu.memory_space<vmem>>, vector<32x8xf32>
    tpu.vector_store %arg6[%c0_134, %c120], %365 {strides = array<i32>} : memref<32x256xf32, #tpu.memory_space<vmem>>, vector<32x8xf32>,
    %367 = vector.extract_strided_slice %334 {offsets = [512, 0], sizes = [32, 8], strides = [1, 1]} : vector<1024x8xf32> to vector<32x8xf32>
    %c0_135 = arith.constant 0 : index
    %c128 = arith.constant 128 : index
    %368 = vector.load %arg6[%c0_135, %c128] : memref<32x256xf32, #tpu.memory_space<vmem>>, vector<32x8xf32>
    tpu.vector_store %arg6[%c0_135, %c128], %367 {strides = array<i32>} : memref<32x256xf32, #tpu.memory_space<vmem>>, vector<32x8xf32>,
    %369 = vector.extract_strided_slice %334 {offsets = [544, 0], sizes = [32, 8], strides = [1, 1]} : vector<1024x8xf32> to vector<32x8xf32>
    %c0_136 = arith.constant 0 : index
    %c136 = arith.constant 136 : index
    %370 = vector.load %arg6[%c0_136, %c136] : memref<32x256xf32, #tpu.memory_space<vmem>>, vector<32x8xf32>
    tpu.vector_store %arg6[%c0_136, %c136], %369 {strides = array<i32>} : memref<32x256xf32, #tpu.memory_space<vmem>>, vector<32x8xf32>,
    %371 = vector.extract_strided_slice %334 {offsets = [576, 0], sizes = [32, 8], strides = [1, 1]} : vector<1024x8xf32> to vector<32x8xf32>
    %c0_137 = arith.constant 0 : index
    %c144_138 = arith.constant 144 : index
    %372 = vector.load %arg6[%c0_137, %c144_138] : memref<32x256xf32, #tpu.memory_space<vmem>>, vector<32x8xf32>
    tpu.vector_store %arg6[%c0_137, %c144_138], %371 {strides = array<i32>} : memref<32x256xf32, #tpu.memory_space<vmem>>, vector<32x8xf32>,
    %373 = vector.extract_strided_slice %334 {offsets = [608, 0], sizes = [32, 8], strides = [1, 1]} : vector<1024x8xf32> to vector<32x8xf32>
    %c0_139 = arith.constant 0 : index
    %c152 = arith.constant 152 : index
    %374 = vector.load %arg6[%c0_139, %c152] : memref<32x256xf32, #tpu.memory_space<vmem>>, vector<32x8xf32>
    tpu.vector_store %arg6[%c0_139, %c152], %373 {strides = array<i32>} : memref<32x256xf32, #tpu.memory_space<vmem>>, vector<32x8xf32>,
    %375 = vector.extract_strided_slice %334 {offsets = [640, 0], sizes = [32, 8], strides = [1, 1]} : vector<1024x8xf32> to vector<32x8xf32>
    %c0_140 = arith.constant 0 : index
    %c160 = arith.constant 160 : index
    %376 = vector.load %arg6[%c0_140, %c160] : memref<32x256xf32, #tpu.memory_space<vmem>>, vector<32x8xf32>
    tpu.vector_store %arg6[%c0_140, %c160], %375 {strides = array<i32>} : memref<32x256xf32, #tpu.memory_space<vmem>>, vector<32x8xf32>,
    %377 = vector.extract_strided_slice %334 {offsets = [672, 0], sizes = [32, 8], strides = [1, 1]} : vector<1024x8xf32> to vector<32x8xf32>
    %c0_141 = arith.constant 0 : index
    %c168 = arith.constant 168 : index
    %378 = vector.load %arg6[%c0_141, %c168] : memref<32x256xf32, #tpu.memory_space<vmem>>, vector<32x8xf32>
    tpu.vector_store %arg6[%c0_141, %c168], %377 {strides = array<i32>} : memref<32x256xf32, #tpu.memory_space<vmem>>, vector<32x8xf32>,
    %379 = vector.extract_strided_slice %334 {offsets = [704, 0], sizes = [32, 8], strides = [1, 1]} : vector<1024x8xf32> to vector<32x8xf32>
    %c0_142 = arith.constant 0 : index
    %c176_143 = arith.constant 176 : index
    %380 = vector.load %arg6[%c0_142, %c176_143] : memref<32x256xf32, #tpu.memory_space<vmem>>, vector<32x8xf32>
    tpu.vector_store %arg6[%c0_142, %c176_143], %379 {strides = array<i32>} : memref<32x256xf32, #tpu.memory_space<vmem>>, vector<32x8xf32>,
    %381 = vector.extract_strided_slice %334 {offsets = [736, 0], sizes = [32, 8], strides = [1, 1]} : vector<1024x8xf32> to vector<32x8xf32>
    %c0_144 = arith.constant 0 : index
    %c184 = arith.constant 184 : index
    %382 = vector.load %arg6[%c0_144, %c184] : memref<32x256xf32, #tpu.memory_space<vmem>>, vector<32x8xf32>
    tpu.vector_store %arg6[%c0_144, %c184], %381 {strides = array<i32>} : memref<32x256xf32, #tpu.memory_space<vmem>>, vector<32x8xf32>,
    %383 = vector.extract_strided_slice %334 {offsets = [768, 0], sizes = [32, 8], strides = [1, 1]} : vector<1024x8xf32> to vector<32x8xf32>
    %c0_145 = arith.constant 0 : index
    %c192 = arith.constant 192 : index
    %384 = vector.load %arg6[%c0_145, %c192] : memref<32x256xf32, #tpu.memory_space<vmem>>, vector<32x8xf32>
    tpu.vector_store %arg6[%c0_145, %c192], %383 {strides = array<i32>} : memref<32x256xf32, #tpu.memory_space<vmem>>, vector<32x8xf32>,
    %385 = vector.extract_strided_slice %334 {offsets = [800, 0], sizes = [32, 8], strides = [1, 1]} : vector<1024x8xf32> to vector<32x8xf32>
    %c0_146 = arith.constant 0 : index
    %c200 = arith.constant 200 : index
    %386 = vector.load %arg6[%c0_146, %c200] : memref<32x256xf32, #tpu.memory_space<vmem>>, vector<32x8xf32>
    tpu.vector_store %arg6[%c0_146, %c200], %385 {strides = array<i32>} : memref<32x256xf32, #tpu.memory_space<vmem>>, vector<32x8xf32>,
    %387 = vector.extract_strided_slice %334 {offsets = [832, 0], sizes = [32, 8], strides = [1, 1]} : vector<1024x8xf32> to vector<32x8xf32>
    %c0_147 = arith.constant 0 : index
    %c208_148 = arith.constant 208 : index
    %388 = vector.load %arg6[%c0_147, %c208_148] : memref<32x256xf32, #tpu.memory_space<vmem>>, vector<32x8xf32>
    tpu.vector_store %arg6[%c0_147, %c208_148], %387 {strides = array<i32>} : memref<32x256xf32, #tpu.memory_space<vmem>>, vector<32x8xf32>,
    %389 = vector.extract_strided_slice %334 {offsets = [864, 0], sizes = [32, 8], strides = [1, 1]} : vector<1024x8xf32> to vector<32x8xf32>
    %c0_149 = arith.constant 0 : index
    %c216 = arith.constant 216 : index
    %390 = vector.load %arg6[%c0_149, %c216] : memref<32x256xf32, #tpu.memory_space<vmem>>, vector<32x8xf32>
    tpu.vector_store %arg6[%c0_149, %c216], %389 {strides = array<i32>} : memref<32x256xf32, #tpu.memory_space<vmem>>, vector<32x8xf32>,
    %391 = vector.extract_strided_slice %334 {offsets = [896, 0], sizes = [32, 8], strides = [1, 1]} : vector<1024x8xf32> to vector<32x8xf32>
    %c0_150 = arith.constant 0 : index
    %c224 = arith.constant 224 : index
    %392 = vector.load %arg6[%c0_150, %c224] : memref<32x256xf32, #tpu.memory_space<vmem>>, vector<32x8xf32>
    tpu.vector_store %arg6[%c0_150, %c224], %391 {strides = array<i32>} : memref<32x256xf32, #tpu.memory_space<vmem>>, vector<32x8xf32>,
    %393 = vector.extract_strided_slice %334 {offsets = [928, 0], sizes = [32, 8], strides = [1, 1]} : vector<1024x8xf32> to vector<32x8xf32>
    %c0_151 = arith.constant 0 : index
    %c232 = arith.constant 232 : index
    %394 = vector.load %arg6[%c0_151, %c232] : memref<32x256xf32, #tpu.memory_space<vmem>>, vector<32x8xf32>
    tpu.vector_store %arg6[%c0_151, %c232], %393 {strides = array<i32>} : memref<32x256xf32, #tpu.memory_space<vmem>>, vector<32x8xf32>,
    %395 = vector.extract_strided_slice %334 {offsets = [960, 0], sizes = [32, 8], strides = [1, 1]} : vector<1024x8xf32> to vector<32x8xf32>
    %c0_152 = arith.constant 0 : index
    %c240_153 = arith.constant 240 : index
    %396 = vector.load %arg6[%c0_152, %c240_153] : memref<32x256xf32, #tpu.memory_space<vmem>>, vector<32x8xf32>
    tpu.vector_store %arg6[%c0_152, %c240_153], %395 {strides = array<i32>} : memref<32x256xf32, #tpu.memory_space<vmem>>, vector<32x8xf32>,
    %397 = vector.extract_strided_slice %334 {offsets = [992, 0], sizes = [32, 8], strides = [1, 1]} : vector<1024x8xf32> to vector<32x8xf32>
    %c0_154 = arith.constant 0 : index
    %c248 = arith.constant 248 : index
    %398 = vector.load %arg6[%c0_154, %c248] : memref<32x256xf32, #tpu.memory_space<vmem>>, vector<32x8xf32>
    tpu.vector_store %arg6[%c0_154, %c248], %397 {strides = array<i32>} : memref<32x256xf32, #tpu.memory_space<vmem>>, vector<32x8xf32>,
    %c0_155 = arith.constant 0 : index
    %c0_156 = arith.constant 0 : index
    %399 = vector.load %arg6[%c0_155, %c0_156] : memref<32x256xf32, #tpu.memory_space<vmem>>, vector<32x256xf32>
    %c0_157 = arith.constant 0 : index
    %c0_158 = arith.constant 0 : index
    %400 = vector.load %arg4[%c0_157, %c0_158] : memref<1x256xf32, #tpu.memory_space<vmem>>, vector<1x256xf32>
    %401 = vector.broadcast %400 : vector<1x256xf32> to vector<32x256xf32>
    %402 = arith.addf %399, %401 : vector<32x256xf32>
    %c0_159 = arith.constant 0 : index
    %c0_160 = arith.constant 0 : index
    %403 = memref.load %arg5[%c0_159, %c0_160] : memref<1x1xf32, #tpu.memory_space<smem>>
    %cst_161 = arith.constant 0.000000e+00 : f32
    %404 = vector.broadcast %cst_161 : f32 to vector<32x256xf32>
    %405 = arith.cmpf ogt, %402, %404 : vector<32x256xf32>
    %406 = vector.broadcast %403 : f32 to vector<32x256xf32>
    %407 = arith.mulf %402, %406 : vector<32x256xf32>
    %408 = arith.select %405, %402, %407 : vector<32x256xi1>, vector<32x256xf32>
    %c0_162 = arith.constant 0 : index
    %c0_163 = arith.constant 0 : index
    %409 = vector.load %arg6[%c0_162, %c0_163] : memref<32x256xf32, #tpu.memory_space<vmem>>, vector<32x256xf32>
    tpu.vector_store %arg6[%c0_162, %c0_163], %408 {strides = array<i32>} : memref<32x256xf32, #tpu.memory_space<vmem>>, vector<32x256xf32>,
    return
  }
  func.func @transform_0(%arg0: i32) -> (i32, i32) {
    %c0_i32 = arith.constant 0 : i32
    %c0_i32_0 = arith.constant 0 : i32
    return %arg0, %c0_i32 : i32, i32
  }
  func.func @transform_1(%arg0: i32) -> (i32, i32) {
    %c0_i32 = arith.constant 0 : i32
    %c0_i32_0 = arith.constant 0 : i32
    %c0_i32_1 = arith.constant 0 : i32
    return %c0_i32, %c0_i32_0 : i32, i32
  }
  func.func @transform_2(%arg0: i32) -> (i32, i32) {
    %c0_i32 = arith.constant 0 : i32
    %c0_i32_0 = arith.constant 0 : i32
    %c0_i32_1 = arith.constant 0 : i32
    return %c0_i32, %c0_i32_0 : i32, i32
  }
  func.func @transform_3(%arg0: i32) -> (i32, i32) {
    %c0_i32 = arith.constant 0 : i32
    %c0_i32_0 = arith.constant 0 : i32
    %c0_i32_1 = arith.constant 0 : i32
    return %c0_i32, %c0_i32_0 : i32, i32
  }
  func.func @transform_4(%arg0: i32) -> (i32, i32) {
    %c0_i32 = arith.constant 0 : i32
    %c0_i32_0 = arith.constant 0 : i32
    %c0_i32_1 = arith.constant 0 : i32
    return %c0_i32, %c0_i32_0 : i32, i32
  }
  func.func @transform_5(%arg0: i32) -> (i32, i32) {
    %c0_i32 = arith.constant 0 : i32
    %c0_i32_0 = arith.constant 0 : i32
    return %arg0, %c0_i32 : i32, i32
  }
}

</mosaic_0001>

<bundles_post_ra>
// kernel: tpu_custom_call.1
= control target key start
LH: loop header
LB: loop body
LE: loop exit
PB: predicated region body
PF: predicated region fallthrough
CT: control target
= control target key end

     0   :  { %s18910_s0 = inlined_call_operand.vmem [shape: bf16[32,64], index: 0, kind: input, shape index: {}]   ;;  %s18911_s1 = inlined_call_operand.vmem [shape: bf16[32,16], index: 1, kind: input, shape index: {}]   ;;  %s18912_s2 = inlined_call_operand.vmem [shape: bf16[36,8], index: 2, kind: input, shape index: {}]   ;;  %s18913_s3 = inlined_call_operand.vmem [shape: f32[1,256], index: 3, kind: input, shape index: {}]   ;;  %s18914_s4 = inlined_call_operand.<no memory space> [shape: f32[1,1], index: 4, kind: input, shape index: {}]   ;;  %s18915_s5 = inlined_call_operand.hbm [shape: f32[64,256], index: 5, kind: output, shape index: {}]  }
   0x1   :  { %10 = sst [smem:[#allocation3]] %s18914_s4 }
   0x2   :  { %11 = vsyncpa [#allocation5], 0 }
   0x3   :  { %13 = vsyncpa [#allocation5 + $0x1], 0  ;;  %s12154_s20 = smov 0   ;;  %s12156_s21 = smov 0  }
   0x4   :  { %s12158_s22 = smov 0   ;;  %s12160_s23 = smov 0  }
   0x5 LB: > { %s12175_s4 = sadd.s32 4294967295, %s12089_s23   ;;  %s11381_s24 = sadd.s32 4294967294, %s12089_s23   ;;  %s12089_s23 = sphi %s12160_s23, %s20560_s23   ;;  %s12085_s22 = sphi %s12158_s22, %s20559_s22   ;;  %s12081_s21 = sphi %s12156_s21, %s20558_s21   ;;  %s12077_s20 = sphi %s12154_s20, %s20557_s20  }
   0x6   : > { %s12179_s25 = sadd.s32 1, %s12089_s23   ;;  %s136_s26 = sadd.s32 1, %s12085_s22 }
   0x7   : > { %s133_s27 = ssub.s32 %s12089_s23, %s12179_s25  ;;  %p146_p0 = scmp.ne.s32.totalorder %s12085_s22, %s12081_s21 }
   0x8   : > { %p134_p1 = scmp.eq.s32.totalorder %s133_s27, 0  ;;  %p147_p2 = scmp.eq.s32.totalorder %s12175_s4, 1 }
   0x9   : > { %p152_p3 = scmp.ne.s32.totalorder %s12081_s21, %s12077_s20  ;;  %p153_p4 = scmp.eq.s32.totalorder %s11381_s24, 1 }
   0xa   : > { %s12190_s28 = scalar_select %p134_p1, %s12085_s22, %s136_s26  }
   0xb   : > { %p12192_p5 = por %p147_p2, %p146_p0  ;;  %p12196_p6 = por %p153_p4, %p152_p3 }
   0xc   : > { %p11384_p7 = scmp.ge.s32.totalorder %s12089_s23, 1  ;;  %p192_p8 = scmp.lt.s32.totalorder %s12089_s23, 3 }
   0xe   : > { %p193_p9 = pnand %p11384_p7, %p192_p8 }
  0x10   : > { %196 = sbr.rel (%p193_p9) target bundleno = 2376 (0x948), region = 40 }
  0x17   : > { %s11386_s6 = sshll.u32 %s12175_s4, 1  ;;  %v11891_v0 = vld [vmem:[%s18911_s1] sm:$0xff]   ;;  %vm252_vm0 = vcmask 130048   ;;  %v11892_v2 = vld [vmem:[%s18911_s1 + $0x8] sm:$0xff]   ;;  %vm308_vm1 = vcmask 31744   ;;  %v18916_v3 = vmov 0  }
  0x18   : > { %p221_p10 = scmp.lt.s32.totalorder %s11386_s6, 3  ;;  %11676 = vmatprep.mubr.msk.bf16.mxu0 %vm252_vm0, %v11891_v0  ;;  %311 = vst.msk [vmem:[#allocation2 + $0x10] sm:$0xff] %vm308_vm1, %v18916_v3  ;;  %309 = vst.msk [vmem:[#allocation2] sm:$0xff] %vm308_vm1, %v18916_v3  ;;  %s12092_s15 = smov 124   ;;  %vm4189_vm2 = vsmask.f32 7424 }
  0x19   : > { %310 = vst.msk [vmem:[#allocation2 + $0x8] sm:$0xff] %vm308_vm1, %v18916_v3  ;;  %312 = vst.msk [vmem:[#allocation2 + $0x218] sm:$0xff] %vm308_vm1, %v18916_v3  ;;  %vm12093_vm7 = vmmov 1   ;;  %vm5756_vm9 = vsmask.f32 256  ;;  %s12094_s16 = smov 120  }
  0x1a   : > { %s20562_s6 = smov (!%p221_p10, %s11386_s6), 3  ;;  %313 = vst.msk [vmem:[#allocation2 + $0x220] sm:$0xff] %vm308_vm1, %v18916_v3  ;;  %314 = vst.msk [vmem:[#allocation2 + $0x228] sm:$0xff] %vm308_vm1, %v18916_v3  ;;  %vm7763_vm13 = vcmask 1046528   ;;  %s12095_s17 = smov 116  }
  0x1b   : > { %s11387_s9 = sshll.u32 %s20562_s6, 2  ;;  %vm3714_vm8 = vmpackc.low %vm12093_vm7, %vm12093_vm7  ;;  %s12096_s18 = smov 112  }
  0x1c   : > { %s224_s12 = scalar_lea.vmem %s18910_s0, %s11387_s9  ;;  %s12097_s19 = smov 108  }
  0x1d   : > { %v11890_v1 = vld [vmem:[%s224_s12] sm:$0xff]   ;;  %s12098_s24 = smov 104   ;;  %s12099_s26 = smov 100  }
  0x1e   : > { %11674 = vmatprep.subr.bf16.mxu0 %v11890_v1  ;;  %s12100_s27 = smov 96   ;;  %s12101_s6 = smov 92  }
  0x1f   : > { %11675 = vmatpush3.bf16.msra.mxu0 %v11890_v1  ;;  %s12102_s7 = smov 88   ;;  %s12103_s8 = smov 84  }
  0x20   : > { %s12104_s9 = smov 80   ;;  %s12105_s10 = smov 76  }
  0x21   : > { %s12106_s11 = smov 72   ;;  %s12107_s12 = smov 4  }
  0x22   : > { %11677 = vmatmul.mubr.msk.bf16.vlgmr.msra.gmra.mrb[0].mxu0 %vm252_vm0, %v11892_v2  ;;  %s12108_s13 = smov 8   ;;  %s12109_s14 = smov 12  }
  0xf5   : > { %v12226_v4 = vpop.f32.mrb[0].mxu0 }
  0xf6   : > { %19188 = vst [vmem:[#allocation7_spill] sm:$0xff] %v12226_v4  ;;  %v12228_v5 = vpop.f32.mrb[1].mxu0  ;;  %v357_v6 = vmul.f32 0.9677419, %v12226_v4  ;;  %v325_v7 = vmul.f32 0.48387095, %v12226_v4 }
  0xf7   : > { %v12232_v8 = vpop.f32.mrb[2].mxu0  ;;  %v12243_v12 = vmul.f32 0.4516129, %v12226_v4  ;;  %v12252_v14 = vmul.f32 0.9354839, %v12226_v4 }
  0xf8   : > { %19189 = vst [vmem:[#allocation8_spill] sm:$0xff] %v12232_v8  ;;  %367 = vrot.lane.b32.xlu0 %v357_v6, %s12092_s15  ;;  %335 = vrot.lane.b32.xlu1 %v325_v7, %s12092_s15  ;;  %v12236_v9 = vpop.f32.mrb[3].mxu0  ;;  %v316_v10 = vpack.c.bf16 %v12232_v8, %v12226_v4  ;;  %v326_v13 = vmul.f32 0.48387095, %v12232_v8  ;;  %v358_v15 = vmul.f32 0.9677419, %v12232_v8 }
  0xf9   : > { %v315_v11 = vpack.c.bf16 %v12236_v9, %v12228_v5  ;;  %19190 = vst [vmem:[#allocation9_spill] sm:$0xff] %v12243_v12  ;;  %19191 = vst [vmem:[#allocation10_spill] sm:$0xff] %v12252_v14  ;;  %v469_v16 = vmul.f32 0.41935483, %v12226_v4  ;;  %v12260_v17 = vmul.f32 0.4516129, %v12232_v8 }
  0xfa   : > { %318 = vst.msk [vmem:[#allocation2 + $0x20] sm:$0xff] %vm308_vm1, %v316_v10  ;;  %v12266_v18 = vmul.f32 0.9032258, %v12226_v4  ;;  %v12269_v19 = vmul.f32 0.9354839, %v12232_v8 }
  0xfb   : > { %317 = vst.msk [vmem:[#allocation2 + $0x18] sm:$0xff] %vm308_vm1, %v315_v11  ;;  %19192 = vst [vmem:[#allocation11_spill] sm:$0xff] %v12260_v17  ;;  %v12276_v20 = vmul.f32 0.38709676, %v12226_v4  ;;  %v470_v21 = vmul.f32 0.41935483, %v12232_v8 }
  0xfc   : > { %399 = vrot.lane.b32.xlu0 %v12243_v12, %s12092_s15  ;;  %337 = vrot.lane.b32.xlu1 %v326_v13, %s12092_s15  ;;  %19193 = vst [vmem:[#allocation12_spill] sm:$0xff] %v12266_v18  ;;  %19194 = vst [vmem:[#allocation13_spill] sm:$0xff] %v12269_v19  ;;  %v12283_v22 = vmul.f32 0.87096775, %v12226_v4  ;;  %v12286_v23 = vmul.f32 0.9032258, %v12232_v8 }
  0xfd   : > { %19195 = vst [vmem:[#allocation14_spill] sm:$0xff] %v12276_v20  ;;  %v629_v24 = vmul.f32 0.3548387, %v12226_v4  ;;  %v12294_v25 = vmul.f32 0.38709676, %v12232_v8 }
  0xfe   : > { %19196 = vst [vmem:[#allocation15_spill] sm:$0xff] %v12283_v22  ;;  %19197 = vst [vmem:[#allocation16_spill] sm:$0xff] %v12286_v23  ;;  %v669_v26 = vmul.f32 0.83870965, %v12226_v4  ;;  %v12301_v27 = vmul.f32 0.87096775, %v12232_v8 }
  0xff   : > { %19198 = vst [vmem:[#allocation17_spill] sm:$0xff] %v12294_v25  ;;  %v12307_v28 = vmul.f32 0.32258064, %v12226_v4  ;;  %v630_v29 = vmul.f32 0.3548387, %v12232_v8 }
 0x100   : > { %439 = vrot.lane.b32.xlu0 %v12252_v14, %s12092_s15  ;;  %369 = vrot.lane.b32.xlu1 %v358_v15, %s12092_s15  ;;  %19199 = vst [vmem:[#allocation18_spill] sm:$0xff] %v12301_v27  ;;  %v12314_v30 = vmul.f32 0.8064516, %v12226_v4  ;;  %v670_v31 = vmul.f32 0.83870965, %v12232_v8 }
 0x101   : > { %19200 = vst [vmem:[#allocation19_spill] sm:$0xff] %v12307_v28  ;;  %v789_v32 = vmul.f32 0.29032257, %v12226_v4  ;;  %v12322_v33 = vmul.f32 0.32258064, %v12232_v8  ;;  %v3240_v40 = vld [vmem:[#allocation2 + $0x20] sm:$0xff] }
 0x102   : > { %19201 = vst [vmem:[#allocation20_spill] sm:$0xff] %v12314_v30  ;;  %v12328_v34 = vmul.f32 0.7741935, %v12226_v4  ;;  %v12331_v35 = vmul.f32 0.8064516, %v12232_v8  ;;  %v3239_v41 = vld [vmem:[#allocation2 + $0x18] sm:$0xff] }
 0x103   : > { %19202 = vst [vmem:[#allocation21_spill] sm:$0xff] %v12322_v33  ;;  %v12338_v36 = vmul.f32 0.2580645, %v12226_v4  ;;  %v790_v37 = vmul.f32 0.29032257, %v12232_v8  ;;  %v6781_v42 = vshll.u32 %v3239_v41, 16 }
 0x104   : > { %479 = vrot.lane.b32.xlu0 %v469_v16, %s12092_s15  ;;  %401 = vrot.lane.b32.xlu1 %v12260_v17, %s12092_s15  ;;  %19203 = vst [vmem:[#allocation22_spill] sm:$0xff] %v12328_v34  ;;  %19204 = vst [vmem:[#allocation23_spill] sm:$0xff] %v12331_v35  ;;  %v12345_v38 = vmul.f32 0.7419355, %v12226_v4  ;;  %v12348_v39 = vmul.f32 0.7741935, %v12232_v8 }
 0x105   : > { %19205 = vst [vmem:[#allocation24_spill] sm:$0xff] %v12338_v36  ;;  %v6789_v43 = vshll.u32 %v3240_v40, 16  ;;  %v937_v44 = vmul.f32 0.22580644, %v12226_v4  ;;  %v12356_v45 = vmul.f32 0.2580645, %v12232_v8 }
 0x106   : > { %19206 = vst [vmem:[#allocation25_spill] sm:$0xff] %v12345_v38  ;;  %19207 = vst [vmem:[#allocation26_spill] sm:$0xff] %v12348_v39  ;;  %v12358_v46 = vrot.slane %v6781_v42, 1  ;;  %v6785_v47 = vshrl.u32 %v3239_v41, 16  ;;  %v977_v50 = vmul.f32 0.7096774, %v12226_v4 }
 0x107   : > { %19208 = vst [vmem:[#allocation27_spill] sm:$0xff] %v12356_v45  ;;  %v12363_v48 = vrot.slane %v6789_v43, 1  ;;  %v12368_v51 = vmul.f32 0.7419355, %v12232_v8  ;;  %v12378_v53 = vmul.f32 0.19354838, %v12226_v4 }
 0x108   : > { %519 = vrot.lane.b32.xlu0 %v12266_v18, %s12092_s15  ;;  %441 = vrot.lane.b32.xlu1 %v12269_v19, %s12092_s15  ;;  %19209 = vst [vmem:[#allocation28_spill] sm:$0xff] %v12358_v46  ;;  %v6787_v49 = vor.u32 %v6785_v47, %v12358_v46  ;;  %v938_v54 = vmul.f32 0.22580644, %v12232_v8  ;;  %v12385_v55 = vmul.f32 0.67741936, %v12226_v4 }
 0x109   : > { %19210 = vst [vmem:[#allocation29_spill] sm:$0xff] %v12363_v48  ;;  %19211 = vst [vmem:[#allocation30_spill] sm:$0xff] %v12368_v51  ;;  %v978_v56 = vmul.f32 0.7096774, %v12232_v8  ;;  %v1081_v57 = vmul.f32 0.16129032, %v12226_v4 }
 0x10a   : > { %v12372_v52 = vsel %vm4189_vm2, %v6787_v49, %v12363_v48  ;;  %v12393_v58 = vmul.f32 0.19354838, %v12232_v8  ;;  %v12399_v59 = vmul.f32 0.6451613, %v12226_v4  ;;  %v12402_v60 = vmul.f32 0.67741936, %v12232_v8 }
 0x10b   : > { %19212 = vst [vmem:[#allocation31_spill] sm:$0xff] %v12372_v52  ;;  %v12409_v61 = vmul.f32 0.12903225, %v12226_v4  ;;  %v1082_v62 = vmul.f32 0.16129032, %v12232_v8 }
 0x10c   : > { %559 = vrot.lane.b32.xlu0 %v12276_v20, %s12092_s15  ;;  %481 = vrot.lane.b32.xlu1 %v470_v21, %s12092_s15  ;;  %v12416_v63 = vmul.f32 0.61290324, %v12226_v4  ;;  %v12419_v0 = vmul.f32 0.6451613, %v12232_v8  ;;  %v1217_v1 = vmul.f32 0.09677419, %v12226_v4 }
 0x10d   : > { %v12427_v2 = vmul.f32 0.12903225, %v12232_v8  ;;  %v1257_v6 = vmul.f32 0.58064514, %v12226_v4  ;;  %v12434_v7 = vmul.f32 0.61290324, %v12232_v8 }
 0x10e   : > { %v425_v10 = vmul.f32 0.06451613, %v12226_v4  ;;  %v1218_v11 = vmul.f32 0.09677419, %v12232_v8  ;;  %v385_v13 = vmul.f32 0.5483871, %v12226_v4 }
 0x10f   : > { %v1258_v15 = vmul.f32 0.58064514, %v12232_v8  ;;  %v1361_v16 = vmul.f32 0.032258064, %v12226_v4  ;;  %v426_v21 = vmul.f32 0.06451613, %v12232_v8 }
 0x110   : > { %599 = vrot.lane.b32.xlu0 %v12283_v22, %s12092_s15  ;;  %521 = vrot.lane.b32.xlu1 %v12286_v23, %s12092_s15  ;;  %v12460_v40 = vmul.f32 0.516129, %v12226_v4  ;;  %v12463_v41 = vmul.f32 0.516129, %v12232_v8  ;;  %v356_v47 = vmul.f32 0.9677419, %v12236_v9 }
 0x111   : > { %v627_v48 = vmul.f32 0.3548387, %v12228_v5  ;;  %v12552_v46 = vmul.f32 0.87096775, %v12236_v9  ;;  %v668_v12 = vmul.f32 0.83870965, %v12236_v9 }
 0x112   : > { %v12618_v17 = vmul.f32 0.8064516, %v12236_v9  ;;  %v826_v23 = vmul.f32 0.22580647, %v12232_v8  ;;  %v935_v22 = vmul.f32 0.22580644, %v12228_v5 }
 0x113   : > { %19222 = vst [vmem:[#allocation41_spill] sm:$0xff] %v12552_v46 }
 0x114   : > { %639 = vrot.lane.b32.xlu0 %v629_v24, %s12092_s15  ;;  %561 = vrot.lane.b32.xlu1 %v12294_v25, %s12092_s15  ;;  %v323_v24 = vmul.f32 0.48387095, %v12228_v5  ;;  %19226 = vst [vmem:[#allocation45_spill] sm:$0xff] %v12618_v17 }
 0x118   : > { %679 = vrot.lane.b32.xlu0 %v669_v26, %s12092_s15  ;;  %601 = vrot.lane.b32.xlu1 %v12301_v27, %s12092_s15  ;;  %v386_v26 = vmul.f32 0.5483871, %v12232_v8 }
 0x11c   : > { %719 = vrot.lane.b32.xlu0 %v12307_v28, %s12092_s15  ;;  %641 = vrot.lane.b32.xlu1 %v630_v29, %s12092_s15  ;;  %v973_v28 = vmul.f32 0.2903226, %v12226_v4 }
 0x120   : > { %759 = vrot.lane.b32.xlu0 %v12314_v30, %s12092_s15  ;;  %681 = vrot.lane.b32.xlu1 %v670_v31, %s12092_s15 }
 0x124   : > { %799 = vrot.lane.b32.xlu0 %v789_v32, %s12092_s15  ;;  %721 = vrot.lane.b32.xlu1 %v12322_v33, %s12092_s15  ;;  %v355_v32 = vmul.f32 0.9677419, %v12228_v5  ;;  %v12708_v33 = vmul.f32 0.19354838, %v12236_v9 }
 0x128   : > { %839 = vrot.lane.b32.xlu0 %v12328_v34, %s12092_s15  ;;  %761 = vrot.lane.b32.xlu1 %v12331_v35, %s12092_s15 }
 0x12c   : > { %879 = vrot.lane.b32.xlu0 %v12338_v36, %s12092_s15  ;;  %801 = vrot.lane.b32.xlu1 %v790_v37, %s12092_s15  ;;  %v1362_v37 = vmul.f32 0.032258064, %v12232_v8  ;;  %v12804_v36 = vmul.f32 0.06451613, %v12228_v5 }
 0x130   : > { %911 = vrot.lane.b32.xlu0 %v12345_v38, %s12092_s15  ;;  %841 = vrot.lane.b32.xlu1 %v12348_v39, %s12092_s15 }
 0x134   : > { %947 = vrot.lane.b32.xlu0 %v937_v44, %s12092_s15  ;;  %881 = vrot.lane.b32.xlu1 %v12356_v45, %s12092_s15  ;;  %v12466_v44 = vmul.f32 0.4516129, %v12228_v5  ;;  %v324_v45 = vmul.f32 0.48387095, %v12236_v9 }
 0x136   : > { %19213 = vst [vmem:[#allocation32_spill] sm:$0xff] %v12466_v44 }
 0x138   : > { %987 = vrot.lane.b32.xlu0 %v977_v50, %s12092_s15  ;;  %913 = vrot.lane.b32.xlu1 %v12368_v51, %s12092_s15 }
 0x13c   : > { %1019 = vrot.lane.b32.xlu0 %v12378_v53, %s12092_s15  ;;  %949 = vrot.lane.b32.xlu1 %v938_v54, %s12092_s15  ;;  %v353_v54 = vmul.f32 0.032258093, %v12226_v4 }
 0x140   : > { %1051 = vrot.lane.b32.xlu0 %v12385_v55, %s12092_s15  ;;  %989 = vrot.lane.b32.xlu1 %v978_v56, %s12092_s15 }
 0x144   : > { %1091 = vrot.lane.b32.xlu0 %v1081_v57, %s12092_s15  ;;  %1021 = vrot.lane.b32.xlu1 %v12393_v58, %s12092_s15  ;;  %v354_v57 = vmul.f32 0.032258093, %v12232_v8 }
 0x148   : > { %1127 = vrot.lane.b32.xlu0 %v12399_v59, %s12092_s15  ;;  %1053 = vrot.lane.b32.xlu1 %v12402_v60, %s12092_s15 }
 0x14c   : > { %1159 = vrot.lane.b32.xlu0 %v12409_v61, %s12092_s15  ;;  %1093 = vrot.lane.b32.xlu1 %v1082_v62, %s12092_s15 }
 0x150   : > { %1191 = vrot.lane.b32.xlu0 %v12416_v63, %s12092_s15  ;;  %1129 = vrot.lane.b32.xlu1 %v12419_v0, %s12092_s15 }
 0x154   : > { %1227 = vrot.lane.b32.xlu0 %v1217_v1, %s12092_s15  ;;  %1161 = vrot.lane.b32.xlu1 %v12427_v2, %s12092_s15 }
 0x158   : > { %1267 = vrot.lane.b32.xlu0 %v1257_v6, %s12092_s15  ;;  %1193 = vrot.lane.b32.xlu1 %v12434_v7, %s12092_s15  ;;  %v12477_v6 = vmul.f32 0.9354839, %v12228_v5 }
 0x15a   : > { %19214 = vst [vmem:[#allocation33_spill] sm:$0xff] %v12477_v6 }
 0x15c   : > { %1299 = vrot.lane.b32.xlu0 %v425_v10, %s12092_s15  ;;  %1229 = vrot.lane.b32.xlu1 %v1218_v11, %s12092_s15  ;;  %v12480_v11 = vmul.f32 0.4516129, %v12236_v9 }
 0x15e   : > { %19215 = vst [vmem:[#allocation34_spill] sm:$0xff] %v12480_v11 }
 0x160   : > { %1331 = vrot.lane.b32.xlu0 %v385_v13, %s12092_s15  ;;  %1269 = vrot.lane.b32.xlu1 %v1258_v15, %s12092_s15 }
 0x164   : > { %1371 = vrot.lane.b32.xlu0 %v1361_v16, %s12092_s15  ;;  %1301 = vrot.lane.b32.xlu1 %v426_v21, %s12092_s15 }
 0x168   : > { %331 = vrot.lane.b32.xlu0 %v323_v24, %s12092_s15  ;;  %1333 = vrot.lane.b32.xlu1 %v386_v26, %s12092_s15 }
 0x16a   : > { %v368_v29 = vpop.permute.xlu0 %367  ;;  %v336_v31 = vpop.permute.xlu1 %335 }
 0x16b   : > { %v345_v49 = vadd.f32 %v336_v31, %v12460_v40  ;;  %v377_v15 = vadd.f32 %v368_v29, %v353_v54 }
 0x16c   : > { %363 = vrot.lane.b32.xlu0 %v355_v32, %s12092_s15  ;;  %1373 = vrot.lane.b32.xlu1 %v1362_v37, %s12092_s15  ;;  %v467_v37 = vmul.f32 0.41935483, %v12228_v5 }
 0x16e   : > { %v400_v42 = vpop.permute.xlu0 %399  ;;  %v338_v43 = vpop.permute.xlu1 %337 }
 0x16f   : > { %v346_v50 = vadd.f32 %v338_v43, %v12463_v41  ;;  %v12489_v43 = vmul.f32 0.9354839, %v12236_v9 }
 0x170   : > { %395 = vrot.lane.b32.xlu0 %v12466_v44, %s12092_s15  ;;  %365 = vrot.lane.b32.xlu1 %v356_v47, %s12092_s15  ;;  %v12491_v47 = vadd.f32 %v400_v42, %v385_v13  ;;  %v468_v13 = vmul.f32 0.41935483, %v12236_v9  ;;  %v628_v44 = vmul.f32 0.3548387, %v12236_v9 }
 0x171   : > { %v348_v56 = vpack.c.bf16 %v346_v50, %v345_v49  ;;  %19216 = vst [vmem:[#allocation35_spill] sm:$0xff] %v12489_v43 }
 0x172   : > { %v440_v62 = vpop.permute.xlu0 %439  ;;  %v370_v1 = vpop.permute.xlu1 %369 }
 0x173   : > { %350 = vst.msk [vmem:[#allocation2 + $0x30] sm:$0xff] %vm308_vm1, %v348_v56  ;;  %v378_v16 = vadd.f32 %v370_v1, %v354_v57  ;;  %v12502_v56 = vmul.f32 0.9032258, %v12228_v5  ;;  %v12505_v42 = vadd.f32 %v440_v62, %v425_v10  ;;  %v12520_v10 = vmul.f32 0.9032258, %v12236_v9 }
 0x174   : > { %435 = vrot.lane.b32.xlu0 %v12477_v6, %s12092_s15  ;;  %397 = vrot.lane.b32.xlu1 %v12480_v11, %s12092_s15  ;;  %v667_v11 = vmul.f32 0.83870965, %v12228_v5  ;;  %v787_v6 = vmul.f32 0.29032257, %v12228_v5 }
 0x175   : > { %v380_v24 = vpack.c.bf16 %v378_v16, %v377_v15  ;;  %19217 = vst [vmem:[#allocation36_spill] sm:$0xff] %v12502_v56  ;;  %v466_v15 = vmul.f32 0.5806452, %v12232_v8  ;;  %19219 = vst [vmem:[#allocation38_spill] sm:$0xff] %v12520_v10 }
 0x176   : > { %v480_v31 = vpop.permute.xlu0 %479  ;;  %v402_v32 = vpop.permute.xlu1 %401 }
 0x177   : > { %382 = vst.msk [vmem:[#allocation2 + $0x40] sm:$0xff] %vm308_vm1, %v380_v24  ;;  %v12494_v29 = vadd.f32 %v402_v32, %v386_v26  ;;  %v465_v26 = vmul.f32 0.5806452, %v12226_v4  ;;  %v12517_v32 = vmul.f32 0.38709676, %v12228_v5 }
 0x178   : > { %475 = vrot.lane.b32.xlu0 %v467_v37, %s12092_s15  ;;  %437 = vrot.lane.b32.xlu1 %v12489_v43, %s12092_s15  ;;  %v505_v37 = vmul.f32 0.09677422, %v12226_v4 }
 0x179   : > { %19218 = vst [vmem:[#allocation37_spill] sm:$0xff] %v12517_v32 }
 0x17a   : > { %v520_v50 = vpop.permute.xlu0 %519  ;;  %v442_v54 = vpop.permute.xlu1 %441 }
 0x17b   : > { %v12507_v57 = vadd.f32 %v442_v54, %v426_v21  ;;  %v12522_v21 = vadd.f32 %v480_v31, %v465_v26  ;;  %v12535_v31 = vmul.f32 0.87096775, %v12228_v5  ;;  %v12538_v26 = vmul.f32 0.38709676, %v12236_v9 }
 0x17c   : > { %515 = vrot.lane.b32.xlu0 %v12502_v56, %s12092_s15  ;;  %477 = vrot.lane.b32.xlu1 %v468_v13, %s12092_s15  ;;  %v506_v13 = vmul.f32 0.09677422, %v12232_v8  ;;  %v12640_v56 = vmul.f32 0.7741935, %v12236_v9 }
 0x17d   : > { %19220 = vst [vmem:[#allocation39_spill] sm:$0xff] %v12535_v31  ;;  %19221 = vst [vmem:[#allocation40_spill] sm:$0xff] %v12538_v26 }
 0x17e   : > { %v560_v16 = vpop.permute.xlu0 %559  ;;  %v482_v24 = vpop.permute.xlu1 %481  ;;  %19230 = vst [vmem:[#allocation49_spill] sm:$0xff] %v12640_v56 }
 0x17f   : > { %v12524_v62 = vadd.f32 %v482_v24, %v466_v15  ;;  %v12540_v15 = vadd.f32 %v520_v50, %v505_v37  ;;  %v12555_v50 = vadd.f32 %v560_v16, %v12416_v63  ;;  %v12580_v37 = vmul.f32 0.32258064, %v12228_v5 }
 0x180   : > { %555 = vrot.lane.b32.xlu0 %v12517_v32, %s12092_s15  ;;  %517 = vrot.lane.b32.xlu1 %v12520_v10, %s12092_s15  ;;  %v12637_v10 = vmul.f32 0.2580645, %v12228_v5  ;;  %v936_v32 = vmul.f32 0.22580644, %v12236_v9 }
 0x181   : > { %19223 = vst [vmem:[#allocation42_spill] sm:$0xff] %v12580_v37 }
 0x182   : > { %v600_v1 = vpop.permute.xlu0 %599  ;;  %v522_v49 = vpop.permute.xlu1 %521  ;;  %19229 = vst [vmem:[#allocation48_spill] sm:$0xff] %v12637_v10 }
 0x183   : > { %v12542_v24 = vadd.f32 %v522_v49, %v506_v13  ;;  %v12568_v63 = vadd.f32 %v600_v1, %v12409_v61  ;;  %v666_v1 = vmul.f32 0.16129035, %v12232_v8 }
 0x184   : > { %595 = vrot.lane.b32.xlu0 %v12535_v31, %s12092_s15  ;;  %557 = vrot.lane.b32.xlu1 %v12538_v26, %s12092_s15 }
 0x186   : > { %v640_v3 = vpop.permute.xlu0 %639  ;;  %v562_v52 = vpop.permute.xlu1 %561 }
 0x187   : > { %v12558_v49 = vadd.f32 %v562_v52, %v12434_v7  ;;  %v12584_v61 = vadd.f32 %v640_v3, %v12399_v59  ;;  %v12599_v3 = vmul.f32 0.8064516, %v12228_v5  ;;  %v12602_v59 = vmul.f32 0.32258064, %v12236_v9 }
 0x188   : > { %635 = vrot.lane.b32.xlu0 %v627_v48, %s12092_s15  ;;  %597 = vrot.lane.b32.xlu1 %v12552_v46, %s12092_s15 }
 0x189   : > { %19224 = vst [vmem:[#allocation43_spill] sm:$0xff] %v12599_v3  ;;  %19225 = vst [vmem:[#allocation44_spill] sm:$0xff] %v12602_v59 }
 0x18a   : > { %v680_v13 = vpop.permute.xlu0 %679  ;;  %v602_v54 = vpop.permute.xlu1 %601 }
 0x18b   : > { %v12571_v52 = vadd.f32 %v602_v54, %v12427_v2 }
 0x18c   : > { %675 = vrot.lane.b32.xlu0 %v667_v11, %s12092_s15  ;;  %637 = vrot.lane.b32.xlu1 %v628_v44, %s12092_s15  ;;  %v665_v44 = vmul.f32 0.16129035, %v12226_v4 }
 0x18e   : > { %v12577_v7 = vpop.permute.xlu0 %719  ;;  %v642_v16 = vpop.permute.xlu1 %641 }
 0x18f   : > { %v12587_v2 = vadd.f32 %v642_v16, %v12419_v0  ;;  %v12604_v0 = vadd.f32 %v680_v13, %v665_v44  ;;  %v12626_v44 = vmul.f32 0.7741935, %v12228_v5 }
 0x190   : > { %715 = vrot.lane.b32.xlu0 %v12580_v37, %s12092_s15  ;;  %677 = vrot.lane.b32.xlu1 %v668_v12, %s12092_s15  ;;  %v785_v12 = vmul.f32 0.70967746, %v12226_v4  ;;  %v976_v37 = vmul.f32 0.7096774, %v12236_v9 }
 0x191   : > { %19227 = vst [vmem:[#allocation46_spill] sm:$0xff] %v12626_v44 }
 0x192   : > { %v12596_v54 = vpop.permute.xlu0 %759  ;;  %v682_v48 = vpop.permute.xlu1 %681 }
 0x193   : > { %v12606_v16 = vadd.f32 %v682_v48, %v666_v1  ;;  %v788_v1 = vmul.f32 0.29032257, %v12236_v9 }
 0x194   : > { %755 = vrot.lane.b32.xlu0 %v12599_v3, %s12092_s15  ;;  %717 = vrot.lane.b32.xlu1 %v12602_v59, %s12092_s15  ;;  %v12705_v3 = vmul.f32 0.67741936, %v12228_v5 }
 0x196   : > { %v800_v11 = vpop.permute.xlu0 %799  ;;  %v12614_v43 = vpop.permute.xlu1 %721 }
 0x197   : > { %v12642_v18 = vadd.f32 %v800_v11, %v785_v12  ;;  %v12657_v11 = vmul.f32 0.7419355, %v12228_v5 }
 0x198   : > { %795 = vrot.lane.b32.xlu0 %v787_v6, %s12092_s15  ;;  %757 = vrot.lane.b32.xlu1 %v12618_v17, %s12092_s15  ;;  %v786_v6 = vmul.f32 0.70967746, %v12232_v8 }
 0x199   : > { %19231 = vst [vmem:[#allocation50_spill] sm:$0xff] %v12642_v18  ;;  %19234 = vst [vmem:[#allocation53_spill] sm:$0xff] %v12657_v11 }
 0x19a   : > { %v840_v13 = vpop.permute.xlu0 %839  ;;  %v12623_v48 = vpop.permute.xlu1 %761 }
 0x19c   : > { %835 = vrot.lane.b32.xlu0 %v12626_v44, %s12092_s15  ;;  %797 = vrot.lane.b32.xlu1 %v788_v1, %s12092_s15  ;;  %v825_v1 = vmul.f32 0.22580647, %v12226_v4  ;;  %v12724_v44 = vmul.f32 0.67741936, %v12236_v9 }
 0x19e   : > { %v12634_v14 = vpop.permute.xlu0 %879  ;;  %v802_v19 = vpop.permute.xlu1 %801  ;;  %v12662_v12 = vadd.f32 %v840_v13, %v825_v1  ;;  %v12678_v13 = vmul.f32 0.7419355, %v12236_v9  ;;  %v975_v1 = vmul.f32 0.7096774, %v12228_v5 }
 0x19f   : > { %19228 = vst [vmem:[#allocation47_spill] sm:$0xff] %v12634_v14  ;;  %v12644_v26 = vadd.f32 %v802_v19, %v786_v6  ;;  %v12660_v19 = vmul.f32 0.2580645, %v12236_v9  ;;  %v12875_v14 = vmul.f32 0.516129, %v12236_v9 }
 0x1a0   : > { %875 = vrot.lane.b32.xlu0 %v12637_v10, %s12092_s15  ;;  %837 = vrot.lane.b32.xlu1 %v12640_v56, %s12092_s15  ;;  %19236 = vst [vmem:[#allocation55_spill] sm:$0xff] %v12662_v12  ;;  %19240 = vst [vmem:[#allocation59_spill] sm:$0xff] %v12678_v13  ;;  %v1079_v56 = vmul.f32 0.16129032, %v12228_v5  ;;  %v1467_v10 = vlaneseq }
 0x1a1   : > { %19232 = vst [vmem:[#allocation51_spill] sm:$0xff] %v12644_v26  ;;  %19235 = vst [vmem:[#allocation54_spill] sm:$0xff] %v12660_v19 }
 0x1a2   : > { %v12654_v20 = vpop.permute.xlu0 %911  ;;  %v842_v46 = vpop.permute.xlu1 %841 }
 0x1a3   : > { %19233 = vst [vmem:[#allocation52_spill] sm:$0xff] %v12654_v20  ;;  %v12664_v6 = vadd.f32 %v842_v46, %v826_v23 }
 0x1a4   : > { %907 = vrot.lane.b32.xlu0 %v12657_v11, %s12092_s15  ;;  %877 = vrot.lane.b32.xlu1 %v12660_v19, %s12092_s15  ;;  %v1118_v19 = vmul.f32 0.35483873, %v12232_v8 }
 0x1a5   : > { %19237 = vst [vmem:[#allocation56_spill] sm:$0xff] %v12664_v6 }
 0x1a6   : > { %v12672_v31 = vpop.permute.xlu0 %947  ;;  %v12674_v25 = vpop.permute.xlu1 %881 }
 0x1a7   : > { %19238 = vst [vmem:[#allocation57_spill] sm:$0xff] %v12672_v31  ;;  %19239 = vst [vmem:[#allocation58_spill] sm:$0xff] %v12674_v25 }
 0x1a8   : > { %943 = vrot.lane.b32.xlu0 %v935_v22, %s12092_s15  ;;  %909 = vrot.lane.b32.xlu1 %v12678_v13, %s12092_s15  ;;  %v12694_v22 = vmul.f32 0.19354838, %v12228_v5 }
 0x1aa   : > { %v988_v23 = vpop.permute.xlu0 %987  ;;  %v12683_v46 = vpop.permute.xlu1 %913 }
 0x1ab   : > { %19241 = vst [vmem:[#allocation60_spill] sm:$0xff] %v12683_v46  ;;  %v1360_v46 = vmul.f32 0.032258064, %v12236_v9 }
 0x1ac   : > { %983 = vrot.lane.b32.xlu0 %v975_v1, %s12092_s15  ;;  %945 = vrot.lane.b32.xlu1 %v936_v32, %s12092_s15  ;;  %v974_v1 = vmul.f32 0.2903226, %v12232_v8 }
 0x1ae   : > { %v12689_v27 = vpop.permute.xlu0 %1019  ;;  %v12691_v59 = vpop.permute.xlu1 %949 }
 0x1af   : > { %19242 = vst [vmem:[#allocation61_spill] sm:$0xff] %v12689_v27  ;;  %19243 = vst [vmem:[#allocation62_spill] sm:$0xff] %v12691_v59  ;;  %v12710_v27 = vadd.f32 %v988_v23, %v973_v28 }
 0x1b0   : > { %1015 = vrot.lane.b32.xlu0 %v12694_v22, %s12092_s15  ;;  %985 = vrot.lane.b32.xlu1 %v976_v37, %s12092_s15  ;;  %v1077_v37 = vmul.f32 0.8387097, %v12226_v4 }
 0x1b1   : > { %19245 = vst [vmem:[#allocation64_spill] sm:$0xff] %v12710_v27 }
 0x1b2   : > { %v12702_v17 = vpop.permute.xlu0 %1051  ;;  %v990_v32 = vpop.permute.xlu1 %989 }
 0x1b3   : > { %19244 = vst [vmem:[#allocation63_spill] sm:$0xff] %v12702_v17  ;;  %v12712_v30 = vadd.f32 %v990_v32, %v974_v1  ;;  %v12732_v1 = vmul.f32 0.6451613, %v12228_v5  ;;  %v1080_v32 = vmul.f32 0.16129032, %v12236_v9 }
 0x1b4   : > { %1047 = vrot.lane.b32.xlu0 %v12705_v3, %s12092_s15  ;;  %1017 = vrot.lane.b32.xlu1 %v12708_v33, %s12092_s15 }
 0x1b5   : > { %19246 = vst [vmem:[#allocation65_spill] sm:$0xff] %v12712_v30 }
 0x1b6   : > { %v1092_v17 = vpop.permute.xlu0 %1091  ;;  %v12720_v35 = vpop.permute.xlu1 %1021 }
 0x1b7   : > { %19247 = vst [vmem:[#allocation66_spill] sm:$0xff] %v12720_v35  ;;  %v12743_v35 = vmul.f32 0.12903225, %v12228_v5  ;;  %v12748_v31 = vadd.f32 %v1092_v17, %v1077_v37  ;;  %v12766_v37 = vmul.f32 0.12903225, %v12236_v9 }
 0x1b8   : > { %1087 = vrot.lane.b32.xlu0 %v1079_v56, %s12092_s15  ;;  %1049 = vrot.lane.b32.xlu1 %v12724_v44, %s12092_s15  ;;  %v1078_v56 = vmul.f32 0.8387097, %v12232_v8 }
 0x1b9   : > { %19250 = vst [vmem:[#allocation69_spill] sm:$0xff] %v12748_v31 }
 0x1ba   : > { %v1128_v28 = vpop.permute.xlu0 %1127  ;;  %v12729_v23 = vpop.permute.xlu1 %1053 }
 0x1bb   : > { %19248 = vst [vmem:[#allocation67_spill] sm:$0xff] %v12729_v23  ;;  %v12746_v23 = vmul.f32 0.6451613, %v12236_v9 }
 0x1bc   : > { %1123 = vrot.lane.b32.xlu0 %v12732_v1, %s12092_s15  ;;  %1089 = vrot.lane.b32.xlu1 %v1080_v32, %s12092_s15  ;;  %v1117_v32 = vmul.f32 0.35483873, %v12226_v4 }
 0x1be   : > { %v12740_v27 = vpop.permute.xlu0 %1159  ;;  %v1094_v30 = vpop.permute.xlu1 %1093 }
 0x1bf   : > { %19249 = vst [vmem:[#allocation68_spill] sm:$0xff] %v12740_v27  ;;  %v12750_v34 = vadd.f32 %v1094_v30, %v1078_v56  ;;  %v12763_v30 = vmul.f32 0.61290324, %v12228_v5  ;;  %v12768_v56 = vadd.f32 %v1128_v28, %v1117_v32  ;;  %v1215_v28 = vmul.f32 0.09677419, %v12228_v5 }
 0x1c0   : > { %1155 = vrot.lane.b32.xlu0 %v12743_v35, %s12092_s15  ;;  %1125 = vrot.lane.b32.xlu1 %v12746_v23, %s12092_s15 }
 0x1c1   : > { %19251 = vst [vmem:[#allocation70_spill] sm:$0xff] %v12750_v34  ;;  %19253 = vst [vmem:[#allocation72_spill] sm:$0xff] %v12768_v56  ;;  %v1216_v56 = vmul.f32 0.09677419, %v12236_v9 }
 0x1c2   : > { %v12760_v59 = vpop.permute.xlu0 %1191  ;;  %v1130_v17 = vpop.permute.xlu1 %1129 }
 0x1c3   : > { %19252 = vst [vmem:[#allocation71_spill] sm:$0xff] %v12760_v59  ;;  %v12770_v39 = vadd.f32 %v1130_v17, %v1118_v19  ;;  %v12778_v59 = vshrl.u32 %v1467_v10, 7  ;;  %v12786_v19 = vmul.f32 0.61290324, %v12236_v9 }
 0x1c4   : > { %1187 = vrot.lane.b32.xlu0 %v12763_v30, %s12092_s15  ;;  %1157 = vrot.lane.b32.xlu1 %v12766_v37, %s12092_s15 }
 0x1c5   : > { %19254 = vst [vmem:[#allocation73_spill] sm:$0xff] %v12770_v39  ;;  %19255 = vst [vmem:[#allocation74_spill] sm:$0xff] %v12778_v59  ;;  %v1479_v32 = vadd.s32 88, %v12778_v59  ;;  %v1483_v17 = vadd.s32 120, %v12778_v59  ;;  %v1256_v59 = vmul.f32 0.58064514, %v12236_v9 }
 0x1c6   : > { %v12780_v31 = vpop.permute.xlu0 %1227  ;;  %v12782_v34 = vpop.permute.xlu1 %1161 }
 0x1c7   : > { %19256 = vst [vmem:[#allocation75_spill] sm:$0xff] %v12780_v31  ;;  %19257 = vst [vmem:[#allocation76_spill] sm:$0xff] %v12782_v34  ;;  %v1255_v31 = vmul.f32 0.58064514, %v12228_v5  ;;  %v1685_v39 = vand.u32 31, %v1479_v32  ;;  %v1713_v34 = vand.u32 31, %v1483_v17 }
 0x1c8   : > { %1223 = vrot.lane.b32.xlu0 %v1215_v28, %s12092_s15  ;;  %1189 = vrot.lane.b32.xlu1 %v12786_v19, %s12092_s15  ;;  %v1254_v32 = vmul.f32 0.41935486, %v12232_v8 }
 0x1c9   : > { %vm12807_vm3 = vcmp.ne.s32.totalorder %v1685_v39, 31  ;;  %vm12814_vm4 = vcmp.ne.s32.totalorder %v1713_v34, 31  ;;  %v12823_v39 = vmul.f32 0.5483871, %v12228_v5 }
 0x1ca   : > { %v1268_v10 = vpop.permute.xlu0 %1267  ;;  %v12793_v27 = vpop.permute.xlu1 %1193  ;;  %vm5291_vm5 = vmpackc.low %vm12807_vm3, %vm12807_vm3 }
 0x1cb   : > { %19258 = vst [vmem:[#allocation77_spill] sm:$0xff] %v12793_v27  ;;  %vm5295_vm6 = vmpackc.low %vm12814_vm4, %vm12814_vm4 }
 0x1cc   : > { %1263 = vrot.lane.b32.xlu0 %v1255_v31, %s12092_s15  ;;  %1225 = vrot.lane.b32.xlu1 %v1216_v56, %s12092_s15  ;;  %v1253_v56 = vmul.f32 0.41935486, %v12226_v4  ;;  %v1359_v31 = vmul.f32 0.032258064, %v12228_v5 }
 0x1ce   : > { %v12799_v20 = vpop.permute.xlu0 %1299  ;;  %v12801_v28 = vpop.permute.xlu1 %1229  ;;  %v12831_v34 = vadd.f32 %v1268_v10, %v1253_v56 }
 0x1cf   : > { %19259 = vst [vmem:[#allocation78_spill] sm:$0xff] %v12799_v20  ;;  %19260 = vst [vmem:[#allocation79_spill] sm:$0xff] %v12801_v28  ;;  %v12826_v28 = vmul.f32 0.06451613, %v12236_v9 }
 0x1d0   : > { %1295 = vrot.lane.b32.xlu0 %v12804_v36, %s12092_s15  ;;  %1265 = vrot.lane.b32.xlu1 %v1256_v59, %s12092_s15  ;;  %19266 = vst [vmem:[#allocation81_spill] sm:$0xff] %v12831_v34 }
 0x1d2   : > { %v12820_v17 = vpop.permute.xlu0 %1331  ;;  %v1270_v20 = vpop.permute.xlu1 %1269 }
 0x1d3   : > { %19265 = vst [vmem:[#allocation80_spill] sm:$0xff] %v12820_v17  ;;  %v12833_v59 = vadd.f32 %v1270_v20, %v1254_v32  ;;  %v19268_v17 = vmov 0   ;;  %v384_v32 = vmul.f32 0.5483871, %v12236_v9 }
 0x1d4   : > { %1327 = vrot.lane.b32.xlu0 %v12823_v39, %s12092_s15  ;;  %1297 = vrot.lane.b32.xlu1 %v12826_v28, %s12092_s15  ;;  %v5427_v10 = vsel %vm5291_vm5, 65537, %v19268_v17  ;;  %v5431_v13 = vsel %vm5295_vm6, 65537, %v19268_v17  ;;  %v12851_v11 = vsel %vm3714_vm8, 65537, %v19268_v17 }
 0x1d5   : > { %19267 = vst [vmem:[#allocation82_spill] sm:$0xff] %v12833_v59  ;;  %19270 = vst [vmem:[#allocation84_spill] sm:$0xff] %v12851_v11  ;;  %v11466_v27 = vcombine.low %v12851_v11, %v5427_v10  ;;  %v11468_v34 = vcombine.low %v12851_v11, %v5431_v13  ;;  %v1357_v10 = vmul.f32 0.96774197, %v12226_v4  ;;  %v1358_v13 = vmul.f32 0.96774197, %v12232_v8 }
 0x1d6   : > { %v1372_v56 = vpop.permute.xlu0 %1371  ;;  %v12845_v20 = vpop.permute.xlu1 %1301 }
 0x1d7   : > { %19269 = vst [vmem:[#allocation83_spill] sm:$0xff] %v12845_v20  ;;  %v5797_v17 = vshrl.u32 %v11466_v27, 16  ;;  %v5800_v38 = vshll.u32 %v11466_v27, 16 }
 0x1d8   : > { %1367 = vrot.lane.b32.xlu0 %v1359_v31, %s12092_s15  ;;  %1329 = vrot.lane.b32.xlu1 %v384_v32, %s12092_s15  ;;  %v12867_v31 = vcombine.low %v12851_v11, %v12851_v11  ;;  %v351_v11 = vmul.f32 0.032258093, %v12228_v5 }
 0x1d9   : > { %v5799_v4 = vrot.slane %v5797_v17, 7 }
 0x1da   : > { %v12857_v59 = vpop.permute.xlu0 %331  ;;  %v12859_v20 = vpop.permute.xlu1 %1333  ;;  %v4202_v8 = vshrl.u32 %v12867_v31, 16 }
 0x1db   : > { %19271 = vst [vmem:[#allocation85_spill] sm:$0xff] %v12857_v59  ;;  %19272 = vst [vmem:[#allocation86_spill] sm:$0xff] %v12859_v20  ;;  %v5813_v59 = vshrl.u32 %v11468_v34, 16  ;;  %v12872_v20 = vmul.f32 0.516129, %v12228_v5  ;;  %v5802_v27 = vor.u32 %v5800_v38, %v5799_v4 }
 0x1dc   : > { %1369 = vrot.lane.b32.xlu1 %v1360_v46, %s12092_s15  ;;  %333 = vrot.lane.b32.xlu0 %v324_v45, %s12092_s15  ;;  %v12877_v46 = vadd.f32 %v1372_v56, %v1357_v10  ;;  %v352_v56 = vmul.f32 0.032258093, %v12236_v9  ;;  %v12898_v17 = vrot.slane %v4202_v8, 7 }
 0x1dd   : > { %v12890_v10 = vrot.slane %v5813_v59, 7 }
 0x1de   : > { %v364_v12 = vpop.permute.xlu0 %363  ;;  %v1374_v6 = vpop.permute.xlu1 %1373  ;;  %19273 = vst [vmem:[#allocation87_spill] sm:$0xff] %v12877_v46  ;;  %19276 = vst [vmem:[#allocation90_spill] sm:$0xff] %v12898_v17  ;;  %v3242_v46 = vld [vmem:[#allocation2 + $0x30] sm:$0xff] }
 0x1df   : > { %v12879_v45 = vadd.f32 %v1374_v6, %v1358_v13  ;;  %19275 = vst [vmem:[#allocation89_spill] sm:$0xff] %v12890_v10  ;;  %v5816_v6 = vshll.u32 %v11468_v34, 16  ;;  %v375_v18 = vadd.f32 %v364_v12, %v351_v11  ;;  %v4198_v11 = vshll.u32 %v12867_v31, 16 }
 0x1e0   : > { %1403 = vrot.lane.b32.xlu0 %v12872_v20, %s12092_s15  ;;  %1405 = vrot.lane.b32.xlu1 %v12875_v14, %s12092_s15  ;;  %v6805_v38 = vshll.u32 %v3242_v46, 16 }
 0x1e1   : > { %19274 = vst [vmem:[#allocation88_spill] sm:$0xff] %v12879_v45  ;;  %v5818_v59 = vor.u32 %v5816_v6, %v12890_v10  ;;  %v19279_v6 = vpack.c.bf16 %v12507_v57, %v12505_v42 }
 0x1e2   : > { %v396_v13 = vpop.permute.xlu0 %395  ;;  %v366_v51 = vpop.permute.xlu1 %365 }
 0x1e3   : > { %v376_v26 = vadd.f32 %v366_v51, %v352_v56  ;;  %v407_v51 = vadd.f32 %v396_v13, %v12823_v39  ;;  %v3244_v56 = vld [vmem:[#allocation2 + $0x40] sm:$0xff]  ;;  %v12926_v13 = vrot.slane %v6805_v38, 1  ;;  %v503_v38 = vmul.f32 0.09677422, %v12228_v5 }
 0x1e4   : > { %1407 = vrot.lane.b32.xlu0 %v12460_v40, %s12092_s15  ;;  %1409 = vrot.lane.b32.xlu1 %v12463_v41, %s12092_s15  ;;  %v19277_v41 = vpack.c.bf16 %v12494_v29, %v12491_v47 }
 0x1e5   : > { %v379_v25 = vpack.c.bf16 %v376_v26, %v375_v18  ;;  %v12911_v18 = vor.u32 %v12898_v17, %v4198_v11  ;;  %v5803_v26 = vsel %vm5756_vm9, %v12898_v17, %v5802_v27  ;;  %v463_v27 = vmul.f32 0.5806452, %v12228_v5 }
 0x1e6   : > { %v436_v34 = vpop.permute.xlu0 %435  ;;  %v398_v45 = vpop.permute.xlu1 %397  ;;  %vm6305_vm10 = vcmp.ne.s16.totalorder %v5803_v26, 0 }
 0x1e7   : > { %381 = vst.msk [vmem:[#allocation2 + $0x38] sm:$0xff] %vm308_vm1, %v379_v25  ;;  %v408_v40 = vadd.f32 %v398_v45, %v384_v32  ;;  %19278 = vst [vmem:[#allocation91_spill] sm:$0xff] %v12911_v18  ;;  %v5819_v25 = vsel %vm5756_vm9, %v12898_v17, %v5818_v59  ;;  %v5811_v45 = vsel %vm5756_vm9, %v5799_v4, %v12911_v18  ;;  %v464_v4 = vmul.f32 0.5806452, %v12236_v9 }
 0x1e8   : > { %417 = vrot.lane.b32.xlu1 %v19277_v41, %s12092_s15  ;;  %v447_v47 = vadd.f32 %v436_v34, %v12804_v36  ;;  %vm6307_vm11 = vcmp.ne.s16.totalorder %v5819_v25, 0  ;;  %vm6306_vm12 = vcmp.ne.s16.totalorder %v5811_v45, 0  ;;  %v12930_v41 = vsel %vm6305_vm10, %v3242_v46, 0 }
 0x1e9   : > { %v411_v12 = vpack.c.bf16 %v408_v40, %v407_v51  ;;  %v6809_v51 = vshrl.u32 %v3242_v46, 16  ;;  %v6821_v40 = vshll.u32 %v3244_v56, 16  ;;  %19280 = vst [vmem:[#allocation92_spill] sm:$0xff] %v12930_v41  ;;  %v12933_v57 = vsel %vm6307_vm11, %v3244_v56, 0 }
 0x1ea   : > { %v476_v39 = vpop.permute.xlu0 %475  ;;  %v438_v32 = vpop.permute.xlu1 %437  ;;  %19281 = vst [vmem:[#allocation93_spill] sm:$0xff] %v12933_v57  ;;  %v19282_v25 = vpack.c.bf16 %v12524_v62, %v12522_v21  ;;  %v18985_v21 = vrot.slane %v12933_v57, 1 }
 0x1eb   : > { %v448_v29 = vadd.f32 %v438_v32, %v12826_v28  ;;  %415 = vrot.lane.b32.xlu0 %v411_v12, %s12092_s15  ;;  %v487_v26 = vadd.f32 %v476_v39, %v463_v27  ;;  %v504_v32 = vmul.f32 0.09677422, %v12236_v9  ;;  %v6811_v46 = vor.u32 %v6809_v51, %v12926_v13 }
 0x1ec   : > { %457 = vrot.lane.b32.xlu1 %v19279_v6, %s12092_s15 }
 0x1ed   : > { %v451_v59 = vpack.c.bf16 %v448_v29, %v447_v47 }
 0x1ee   : > { %v516_v36 = vpop.permute.xlu0 %515  ;;  %v478_v28 = vpop.permute.xlu1 %477  ;;  %v3243_v34 = vld [vmem:[#allocation2 + $0x38] sm:$0xff] }
 0x1ef   : > { %v488_v12 = vadd.f32 %v478_v28, %v464_v4  ;;  %455 = vrot.lane.b32.xlu0 %v451_v59, %s12092_s15  ;;  %v6813_v42 = vshll.u32 %v3243_v34, 16  ;;  %v6375_v39 = vsel %vm6306_vm12, %v3243_v34, 0  ;;  %v6817_v6 = vshrl.u32 %v3243_v34, 16 }
 0x1f0   : > { %497 = vrot.lane.b32.xlu1 %v19282_v25, %s12094_s16  ;;  %v7775_v27 = vrot.slane %v6375_v39, 1  ;;  %v12943_v4 = vrot.slane %v6821_v40, 1  ;;  %v18986_v28 = vrot.slane %v12930_v41, 1  ;;  %v527_v62 = vadd.f32 %v516_v36, %v503_v38 }
 0x1f1   : > { %v491_v47 = vpack.c.bf16 %v488_v12, %v487_v26  ;;  %v6815_v29 = vrot.slane %v6813_v42, 1  ;;  %v19285_v34 = vpack.c.bf16 %v12542_v24, %v12540_v15 }
 0x1f2   : > { %v556_v56 = vpop.permute.xlu0 %555  ;;  %v518_v59 = vpop.permute.xlu1 %517  ;;  %19283 = vst [vmem:[#allocation94_spill] sm:$0xff] %v12943_v4  ;;  %v12958_v40 = vsel %vm7763_vm13, %v7775_v27, %v18985_v21  ;;  %v12963_v36 = vsel %vm7763_vm13, %v18986_v28, %v7775_v27 }
 0x1f3   : > { %v528_v25 = vadd.f32 %v518_v59, %v504_v32  ;;  %495 = vrot.lane.b32.xlu0 %v491_v47, %s12094_s16  ;;  %v12949_v45 = vsel %vm4189_vm2, %v6811_v46, %v6815_v29  ;;  %v6819_v51 = vor.u32 %v6817_v6, %v6815_v29  ;;  %19286 = vst [vmem:[#allocation96_spill] sm:$0xff] %v12958_v40  ;;  %19287 = vst [vmem:[#allocation97_spill] sm:$0xff] %v12963_v36 }
 0x1f4   : > { %19284 = vst [vmem:[#allocation95_spill] sm:$0xff] %v12949_v45  ;;  %537 = vrot.lane.b32.xlu1 %v19285_v34, %s12094_s16  ;;  %v567_v15 = vadd.f32 %v556_v56, %v12763_v30  ;;  %v19289_v32 = vpack.c.bf16 %v12558_v49, %v12555_v50  ;;  %v19290_v30 = vpack.c.bf16 %v12571_v52, %v12568_v63  ;;  %v663_v49 = vmul.f32 0.16129035, %v12228_v5 }
 0x1f5   : > { %v531_v26 = vpack.c.bf16 %v528_v25, %v527_v62  ;;  %v12967_v12 = vsel %vm4189_vm2, %v6819_v51, %v12943_v4  ;;  %v664_v63 = vmul.f32 0.16129035, %v12236_v9  ;;  %v730_v52 = vadd.f32 %v12614_v43, %v12402_v60 }
 0x1f6   : > { %19288 = vst [vmem:[#allocation98_spill] sm:$0xff] %v12967_v12  ;;  %v596_v42 = vpop.permute.xlu0 %595  ;;  %v558_v38 = vpop.permute.xlu1 %557 }
 0x1f7   : > { %v568_v24 = vadd.f32 %v558_v38, %v12786_v19  ;;  %535 = vrot.lane.b32.xlu0 %v531_v26, %s12094_s16  ;;  %v607_v29 = vadd.f32 %v596_v42, %v12743_v35  ;;  %v19291_v35 = vpack.c.bf16 %v12587_v2, %v12584_v61  ;;  %v19292_v61 = vpack.c.bf16 %v12606_v16, %v12604_v0 }
 0x1f8   : > { %577 = vrot.lane.b32.xlu1 %v19289_v32, %s12095_s17  ;;  %v770_v26 = vadd.f32 %v12623_v48, %v12393_v58 }
 0x1f9   : > { %v571_v46 = vpack.c.bf16 %v568_v24, %v567_v15 }
 0x1fa   : > { %v636_v39 = vpop.permute.xlu0 %635  ;;  %v598_v47 = vpop.permute.xlu1 %597 }
 0x1fb   : > { %v608_v6 = vadd.f32 %v598_v47, %v12766_v37  ;;  %575 = vrot.lane.b32.xlu0 %v571_v46, %s12095_s17  ;;  %v647_v59 = vadd.f32 %v636_v39, %v12732_v1  ;;  %v19293_v39 = vld [vmem:[#allocation51_spill] sm:$0xff]  ;;  %v19294_v47 = vld [vmem:[#allocation50_spill] sm:$0xff] }
 0x1fc   : > { %617 = vrot.lane.b32.xlu1 %v19290_v30, %s12095_s17  ;;  %v19296_v30 = vld [vmem:[#allocation30_spill] sm:$0xff] }
 0x1fd   : > { %v611_v19 = vpack.c.bf16 %v608_v6, %v607_v29  ;;  %v19295_v29 = vpack.c.bf16 %v19293_v39, %v19294_v47  ;;  %v824_v6 = vmul.f32 0.22580647, %v12236_v9  ;;  %v19313_v39 = vld [vmem:[#allocation22_spill] sm:$0xff]  ;;  %v19314_v47 = vld [vmem:[#allocation57_spill] sm:$0xff] }
 0x1fe   : > { %v676_v27 = vpop.permute.xlu0 %675  ;;  %v638_v56 = vpop.permute.xlu1 %637 }
 0x1ff   : > { %v648_v50 = vadd.f32 %v638_v56, %v12746_v23  ;;  %615 = vrot.lane.b32.xlu0 %v611_v19, %s12095_s17  ;;  %v687_v1 = vadd.f32 %v676_v27, %v663_v49  ;;  %v729_v23 = vadd.f32 %v12577_v7, %v12385_v55  ;;  %v769_v55 = vadd.f32 %v12596_v54, %v12378_v53  ;;  %v19297_v19 = vld [vmem:[#allocation58_spill] sm:$0xff]  ;;  %v19298_v49 = vld [vmem:[#allocation25_spill] sm:$0xff]  ;;  %s12111_s17 = smov 20  }
 0x200   : > { %657 = vrot.lane.b32.xlu1 %v19291_v35, %s12096_s18  ;;  %v890_v27 = vadd.f32 %v19297_v19, %v19296_v30  ;;  %v19315_v19 = vld [vmem:[#allocation46_spill] sm:$0xff] }
 0x201   : > { %v651_v37 = vpack.c.bf16 %v648_v50, %v647_v59  ;;  %v732_v34 = vpack.c.bf16 %v730_v52, %v729_v23  ;;  %v772_v0 = vpack.c.bf16 %v770_v26, %v769_v55  ;;  %v19300_v52 = vld [vmem:[#allocation56_spill] sm:$0xff]  ;;  %v19303_v23 = vld [vmem:[#allocation27_spill] sm:$0xff] }
 0x202   : > { %v716_v62 = vpop.permute.xlu0 %715  ;;  %v678_v25 = vpop.permute.xlu1 %677  ;;  %v19307_v55 = vld [vmem:[#allocation24_spill] sm:$0xff] }
 0x203   : > { %v688_v51 = vadd.f32 %v678_v25, %v664_v63  ;;  %655 = vrot.lane.b32.xlu0 %v651_v37, %s12096_s18  ;;  %v727_v42 = vadd.f32 %v716_v62, %v12705_v3  ;;  %v783_v3 = vmul.f32 0.70967746, %v12228_v5  ;;  %v19299_v37 = vld [vmem:[#allocation47_spill] sm:$0xff] }
 0x204   : > { %697 = vrot.lane.b32.xlu1 %v19292_v61, %s12096_s18  ;;  %v889_v63 = vadd.f32 %v19299_v37, %v19298_v49  ;;  %v19301_v62 = vld [vmem:[#allocation55_spill] sm:$0xff]  ;;  %v19304_v61 = vld [vmem:[#allocation60_spill] sm:$0xff]  ;;  %v972_v49 = vmul.f32 0.2903226, %v12236_v9 }
 0x205   : > { %v691_v2 = vpack.c.bf16 %v688_v51, %v687_v1  ;;  %v19302_v25 = vpack.c.bf16 %v19300_v52, %v19301_v62  ;;  %v19317_v37 = vld [vmem:[#allocation23_spill] sm:$0xff] }
 0x206   : > { %v756_v60 = vpop.permute.xlu0 %755  ;;  %v718_v43 = vpop.permute.xlu1 %717  ;;  %v892_v51 = vpack.c.bf16 %v890_v27, %v889_v63  ;;  %v19318_v63 = vld [vmem:[#allocation66_spill] sm:$0xff] }
 0x207   : > { %v728_v38 = vadd.f32 %v718_v43, %v12724_v44  ;;  %695 = vrot.lane.b32.xlu0 %v691_v2, %s12096_s18  ;;  %v767_v24 = vadd.f32 %v756_v60, %v12694_v22  ;;  %v784_v44 = vmul.f32 0.70967746, %v12236_v9  ;;  %v922_v2 = vadd.f32 %v19304_v61, %v19303_v23  ;;  %v19305_v60 = vld [vmem:[#allocation53_spill] sm:$0xff]  ;;  %v19319_v23 = vld [vmem:[#allocation20_spill] sm:$0xff] }
 0x208   : > { %737 = vrot.lane.b32.xlu1 %v732_v34, %s12097_s19  ;;  %v1030_v52 = vadd.f32 %v19318_v63, %v19317_v37  ;;  %v19320_v61 = vld [vmem:[#allocation61_spill] sm:$0xff]  ;;  %v1115_v63 = vmul.f32 0.35483873, %v12228_v5 }
 0x209   : > { %v731_v7 = vpack.c.bf16 %v728_v38, %v727_v42  ;;  %v19306_v42 = vld [vmem:[#allocation59_spill] sm:$0xff] }
 0x20a   : > { %v796_v16 = vpop.permute.xlu0 %795  ;;  %v758_v15 = vpop.permute.xlu1 %757 }
 0x20b   : > { %v768_v58 = vadd.f32 %v758_v15, %v12708_v33  ;;  %735 = vrot.lane.b32.xlu0 %v731_v7, %s12097_s19  ;;  %v807_v53 = vadd.f32 %v796_v16, %v783_v3  ;;  %v823_v33 = vmul.f32 0.22580647, %v12228_v5  ;;  %v19308_v7 = vld [vmem:[#allocation52_spill] sm:$0xff] }
 0x20c   : > { %777 = vrot.lane.b32.xlu1 %v772_v0, %s12097_s19  ;;  %v921_v0 = vadd.f32 %v19308_v7, %v19307_v55  ;;  %v19325_v55 = vld [vmem:[#allocation67_spill] sm:$0xff] }
 0x20d   : > { %v771_v48 = vpack.c.bf16 %v768_v58, %v767_v24  ;;  %v19309_v24 = vld [vmem:[#allocation26_spill] sm:$0xff] }
 0x20e   : > { %v836_v32 = vpop.permute.xlu0 %835  ;;  %v798_v46 = vpop.permute.xlu1 %797  ;;  %v924_v15 = vpack.c.bf16 %v922_v2, %v921_v0  ;;  %v19310_v58 = vld [vmem:[#allocation62_spill] sm:$0xff]  ;;  %v1029_v2 = vadd.f32 %v19320_v61, %v19319_v23 }
 0x20f   : > { %v808_v54 = vadd.f32 %v798_v46, %v784_v44  ;;  %775 = vrot.lane.b32.xlu0 %v771_v48, %s12097_s19  ;;  %v847_v50 = vadd.f32 %v836_v32, %v823_v33  ;;  %v958_v3 = vadd.f32 %v19310_v58, %v19309_v24  ;;  %v19311_v32 = vld [vmem:[#allocation48_spill] sm:$0xff]  ;;  %v19327_v58 = vld [vmem:[#allocation45_spill] sm:$0xff]  ;;  %s12112_s19 = smov 24  }
 0x210   : > { %817 = vrot.lane.b32.xlu1 %v19295_v29, %s12098_s24  ;;  %v957_v29 = vadd.f32 %v19314_v47, %v19313_v39  ;;  %v19330_v47 = vld [vmem:[#allocation42_spill] sm:$0xff] }
 0x211   : > { %v811_v22 = vpack.c.bf16 %v808_v54, %v807_v53  ;;  %v19312_v53 = vld [vmem:[#allocation54_spill] sm:$0xff] }
 0x212   : > { %v876_v56 = vpop.permute.xlu0 %875  ;;  %v838_v59 = vpop.permute.xlu1 %837 }
 0x213   : > { %v848_v35 = vadd.f32 %v838_v59, %v824_v6  ;;  %815 = vrot.lane.b32.xlu0 %v811_v22, %s12098_s24  ;;  %v887_v43 = vadd.f32 %v876_v56, %v19305_v60  ;;  %v960_v22 = vpack.c.bf16 %v958_v3, %v957_v29  ;;  %v19316_v56 = vld [vmem:[#allocation49_spill] sm:$0xff] }
 0x214   : > { %857 = vrot.lane.b32.xlu1 %v19302_v25, %s12098_s24 }
 0x215   : > { %v851_v1 = vpack.c.bf16 %v848_v35, %v847_v50  ;;  %v971_v50 = vmul.f32 0.2903226, %v12228_v5 }
 0x216   : > { %v908_v34 = vpop.permute.xlu0 %907  ;;  %v878_v26 = vpop.permute.xlu1 %877 }
 0x217   : > { %v888_v38 = vadd.f32 %v878_v26, %v19306_v42  ;;  %855 = vrot.lane.b32.xlu0 %v851_v1, %s12098_s24  ;;  %v919_v46 = vadd.f32 %v908_v34, %v19311_v32  ;;  %v19321_v34 = vld [vmem:[#allocation65_spill] sm:$0xff]  ;;  %v19322_v26 = vld [vmem:[#allocation64_spill] sm:$0xff]  ;;  %v1032_v42 = vpack.c.bf16 %v1030_v52, %v1029_v2 }
 0x218   : > { %897 = vrot.lane.b32.xlu1 %v892_v51, %s12099_s26  ;;  %v19323_v60 = vpack.c.bf16 %v19321_v34, %v19322_v26  ;;  %v19337_v26 = vld [vmem:[#allocation15_spill] sm:$0xff] }
 0x219   : > { %v891_v16 = vpack.c.bf16 %v888_v38, %v887_v43  ;;  %v19324_v38 = vld [vmem:[#allocation21_spill] sm:$0xff] }
 0x21a   : > { %v944_v48 = vpop.permute.xlu0 %943  ;;  %v910_v44 = vpop.permute.xlu1 %909  ;;  %v1062_v7 = vadd.f32 %v19325_v55, %v19324_v38  ;;  %v19340_v38 = vld [vmem:[#allocation72_spill] sm:$0xff] }
 0x21b   : > { %v920_v54 = vadd.f32 %v910_v44, %v19312_v53  ;;  %895 = vrot.lane.b32.xlu0 %v891_v16, %s12099_s26  ;;  %v955_v27 = vadd.f32 %v944_v48, %v19315_v19  ;;  %v19328_v48 = vld [vmem:[#allocation19_spill] sm:$0xff]  ;;  %v1076_v19 = vmul.f32 0.8387097, %v12236_v9 }
 0x21c   : > { %929 = vrot.lane.b32.xlu1 %v924_v15, %s12099_s26  ;;  %v19326_v15 = vld [vmem:[#allocation43_spill] sm:$0xff] }
 0x21d   : > { %v923_v33 = vpack.c.bf16 %v920_v54, %v919_v46  ;;  %v19329_v44 = vld [vmem:[#allocation63_spill] sm:$0xff] }
 0x21e   : > { %v984_v6 = vpop.permute.xlu0 %983  ;;  %v946_v30 = vpop.permute.xlu1 %945  ;;  %v1061_v32 = vadd.f32 %v19329_v44, %v19328_v48  ;;  %v19344_v48 = vld [vmem:[#allocation39_spill] sm:$0xff] }
 0x21f   : > { %v956_v59 = vadd.f32 %v946_v30, %v19316_v56  ;;  %927 = vrot.lane.b32.xlu0 %v923_v33, %s12099_s26  ;;  %v995_v1 = vadd.f32 %v984_v6, %v971_v50  ;;  %v19331_v33 = vld [vmem:[#allocation44_spill] sm:$0xff]  ;;  %v1075_v6 = vmul.f32 0.8387097, %v12228_v5  ;;  %s12113_s26 = smov 28  }
 0x220   : > { %965 = vrot.lane.b32.xlu1 %v960_v22, %s12100_s27  ;;  %v1064_v53 = vpack.c.bf16 %v1062_v7, %v1061_v32  ;;  %v19345_v32 = vld [vmem:[#allocation41_spill] sm:$0xff] }
 0x221   : > { %v959_v35 = vpack.c.bf16 %v956_v59, %v955_v27 }
 0x222   : > { %v1016_v62 = vpop.permute.xlu0 %1015  ;;  %v986_v25 = vpop.permute.xlu1 %985 }
 0x223   : > { %v996_v51 = vadd.f32 %v986_v25, %v972_v49  ;;  %963 = vrot.lane.b32.xlu0 %v959_v35, %s12100_s27  ;;  %v1027_v24 = vadd.f32 %v1016_v62, %v19326_v15  ;;  %v19332_v35 = vld [vmem:[#allocation70_spill] sm:$0xff]  ;;  %v19333_v49 = vld [vmem:[#allocation69_spill] sm:$0xff]  ;;  %v1116_v62 = vmul.f32 0.35483873, %v12236_v9 }
 0x224   : > { %1005 = vrot.lane.b32.xlu1 %v19323_v60, %s12100_s27  ;;  %v19334_v37 = vpack.c.bf16 %v19332_v35, %v19333_v49  ;;  %v19335_v25 = vld [vmem:[#allocation18_spill] sm:$0xff]  ;;  %v19338_v60 = vld [vmem:[#allocation68_spill] sm:$0xff]  ;;  %v19343_v15 = vld [vmem:[#allocation77_spill] sm:$0xff] }
 0x225   : > { %v999_v43 = vpack.c.bf16 %v996_v51, %v995_v1  ;;  %v19336_v1 = vld [vmem:[#allocation76_spill] sm:$0xff]  ;;  %v19353_v49 = vld [vmem:[#allocation75_spill] sm:$0xff] }
 0x226   : > { %v1048_v0 = vpop.permute.xlu0 %1047  ;;  %v1018_v16 = vpop.permute.xlu1 %1017  ;;  %v1170_v51 = vadd.f32 %v19336_v1, %v19335_v25  ;;  %v19352_v35 = vld [vmem:[#allocation12_spill] sm:$0xff] }
 0x227   : > { %v1028_v3 = vadd.f32 %v1018_v16, %v19327_v58  ;;  %1003 = vrot.lane.b32.xlu0 %v999_v43, %s12100_s27  ;;  %v1059_v29 = vadd.f32 %v1048_v0, %v19330_v47  ;;  %v1169_v43 = vadd.f32 %v19338_v60, %v19337_v26  ;;  %v19342_v16 = vld [vmem:[#allocation17_spill] sm:$0xff]  ;;  %v19354_v1 = vld [vmem:[#allocation36_spill] sm:$0xff]  ;;  %v1252_v26 = vmul.f32 0.41935486, %v12236_v9 }
 0x228   : > { %1037 = vrot.lane.b32.xlu1 %v1032_v42, %s12101_s6  ;;  %v19339_v42 = vld [vmem:[#allocation73_spill] sm:$0xff] }
 0x229   : > { %v1031_v46 = vpack.c.bf16 %v1028_v3, %v1027_v24  ;;  %v19341_v55 = vpack.c.bf16 %v19339_v42, %v19340_v38  ;;  %v1172_v0 = vpack.c.bf16 %v1170_v51, %v1169_v43  ;;  %v1202_v24 = vadd.f32 %v19343_v15, %v19342_v16  ;;  %v19356_v60 = vld [vmem:[#allocation13_spill] sm:$0xff]  ;;  %v19357_v43 = vld [vmem:[#allocation83_spill] sm:$0xff]  ;;  %v19358_v16 = vld [vmem:[#allocation10_spill] sm:$0xff] }
 0x22a   : > { %v1088_v54 = vpop.permute.xlu0 %1087  ;;  %v1050_v39 = vpop.permute.xlu1 %1049  ;;  %v1310_v42 = vadd.f32 %v19357_v43, %v19356_v60  ;;  %v19359_v15 = vld [vmem:[#allocation78_spill] sm:$0xff]  ;;  %v19372_v43 = vld [vmem:[#allocation88_spill] sm:$0xff] }
 0x22b   : > { %v1060_v22 = vadd.f32 %v1050_v39, %v19331_v33  ;;  %1035 = vrot.lane.b32.xlu0 %v1031_v46, %s12101_s6  ;;  %v1099_v59 = vadd.f32 %v1088_v54, %v1075_v6  ;;  %v19347_v54 = vld [vmem:[#allocation71_spill] sm:$0xff]  ;;  %v19348_v33 = vld [vmem:[#allocation16_spill] sm:$0xff] }
 0x22c   : > { %1069 = vrot.lane.b32.xlu1 %v1064_v53, %s12101_s6  ;;  %v19346_v53 = vld [vmem:[#allocation14_spill] sm:$0xff] }
 0x22d   : > { %v1063_v30 = vpack.c.bf16 %v1060_v22, %v1059_v29  ;;  %v1201_v39 = vadd.f32 %v19347_v54, %v19346_v53  ;;  %v19349_v22 = vld [vmem:[#allocation79_spill] sm:$0xff]  ;;  %v19364_v53 = vld [vmem:[#allocation86_spill] sm:$0xff] }
 0x22e   : > { %v1124_v27 = vpop.permute.xlu0 %1123  ;;  %v1090_v56 = vpop.permute.xlu1 %1089  ;;  %v1238_v6 = vadd.f32 %v19349_v22, %v19348_v33  ;;  %v19366_v22 = vld [vmem:[#allocation35_spill] sm:$0xff] }
 0x22f   : > { %v1100_v50 = vadd.f32 %v1090_v56, %v1076_v19  ;;  %1067 = vrot.lane.b32.xlu0 %v1063_v30, %s12101_s6  ;;  %v1135_v2 = vadd.f32 %v1124_v27, %v1115_v63  ;;  %v1204_v29 = vpack.c.bf16 %v1202_v24, %v1201_v39  ;;  %v19350_v27 = vld [vmem:[#allocation37_spill] sm:$0xff]  ;;  %v1309_v24 = vadd.f32 %v19359_v15, %v19358_v16  ;;  %s12114_s6 = smov 32  }
 0x230   : > { %1109 = vrot.lane.b32.xlu1 %v19334_v37, %s12102_s7  ;;  %v1237_v37 = vadd.f32 %v19353_v49, %v19352_v35  ;;  %v19369_v49 = vld [vmem:[#allocation32_spill] sm:$0xff]  ;;  %v1396_v16 = vmul.f32 0.48387098, %v12236_v9 }
 0x231   : > { %v1103_v52 = vpack.c.bf16 %v1100_v50, %v1099_v59  ;;  %v19351_v59 = vld [vmem:[#allocation40_spill] sm:$0xff] }
 0x232   : > { %v1156_v23 = vpop.permute.xlu0 %1155  ;;  %v1126_v61 = vpop.permute.xlu1 %1125 }
 0x233   : > { %v1136_v34 = vadd.f32 %v1126_v61, %v1116_v62  ;;  %1107 = vrot.lane.b32.xlu0 %v1103_v52, %s12102_s7  ;;  %v1167_v44 = vadd.f32 %v1156_v23, %v19344_v48  ;;  %v1240_v52 = vpack.c.bf16 %v1238_v6, %v1237_v37  ;;  %v19355_v23 = vld [vmem:[#allocation38_spill] sm:$0xff] }
 0x234   : > { %1145 = vrot.lane.b32.xlu1 %v19341_v55, %s12102_s7 }
 0x235   : > { %v1139_v7 = vpack.c.bf16 %v1136_v34, %v1135_v2  ;;  %v1251_v2 = vmul.f32 0.41935486, %v12228_v5 }
 0x236   : > { %v1188_v58 = vpop.permute.xlu0 %1187  ;;  %v1158_v3 = vpop.permute.xlu1 %1157 }
 0x237   : > { %v1168_v46 = vadd.f32 %v1158_v3, %v19345_v32  ;;  %1143 = vrot.lane.b32.xlu0 %v1139_v7, %s12102_s7  ;;  %v1199_v56 = vadd.f32 %v1188_v58, %v19350_v27  ;;  %v19360_v58 = vld [vmem:[#allocation82_spill] sm:$0xff]  ;;  %v19361_v3 = vld [vmem:[#allocation81_spill] sm:$0xff]  ;;  %v1312_v32 = vpack.c.bf16 %v1310_v42, %v1309_v24  ;;  %v19373_v42 = vld [vmem:[#allocation87_spill] sm:$0xff] }
 0x238   : > { %1177 = vrot.lane.b32.xlu1 %v1172_v0, %s12103_s8  ;;  %v19362_v48 = vpack.c.bf16 %v19360_v58, %v19361_v3  ;;  %v19375_v3 = vld [vmem:[#allocation7_spill] sm:$0xff] }
 0x239   : > { %v1171_v47 = vpack.c.bf16 %v1168_v46, %v1167_v44  ;;  %v19363_v46 = vld [vmem:[#allocation11_spill] sm:$0xff] }
 0x23a   : > { %v1224_v30 = vpop.permute.xlu0 %1223  ;;  %v1190_v19 = vpop.permute.xlu1 %1189  ;;  %v1342_v54 = vadd.f32 %v19364_v53, %v19363_v46 }
 0x23b   : > { %v1200_v50 = vadd.f32 %v1190_v19, %v19351_v59  ;;  %1175 = vrot.lane.b32.xlu0 %v1171_v47, %s12103_s8  ;;  %v1235_v51 = vadd.f32 %v1224_v30, %v19354_v1  ;;  %v19367_v30 = vld [vmem:[#allocation9_spill] sm:$0xff]  ;;  %v19368_v19 = vld [vmem:[#allocation80_spill] sm:$0xff]  ;;  %v1356_v1 = vmul.f32 0.96774197, %v12236_v9 }
 0x23c   : > { %1209 = vrot.lane.b32.xlu1 %v1204_v29, %s12103_s8  ;;  %v19365_v29 = vld [vmem:[#allocation33_spill] sm:$0xff]  ;;  %v1341_v27 = vadd.f32 %v19368_v19, %v19367_v30 }
 0x23d   : > { %v1203_v63 = vpack.c.bf16 %v1200_v50, %v1199_v56 }
 0x23e   : > { %v1264_v62 = vpop.permute.xlu0 %1263  ;;  %v1226_v25 = vpop.permute.xlu1 %1225  ;;  %v1344_v59 = vpack.c.bf16 %v1342_v54, %v1341_v27 }
 0x23f   : > { %v1236_v61 = vadd.f32 %v1226_v25, %v19355_v23  ;;  %1207 = vrot.lane.b32.xlu0 %v1203_v63, %s12103_s8  ;;  %v1275_v7 = vadd.f32 %v1264_v62, %v1251_v2  ;;  %v19370_v63 = vld [vmem:[#allocation34_spill] sm:$0xff]  ;;  %v1355_v62 = vmul.f32 0.96774197, %v12228_v5 }
 0x240   : > { %1245 = vrot.lane.b32.xlu1 %v1240_v52, %s12104_s9 }
 0x241   : > { %v1239_v34 = vpack.c.bf16 %v1236_v61, %v1235_v51  ;;  %v19371_v61 = vld [vmem:[#allocation85_spill] sm:$0xff] }
 0x242   : > { %v1296_v38 = vpop.permute.xlu0 %1295  ;;  %v1266_v55 = vpop.permute.xlu1 %1265  ;;  %v343_v2 = vadd.f32 %v19371_v61, %v12872_v20 }
 0x243   : > { %v1276_v0 = vadd.f32 %v1266_v55, %v1252_v26  ;;  %1243 = vrot.lane.b32.xlu0 %v1239_v34, %s12104_s9  ;;  %v1307_v33 = vadd.f32 %v1296_v38, %v19365_v29  ;;  %v19374_v38 = vpack.c.bf16 %v19372_v43, %v19373_v42 }
 0x244   : > { %1285 = vrot.lane.b32.xlu1 %v19362_v48, %s12104_s9  ;;  %v1397_v48 = vmul.f32 0.48387098, %v19375_v3 }
 0x245   : > { %v1279_v44 = vpack.c.bf16 %v1276_v0, %v1275_v7  ;;  %v1395_v0 = vmul.f32 0.48387098, %v12228_v5 }
 0x246   : > { %v1328_v39 = vpop.permute.xlu0 %1327  ;;  %v1298_v47 = vpop.permute.xlu1 %1297 }
 0x247   : > { %v1308_v6 = vadd.f32 %v1298_v47, %v19366_v22  ;;  %1283 = vrot.lane.b32.xlu0 %v1279_v44, %s12104_s9  ;;  %v1339_v37 = vadd.f32 %v1328_v39, %v19369_v49  ;;  %v19376_v44 = vld [vmem:[#allocation8_spill] sm:$0xff] }
 0x248   : > { %1317 = vrot.lane.b32.xlu1 %v1312_v32, %s12105_s10  ;;  %v1398_v32 = vmul.f32 0.48387098, %v19376_v44 }
 0x249   : > { %v1311_v56 = vpack.c.bf16 %v1308_v6, %v1307_v33 }
 0x24a   : > { %v1368_v50 = vpop.permute.xlu0 %1367  ;;  %v1330_v35 = vpop.permute.xlu1 %1329 }
 0x24b   : > { %v1340_v52 = vadd.f32 %v1330_v35, %v19370_v63  ;;  %1315 = vrot.lane.b32.xlu0 %v1311_v56, %s12105_s10  ;;  %v1379_v34 = vadd.f32 %v1368_v50, %v1355_v62 }
 0x24c   : > { %1349 = vrot.lane.b32.xlu1 %v1344_v59, %s12105_s10 }
 0x24d   : > { %v1343_v25 = vpack.c.bf16 %v1340_v52, %v1339_v37 }
 0x24e   : > { %v1370_v51 = vpop.permute.xlu1 %1369  ;;  %v334_v23 = vpop.permute.xlu0 %333 }
 0x24f   : > { %v1380_v26 = vadd.f32 %v1370_v51, %v1356_v1  ;;  %v344_v60 = vadd.f32 %v334_v23, %v12875_v14  ;;  %1347 = vrot.lane.b32.xlu0 %v1343_v25, %s12105_s10 }
 0x250   : > { %1389 = vrot.lane.b32.xlu1 %v19374_v38, %s12106_s11 }
 0x251   : > { %v1383_v55 = vpack.c.bf16 %v1380_v26, %v1379_v34  ;;  %v347_v7 = vpack.c.bf16 %v344_v60, %v343_v2 }
 0x252   : > { %v1404_v15 = vpop.permute.xlu0 %1403  ;;  %v1406_v24 = vpop.permute.xlu1 %1405 }
 0x253   : > { %349 = vst.msk [vmem:[#allocation2 + $0x28] sm:$0xff] %vm308_vm1, %v347_v7  ;;  %v1415_v20 = vadd.f32 %v1404_v15, %v1395_v0  ;;  %v1416_v58 = vadd.f32 %v1406_v24, %v1396_v16  ;;  %1387 = vrot.lane.b32.xlu0 %v1383_v55, %s12106_s11 }
 0x255   : > { %v1419_v14 = vpack.c.bf16 %v1416_v58, %v1415_v20 }
 0x256   : > { %v1408_v46 = vpop.permute.xlu0 %1407  ;;  %v1410_v53 = vpop.permute.xlu1 %1409 }
 0x257   : > { %v1417_v54 = vadd.f32 %v1408_v46, %v1397_v48  ;;  %v1418_v39 = vadd.f32 %v1410_v53, %v1398_v32  ;;  %1423 = vrot.lane.b32.xlu0 %v1419_v14, %s12106_s11 }
 0x259   : > { %v1420_v47 = vpack.c.bf16 %v1418_v39, %v1417_v54 }
 0x25a   : > { %v418_v29 = vpop.permute.xlu1 %417  ;;  %v13128_v33 = vld [vmem:[#allocation2 + $0x28] sm:$0xff] }
 0x25b   : > { %422 = vst.msk [vmem:[#allocation2 + $0x50] sm:$0xff] %vm308_vm1, %v418_v29  ;;  %1439 = vrot.lane.b32.xlu0 %v12228_v5, %s12092_s15  ;;  %1425 = vrot.lane.b32.xlu1 %v1420_v47, %s12106_s11  ;;  %v6797_v22 = vshll.u32 %v13128_v33, 16  ;;  %v6801_v56 = vshrl.u32 %v13128_v33, 16 }
 0x25d   : > { %v416_v6 = vpop.permute.xlu0 %415  ;;  %v13141_v19 = vrot.slane %v6797_v22, 1 }
 0x25e   : > { %421 = vst.msk [vmem:[#allocation2 + $0x48] sm:$0xff] %vm308_vm1, %v416_v6  ;;  %v458_v30 = vpop.permute.xlu1 %457 }
 0x25f   : > { %462 = vst.msk [vmem:[#allocation2 + $0x60] sm:$0xff] %vm308_vm1, %v458_v30  ;;  %1443 = vrot.lane.b32.xlu0 %v19375_v3, %s12092_s15  ;;  %1441 = vrot.lane.b32.xlu1 %v12236_v9, %s12092_s15  ;;  %19377 = vst [vmem:[#allocation51_spill] sm:$0xff] %v13141_v19  ;;  %v6803_v50 = vor.u32 %v6801_v56, %v13141_v19 }
 0x261   : > { %v456_v27 = vpop.permute.xlu0 %455  ;;  %v13153_v37 = vsel %vm4189_vm2, %v6803_v50, %v12926_v13 }
 0x262   : > { %461 = vst.msk [vmem:[#allocation2 + $0x58] sm:$0xff] %vm308_vm1, %v456_v27  ;;  %v498_v59 = vpop.permute.xlu1 %497  ;;  %19378 = vst [vmem:[#allocation50_spill] sm:$0xff] %v13153_v37 }
 0x263   : > { %502 = vst.msk [vmem:[#allocation2 + $0x70] sm:$0xff] %vm308_vm1, %v498_v59  ;;  %1445 = vrot.lane.b32.xlu1 %v19376_v44, %s12092_s15  ;;  %v19379_v59 = vld [vmem:[#allocation74_spill] sm:$0xff]  ;;  %s12110_s15 = smov 16  }
 0x264   : > { %v1472_v50 = vadd.s32 32, %v19379_v59  ;;  %v1568_v40 = vadd.s32 800, %v19379_v59 }
 0x265   : > { %v496_v35 = vpop.permute.xlu0 %495 }
 0x266   : > { %501 = vst.msk [vmem:[#allocation2 + $0x68] sm:$0xff] %vm308_vm1, %v496_v35  ;;  %v538_v49 = vpop.permute.xlu1 %537  ;;  %v1476_v35 = vadd.s32 64, %v19379_v59 }
 0x267   : > { %542 = vst.msk [vmem:[#allocation2 + $0x80] sm:$0xff] %vm308_vm1, %v538_v49 }
 0x269   : > { %v536_v63 = vpop.permute.xlu0 %535 }
 0x26a   : > { %541 = vst.msk [vmem:[#allocation2 + $0x78] sm:$0xff] %vm308_vm1, %v536_v63  ;;  %v578_v52 = vpop.permute.xlu1 %577 }
 0x26b   : > { %582 = vst.msk [vmem:[#allocation2 + $0x90] sm:$0xff] %vm308_vm1, %v578_v52  ;;  %v1636_v52 = vand.u32 31, %v1472_v50 }
 0x26d   : > { %v576_v62 = vpop.permute.xlu0 %575  ;;  %vm3309_vm14 = vcmp.ne.s32.totalorder %v1636_v52, 0  ;;  %v1431_v52 = vmul.f32 0.0, %v12228_v5 }
 0x26e   : > { %581 = vst.msk [vmem:[#allocation2 + $0x88] sm:$0xff] %vm308_vm1, %v576_v62  ;;  %v618_v25 = vpop.permute.xlu1 %617  ;;  %v1664_v62 = vand.u32 31, %v1476_v35  ;;  %vm3717_vm3 = vmpackc.low %vm3309_vm14, %vm3309_vm14 }
 0x26f   : > { %622 = vst.msk [vmem:[#allocation2 + $0xa0] sm:$0xff] %vm308_vm1, %v618_v25 }
 0x270   : > { %vm3313_vm15 = vcmp.ne.s32.totalorder %v1664_v62, 0  ;;  %v1432_v62 = vmul.f32 0.0, %v12236_v9  ;;  %v1433_v9 = vmul.f32 0.0, %v19375_v3 }
 0x271   : > { %v616_v1 = vpop.permute.xlu0 %615  ;;  %vm3721_vm4 = vmpackc.low %vm3313_vm15, %vm3313_vm15 }
 0x272   : > { %621 = vst.msk [vmem:[#allocation2 + $0x98] sm:$0xff] %vm308_vm1, %v616_v1  ;;  %v658_v51 = vpop.permute.xlu1 %657 }
 0x273   : > { %662 = vst.msk [vmem:[#allocation2 + $0xb0] sm:$0xff] %vm308_vm1, %v658_v51  ;;  %v1480_v51 = vadd.s32 96, %v19379_v59 }
 0x275   : > { %v656_v13 = vpop.permute.xlu0 %655 }
 0x276   : > { %661 = vst.msk [vmem:[#allocation2 + $0xa8] sm:$0xff] %vm308_vm1, %v656_v13  ;;  %v698_v23 = vpop.permute.xlu1 %697  ;;  %v1484_v13 = vadd.s32 128, %v19379_v59 }
 0x277   : > { %702 = vst.msk [vmem:[#allocation2 + $0xc0] sm:$0xff] %vm308_vm1, %v698_v23 }
 0x279   : > { %v696_v61 = vpop.permute.xlu0 %695 }
 0x27a   : > { %701 = vst.msk [vmem:[#allocation2 + $0xb8] sm:$0xff] %vm308_vm1, %v696_v61  ;;  %v738_v2 = vpop.permute.xlu1 %737 }
 0x27b   : > { %742 = vst.msk [vmem:[#allocation2 + $0xd0] sm:$0xff] %vm308_vm1, %v738_v2  ;;  %v1692_v2 = vand.u32 31, %v1480_v51 }
 0x27d   : > { %v736_v34 = vpop.permute.xlu0 %735  ;;  %vm13207_vm5 = vcmp.ne.s32.totalorder %v1692_v2, 0 }
 0x27e   : > { %741 = vst.msk [vmem:[#allocation2 + $0xc8] sm:$0xff] %vm308_vm1, %v736_v34  ;;  %v778_v26 = vpop.permute.xlu1 %777  ;;  %v1720_v34 = vand.u32 31, %v1484_v13  ;;  %vm3725_vm7 = vmpackc.low %vm13207_vm5, %vm13207_vm5 }
 0x27f   : > { %782 = vst.msk [vmem:[#allocation2 + $0xe0] sm:$0xff] %vm308_vm1, %v778_v26 }
 0x280   : > { %vm13212_vm6 = vcmp.ne.s32.totalorder %v1720_v34, 0 }
 0x281   : > { %v776_v60 = vpop.permute.xlu0 %775  ;;  %vm3729_vm8 = vmpackc.low %vm13212_vm6, %vm13212_vm6 }
 0x282   : > { %781 = vst.msk [vmem:[#allocation2 + $0xd8] sm:$0xff] %vm308_vm1, %v776_v60  ;;  %v818_v43 = vpop.permute.xlu1 %817  ;;  %v19380_v60 = vmov 0  }
 0x283   : > { %822 = vst.msk [vmem:[#allocation2 + $0xf0] sm:$0xff] %vm308_vm1, %v818_v43  ;;  %v3853_v43 = vsel %vm3717_vm3, 65537, %v19380_v60 }
 0x285   : > { %v816_v42 = vpop.permute.xlu0 %815 }
 0x286   : > { %821 = vst.msk [vmem:[#allocation2 + $0xe8] sm:$0xff] %vm308_vm1, %v816_v42  ;;  %v858_v38 = vpop.permute.xlu1 %857 }
 0x287   : > { %862 = vst.msk [vmem:[#allocation2 + $0x100] sm:$0xff] %vm308_vm1, %v858_v38  ;;  %v3857_v38 = vsel %vm3721_vm4, 65537, %v19380_v60 }
 0x289   : > { %v856_v55 = vpop.permute.xlu0 %855 }
 0x28a   : > { %861 = vst.msk [vmem:[#allocation2 + $0xf8] sm:$0xff] %vm308_vm1, %v856_v55  ;;  %v898_v7 = vpop.permute.xlu1 %897  ;;  %v1504_v55 = vadd.s32 288, %v19379_v59 }
 0x28b   : > { %902 = vst.msk [vmem:[#allocation2 + $0x110] sm:$0xff] %vm308_vm1, %v898_v7  ;;  %v19383_v7 = vld [vmem:[#allocation84_spill] sm:$0xff] }
 0x28d   : > { %v896_v0 = vpop.permute.xlu0 %895 }
 0x28e   : > { %901 = vst.msk [vmem:[#allocation2 + $0x108] sm:$0xff] %vm308_vm1, %v896_v0  ;;  %v930_v16 = vpop.permute.xlu1 %929  ;;  %v11395_v0 = vcombine.low %v3853_v43, %v19383_v7 }
 0x28f   : > { %934 = vst.msk [vmem:[#allocation2 + $0x120] sm:$0xff] %vm308_vm1, %v930_v16  ;;  %v1434_v16 = vmul.f32 0.0, %v19376_v44 }
 0x291   : > { %v928_v15 = vpop.permute.xlu0 %927 }
 0x292   : > { %933 = vst.msk [vmem:[#allocation2 + $0x118] sm:$0xff] %vm308_vm1, %v928_v15  ;;  %v966_v24 = vpop.permute.xlu1 %965 }
 0x293   : > { %970 = vst.msk [vmem:[#allocation2 + $0x130] sm:$0xff] %vm308_vm1, %v966_v24  ;;  %v11397_v24 = vcombine.low %v3857_v38, %v19383_v7 }
 0x295   : > { %v964_v20 = vpop.permute.xlu0 %963  ;;  %v4226_v34 = vshrl.u32 %v11397_v24, 16 }
 0x296   : > { %969 = vst.msk [vmem:[#allocation2 + $0x128] sm:$0xff] %vm308_vm1, %v964_v20  ;;  %v1006_v58 = vpop.permute.xlu1 %1005  ;;  %v1488_v20 = vadd.s32 160, %v19379_v59 }
 0x297   : > { %1010 = vst.msk [vmem:[#allocation2 + $0x140] sm:$0xff] %vm308_vm1, %v1006_v58  ;;  %v1492_v58 = vadd.s32 192, %v19379_v59 }
 0x299   : > { %v1004_v14 = vpop.permute.xlu0 %1003 }
 0x29a   : > { %1009 = vst.msk [vmem:[#allocation2 + $0x138] sm:$0xff] %vm308_vm1, %v1004_v14  ;;  %v1038_v48 = vpop.permute.xlu1 %1037  ;;  %v13228_v14 = vrot.slane %v4198_v11, 1 }
 0x29b   : > { %1042 = vst.msk [vmem:[#allocation2 + $0x150] sm:$0xff] %vm308_vm1, %v1038_v48  ;;  %v4206_v48 = vshll.u32 %v11395_v0, 16 }
 0x29c   : > { %19386 = vst [vmem:[#allocation30_spill] sm:$0xff] %v13228_v14 }
 0x29d   : > { %v1036_v32 = vpop.permute.xlu0 %1035  ;;  %v4208_v11 = vrot.slane %v4206_v48, 1 }
 0x29e   : > { %1041 = vst.msk [vmem:[#allocation2 + $0x148] sm:$0xff] %vm308_vm1, %v1036_v32  ;;  %v1070_v46 = vpop.permute.xlu1 %1069 }
 0x29f   : > { %1074 = vst.msk [vmem:[#allocation2 + $0x160] sm:$0xff] %vm308_vm1, %v1070_v46  ;;  %v4222_v46 = vshll.u32 %v11397_v24, 16 }
 0x2a1   : > { %v1068_v53 = vpop.permute.xlu0 %1067 }
 0x2a2   : > { %1073 = vst.msk [vmem:[#allocation2 + $0x158] sm:$0xff] %vm308_vm1, %v1068_v53  ;;  %v1110_v54 = vpop.permute.xlu1 %1109  ;;  %v1748_v53 = vand.u32 31, %v1488_v20 }
 0x2a3   : > { %1114 = vst.msk [vmem:[#allocation2 + $0x170] sm:$0xff] %vm308_vm1, %v1110_v54  ;;  %v3861_v54 = vsel %vm3725_vm7, 65537, %v19380_v60 }
 0x2a4   : > { %v11399_v50 = vcombine.low %v3861_v54, %v19383_v7  ;;  %vm13243_vm10 = vcmp.ne.s32.totalorder %v1748_v53, 0  ;;  %v3238_v53 = vld [vmem:[#allocation2 + $0x10] sm:$0xff] }
 0x2a5   : > { %v1108_v39 = vpop.permute.xlu0 %1107  ;;  %vm3733_vm12 = vmpackc.low %vm13243_vm10, %vm13243_vm10 }
 0x2a6   : > { %1113 = vst.msk [vmem:[#allocation2 + $0x168] sm:$0xff] %vm308_vm1, %v1108_v39  ;;  %v1146_v47 = vpop.permute.xlu1 %1145  ;;  %v3865_v39 = vsel %vm3729_vm8, 65537, %v19380_v60  ;;  %v3869_v43 = vsel %vm3733_vm12, 65537, %v19380_v60  ;;  %v4242_v48 = vshrl.u32 %v11399_v50, 16 }
 0x2a7   : > { %1150 = vst.msk [vmem:[#allocation2 + $0x180] sm:$0xff] %vm308_vm1, %v1146_v47  ;;  %v1776_v47 = vand.u32 31, %v1492_v58  ;;  %v13241_v35 = vcombine.low %v3865_v39, %v19383_v7  ;;  %v13279_v39 = vcombine.low %v3869_v43, %v19383_v7 }
 0x2a9   : > { %v1144_v29 = vpop.permute.xlu0 %1143  ;;  %vm13248_vm11 = vcmp.ne.s32.totalorder %v1776_v47, 0  ;;  %v4270_v31 = vshll.u32 %v13279_v39, 16 }
 0x2aa   : > { %1149 = vst.msk [vmem:[#allocation2 + $0x178] sm:$0xff] %vm308_vm1, %v1144_v29  ;;  %v1178_v22 = vpop.permute.xlu1 %1177  ;;  %v1496_v29 = vadd.s32 224, %v19379_v59  ;;  %vm3737_vm14 = vmpackc.low %vm13248_vm11, %vm13248_vm11 }
 0x2ab   : > { %1182 = vst.msk [vmem:[#allocation2 + $0x190] sm:$0xff] %vm308_vm1, %v1178_v22  ;;  %v13237_v22 = vor.u32 %v4202_v8, %v13228_v14 }
 0x2ac   : > { %v1804_v8 = vand.u32 31, %v1496_v29 }
 0x2ad   : > { %v1176_v6 = vpop.permute.xlu0 %1175  ;;  %19387 = vst [vmem:[#allocation58_spill] sm:$0xff] %v13237_v22  ;;  %v4209_v51 = vsel %vm4189_vm2, %v13237_v22, %v4208_v11 }
 0x2ae   : > { %1181 = vst.msk [vmem:[#allocation2 + $0x188] sm:$0xff] %vm308_vm1, %v1176_v6  ;;  %v1210_v30 = vpop.permute.xlu1 %1209  ;;  %v4210_v6 = vshrl.u32 %v11395_v0, 16  ;;  %vm13268_vm15 = vcmp.ne.s32.totalorder %v1804_v8, 0  ;;  %vm4735_vm3 = vcmp.ne.s16.totalorder %v4209_v51, 0 }
 0x2af   : > { %1214 = vst.msk [vmem:[#allocation2 + $0x1a0] sm:$0xff] %vm308_vm1, %v1210_v30  ;;  %vm3741_vm4 = vmpackc.low %vm13268_vm15, %vm13268_vm15  ;;  %v13284_v44 = vsel %vm4735_vm3, %v3238_v53, 0  ;;  %v11899_v53 = vld [vmem:[#allocation2 + $0x40] sm:$0xff] }
 0x2b0   : > { %19394 = vst [vmem:[#allocation25_spill] sm:$0xff] %v13284_v44 }
 0x2b1   : > { %v1208_v27 = vpop.permute.xlu0 %1207 }
 0x2b2   : > { %1213 = vst.msk [vmem:[#allocation2 + $0x198] sm:$0xff] %vm308_vm1, %v1208_v27  ;;  %v1246_v56 = vpop.permute.xlu1 %1245 }
 0x2b3   : > { %1250 = vst.msk [vmem:[#allocation2 + $0x1b0] sm:$0xff] %vm308_vm1, %v1246_v56  ;;  %v4224_v56 = vrot.slane %v4222_v46, 1 }
 0x2b5   : > { %v1244_v49 = vpop.permute.xlu0 %1243  ;;  %v4225_v13 = vsel %vm4189_vm2, %v13237_v22, %v4224_v56  ;;  %v4228_v54 = vor.u32 %v4226_v34, %v4224_v56 }
 0x2b6   : > { %1249 = vst.msk [vmem:[#allocation2 + $0x1a8] sm:$0xff] %vm308_vm1, %v1244_v49  ;;  %v1286_v63 = vpop.permute.xlu1 %1285  ;;  %vm4737_vm6 = vcmp.ne.s16.totalorder %v4225_v13, 0  ;;  %v4272_v13 = vrot.slane %v4270_v31, 1  ;;  %v3246_v31 = vld [vmem:[#allocation2 + $0x50] sm:$0xff] }
 0x2b7   : > { %1290 = vst.msk [vmem:[#allocation2 + $0x1c0] sm:$0xff] %vm308_vm1, %v1286_v63  ;;  %v1500_v63 = vadd.s32 256, %v19379_v59  ;;  %v4233_v8 = vsel %vm4189_vm2, %v4228_v54, %v13228_v14 }
 0x2b8   : > { %vm4738_vm12 = vcmp.ne.s16.totalorder %v4233_v8, 0  ;;  %v3245_v8 = vld [vmem:[#allocation2 + $0x48] sm:$0xff] }
 0x2b9   : > { %v1284_v25 = vpop.permute.xlu0 %1283  ;;  %v1832_v38 = vand.u32 31, %v1500_v63  ;;  %v4258_v63 = vshrl.u32 %v13241_v35, 16 }
 0x2ba   : > { %1289 = vst.msk [vmem:[#allocation2 + $0x1b8] sm:$0xff] %vm308_vm1, %v1284_v25  ;;  %v1318_v1 = vpop.permute.xlu1 %1317  ;;  %v4212_v25 = vor.u32 %v4210_v6, %v4208_v11  ;;  %v1860_v11 = vand.u32 31, %v1504_v55 }
 0x2bb   : > { %1322 = vst.msk [vmem:[#allocation2 + $0x1d0] sm:$0xff] %vm308_vm1, %v1318_v1  ;;  %vm13289_vm5 = vcmp.ne.s32.totalorder %v1832_v38, 0 }
 0x2bc   : > { %v4217_v3 = vsel %vm4189_vm2, %v4212_v25, %v13228_v14  ;;  %vm3745_vm8 = vmpackc.low %vm13289_vm5, %vm13289_vm5  ;;  %vm13310_vm10 = vcmp.ne.s32.totalorder %v1860_v11, 0  ;;  %v11896_v25 = vld [vmem:[#allocation2 + $0x20] sm:$0xff] }
 0x2bd   : > { %v1316_v23 = vpop.permute.xlu0 %1315  ;;  %vm4736_vm7 = vcmp.ne.s16.totalorder %v4217_v3, 0  ;;  %vm3749_vm15 = vmpackc.low %vm13310_vm10, %vm13310_vm10  ;;  %v13349_v3 = vsel %vm4738_vm12, %v13128_v33, 0 }
 0x2be   : > { %1321 = vst.msk [vmem:[#allocation2 + $0x1c8] sm:$0xff] %vm308_vm1, %v1316_v23  ;;  %v1350_v61 = vpop.permute.xlu1 %1349  ;;  %v4238_v23 = vshll.u32 %v11399_v50, 16  ;;  %19404 = vst [vmem:[#allocation27_spill] sm:$0xff] %v13349_v3 }
 0x2bf   : > { %1354 = vst.msk [vmem:[#allocation2 + $0x1e0] sm:$0xff] %vm308_vm1, %v1350_v61  ;;  %v4254_v61 = vshll.u32 %v13241_v35, 16  ;;  %v3881_v35 = vsel %vm3745_vm8, 65537, %v19380_v60 }
 0x2c0   : > { %v4240_v24 = vrot.slane %v4238_v23, 1 }
 0x2c1   : > { %v1348_v26 = vpop.permute.xlu0 %1347  ;;  %v4256_v58 = vrot.slane %v4254_v61, 1  ;;  %v11897_v61 = vld [vmem:[#allocation2 + $0x18] sm:$0xff] }
 0x2c2   : > { %1353 = vst.msk [vmem:[#allocation2 + $0x1d8] sm:$0xff] %vm308_vm1, %v1348_v26  ;;  %v1390_v42 = vpop.permute.xlu1 %1389  ;;  %v4241_v56 = vsel %vm4189_vm2, %v13237_v22, %v4240_v24  ;;  %v4244_v49 = vor.u32 %v4242_v48, %v4240_v24  ;;  %v3885_v24 = vsel %vm3749_vm15, 65537, %v19380_v60  ;;  %v4273_v48 = vsel %vm4189_vm2, %v13237_v22, %v4272_v13 }
 0x2c3   : > { %1394 = vst.msk [vmem:[#allocation2 + $0x1f0] sm:$0xff] %vm308_vm1, %v1390_v42  ;;  %v4257_v50 = vsel %vm4189_vm2, %v13237_v22, %v4256_v58  ;;  %vm4739_vm11 = vcmp.ne.s16.totalorder %v4241_v56, 0  ;;  %v4274_v42 = vshrl.u32 %v13279_v39, 16 }
 0x2c4   : > { %v4249_v34 = vsel %vm4189_vm2, %v4244_v49, %v13228_v14 }
 0x2c5   : > { %v1388_v15 = vpop.permute.xlu0 %1387 }
 0x2c6   : > { %1393 = vst.msk [vmem:[#allocation2 + $0x1e8] sm:$0xff] %vm308_vm1, %v1388_v15  ;;  %v3873_v15 = vsel %vm3737_vm14, 65537, %v19380_v60  ;;  %vm4741_vm14 = vcmp.ne.s16.totalorder %v4257_v50, 0 }
 0x2c7   : > { %v13287_v47 = vcombine.low %v3873_v15, %v19383_v7  ;;  %v11898_v15 = vld [vmem:[#allocation2 + $0x30] sm:$0xff]  ;;  %v13360_v33 = vsel %vm4741_vm14, %v11899_v53, 0 }
 0x2c8   : > { %19405 = vst [vmem:[#allocation60_spill] sm:$0xff] %v13360_v33 }
 0x2c9   : > { %v1424_v32 = vpop.permute.xlu0 %1423  ;;  %v4290_v55 = vshrl.u32 %v13287_v47, 16 }
 0x2ca   : > { %1429 = vst.msk [vmem:[#allocation2 + $0x1f8] sm:$0xff] %vm308_vm1, %v1424_v32 }
 0x2cd   : > { %v1440_v30 = vpop.permute.xlu0 %1439  ;;  %v1426_v27 = vpop.permute.xlu1 %1425 }
 0x2ce   : > { %1430 = vst.msk [vmem:[#allocation2 + $0x200] sm:$0xff] %vm308_vm1, %v1426_v27  ;;  %v1451_v5 = vadd.f32 %v1440_v30, %v1431_v52  ;;  %v1508_v30 = vadd.s32 320, %v19379_v59  ;;  %v3877_v27 = vsel %vm3741_vm4, 65537, %v19380_v60  ;;  %v4286_v52 = vshll.u32 %v13287_v47, 16 }
 0x2cf   : > { %v13318_v51 = vcombine.low %v3877_v27, %v19383_v7  ;;  %vm4740_vm4 = vcmp.ne.s16.totalorder %v4249_v34, 0  ;;  %v4276_v47 = vor.u32 %v4274_v42, %v4272_v13  ;;  %v11900_v27 = vld [vmem:[#allocation2 + $0x38] sm:$0xff] }
 0x2d0   : > { %v1888_v23 = vand.u32 31, %v1508_v30  ;;  %v4288_v43 = vrot.slane %v4286_v52, 1  ;;  %v13371_v30 = vcombine.low %v3885_v24, %v19383_v7  ;;  %v13373_v56 = vsel %vm4740_vm4, %v11900_v27, 0  ;;  %v3247_v42 = vld [vmem:[#allocation2 + $0x58] sm:$0xff] }
 0x2d1   : > { %v1442_v1 = vpop.permute.xlu1 %1441  ;;  %v1444_v26 = vpop.permute.xlu0 %1443  ;;  %v4302_v38 = vshll.u32 %v13318_v51, 16  ;;  %19406 = vst [vmem:[#allocation53_spill] sm:$0xff] %v13373_v56  ;;  %v4306_v50 = vshrl.u32 %v13318_v51, 16  ;;  %v1524_v51 = vadd.s32 448, %v19379_v59 }
 0x2d2   : > { %v1452_v2 = vadd.f32 %v1442_v1, %v1432_v62  ;;  %v1453_v32 = vadd.f32 %v1444_v26, %v1433_v9  ;;  %v13315_v1 = vsel %vm4737_vm6, %v11896_v25, 0  ;;  %v1512_v9 = vadd.s32 352, %v19379_v59 }
 0x2d3   : > { %19399 = vst [vmem:[#allocation47_spill] sm:$0xff] %v13315_v1  ;;  %v4260_v26 = vor.u32 %v4258_v63, %v4256_v58  ;;  %vm13341_vm3 = vcmp.ne.s32.totalorder %v1888_v23, 0  ;;  %v4289_v39 = vsel %vm4189_vm2, %v13237_v22, %v4288_v43  ;;  %v4304_v29 = vrot.slane %v4302_v38, 1 }
 0x2d4   : > { %v1455_v0 = vpack.c.bf16 %v1452_v2, %v1451_v5  ;;  %v13321_v5 = vsel %vm4736_vm7, %v11897_v61, 0  ;;  %v1516_v2 = vadd.s32 384, %v19379_v59  ;;  %v1916_v58 = vand.u32 31, %v1512_v9  ;;  %vm3753_vm5 = vmpackc.low %vm13341_vm3, %vm13341_vm3 }
 0x2d5   : > { %v1446_v20 = vpop.permute.xlu1 %1445  ;;  %19400 = vst [vmem:[#allocation56_spill] sm:$0xff] %v13321_v5  ;;  %v4265_v54 = vsel %vm4189_vm2, %v4260_v26, %v13228_v14  ;;  %v4292_v11 = vor.u32 %v4290_v55, %v4288_v43  ;;  %vm4743_vm6 = vcmp.ne.s16.totalorder %v4273_v48, 0  ;;  %v3889_v63 = vsel %vm3753_vm5, 65537, %v19380_v60  ;;  %v3248_v43 = vld [vmem:[#allocation2 + $0x60] sm:$0xff] }
 0x2d6   : > { %v1454_v46 = vadd.f32 %v1446_v20, %v1434_v16  ;;  %1459 = vrot.lane.b32.xlu0 %v1455_v0, %s12106_s11  ;;  %v13339_v0 = vcombine.low %v3881_v35, %v19383_v7  ;;  %v13346_v20 = vsel %vm4739_vm11, %v11898_v15, 0  ;;  %vm13376_vm7 = vcmp.ne.s32.totalorder %v1916_v58, 0 }
 0x2d7   : > { %19403 = vst [vmem:[#allocation55_spill] sm:$0xff] %v13346_v20  ;;  %vm4742_vm8 = vcmp.ne.s16.totalorder %v4265_v54, 0  ;;  %vm4745_vm11 = vcmp.ne.s16.totalorder %v4289_v39, 0  ;;  %v4281_v25 = vsel %vm4189_vm2, %v4276_v47, %v13228_v14  ;;  %v4305_v23 = vsel %vm4189_vm2, %v13237_v22, %v4304_v29  ;;  %vm3757_vm12 = vmpackc.low %vm13376_vm7, %vm13376_vm7  ;;  %v3250_v39 = vld [vmem:[#allocation2 + $0x70] sm:$0xff]  ;;  %v3249_v47 = vld [vmem:[#allocation2 + $0x68] sm:$0xff] }
 0x2d8   : > { %v1456_v6 = vpack.c.bf16 %v1454_v46, %v1453_v32  ;;  %v1944_v32 = vand.u32 31, %v1516_v2  ;;  %v1520_v46 = vadd.s32 416, %v19379_v59  ;;  %v4297_v61 = vsel %vm4189_vm2, %v4292_v11, %v13228_v14 }
 0x2d9   : > { %v4334_v9 = vshll.u32 %v13371_v30, 16  ;;  %v13401_v13 = vsel %vm4743_vm6, %v3246_v31, 0  ;;  %v13403_v2 = vsel %vm4742_vm8, %v3245_v8, 0  ;;  %v4308_v34 = vor.u32 %v4306_v50, %v4304_v29 }
 0x2da   : > { %6503 = vrot.lane.b32.xlu0 %v13284_v44, %s12107_s12  ;;  %1461 = vrot.lane.b32.xlu1 %v1456_v6, %s12106_s11  ;;  %v4318_v6 = vshll.u32 %v13339_v0, 16  ;;  %vm13385_vm10 = vcmp.ne.s32.totalorder %v1944_v32, 0  ;;  %v1972_v62 = vand.u32 31, %v1520_v46  ;;  %19411 = vst [vmem:[#allocation59_spill] sm:$0xff] %v13401_v13  ;;  %19412 = vst [vmem:[#allocation24_spill] sm:$0xff] %v13403_v2  ;;  %v13406_v26 = vcombine.low %v3889_v63, %v19383_v7 }
 0x2db   : > { %vm3761_vm14 = vmpackc.low %vm13385_vm10, %vm13385_vm10  ;;  %vm4744_vm15 = vcmp.ne.s16.totalorder %v4281_v25, 0  ;;  %v4322_v38 = vshrl.u32 %v13339_v0, 16  ;;  %v1528_v16 = vadd.s32 480, %v19379_v59  ;;  %vm4747_vm4 = vcmp.ne.s16.totalorder %v4305_v23, 0  ;;  %v3252_v25 = vld [vmem:[#allocation2 + $0x80] sm:$0xff] }
 0x2dc   : > { %v4320_v35 = vrot.slane %v4318_v6, 1  ;;  %vm13416_vm3 = vcmp.ne.s32.totalorder %v1972_v62, 0  ;;  %v3893_v15 = vsel %vm3757_vm12, 65537, %v19380_v60  ;;  %v2000_v24 = vand.u32 31, %v1524_v51  ;;  %v3251_v51 = vld [vmem:[#allocation2 + $0x78] sm:$0xff] }
 0x2dd   : > { %vm4746_vm5 = vcmp.ne.s16.totalorder %v4297_v61, 0  ;;  %v4336_v48 = vrot.slane %v4334_v9, 1  ;;  %v3897_v32 = vsel %vm3761_vm14, 65537, %v19380_v60  ;;  %v13426_v46 = vsel %vm4745_vm11, %v3248_v43, 0  ;;  %vm3765_vm6 = vmpackc.low %vm13416_vm3, %vm13416_vm3 }
 0x2de   : > { %6507 = vrot.lane.b32.xlu0 %v13315_v1, %s12107_s12  ;;  %6505 = vrot.lane.b32.xlu1 %v13321_v5, %s12107_s12  ;;  %v4321_v58 = vsel %vm4189_vm2, %v13237_v22, %v4320_v35  ;;  %19415 = vst [vmem:[#allocation52_spill] sm:$0xff] %v13426_v46  ;;  %v13428_v0 = vsel %vm4744_vm15, %v3247_v42, 0  ;;  %v4313_v53 = vsel %vm4189_vm2, %v4308_v34, %v13228_v14  ;;  %v4350_v54 = vshll.u32 %v13406_v26, 16 }
 0x2df   : > { %19416 = vst [vmem:[#allocation26_spill] sm:$0xff] %v13428_v0  ;;  %v4324_v29 = vor.u32 %v4322_v38, %v4320_v35  ;;  %v4338_v11 = vshrl.u32 %v13371_v30, 16  ;;  %v11415_v6 = vcombine.low %v3893_v15, %v19383_v7  ;;  %v2028_v27 = vand.u32 31, %v1528_v16 }
 0x2e0   : > { %v13443_v50 = vcombine.low %v3897_v32, %v19383_v7  ;;  %vm13445_vm7 = vcmp.ne.s32.totalorder %v2000_v24, 0  ;;  %vm4749_vm8 = vcmp.ne.s16.totalorder %v4321_v58, 0  ;;  %vm4748_vm10 = vcmp.ne.s16.totalorder %v4313_v53, 0  ;;  %v3253_v58 = vld [vmem:[#allocation2 + $0x88] sm:$0xff] }
 0x2e1   : > { %v4337_v31 = vsel %vm4189_vm2, %v13237_v22, %v4336_v48  ;;  %v3901_v8 = vsel %vm3765_vm6, 65537, %v19380_v60  ;;  %v13453_v63 = vsel %vm4747_vm4, %v3250_v39, 0  ;;  %v13456_v30 = vsel %vm4746_vm5, %v3249_v47, 0  ;;  %vm3769_vm11 = vmpackc.low %vm13445_vm7, %vm13445_vm7 }
 0x2e2   : > { %6511 = vrot.lane.b32.xlu0 %v13346_v20, %s12107_s12  ;;  %6509 = vrot.lane.b32.xlu1 %v13349_v3, %s12107_s12  ;;  %19419 = vst [vmem:[#allocation62_spill] sm:$0xff] %v13453_v63  ;;  %19420 = vst [vmem:[#allocation48_spill] sm:$0xff] %v13456_v30  ;;  %v4352_v52 = vrot.slane %v4350_v54, 1  ;;  %v1532_v62 = vadd.s32 512, %v19379_v59  ;;  %v4329_v35 = vsel %vm4189_vm2, %v4324_v29, %v13228_v14  ;;  %v4366_v9 = vshll.u32 %v11415_v6, 16 }
 0x2e3   : > { %v4340_v23 = vor.u32 %v4338_v11, %v4336_v48  ;;  %vm13468_vm12 = vcmp.ne.s32.totalorder %v2028_v27, 0  ;;  %v4354_v34 = vshrl.u32 %v13406_v26, 16  ;;  %v4382_v43 = vshll.u32 %v13443_v50, 16  ;;  %v3254_v48 = vld [vmem:[#allocation2 + $0x90] sm:$0xff] }
 0x2e4   : > { %v13475_v42 = vcombine.low %v3901_v8, %v19383_v7  ;;  %v1536_v38 = vadd.s32 544, %v19379_v59  ;;  %vm4751_vm14 = vcmp.ne.s16.totalorder %v4337_v31, 0  ;;  %v4370_v55 = vshrl.u32 %v11415_v6, 16  ;;  %vm3773_vm15 = vmpackc.low %vm13468_vm12, %vm13468_vm12 }
 0x2e5   : > { %v13479_v16 = vsel %vm4749_vm8, %v3252_v25, 0  ;;  %v13482_v15 = vsel %vm4748_vm10, %v3251_v51, 0  ;;  %v3905_v24 = vsel %vm3769_vm11, 65537, %v19380_v60  ;;  %v2056_v26 = vand.u32 31, %v1532_v62  ;;  %v3256_v51 = vld [vmem:[#allocation2 + $0xa0] sm:$0xff] }
 0x2e6   : > { %6515 = vrot.lane.b32.xlu0 %v13360_v33, %s12107_s12  ;;  %6513 = vrot.lane.b32.xlu1 %v13373_v56, %s12107_s12  ;;  %19423 = vst [vmem:[#allocation54_spill] sm:$0xff] %v13479_v16  ;;  %19424 = vst [vmem:[#allocation22_spill] sm:$0xff] %v13482_v15  ;;  %vm4750_vm3 = vcmp.ne.s16.totalorder %v4329_v35, 0  ;;  %v4353_v32 = vsel %vm4189_vm2, %v13237_v22, %v4352_v52  ;;  %v4345_v53 = vsel %vm4189_vm2, %v4340_v23, %v13228_v14  ;;  %v3255_v35 = vld [vmem:[#allocation2 + $0x98] sm:$0xff] }
 0x2e7   : > { %v4368_v54 = vrot.slane %v4366_v9, 1  ;;  %v4356_v39 = vor.u32 %v4354_v34, %v4352_v52  ;;  %v4384_v47 = vrot.slane %v4382_v43, 1  ;;  %v4398_v29 = vshll.u32 %v13475_v42, 16 }
 0x2e8   : > { %v2084_v11 = vand.u32 31, %v1536_v38  ;;  %v4386_v27 = vshrl.u32 %v13443_v50, 16  ;;  %v13499_v49 = vcombine.low %v3905_v24, %v19383_v7  ;;  %v3909_v8 = vsel %vm3773_vm15, 65537, %v19380_v60 }
 0x2e9   : > { %v4372_v6 = vor.u32 %v4370_v55, %v4368_v54  ;;  %v13508_v62 = vsel %vm4751_vm14, %v3254_v48, 0  ;;  %v13510_v52 = vsel %vm4750_vm3, %v3253_v58, 0  ;;  %vm13512_vm4 = vcmp.ne.s32.totalorder %v2056_v26, 0 }
 0x2ea   : > { %6519 = vrot.lane.b32.xlu0 %v13401_v13, %s12107_s12  ;;  %6517 = vrot.lane.b32.xlu1 %v13403_v2, %s12107_s12  ;;  %19425 = vst [vmem:[#allocation57_spill] sm:$0xff] %v13508_v62  ;;  %19426 = vst [vmem:[#allocation46_spill] sm:$0xff] %v13510_v52  ;;  %v1540_v50 = vadd.s32 576, %v19379_v59  ;;  %vm4753_vm5 = vcmp.ne.s16.totalorder %v4353_v32, 0  ;;  %vm4752_vm6 = vcmp.ne.s16.totalorder %v4345_v53, 0  ;;  %v4369_v31 = vsel %vm4189_vm2, %v13237_v22, %v4368_v54  ;;  %v3258_v53 = vld [vmem:[#allocation2 + $0xb0] sm:$0xff] }
 0x2eb   : > { %v1544_v23 = vadd.s32 608, %v19379_v59  ;;  %v4361_v9 = vsel %vm4189_vm2, %v4356_v39, %v13228_v14  ;;  %v4385_v61 = vsel %vm4189_vm2, %v13237_v22, %v4384_v47  ;;  %v4400_v34 = vrot.slane %v4398_v29, 1  ;;  %vm3777_vm8 = vmpackc.low %vm13512_vm4, %vm13512_vm4  ;;  %v3257_v54 = vld [vmem:[#allocation2 + $0xa8] sm:$0xff] }
 0x2ec   : > { %vm13528_vm7 = vcmp.ne.s32.totalorder %v2084_v11, 0  ;;  %v4377_v38 = vsel %vm4189_vm2, %v4372_v6, %v13228_v14  ;;  %v4388_v55 = vor.u32 %v4386_v27, %v4384_v47  ;;  %v4414_v24 = vshll.u32 %v13499_v49, 16 }
 0x2ed   : > { %v13536_v26 = vcombine.low %v3909_v8, %v19383_v7  ;;  %v13541_v48 = vsel %vm4753_vm5, %v3256_v51, 0  ;;  %v13543_v58 = vsel %vm4752_vm6, %v3255_v35, 0  ;;  %v2112_v32 = vand.u32 31, %v1540_v50  ;;  %vm3781_vm12 = vmpackc.low %vm13528_vm7, %vm13528_vm7  ;;  %v3264_v35 = vld [vmem:[#allocation2 + $0xe0] sm:$0xff] }
 0x2ee   : > { %6523 = vrot.lane.b32.xlu0 %v13426_v46, %s12107_s12  ;;  %6521 = vrot.lane.b32.xlu1 %v13428_v0, %s12107_s12  ;;  %19431 = vst [vmem:[#allocation49_spill] sm:$0xff] %v13541_v48  ;;  %19432 = vst [vmem:[#allocation23_spill] sm:$0xff] %v13543_v58  ;;  %vm4755_vm10 = vcmp.ne.s16.totalorder %v4369_v31, 0  ;;  %vm4754_vm11 = vcmp.ne.s16.totalorder %v4361_v9, 0  ;;  %v4402_v39 = vshrl.u32 %v13475_v42, 16  ;;  %v2140_v47 = vand.u32 31, %v1544_v23 }
 0x2ef   : > { %vm4757_vm14 = vcmp.ne.s16.totalorder %v4385_v61, 0  ;;  %vm4756_vm15 = vcmp.ne.s16.totalorder %v4377_v38, 0  ;;  %v3913_v29 = vsel %vm3777_vm8, 65537, %v19380_v60  ;;  %v1548_v11 = vadd.s32 640, %v19379_v59  ;;  %v3260_v31 = vld [vmem:[#allocation2 + $0xc0] sm:$0xff]  ;;  %v3259_v23 = vld [vmem:[#allocation2 + $0xb8] sm:$0xff] }
 0x2f0   : > { %v4401_v6 = vsel %vm4189_vm2, %v13237_v22, %v4400_v34  ;;  %v4393_v27 = vsel %vm4189_vm2, %v4388_v55, %v13228_v14  ;;  %v4416_v8 = vrot.slane %v4414_v24, 1  ;;  %v4430_v42 = vshll.u32 %v13536_v26, 16  ;;  %v3261_v61 = vld [vmem:[#allocation2 + $0xc8] sm:$0xff] }
 0x2f1   : > { %v13560_v25 = vsel %vm4755_vm10, %v3258_v53, 0  ;;  %v13562_v50 = vsel %vm4754_vm11, %v3257_v54, 0  ;;  %v3917_v51 = vsel %vm3781_vm12, 65537, %v19380_v60  ;;  %vm13565_vm3 = vcmp.ne.s32.totalorder %v2112_v32, 0 }
 0x2f2   : > { %6527 = vrot.lane.b32.xlu0 %v13453_v63, %s12107_s12  ;;  %6525 = vrot.lane.b32.xlu1 %v13456_v30, %s12107_s12  ;;  %19433 = vst [vmem:[#allocation66_spill] sm:$0xff] %v13560_v25  ;;  %19434 = vst [vmem:[#allocation20_spill] sm:$0xff] %v13562_v50  ;;  %v4404_v9 = vor.u32 %v4402_v39, %v4400_v34  ;;  %v11425_v43 = vcombine.low %v3913_v29, %v19383_v7  ;;  %vm13574_vm4 = vcmp.ne.s32.totalorder %v2140_v47, 0 }
 0x2f3   : > { %v1552_v24 = vadd.s32 672, %v19379_v59  ;;  %v4418_v32 = vshrl.u32 %v13499_v49, 16  ;;  %v2168_v53 = vand.u32 31, %v1548_v11  ;;  %vm4759_vm5 = vcmp.ne.s16.totalorder %v4401_v6, 0  ;;  %vm3785_vm6 = vmpackc.low %vm13565_vm3, %vm13565_vm3  ;;  %v3262_v49 = vld [vmem:[#allocation2 + $0xd0] sm:$0xff] }
 0x2f4   : > { %v13581_v54 = vcombine.low %v3917_v51, %v19383_v7  ;;  %v13587_v34 = vsel %vm4757_vm14, %v3260_v31, 0  ;;  %v13590_v39 = vsel %vm4756_vm15, %v3259_v23, 0  ;;  %vm4758_vm7 = vcmp.ne.s16.totalorder %v4393_v27, 0  ;;  %vm3789_vm8 = vmpackc.low %vm13574_vm4, %vm13574_vm4  ;;  %v3268_v27 = vld [vmem:[#allocation2 + $0x100] sm:$0xff] }
 0x2f5   : > { %19439 = vst [vmem:[#allocation61_spill] sm:$0xff] %v13587_v34  ;;  %19440 = vst [vmem:[#allocation65_spill] sm:$0xff] %v13590_v39  ;;  %v4417_v47 = vsel %vm4189_vm2, %v13237_v22, %v4416_v8  ;;  %v4409_v38 = vsel %vm4189_vm2, %v4404_v9, %v13228_v14  ;;  %v4432_v29 = vrot.slane %v4430_v42, 1  ;;  %v4446_v11 = vshll.u32 %v11425_v43, 16 }
 0x2f6   : > { %6531 = vrot.lane.b32.xlu0 %v13479_v16, %s12107_s12  ;;  %6529 = vrot.lane.b32.xlu1 %v13482_v15, %s12107_s12  ;;  %v2196_v51 = vand.u32 31, %v1552_v24  ;;  %v4420_v31 = vor.u32 %v4418_v32, %v4416_v8  ;;  %v4434_v23 = vshrl.u32 %v13536_v26, 16  ;;  %v3921_v55 = vsel %vm3785_vm6, 65537, %v19380_v60  ;;  %v3263_v24 = vld [vmem:[#allocation2 + $0xd8] sm:$0xff] }
 0x2f7   : > { %vm13610_vm10 = vcmp.ne.s32.totalorder %v2168_v53, 0  ;;  %v4462_v28 = vshll.u32 %v13581_v54, 16  ;;  %v3925_v42 = vsel %vm3789_vm8, 65537, %v19380_v60  ;;  %v1556_v9 = vadd.s32 704, %v19379_v59 }
 0x2f8   : > { %v13618_v8 = vsel %vm4759_vm5, %v3262_v49, 0  ;;  %v13621_v26 = vsel %vm4758_vm7, %v3261_v61, 0  ;;  %vm4761_vm11 = vcmp.ne.s16.totalorder %v4417_v47, 0  ;;  %vm4760_vm12 = vcmp.ne.s16.totalorder %v4409_v38, 0  ;;  %vm3793_vm14 = vmpackc.low %vm13610_vm10, %vm13610_vm10 }
 0x2f9   : > { %19443 = vst [vmem:[#allocation64_spill] sm:$0xff] %v13618_v8  ;;  %19444 = vst [vmem:[#allocation21_spill] sm:$0xff] %v13621_v26  ;;  %v4433_v32 = vsel %vm4189_vm2, %v13237_v22, %v4432_v29  ;;  %v4448_v53 = vrot.slane %v4446_v11, 1  ;;  %v13630_v6 = vcombine.low %v3921_v55, %v19383_v7  ;;  %vm13635_vm15 = vcmp.ne.s32.totalorder %v2196_v51, 0 }
 0x2fa   : > { %6535 = vrot.lane.b32.xlu0 %v13508_v62, %s12107_s12  ;;  %6533 = vrot.lane.b32.xlu1 %v13510_v52, %s12107_s12  ;;  %v4425_v49 = vsel %vm4189_vm2, %v4420_v31, %v13228_v14  ;;  %v4436_v61 = vor.u32 %v4434_v23, %v4432_v29  ;;  %v4450_v5 = vshrl.u32 %v11425_v43, 16  ;;  %v13642_v44 = vcombine.low %v3925_v42, %v19383_v7  ;;  %vm3797_vm3 = vmpackc.low %vm13635_vm15, %vm13635_vm15  ;;  %v3265_v43 = vld [vmem:[#allocation2 + $0xe8] sm:$0xff] }
 0x2fb   : > { %v4464_v11 = vrot.slane %v4462_v28, 1  ;;  %v2224_v36 = vand.u32 31, %v1556_v9  ;;  %v13645_v55 = vsel %vm4761_vm11, %v3264_v35, 0  ;;  %v13648_v21 = vsel %vm4760_vm12, %v3263_v24, 0  ;;  %v3266_v28 = vld [vmem:[#allocation2 + $0xf0] sm:$0xff] }
 0x2fc   : > { %19447 = vst [vmem:[#allocation67_spill] sm:$0xff] %v13645_v55  ;;  %19448 = vst [vmem:[#allocation43_spill] sm:$0xff] %v13648_v21  ;;  %v3929_v51 = vsel %vm3793_vm14, 65537, %v19380_v60  ;;  %v1560_v29 = vadd.s32 736, %v19379_v59  ;;  %vm4763_vm4 = vcmp.ne.s16.totalorder %v4433_v32, 0  ;;  %vm4762_vm5 = vcmp.ne.s16.totalorder %v4425_v49, 0 }
 0x2fd   : > { %v4449_v47 = vsel %vm4189_vm2, %v13237_v22, %v4448_v53  ;;  %v4478_v38 = vshll.u32 %v13630_v6, 16  ;;  %v4441_v31 = vsel %vm4189_vm2, %v4436_v61, %v13228_v14  ;;  %v4452_v23 = vor.u32 %v4450_v5, %v4448_v53 }
 0x2fe   : > { %6539 = vrot.lane.b32.xlu0 %v13541_v48, %s12107_s12  ;;  %6537 = vrot.lane.b32.xlu1 %v13543_v58, %s12107_s12  ;;  %v4466_v42 = vshrl.u32 %v13581_v54, 16  ;;  %v4494_v9 = vshll.u32 %v13642_v44, 16  ;;  %v4465_v35 = vsel %vm4189_vm2, %v13237_v22, %v4464_v11  ;;  %v13669_v24 = vcombine.low %v3929_v51, %v19383_v7  ;;  %v3267_v51 = vld [vmem:[#allocation2 + $0xf8] sm:$0xff] }
 0x2ff   : > { %v3933_v32 = vsel %vm3797_vm3, 65537, %v19380_v60  ;;  %vm13677_vm6 = vcmp.ne.s32.totalorder %v2224_v36, 0  ;;  %v13681_v5 = vsel %vm4763_vm4, %v3266_v28, 0  ;;  %v13683_v54 = vsel %vm4762_vm5, %v3265_v43, 0 }
 0x300   : > { %19451 = vst [vmem:[#allocation45_spill] sm:$0xff] %v13681_v5  ;;  %19452 = vst [vmem:[#allocation19_spill] sm:$0xff] %v13683_v54  ;;  %v2252_v53 = vand.u32 31, %v1560_v29  ;;  %v1564_v61 = vadd.s32 768, %v19379_v59  ;;  %vm4765_vm7 = vcmp.ne.s16.totalorder %v4449_v47, 0  ;;  %vm4764_vm8 = vcmp.ne.s16.totalorder %v4441_v31, 0 }
 0x301   : > { %v4480_v36 = vrot.slane %v4478_v38, 1  ;;  %v4457_v28 = vsel %vm4189_vm2, %v4452_v23, %v13228_v14  ;;  %v4468_v43 = vor.u32 %v4466_v42, %v4464_v11  ;;  %v4496_v29 = vrot.slane %v4494_v9, 1  ;;  %vm3801_vm10 = vmpackc.low %vm13677_vm6, %vm13677_vm6  ;;  %v3270_v23 = vld [vmem:[#allocation2 + $0x110] sm:$0xff] }
 0x302   : > { %6543 = vrot.lane.b32.xlu0 %v13560_v25, %s12107_s12  ;;  %6541 = vrot.lane.b32.xlu1 %v13562_v50, %s12107_s12  ;;  %v4482_v57 = vshrl.u32 %v13630_v6, 16  ;;  %vm4767_vm11 = vcmp.ne.s16.totalorder %v4465_v35, 0  ;;  %v4510_v41 = vshll.u32 %v13669_v24, 16  ;;  %v4498_v47 = vshrl.u32 %v13642_v44, 16  ;;  %v3269_v44 = vld [vmem:[#allocation2 + $0x108] sm:$0xff]  ;;  %v3271_v35 = vld [vmem:[#allocation2 + $0x118] sm:$0xff] }
 0x303   : > { %v13700_v38 = vcombine.low %v3933_v32, %v19383_v7  ;;  %v13702_v31 = vsel %vm4765_vm7, %v3268_v27, 0  ;;  %v13704_v10 = vsel %vm4764_vm8, %v3267_v51, 0  ;;  %vm13706_vm12 = vcmp.ne.s32.totalorder %v2252_v53, 0 }
 0x304   : > { %19453 = vst [vmem:[#allocation63_spill] sm:$0xff] %v13702_v31  ;;  %19454 = vst [vmem:[#allocation42_spill] sm:$0xff] %v13704_v10  ;;  %v2280_v6 = vand.u32 31, %v1564_v61  ;;  %vm4766_vm14 = vcmp.ne.s16.totalorder %v4457_v28, 0  ;;  %v3937_v42 = vsel %vm3801_vm10, 65537, %v19380_v60  ;;  %v2308_v9 = vand.u32 31, %v1568_v40 }
 0x305   : > { %v1572_v32 = vadd.s32 832, %v19379_v59  ;;  %v4481_v49 = vsel %vm4189_vm2, %v13237_v22, %v4480_v36  ;;  %v4473_v53 = vsel %vm4189_vm2, %v4468_v43, %v13228_v14  ;;  %v4497_v61 = vsel %vm4189_vm2, %v13237_v22, %v4496_v29  ;;  %vm3805_vm15 = vmpackc.low %vm13706_vm12, %vm13706_vm12 }
 0x306   : > { %6547 = vrot.lane.b32.xlu0 %v13587_v34, %s12107_s12  ;;  %6545 = vrot.lane.b32.xlu1 %v13590_v39, %s12107_s12  ;;  %v4484_v27 = vor.u32 %v4482_v57, %v4480_v36  ;;  %v4512_v51 = vrot.slane %v4510_v41, 1  ;;  %v4500_v12 = vor.u32 %v4498_v47, %v4496_v29  ;;  %v4526_v4 = vshll.u32 %v13700_v38, 16  ;;  %v3272_v41 = vld [vmem:[#allocation2 + $0x120] sm:$0xff] }
 0x307   : > { %v4514_v28 = vshrl.u32 %v13669_v24, 16  ;;  %v13728_v40 = vsel %vm4767_vm11, %v3270_v23, 0  ;;  %v13730_v37 = vsel %vm4766_vm14, %v3269_v44, 0  ;;  %v13733_v43 = vcombine.low %v3937_v42, %v19383_v7 }
 0x308   : > { %19457 = vst [vmem:[#allocation44_spill] sm:$0xff] %v13728_v40  ;;  %19458 = vst [vmem:[#allocation70_spill] sm:$0xff] %v13730_v37  ;;  %vm13735_vm3 = vcmp.ne.s32.totalorder %v2280_v6, 0  ;;  %vm4769_vm4 = vcmp.ne.s16.totalorder %v4481_v49, 0  ;;  %vm4768_vm5 = vcmp.ne.s16.totalorder %v4473_v53, 0  ;;  %vm13743_vm6 = vcmp.ne.s32.totalorder %v2308_v9, 0 }
 0x309   : > { %v2336_v36 = vand.u32 31, %v1572_v32  ;;  %v4489_v29 = vsel %vm4189_vm2, %v4484_v27, %v13228_v14  ;;  %v3941_v47 = vsel %vm3805_vm15, 65537, %v19380_v60  ;;  %v1576_v11 = vadd.s32 864, %v19379_v59  ;;  %vm3809_vm8 = vmpackc.low %vm13735_vm3, %vm13735_vm3 }
 0x30a   : > { %6551 = vrot.lane.b32.xlu0 %v13618_v8, %s12107_s12  ;;  %6549 = vrot.lane.b32.xlu1 %v13621_v26, %s12107_s12  ;;  %vm4771_vm7 = vcmp.ne.s16.totalorder %v4497_v61, 0  ;;  %v4513_v6 = vsel %vm4189_vm2, %v13237_v22, %v4512_v51  ;;  %v4505_v23 = vsel %vm4189_vm2, %v4500_v12, %v13228_v14  ;;  %v4528_v44 = vrot.slane %v4526_v4, 1  ;;  %vm3813_vm10 = vmpackc.low %vm13743_vm6, %vm13743_vm6  ;;  %v3274_v4 = vld [vmem:[#allocation2 + $0x130] sm:$0xff]  ;;  %v3273_v12 = vld [vmem:[#allocation2 + $0x128] sm:$0xff] }
 0x30b   : > { %v13758_v42 = vsel %vm4769_vm4, %v3272_v41, 0  ;;  %v13760_v9 = vsel %vm4768_vm5, %v3271_v35, 0  ;;  %v4516_v32 = vor.u32 %v4514_v28, %v4512_v51  ;;  %v4542_v49 = vshll.u32 %v13733_v43, 16  ;;  %v3275_v61 = vld [vmem:[#allocation2 + $0x138] sm:$0xff] }
 0x30c   : > { %19463 = vst [vmem:[#allocation69_spill] sm:$0xff] %v13758_v42  ;;  %19464 = vst [vmem:[#allocation18_spill] sm:$0xff] %v13760_v9  ;;  %vm4770_vm11 = vcmp.ne.s16.totalorder %v4489_v29, 0  ;;  %v11439_v53 = vcombine.low %v3941_v47, %v19383_v7  ;;  %vm13771_vm12 = vcmp.ne.s32.totalorder %v2336_v36, 0  ;;  %v1580_v51 = vadd.s32 896, %v19379_v59 }
 0x30d   : > { %v4530_v28 = vshrl.u32 %v13700_v38, 16  ;;  %v3945_v57 = vsel %vm3809_vm8, 65537, %v19380_v60  ;;  %v2364_v41 = vand.u32 31, %v1576_v11  ;;  %vm4773_vm14 = vcmp.ne.s16.totalorder %v4513_v6, 0  ;;  %vm3817_vm3 = vmpackc.low %vm13771_vm12, %vm13771_vm12  ;;  %v3276_v38 = vld [vmem:[#allocation2 + $0x140] sm:$0xff] }
 0x30e   : > { %6555 = vrot.lane.b32.xlu0 %v13645_v55, %s12107_s12  ;;  %6553 = vrot.lane.b32.xlu1 %v13648_v21, %s12107_s12  ;;  %vm4772_vm15 = vcmp.ne.s16.totalorder %v4505_v23, 0  ;;  %v4529_v35 = vsel %vm4189_vm2, %v13237_v22, %v4528_v44  ;;  %v3949_v24 = vsel %vm3813_vm10, 65537, %v19380_v60  ;;  %v13782_v29 = vsel %vm4771_vm7, %v3274_v4, 0 }
 0x30f   : > { %19467 = vst [vmem:[#allocation76_spill] sm:$0xff] %v13782_v29  ;;  %v13784_v36 = vsel %vm4770_vm11, %v3273_v12, 0  ;;  %v4521_v47 = vsel %vm4189_vm2, %v4516_v32, %v13228_v14  ;;  %v4544_v45 = vrot.slane %v4542_v49, 1  ;;  %v4558_v11 = vshll.u32 %v11439_v53, 16 }
 0x310   : > { %19468 = vst [vmem:[#allocation15_spill] sm:$0xff] %v13784_v36  ;;  %v4546_v4 = vshrl.u32 %v13733_v43, 16  ;;  %v11441_v12 = vcombine.low %v3945_v57, %v19383_v7  ;;  %v2392_v19 = vand.u32 31, %v1580_v51  ;;  %v4532_v32 = vor.u32 %v4530_v28, %v4528_v44  ;;  %v3278_v51 = vld [vmem:[#allocation2 + $0x150] sm:$0xff]  ;;  %v3277_v28 = vld [vmem:[#allocation2 + $0x148] sm:$0xff] }
 0x311   : > { %v11443_v49 = vcombine.low %v3949_v24, %v19383_v7  ;;  %vm13798_vm4 = vcmp.ne.s32.totalorder %v2364_v41, 0  ;;  %vm4775_vm5 = vcmp.ne.s16.totalorder %v4529_v35, 0  ;;  %v13808_v43 = vsel %vm4772_vm15, %v3275_v61, 0 }
 0x312   : > { %6559 = vrot.lane.b32.xlu0 %v13681_v5, %s12107_s12  ;;  %6557 = vrot.lane.b32.xlu1 %v13683_v54, %s12107_s12  ;;  %19472 = vst [vmem:[#allocation73_spill] sm:$0xff] %v13808_v43  ;;  %vm4774_vm6 = vcmp.ne.s16.totalorder %v4521_v47, 0  ;;  %v4545_v44 = vsel %vm4189_vm2, %v13237_v22, %v4544_v45  ;;  %v4560_v57 = vrot.slane %v4558_v11, 1  ;;  %v4548_v41 = vor.u32 %v4546_v4, %v4544_v45  ;;  %vm3821_vm7 = vmpackc.low %vm13798_vm4, %vm13798_vm4 }
 0x313   : > { %v4574_v6 = vshll.u32 %v11441_v12, 16  ;;  %vm13819_vm8 = vcmp.ne.s32.totalorder %v2392_v19, 0  ;;  %v4537_v24 = vsel %vm4189_vm2, %v4532_v32, %v13228_v14  ;;  %v4590_v61 = vshll.u32 %v11443_v49, 16 }
 0x314   : > { %vm4777_vm10 = vcmp.ne.s16.totalorder %v4545_v44, 0  ;;  %v13827_v45 = vsel %vm4775_vm5, %v3278_v51, 0  ;;  %v13830_v11 = vsel %vm4774_vm6, %v3277_v28, 0  ;;  %v3957_v19 = vsel %vm3821_vm7, 65537, %v19380_v60  ;;  %vm3825_vm11 = vmpackc.low %vm13819_vm8, %vm13819_vm8 }
 0x315   : > { %19475 = vst [vmem:[#allocation72_spill] sm:$0xff] %v13827_v45  ;;  %19476 = vst [vmem:[#allocation17_spill] sm:$0xff] %v13830_v11  ;;  %v1588_v4 = vadd.s32 960, %v19379_v59  ;;  %vm4776_vm12 = vcmp.ne.s16.totalorder %v4537_v24, 0  ;;  %v4561_v35 = vsel %vm4189_vm2, %v13237_v22, %v4560_v57  ;;  %v4576_v47 = vrot.slane %v4574_v6, 1  ;;  %v3282_v6 = vld [vmem:[#allocation2 + $0x170] sm:$0xff] }
 0x316   : > { %6563 = vrot.lane.b32.xlu0 %v13702_v31, %s12107_s12  ;;  %6561 = vrot.lane.b32.xlu1 %v13704_v10, %s12107_s12  ;;  %v4592_v27 = vrot.slane %v4590_v61, 1  ;;  %v4578_v51 = vshrl.u32 %v11441_v12, 16  ;;  %v3961_v24 = vsel %vm3825_vm11, 65537, %v19380_v60  ;;  %vm4779_vm15 = vcmp.ne.s16.totalorder %v4561_v35, 0 }
 0x317   : > { %v4577_v44 = vsel %vm4189_vm2, %v13237_v22, %v4576_v47  ;;  %v13881_v35 = vsel %vm4779_vm15, %v3282_v6, 0 }
 0x318   : > { %v4580_v61 = vor.u32 %v4578_v51, %v4576_v47  ;;  %19481 = vst [vmem:[#allocation41_spill] sm:$0xff] %v13881_v35  ;;  %vm4781_vm6 = vcmp.ne.s16.totalorder %v4577_v44, 0 }
 0x31a   : > { %6567 = vrot.lane.b32.xlu0 %v13728_v40, %s12107_s12  ;;  %6565 = vrot.lane.b32.xlu1 %v13730_v37, %s12107_s12  ;;  %v4594_v40 = vshrl.u32 %v11443_v49, 16  ;;  %v2448_v49 = vand.u32 31, %v1588_v4 }
 0x31c   : > { %v4596_v4 = vor.u32 %v4594_v40, %v4592_v27  ;;  %vm13885_vm5 = vcmp.ne.s32.totalorder %v2448_v49, 0  ;;  %v3284_v40 = vld [vmem:[#allocation2 + $0x180] sm:$0xff] }
 0x31e   : > { %6571 = vrot.lane.b32.xlu0 %v13758_v42, %s12107_s12  ;;  %6569 = vrot.lane.b32.xlu1 %v13760_v9, %s12107_s12  ;;  %v1584_v42 = vadd.s32 928, %v19379_v59 }
 0x322   : > { %6575 = vrot.lane.b32.xlu0 %v13782_v29, %s12107_s12  ;;  %6573 = vrot.lane.b32.xlu1 %v13784_v36, %s12107_s12  ;;  %v3953_v29 = vsel %vm3817_vm3, 65537, %v19380_v60  ;;  %v13805_v36 = vsel %vm4773_vm14, %v3276_v38, 0  ;;  %v4562_v38 = vshrl.u32 %v11439_v53, 16  ;;  %v3279_v53 = vld [vmem:[#allocation2 + $0x158] sm:$0xff] }
 0x323   : > { %19471 = vst [vmem:[#allocation68_spill] sm:$0xff] %v13805_v36  ;;  %v13861_v12 = vsel %vm4776_vm12, %v3279_v53, 0 }
 0x324   : > { %v4564_v32 = vor.u32 %v4562_v38, %v4560_v57  ;;  %19480 = vst [vmem:[#allocation39_spill] sm:$0xff] %v13861_v12  ;;  %v4593_v38 = vsel %vm4189_vm2, %v13237_v22, %v4592_v27  ;;  %v4585_v27 = vsel %vm4189_vm2, %v4580_v61, %v13228_v14 }
 0x325   : > { %vm4783_vm8 = vcmp.ne.s16.totalorder %v4593_v38, 0  ;;  %vm4782_vm12 = vcmp.ne.s16.totalorder %v4585_v27, 0 }
 0x326   : > { %6579 = vrot.lane.b32.xlu0 %v13805_v36, %s12107_s12  ;;  %6577 = vrot.lane.b32.xlu1 %v13808_v43, %s12107_s12  ;;  %v11445_v36 = vcombine.low %v3953_v29, %v19383_v7  ;;  %v2420_v43 = vand.u32 31, %v1584_v42  ;;  %v3280_v42 = vld [vmem:[#allocation2 + $0x160] sm:$0xff]  ;;  %v4553_v29 = vsel %vm4189_vm2, %v4548_v41, %v13228_v14  ;;  %v1592_v41 = vadd.s32 992, %v19379_v59 }
 0x327   : > { %v13859_v57 = vsel %vm4777_vm10, %v3280_v42, 0  ;;  %vm4778_vm3 = vcmp.ne.s16.totalorder %v4553_v29, 0  ;;  %v4569_v23 = vsel %vm4189_vm2, %v4564_v32, %v13228_v14  ;;  %vm3833_vm10 = vmpackc.low %vm13885_vm5, %vm13885_vm5  ;;  %v1600_v32 = vadd.s32 1056, %v19379_v59 }
 0x328   : > { %v4606_v28 = vshll.u32 %v11445_v36, 16  ;;  %vm13854_vm14 = vcmp.ne.s32.totalorder %v2420_v43, 0  ;;  %19479 = vst [vmem:[#allocation77_spill] sm:$0xff] %v13859_v57  ;;  %v3281_v43 = vld [vmem:[#allocation2 + $0x168] sm:$0xff]  ;;  %v4610_v53 = vshrl.u32 %v11445_v36, 16  ;;  %v2476_v47 = vand.u32 31, %v1592_v41 }
 0x329   : > { %vm3829_vm4 = vmpackc.low %vm13854_vm14, %vm13854_vm14  ;;  %v13883_v29 = vsel %vm4778_vm3, %v3281_v43, 0  ;;  %v3283_v36 = vld [vmem:[#allocation2 + $0x178] sm:$0xff]  ;;  %vm4780_vm7 = vcmp.ne.s16.totalorder %v4569_v23, 0  ;;  %v13905_v43 = vsel %vm4781_vm6, %v3284_v40, 0  ;;  %v2532_v38 = vand.u32 31, %v1600_v32 }
 0x32a   : > { %6583 = vrot.lane.b32.xlu0 %v13827_v45, %s12107_s12  ;;  %6581 = vrot.lane.b32.xlu1 %v13830_v11, %s12107_s12  ;;  %v13846_v45 = vcombine.low %v3957_v19, %v19383_v7  ;;  %v4608_v19 = vrot.slane %v4606_v28, 1  ;;  %19482 = vst [vmem:[#allocation14_spill] sm:$0xff] %v13883_v29  ;;  %v1596_v11 = vadd.s32 1024, %v19379_v59  ;;  %v3965_v28 = vsel %vm3829_vm4, 65537, %v19380_v60  ;;  %19485 = vst [vmem:[#allocation71_spill] sm:$0xff] %v13905_v43 }
 0x32b   : > { %v13907_v44 = vsel %vm4780_vm7, %v3283_v36, 0  ;;  %vm13910_vm11 = vcmp.ne.s32.totalorder %v2476_v47, 0 }
 0x32c   : > { %v4622_v42 = vshll.u32 %v13846_v45, 16  ;;  %v4609_v51 = vsel %vm4189_vm2, %v13237_v22, %v4608_v19  ;;  %v4612_v41 = vor.u32 %v4610_v53, %v4608_v19  ;;  %19486 = vst [vmem:[#allocation16_spill] sm:$0xff] %v13907_v44  ;;  %v4626_v23 = vshrl.u32 %v13846_v45, 16  ;;  %v3286_v19 = vld [vmem:[#allocation2 + $0x190] sm:$0xff]  ;;  %vm3837_vm3 = vmpackc.low %vm13910_vm11, %vm13910_vm11 }
 0x32d   : > { %v2504_v53 = vand.u32 31, %v1596_v11  ;;  %v3969_v45 = vsel %vm3833_vm10, 65537, %v19380_v60  ;;  %vm4785_vm14 = vcmp.ne.s16.totalorder %v4609_v51, 0  ;;  %v13929_v36 = vsel %vm4783_vm8, %v3286_v19, 0  ;;  %v3289_v51 = vld [vmem:[#allocation2 + $0x1a8] sm:$0xff] }
 0x32e   : > { %6587 = vrot.lane.b32.xlu0 %v13859_v57, %s12107_s12  ;;  %6585 = vrot.lane.b32.xlu1 %v13861_v12, %s12107_s12  ;;  %v13876_v57 = vcombine.low %v3961_v24, %v19383_v7  ;;  %v4601_v24 = vsel %vm4189_vm2, %v4596_v4, %v13228_v14  ;;  %v4624_v49 = vrot.slane %v4622_v42, 1  ;;  %v3285_v4 = vld [vmem:[#allocation2 + $0x188] sm:$0xff]  ;;  %v11451_v42 = vcombine.low %v3965_v28, %v19383_v7 }
 0x32f   : > { %vm4784_vm15 = vcmp.ne.s16.totalorder %v4601_v24, 0  ;;  %v4617_v40 = vsel %vm4189_vm2, %v4612_v41, %v13228_v14  ;;  %19489 = vst [vmem:[#allocation79_spill] sm:$0xff] %v13929_v36  ;;  %v13931_v11 = vsel %vm4782_vm12, %v3285_v4, 0  ;;  %v11453_v61 = vcombine.low %v3969_v45, %v19383_v7 }
 0x330   : > { %v4638_v6 = vshll.u32 %v13876_v57, 16  ;;  %v4625_v47 = vsel %vm4189_vm2, %v13237_v22, %v4624_v49  ;;  %19490 = vst [vmem:[#allocation37_spill] sm:$0xff] %v13931_v11  ;;  %v4628_v28 = vor.u32 %v4626_v23, %v4624_v49  ;;  %v4654_v41 = vshll.u32 %v11451_v42, 16 }
 0x331   : > { %vm13938_vm4 = vcmp.ne.s32.totalorder %v2504_v53, 0  ;;  %v4642_v19 = vshrl.u32 %v13876_v57, 16  ;;  %v3973_v49 = vsel %vm3837_vm3, 65537, %v19380_v60  ;;  %vm4787_vm5 = vcmp.ne.s16.totalorder %v4625_v47, 0  ;;  %v3290_v57 = vld [vmem:[#allocation2 + $0x1b0] sm:$0xff] }
 0x332   : > { %6591 = vrot.lane.b32.xlu0 %v13881_v35, %s12107_s12  ;;  %6589 = vrot.lane.b32.xlu1 %v13883_v29, %s12107_s12  ;;  %v4640_v27 = vrot.slane %v4638_v6, 1  ;;  %v3287_v35 = vld [vmem:[#allocation2 + $0x198] sm:$0xff]  ;;  %vm4786_vm6 = vcmp.ne.s16.totalorder %v4617_v40, 0  ;;  %v4633_v53 = vsel %vm4189_vm2, %v4628_v28, %v13228_v14  ;;  %vm3841_vm7 = vmpackc.low %vm13938_vm4, %vm13938_vm4  ;;  %v4670_v24 = vshll.u32 %v11453_v61, 16 }
 0x333   : > { %v13948_v23 = vsel %vm4784_vm15, %v3287_v35, 0  ;;  %v4656_v35 = vrot.slane %v4654_v41, 1  ;;  %vm13962_vm8 = vcmp.ne.s32.totalorder %v2532_v38, 0  ;;  %v3977_v28 = vsel %vm3841_vm7, 65537, %v19380_v60 }
 0x334   : > { %19494 = vst [vmem:[#allocation12_spill] sm:$0xff] %v13948_v23  ;;  %v4641_v4 = vsel %vm4189_vm2, %v13237_v22, %v4640_v27  ;;  %v4644_v45 = vor.u32 %v4642_v19, %v4640_v27  ;;  %vm4788_vm11 = vcmp.ne.s16.totalorder %v4633_v53, 0  ;;  %vm3845_vm12 = vmpackc.low %vm13962_vm8, %vm13962_vm8  ;;  %v3291_v27 = vld [vmem:[#allocation2 + $0x1b8] sm:$0xff]  ;;  %v4672_v40 = vrot.slane %v4670_v24, 1  ;;  %v3293_v24 = vld [vmem:[#allocation2 + $0x1c8] sm:$0xff] }
 0x335   : > { %vm4789_vm10 = vcmp.ne.s16.totalorder %v4641_v4, 0  ;;  %v4657_v47 = vsel %vm4189_vm2, %v13237_v22, %v4656_v35  ;;  %v4674_v38 = vshrl.u32 %v11453_v61, 16  ;;  %v11457_v4 = vcombine.low %v3977_v28, %v19383_v7  ;;  %v3294_v61 = vld [vmem:[#allocation2 + $0x1d0] sm:$0xff] }
 0x336   : > { %6595 = vrot.lane.b32.xlu0 %v13905_v43, %s12107_s12  ;;  %6593 = vrot.lane.b32.xlu1 %v13907_v44, %s12107_s12  ;;  %v3288_v43 = vld [vmem:[#allocation2 + $0x1a0] sm:$0xff]  ;;  %v4658_v44 = vshrl.u32 %v11451_v42, 16  ;;  %v4649_v19 = vsel %vm4189_vm2, %v4644_v45, %v13228_v14  ;;  %v3981_v53 = vsel %vm3845_vm12, 65537, %v19380_v60 }
 0x337   : > { %v13945_v6 = vsel %vm4785_vm14, %v3288_v43, 0  ;;  %v11455_v43 = vcombine.low %v3973_v49, %v19383_v7  ;;  %v3292_v42 = vld [vmem:[#allocation2 + $0x1c0] sm:$0xff]  ;;  %vm4791_vm14 = vcmp.ne.s16.totalorder %v4657_v47, 0  ;;  %vm4790_vm15 = vcmp.ne.s16.totalorder %v4649_v19, 0 }
 0x338   : > { %19493 = vst [vmem:[#allocation40_spill] sm:$0xff] %v13945_v6  ;;  %v4660_v49 = vor.u32 %v4658_v44, %v4656_v35  ;;  %v4673_v35 = vsel %vm4189_vm2, %v13237_v22, %v4672_v40  ;;  %v4676_v45 = vor.u32 %v4674_v38, %v4672_v40  ;;  %v4702_v28 = vshll.u32 %v11457_v4, 16  ;;  %v3296_v40 = vld [vmem:[#allocation2 + $0x1e0] sm:$0xff] }
 0x339   : > { %v4686_v41 = vshll.u32 %v11455_v43, 16  ;;  %vm4793_vm3 = vcmp.ne.s16.totalorder %v4673_v35, 0 }
 0x33a   : > { %6599 = vrot.lane.b32.xlu0 %v13929_v36, %s12107_s12  ;;  %6597 = vrot.lane.b32.xlu1 %v13931_v11, %s12107_s12  ;;  %v13968_v36 = vsel %vm4787_vm5, %v3290_v57, 0  ;;  %v13986_v57 = vsel %vm4789_vm10, %v3292_v42, 0  ;;  %v4665_v44 = vsel %vm4189_vm2, %v4660_v49, %v13228_v14  ;;  %v4690_v42 = vshrl.u32 %v11455_v43, 16 }
 0x33b   : > { %19497 = vst [vmem:[#allocation75_spill] sm:$0xff] %v13968_v36  ;;  %19499 = vst [vmem:[#allocation38_spill] sm:$0xff] %v13986_v57  ;;  %v4688_v32 = vrot.slane %v4686_v41, 1  ;;  %v3295_v41 = vld [vmem:[#allocation2 + $0x1d8] sm:$0xff]  ;;  %vm4792_vm4 = vcmp.ne.s16.totalorder %v4665_v44, 0  ;;  %v4681_v38 = vsel %vm4189_vm2, %v4676_v45, %v13228_v14  ;;  %v4704_v19 = vrot.slane %v4702_v28, 1 }
 0x33c   : > { %v14020_v35 = vsel %vm4792_vm4, %v3295_v41, 0  ;;  %v3298_v45 = vld [vmem:[#allocation2 + $0x1f0] sm:$0xff] }
 0x33d   : > { %v4689_v43 = vsel %vm4189_vm2, %v13237_v22, %v4688_v32  ;;  %v4692_v49 = vor.u32 %v4690_v42, %v4688_v32  ;;  %19505 = vst [vmem:[#allocation81_spill] sm:$0xff] %v14020_v35  ;;  %v3297_v32 = vld [vmem:[#allocation2 + $0x1e8] sm:$0xff] }
 0x33e   : > { %6603 = vrot.lane.b32.xlu0 %v13945_v6, %s12107_s12  ;;  %6601 = vrot.lane.b32.xlu1 %v13948_v23, %s12107_s12  ;;  %v13971_v6 = vsel %vm4786_vm6, %v3289_v51, 0  ;;  %v13988_v51 = vsel %vm4788_vm11, %v3291_v27, 0  ;;  %v13999_v27 = vcombine.low %v3981_v53, %v19383_v7  ;;  %vm4795_vm5 = vcmp.ne.s16.totalorder %v4689_v43, 0 }
 0x33f   : > { %19498 = vst [vmem:[#allocation36_spill] sm:$0xff] %v13971_v6  ;;  %19500 = vst [vmem:[#allocation13_spill] sm:$0xff] %v13988_v51  ;;  %vm4794_vm6 = vcmp.ne.s16.totalorder %v4681_v38, 0  ;;  %v4697_v44 = vsel %vm4189_vm2, %v4692_v49, %v13228_v14  ;;  %v3300_v49 = vld [vmem:[#allocation2 + $0x200] sm:$0xff] }
 0x340   : > { %v4718_v53 = vshll.u32 %v13999_v27, 16  ;;  %v14040_v43 = vsel %vm4794_vm6, %v3297_v32, 0  ;;  %vm4796_vm8 = vcmp.ne.s16.totalorder %v4697_v44, 0 }
 0x341   : > { %19509 = vst [vmem:[#allocation35_spill] sm:$0xff] %v14040_v43 }
 0x342   : > { %6607 = vrot.lane.b32.xlu0 %v13968_v36, %s12107_s12  ;;  %6605 = vrot.lane.b32.xlu1 %v13971_v6, %s12107_s12  ;;  %v14004_v36 = vsel %vm4790_vm15, %v3293_v24, 0  ;;  %v14030_v28 = vrot.slane %v4718_v53, 1 }
 0x343   : > { %19502 = vst [vmem:[#allocation10_spill] sm:$0xff] %v14004_v36 }
 0x344   : > { %v4721_v53 = vsel %vm4189_vm2, %v13237_v22, %v14030_v28 }
 0x345   : > { %vm4799_vm10 = vcmp.ne.s16.totalorder %v4721_v53, 0 }
 0x346   : > { %6611 = vrot.lane.b32.xlu0 %v13986_v57, %s12107_s12  ;;  %6609 = vrot.lane.b32.xlu1 %v13988_v51, %s12107_s12  ;;  %v14002_v57 = vsel %vm4791_vm14, %v3294_v61, 0  ;;  %v4706_v61 = vshrl.u32 %v11457_v4, 16  ;;  %v4705_v4 = vsel %vm4189_vm2, %v13237_v22, %v4704_v19 }
 0x347   : > { %19501 = vst [vmem:[#allocation83_spill] sm:$0xff] %v14002_v57  ;;  %vm4797_vm7 = vcmp.ne.s16.totalorder %v4705_v4, 0 }
 0x348   : > { %v1460_v47 = vpop.permute.xlu0 %1459  ;;  %v4708_v42 = vor.u32 %v4706_v61, %v4704_v19  ;;  %v3299_v19 = vld [vmem:[#allocation2 + $0x1f8] sm:$0xff] }
 0x349   : > { %1465 = vst.msk [vmem:[#allocation2 + $0x208] sm:$0xff] %vm308_vm1, %v1460_v47  ;;  %v14062_v4 = vsel %vm4796_vm8, %v3299_v19, 0 }
 0x34a   : > { %6615 = vrot.lane.b32.xlu0 %v14002_v57, %s12107_s12  ;;  %6613 = vrot.lane.b32.xlu1 %v14004_v36, %s12107_s12  ;;  %v14018_v57 = vsel %vm4793_vm3, %v3296_v40, 0  ;;  %v4713_v61 = vsel %vm4189_vm2, %v4708_v42, %v13228_v14  ;;  %19514 = vst [vmem:[#allocation85_spill] sm:$0xff] %v14062_v4 }
 0x34b   : > { %19504 = vst [vmem:[#allocation82_spill] sm:$0xff] %v14018_v57  ;;  %vm4798_vm11 = vcmp.ne.s16.totalorder %v4713_v61, 0 }
 0x34c   : > { %v14015_v24 = vpop.permute.xlu0 %6503  ;;  %v1462_v47 = vpop.permute.xlu1 %1461 }
 0x34d   : > { %19503 = vst [vmem:[#allocation78_spill] sm:$0xff] %v14015_v24  ;;  %1466 = vst.msk [vmem:[#allocation2 + $0x210] sm:$0xff] %vm308_vm1, %v1462_v47  ;;  %v14038_v24 = vsel %vm4795_vm5, %v3298_v45, 0 }
 0x34e   : > { %6619 = vrot.lane.b32.xlu0 %v14018_v57, %s12107_s12  ;;  %6617 = vrot.lane.b32.xlu1 %v14020_v35, %s12107_s12  ;;  %19508 = vst [vmem:[#allocation33_spill] sm:$0xff] %v14038_v24 }
 0x350   : > { %v14032_v40 = vpop.permute.xlu0 %6507  ;;  %v14034_v41 = vpop.permute.xlu1 %6505  ;;  %v14036_v47 = vld [vmem:[#allocation2 + $0x208] sm:$0xff] }
 0x351   : > { %19506 = vst [vmem:[#allocation11_spill] sm:$0xff] %v14032_v40  ;;  %19507 = vst [vmem:[#allocation86_spill] sm:$0xff] %v14034_v41  ;;  %v7407_v38 = vshll.u32 %v14036_v47, 16  ;;  %v7411_v44 = vshrl.u32 %v14036_v47, 16  ;;  %v14081_v22 = vsel %vm4798_vm11, %v14036_v47, 0 }
 0x352   : > { %6623 = vrot.lane.b32.xlu0 %v14038_v24, %s12107_s12  ;;  %6621 = vrot.lane.b32.xlu1 %v14040_v43, %s12107_s12  ;;  %v14060_v24 = vsel %vm4797_vm7, %v3300_v49, 0 }
 0x353   : > { %v14058_v40 = vrot.slane %v7407_v38, 1  ;;  %19513 = vst [vmem:[#allocation34_spill] sm:$0xff] %v14060_v24 }
 0x354   : > { %v14052_v45 = vpop.permute.xlu0 %6511  ;;  %v14054_v32 = vpop.permute.xlu1 %6509  ;;  %v14056_v41 = vld [vmem:[#allocation2 + $0x210] sm:$0xff] }
 0x355   : > { %19510 = vst [vmem:[#allocation9_spill] sm:$0xff] %v14052_v45  ;;  %19511 = vst [vmem:[#allocation80_spill] sm:$0xff] %v14054_v32  ;;  %v7415_v42 = vshll.u32 %v14056_v41, 16  ;;  %v7413_v49 = vor.u32 %v7411_v44, %v14058_v40  ;;  %v14078_v45 = vsel %vm4799_vm10, %v14056_v41, 0 }
 0x356   : > { %19512 = vst [vmem:[#allocation32_spill] sm:$0xff] %v14058_v40  ;;  %6627 = vrot.lane.b32.xlu0 %v14060_v24, %s12107_s12  ;;  %6625 = vrot.lane.b32.xlu1 %v14062_v4, %s12107_s12 }
 0x357   : > { %v14075_v19 = vrot.slane %v7415_v42, 1  ;;  %v1595_v42 = vadd.s32 1016, %v19379_v59 }
 0x358   : > { %v14070_v32 = vpop.permute.xlu0 %6515  ;;  %v14072_v38 = vpop.permute.xlu1 %6513 }
 0x359   : > { %19515 = vst [vmem:[#allocation88_spill] sm:$0xff] %v14070_v32  ;;  %19516 = vst [vmem:[#allocation87_spill] sm:$0xff] %v14072_v38  ;;  %v14089_v53 = vsel %vm4189_vm2, %v7413_v49, %v14075_v19  ;;  %v2497_v49 = vand.u32 31, %v1595_v42 }
 0x35a   : > { %19517 = vst [vmem:[#allocation7_spill] sm:$0xff] %v14075_v19  ;;  %6631 = vrot.lane.b32.xlu0 %v14078_v45, %s12107_s12  ;;  %6629 = vrot.lane.b32.xlu1 %v14081_v22, %s12107_s12  ;;  %19518 = vst [vmem:[#allocation8_spill] sm:$0xff] %v14089_v53  ;;  %v11944_v53 = vld [vmem:[#allocation2 + $0x188] sm:$0xff]  ;;  %s12115_s12 = smov 40  }
 0x35b   : > { %vm4999_vm12 = vcmp.ne.s32.totalorder %v2497_v49, 31  ;;  %v7149_v40 = vshll.u32 %v11944_v53, 16 }
 0x35c   : > { %v14091_v61 = vpop.permute.xlu0 %6519  ;;  %v14093_v44 = vpop.permute.xlu1 %6517  ;;  %vm5407_vm14 = vmpackc.low %vm4999_vm12, %vm4999_vm12 }
 0x35d   : > { %19519 = vst [vmem:[#allocation99_spill] sm:$0xff] %v14091_v61  ;;  %19520 = vst [vmem:[#allocation100_spill] sm:$0xff] %v14093_v44  ;;  %v1599_v44 = vadd.s32 1048, %v19379_v59 }
 0x35e   : > { %6637 = vrot.lane.b32.xlu0 %v13349_v3, %s12108_s13  ;;  %6635 = vrot.lane.b32.xlu1 %v13315_v1, %s12108_s13 }
 0x360   : > { %v14100_v38 = vpop.permute.xlu0 %6523  ;;  %v14102_v32 = vpop.permute.xlu1 %6521 }
 0x361   : > { %19521 = vst [vmem:[#allocation101_spill] sm:$0xff] %v14100_v38  ;;  %19522 = vst [vmem:[#allocation102_spill] sm:$0xff] %v14102_v32  ;;  %v2525_v38 = vand.u32 31, %v1599_v44  ;;  %v5543_v32 = vsel %vm5407_vm14, 65537, %v19380_v60 }
 0x362   : > { %6641 = vrot.lane.b32.xlu0 %v13373_v56, %s12108_s13  ;;  %6639 = vrot.lane.b32.xlu1 %v13346_v20, %s12108_s13  ;;  %v14123_v20 = vcombine.low %v19383_v7, %v5543_v32 }
 0x363   : > { %vm5003_vm15 = vcmp.ne.s32.totalorder %v2525_v38, 31 }
 0x364   : > { %v14109_v61 = vpop.permute.xlu0 %6527  ;;  %v14111_v3 = vpop.permute.xlu1 %6525  ;;  %19527 = vst [vmem:[#allocation107_spill] sm:$0xff] %v14123_v20  ;;  %vm5411_vm3 = vmpackc.low %vm5003_vm15, %vm5003_vm15  ;;  %v6261_v49 = vshrl.u32 %v14123_v20, 16 }
 0x365   : > { %19523 = vst [vmem:[#allocation103_spill] sm:$0xff] %v14109_v61  ;;  %19524 = vst [vmem:[#allocation104_spill] sm:$0xff] %v14111_v3  ;;  %v5547_v44 = vsel %vm5411_vm3, 65537, %v19380_v60 }
 0x366   : > { %6645 = vrot.lane.b32.xlu0 %v13403_v2, %s12108_s13  ;;  %6643 = vrot.lane.b32.xlu1 %v13360_v33, %s12108_s13  ;;  %v11526_v61 = vcombine.low %v19383_v7, %v5547_v44  ;;  %v14136_v32 = vrot.slane %v6261_v49, 7  ;;  %v11928_v33 = vld [vmem:[#allocation2 + $0x108] sm:$0xff] }
 0x368   : > { %v14118_v56 = vpop.permute.xlu0 %6531  ;;  %v14120_v42 = vpop.permute.xlu1 %6529  ;;  %19530 = vst [vmem:[#allocation110_spill] sm:$0xff] %v14136_v32  ;;  %v6277_v38 = vshrl.u32 %v11526_v61, 16  ;;  %v6275_v3 = vsel %vm5756_vm9, %v14136_v32, %v12911_v18 }
 0x369   : > { %19525 = vst [vmem:[#allocation105_spill] sm:$0xff] %v14118_v56  ;;  %19526 = vst [vmem:[#allocation106_spill] sm:$0xff] %v14120_v42  ;;  %vm6364_vm4 = vcmp.ne.s16.totalorder %v6275_v3, 0 }
 0x36a   : > { %6649 = vrot.lane.b32.xlu0 %v13428_v0, %s12108_s13  ;;  %6647 = vrot.lane.b32.xlu1 %v13401_v13, %s12108_s13  ;;  %v6280_v0 = vshll.u32 %v11526_v61, 16  ;;  %v14145_v13 = vrot.slane %v6277_v38, 7 }
 0x36c   : > { %v14132_v56 = vpop.permute.xlu0 %6535  ;;  %v14134_v42 = vpop.permute.xlu1 %6533  ;;  %19531 = vst [vmem:[#allocation111_spill] sm:$0xff] %v14145_v13  ;;  %v6282_v49 = vor.u32 %v6280_v0, %v14145_v13 }
 0x36d   : > { %19528 = vst [vmem:[#allocation108_spill] sm:$0xff] %v14132_v56  ;;  %19529 = vst [vmem:[#allocation109_spill] sm:$0xff] %v14134_v42 }
 0x36e   : > { %6653 = vrot.lane.b32.xlu0 %v13456_v30, %s12108_s13  ;;  %6651 = vrot.lane.b32.xlu1 %v13426_v46, %s12108_s13  ;;  %v6283_v38 = vsel %vm5756_vm9, %v12898_v17, %v6282_v49  ;;  %v19575_v46 = vld [vmem:[#allocation77_spill] sm:$0xff] }
 0x36f   : > { %vm6365_vm5 = vcmp.ne.s16.totalorder %v6283_v38, 0 }
 0x370   : > { %v14147_v44 = vpop.permute.xlu0 %6539  ;;  %v14149_v56 = vpop.permute.xlu1 %6537  ;;  %v14170_v3 = vsel %vm6365_vm5, %v14056_v41, 0 }
 0x371   : > { %19532 = vst [vmem:[#allocation112_spill] sm:$0xff] %v14147_v44  ;;  %19533 = vst [vmem:[#allocation113_spill] sm:$0xff] %v14149_v56  ;;  %v14163_v44 = vsel %vm6364_vm4, %v14036_v47, 0  ;;  %v19042_v49 = vrot.slane %v14170_v3, 1 }
 0x372   : > { %6657 = vrot.lane.b32.xlu0 %v13482_v15, %s12108_s13  ;;  %6655 = vrot.lane.b32.xlu1 %v13453_v63, %s12108_s13  ;;  %19536 = vst [vmem:[#allocation116_spill] sm:$0xff] %v14163_v44  ;;  %19537 = vst [vmem:[#allocation117_spill] sm:$0xff] %v14170_v3  ;;  %v19569_v15 = vld [vmem:[#allocation68_spill] sm:$0xff] }
 0x373   : > { %v19572_v63 = vld [vmem:[#allocation72_spill] sm:$0xff] }
 0x374   : > { %v14156_v61 = vpop.permute.xlu0 %6543  ;;  %v14158_v42 = vpop.permute.xlu1 %6541 }
 0x375   : > { %19534 = vst [vmem:[#allocation114_spill] sm:$0xff] %v14156_v61  ;;  %19535 = vst [vmem:[#allocation115_spill] sm:$0xff] %v14158_v42  ;;  %v19043_v42 = vrot.slane %v14163_v44, 1  ;;  %v11934_v44 = vld [vmem:[#allocation2 + $0x138] sm:$0xff] }
 0x376   : > { %6661 = vrot.lane.b32.xlu0 %v13510_v52, %s12108_s13  ;;  %6659 = vrot.lane.b32.xlu1 %v13479_v16, %s12108_s13  ;;  %v19568_v16 = vld [vmem:[#allocation17_spill] sm:$0xff]  ;;  %v7069_v32 = vshll.u32 %v11934_v44, 16 }
 0x377   : > { %v14187_v41 = vsel %vm7763_vm13, %v19043_v42, %v19042_v49 }
 0x378   : > { %v14172_v0 = vpop.permute.xlu0 %6547  ;;  %v14174_v61 = vpop.permute.xlu1 %6545  ;;  %19540 = vst [vmem:[#allocation120_spill] sm:$0xff] %v14187_v41  ;;  %v7071_v20 = vrot.slane %v7069_v32, 1 }
 0x379   : > { %19538 = vst [vmem:[#allocation118_spill] sm:$0xff] %v14172_v0  ;;  %19539 = vst [vmem:[#allocation119_spill] sm:$0xff] %v14174_v61 }
 0x37a   : > { %6665 = vrot.lane.b32.xlu0 %v13543_v58, %s12108_s13  ;;  %6663 = vrot.lane.b32.xlu1 %v13508_v62, %s12108_s13  ;;  %v19564_v58 = vld [vmem:[#allocation73_spill] sm:$0xff]  ;;  %v19565_v62 = vld [vmem:[#allocation76_spill] sm:$0xff] }
 0x37c   : > { %v14189_v47 = vpop.permute.xlu0 %6551  ;;  %v14191_v38 = vpop.permute.xlu1 %6549 }
 0x37d   : > { %19541 = vst [vmem:[#allocation121_spill] sm:$0xff] %v14189_v47  ;;  %19542 = vst [vmem:[#allocation122_spill] sm:$0xff] %v14191_v38  ;;  %v19560_v38 = vld [vmem:[#allocation15_spill] sm:$0xff] }
 0x37e   : > { %6669 = vrot.lane.b32.xlu0 %v13562_v50, %s12108_s13  ;;  %6667 = vrot.lane.b32.xlu1 %v13541_v48, %s12108_s13 }
 0x380   : > { %v14197_v0 = vpop.permute.xlu0 %6555  ;;  %v14199_v61 = vpop.permute.xlu1 %6553 }
 0x381   : > { %19543 = vst [vmem:[#allocation123_spill] sm:$0xff] %v14197_v0  ;;  %19544 = vst [vmem:[#allocation124_spill] sm:$0xff] %v14199_v61 }
 0x382   : > { %6673 = vrot.lane.b32.xlu0 %v13590_v39, %s12108_s13  ;;  %6671 = vrot.lane.b32.xlu1 %v13560_v25, %s12108_s13  ;;  %v19561_v25 = vld [vmem:[#allocation69_spill] sm:$0xff] }
 0x384   : > { %v14205_v49 = vpop.permute.xlu0 %6559  ;;  %v14207_v42 = vpop.permute.xlu1 %6557 }
 0x385   : > { %19545 = vst [vmem:[#allocation125_spill] sm:$0xff] %v14205_v49  ;;  %19546 = vst [vmem:[#allocation126_spill] sm:$0xff] %v14207_v42 }
 0x386   : > { %6677 = vrot.lane.b32.xlu0 %v13621_v26, %s12108_s13  ;;  %6675 = vrot.lane.b32.xlu1 %v13587_v34, %s12108_s13 }
 0x388   : > { %v14213_v47 = vpop.permute.xlu0 %6563  ;;  %v14215_v0 = vpop.permute.xlu1 %6561 }
 0x389   : > { %19547 = vst [vmem:[#allocation127_spill] sm:$0xff] %v14213_v47  ;;  %19548 = vst [vmem:[#allocation128_spill] sm:$0xff] %v14215_v0 }
 0x38a   : > { %6681 = vrot.lane.b32.xlu0 %v13648_v21, %s12108_s13  ;;  %6679 = vrot.lane.b32.xlu1 %v13618_v8, %s12108_s13  ;;  %v19557_v8 = vld [vmem:[#allocation44_spill] sm:$0xff] }
 0x38c   : > { %v14221_v61 = vpop.permute.xlu0 %6567  ;;  %v14223_v49 = vpop.permute.xlu1 %6565 }
 0x38d   : > { %19549 = vst [vmem:[#allocation129_spill] sm:$0xff] %v14221_v61  ;;  %19550 = vst [vmem:[#allocation130_spill] sm:$0xff] %v14223_v49 }
 0x38e   : > { %6685 = vrot.lane.b32.xlu0 %v13683_v54, %s12108_s13  ;;  %6683 = vrot.lane.b32.xlu1 %v13645_v55, %s12108_s13 }
 0x390   : > { %v14229_v42 = vpop.permute.xlu0 %6571  ;;  %v14231_v26 = vpop.permute.xlu1 %6569 }
 0x391   : > { %19551 = vst [vmem:[#allocation131_spill] sm:$0xff] %v14229_v42  ;;  %19552 = vst [vmem:[#allocation132_spill] sm:$0xff] %v14231_v26 }
 0x392   : > { %6689 = vrot.lane.b32.xlu0 %v13704_v10, %s12108_s13  ;;  %6687 = vrot.lane.b32.xlu1 %v13681_v5, %s12108_s13 }
 0x394   : > { %v14237_v0 = vpop.permute.xlu0 %6575  ;;  %v14239_v21 = vpop.permute.xlu1 %6573 }
 0x395   : > { %19553 = vst [vmem:[#allocation133_spill] sm:$0xff] %v14237_v0  ;;  %19554 = vst [vmem:[#allocation134_spill] sm:$0xff] %v14239_v21  ;;  %v11920_v0 = vld [vmem:[#allocation2 + $0xc8] sm:$0xff] }
 0x396   : > { %6693 = vrot.lane.b32.xlu0 %v13730_v37, %s12108_s13  ;;  %6691 = vrot.lane.b32.xlu1 %v13702_v31, %s12108_s13  ;;  %v6957_v37 = vshll.u32 %v11920_v0, 16 }
 0x398   : > { %v14245_v54 = vpop.permute.xlu0 %6579  ;;  %v14247_v55 = vpop.permute.xlu1 %6577  ;;  %v6959_v26 = vrot.slane %v6957_v37, 1 }
 0x399   : > { %19555 = vst [vmem:[#allocation135_spill] sm:$0xff] %v14245_v54  ;;  %19556 = vst [vmem:[#allocation136_spill] sm:$0xff] %v14247_v55  ;;  %v11914_v55 = vld [vmem:[#allocation2 + $0x98] sm:$0xff] }
 0x39a   : > { %6697 = vrot.lane.b32.xlu0 %v13760_v9, %s12108_s13  ;;  %6695 = vrot.lane.b32.xlu1 %v19557_v8, %s12108_s13 }
 0x39c   : > { %v14253_v34 = vpop.permute.xlu0 %6583  ;;  %v14255_v39 = vpop.permute.xlu1 %6581 }
 0x39d   : > { %19558 = vst [vmem:[#allocation137_spill] sm:$0xff] %v14253_v34  ;;  %19559 = vst [vmem:[#allocation138_spill] sm:$0xff] %v14255_v39 }
 0x39e   : > { %6701 = vrot.lane.b32.xlu0 %v19560_v38, %s12108_s13  ;;  %6699 = vrot.lane.b32.xlu1 %v19561_v25, %s12108_s13 }
 0x3a0   : > { %v14261_v50 = vpop.permute.xlu0 %6587  ;;  %v14263_v48 = vpop.permute.xlu1 %6585 }
 0x3a1   : > { %19562 = vst [vmem:[#allocation139_spill] sm:$0xff] %v14261_v50  ;;  %19563 = vst [vmem:[#allocation140_spill] sm:$0xff] %v14263_v48 }
 0x3a2   : > { %6705 = vrot.lane.b32.xlu0 %v19564_v58, %s12108_s13  ;;  %6703 = vrot.lane.b32.xlu1 %v19565_v62, %s12108_s13  ;;  %v6909_v62 = vshll.u32 %v11914_v55, 16 }
 0x3a4   : > { %v14269_v52 = vpop.permute.xlu0 %6591  ;;  %v14271_v56 = vpop.permute.xlu1 %6589  ;;  %v6911_v54 = vrot.slane %v6909_v62, 1 }
 0x3a5   : > { %19566 = vst [vmem:[#allocation141_spill] sm:$0xff] %v14269_v52  ;;  %19567 = vst [vmem:[#allocation142_spill] sm:$0xff] %v14271_v56 }
 0x3a6   : > { %6709 = vrot.lane.b32.xlu0 %v19568_v16, %s12108_s13  ;;  %6707 = vrot.lane.b32.xlu1 %v19569_v15, %s12108_s13 }
 0x3a8   : > { %v14277_v3 = vpop.permute.xlu0 %6595  ;;  %v14279_v41 = vpop.permute.xlu1 %6593 }
 0x3a9   : > { %19570 = vst [vmem:[#allocation143_spill] sm:$0xff] %v14277_v3  ;;  %19571 = vst [vmem:[#allocation144_spill] sm:$0xff] %v14279_v41  ;;  %v19578_v41 = vld [vmem:[#allocation16_spill] sm:$0xff] }
 0x3aa   : > { %6713 = vrot.lane.b32.xlu0 %v13861_v12, %s12108_s13  ;;  %6711 = vrot.lane.b32.xlu1 %v19572_v63, %s12108_s13  ;;  %v19579_v12 = vld [vmem:[#allocation41_spill] sm:$0xff]  ;;  %v11908_v63 = vld [vmem:[#allocation2 + $0x68] sm:$0xff] }
 0x3ab   : > { %v6861_v50 = vshll.u32 %v11908_v63, 16 }
 0x3ac   : > { %v14285_v30 = vpop.permute.xlu0 %6599  ;;  %v14287_v13 = vpop.permute.xlu1 %6597 }
 0x3ad   : > { %19573 = vst [vmem:[#allocation145_spill] sm:$0xff] %v14285_v30  ;;  %19574 = vst [vmem:[#allocation146_spill] sm:$0xff] %v14287_v13  ;;  %v19582_v13 = vld [vmem:[#allocation71_spill] sm:$0xff]  ;;  %v6863_v39 = vrot.slane %v6861_v50, 1 }
 0x3ae   : > { %6717 = vrot.lane.b32.xlu0 %v13883_v29, %s12108_s13  ;;  %6715 = vrot.lane.b32.xlu1 %v19575_v46, %s12108_s13  ;;  %v11903_v46 = vld [vmem:[#allocation2 + $0x48] sm:$0xff] }
 0x3b0   : > { %v14293_v56 = vpop.permute.xlu0 %6603  ;;  %v14295_v3 = vpop.permute.xlu1 %6601 }
 0x3b1   : > { %19576 = vst [vmem:[#allocation147_spill] sm:$0xff] %v14293_v56  ;;  %19577 = vst [vmem:[#allocation148_spill] sm:$0xff] %v14295_v3  ;;  %v19585_v3 = vld [vmem:[#allocation79_spill] sm:$0xff] }
 0x3b2   : > { %6721 = vrot.lane.b32.xlu0 %v19578_v41, %s12108_s13  ;;  %6719 = vrot.lane.b32.xlu1 %v19579_v12, %s12108_s13 }
 0x3b4   : > { %v14301_v52 = vpop.permute.xlu0 %6607  ;;  %v14303_v30 = vpop.permute.xlu1 %6605 }
 0x3b5   : > { %19580 = vst [vmem:[#allocation149_spill] sm:$0xff] %v14301_v52  ;;  %19581 = vst [vmem:[#allocation150_spill] sm:$0xff] %v14303_v30  ;;  %v19588_v30 = vld [vmem:[#allocation40_spill] sm:$0xff] }
 0x3b6   : > { %6725 = vrot.lane.b32.xlu0 %v13931_v11, %s12108_s13  ;;  %6723 = vrot.lane.b32.xlu1 %v19582_v13, %s12108_s13 }
 0x3b8   : > { %v14309_v29 = vpop.permute.xlu0 %6611  ;;  %v14311_v56 = vpop.permute.xlu1 %6609 }
 0x3b9   : > { %19583 = vst [vmem:[#allocation151_spill] sm:$0xff] %v14309_v29  ;;  %19584 = vst [vmem:[#allocation152_spill] sm:$0xff] %v14311_v56  ;;  %v19591_v56 = vld [vmem:[#allocation75_spill] sm:$0xff] }
 0x3ba   : > { %6729 = vrot.lane.b32.xlu0 %v13948_v23, %s12108_s13  ;;  %6727 = vrot.lane.b32.xlu1 %v19585_v3, %s12108_s13  ;;  %v19607_v3 = vld [vmem:[#allocation58_spill] sm:$0xff] }
 0x3bb   : > { %vm4801_vm7 = vcmp.ne.s16.totalorder %v19607_v3, 0  ;;  %v19612_v3 = vld [vmem:[#allocation28_spill] sm:$0xff] }
 0x3bc   : > { %v14317_v41 = vpop.permute.xlu0 %6615  ;;  %v14319_v52 = vpop.permute.xlu1 %6613 }
 0x3bd   : > { %19586 = vst [vmem:[#allocation153_spill] sm:$0xff] %v14317_v41  ;;  %19587 = vst [vmem:[#allocation154_spill] sm:$0xff] %v14319_v52  ;;  %v19594_v52 = vld [vmem:[#allocation38_spill] sm:$0xff] }
 0x3be   : > { %6733 = vrot.lane.b32.xlu0 %v13971_v6, %s12108_s13  ;;  %6731 = vrot.lane.b32.xlu1 %v19588_v30, %s12108_s13  ;;  %v3304_v30 = vld [vmem:[#allocation2 + $0x220] sm:$0xff] }
 0x3c0   : > { %v14325_v11 = vpop.permute.xlu0 %6619  ;;  %v14327_v29 = vpop.permute.xlu1 %6617 }
 0x3c1   : > { %19589 = vst [vmem:[#allocation155_spill] sm:$0xff] %v14325_v11  ;;  %19590 = vst [vmem:[#allocation156_spill] sm:$0xff] %v14327_v29  ;;  %v4722_v29 = vshrl.u32 %v13999_v27, 16 }
 0x3c2   : > { %6737 = vrot.lane.b32.xlu0 %v13988_v51, %s12108_s13  ;;  %6735 = vrot.lane.b32.xlu1 %v19591_v56, %s12108_s13  ;;  %v19597_v51 = vld [vmem:[#allocation83_spill] sm:$0xff] }
 0x3c4   : > { %v14333_v23 = vpop.permute.xlu0 %6623  ;;  %v14335_v41 = vpop.permute.xlu1 %6621 }
 0x3c5   : > { %19592 = vst [vmem:[#allocation157_spill] sm:$0xff] %v14333_v23  ;;  %19593 = vst [vmem:[#allocation158_spill] sm:$0xff] %v14335_v41 }
 0x3c6   : > { %6741 = vrot.lane.b32.xlu0 %v14004_v36, %s12108_s13  ;;  %6739 = vrot.lane.b32.xlu1 %v19594_v52, %s12108_s13  ;;  %v4724_v36 = vor.u32 %v4722_v29, %v14030_v28 }
 0x3c8   : > { %v14341_v6 = vpop.permute.xlu0 %6627  ;;  %v14343_v11 = vpop.permute.xlu1 %6625 }
 0x3c9   : > { %19595 = vst [vmem:[#allocation159_spill] sm:$0xff] %v14341_v6  ;;  %19596 = vst [vmem:[#allocation160_spill] sm:$0xff] %v14343_v11  ;;  %v4729_v11 = vsel %vm4189_vm2, %v4724_v36, %v13228_v14  ;;  %v3303_v36 = vld [vmem:[#allocation2 + $0x218] sm:$0xff] }
 0x3ca   : > { %6745 = vrot.lane.b32.xlu0 %v14020_v35, %s12108_s13  ;;  %6743 = vrot.lane.b32.xlu1 %v19597_v51, %s12108_s13  ;;  %v3237_v35 = vld [vmem:[#allocation2 + $0x8] sm:$0xff]  ;;  %vm4800_vm6 = vcmp.ne.s16.totalorder %v4729_v11, 0 }
 0x3cb   : > { %v6766_v29 = vshll.u32 %v3237_v35, 16  ;;  %v4869_v51 = vsel %vm4800_vm6, %v3303_v36, 0  ;;  %v6769_v52 = vshrl.u32 %v3237_v35, 16 }
 0x3cc   : > { %v14350_v23 = vpop.permute.xlu0 %6631  ;;  %v14352_v41 = vpop.permute.xlu1 %6629 }
 0x3cd   : > { %19598 = vst [vmem:[#allocation161_spill] sm:$0xff] %v14350_v23  ;;  %19599 = vst [vmem:[#allocation162_spill] sm:$0xff] %v14352_v41  ;;  %v19602_v23 = vld [vmem:[#allocation33_spill] sm:$0xff] }
 0x3ce   : > { %6749 = vrot.lane.b32.xlu0 %v14040_v43, %s12108_s13  ;;  %6747 = vrot.lane.b32.xlu1 %v14018_v57, %s12108_s13  ;;  %v11901_v43 = vld [vmem:[#allocation2 + $0x10] sm:$0xff] }
 0x3cf   : > { %v6773_v57 = vshll.u32 %v11901_v43, 16  ;;  %v6777_v13 = vshrl.u32 %v11901_v43, 16 }
 0x3d0   : > { %v14359_v6 = vpop.permute.xlu0 %6637  ;;  %v14361_v27 = vpop.permute.xlu1 %6635 }
 0x3d1   : > { %19600 = vst [vmem:[#allocation163_spill] sm:$0xff] %v14359_v6  ;;  %19601 = vst [vmem:[#allocation164_spill] sm:$0xff] %v14361_v27  ;;  %v6775_v11 = vrot.slane %v6773_v57, 1  ;;  %v11907_v27 = vld [vmem:[#allocation2 + $0x60] sm:$0xff] }
 0x3d2   : > { %6753 = vrot.lane.b32.xlu0 %v14062_v4, %s12108_s13  ;;  %6751 = vrot.lane.b32.xlu1 %v19602_v23, %s12108_s13  ;;  %v6768_v4 = vrot.slane %v6766_v29, 1  ;;  %v6857_v58 = vshrl.u32 %v11907_v27, 16 }
 0x3d3   : > { %v6779_v35 = vor.u32 %v6777_v13, %v6775_v11  ;;  %v19613_v13 = vld [vmem:[#allocation29_spill] sm:$0xff] }
 0x3d4   : > { %v14369_v28 = vpop.permute.xlu0 %6641  ;;  %v14371_v41 = vpop.permute.xlu1 %6639 }
 0x3d5   : > { %19603 = vst [vmem:[#allocation165_spill] sm:$0xff] %v14369_v28  ;;  %19604 = vst [vmem:[#allocation166_spill] sm:$0xff] %v14371_v41  ;;  %v6833_v28 = vshrl.u32 %v11903_v46, 16  ;;  %v6853_v41 = vshll.u32 %v11907_v27, 16  ;;  %v11912_v27 = vld [vmem:[#allocation2 + $0x88] sm:$0xff] }
 0x3d6   : > { %6757 = vrot.lane.b32.xlu0 %v14081_v22, %s12108_s13  ;;  %6755 = vrot.lane.b32.xlu1 %v14060_v24, %s12108_s13  ;;  %v4870_v22 = vsel %vm4801_vm7, %v3304_v30, 0  ;;  %v6771_v24 = vor.u32 %v6769_v52, %v6768_v4  ;;  %v6784_v30 = vsel %vm4189_vm2, %v6779_v35, %v19612_v3  ;;  %v11902_v52 = vld [vmem:[#allocation2 + $0x20] sm:$0xff]  ;;  %v19617_v35 = vld [vmem:[#allocation31_spill] sm:$0xff]  ;;  %v6893_v38 = vshll.u32 %v11912_v27, 16 }
 0x3d8   : > { %v14377_v56 = vpop.permute.xlu0 %6645  ;;  %v14379_v23 = vpop.permute.xlu1 %6643  ;;  %v6776_v57 = vsel %vm4189_vm2, %v6771_v24, %v6775_v11  ;;  %v19616_v24 = vld [vmem:[#allocation51_spill] sm:$0xff] }
 0x3d9   : > { %19605 = vst [vmem:[#allocation167_spill] sm:$0xff] %v14377_v56  ;;  %19606 = vst [vmem:[#allocation168_spill] sm:$0xff] %v14379_v23  ;;  %v19622_v23 = vld [vmem:[#allocation94_spill] sm:$0xff] }
 0x3da   : > { %6761 = vrot.lane.b32.xlu0 %v4869_v51, %s12108_s13  ;;  %6759 = vrot.lane.b32.xlu1 %v14078_v45, %s12108_s13  ;;  %v6793_v45 = vshrl.u32 %v11902_v52, 16 }
 0x3dc   : > { %v14385_v12 = vpop.permute.xlu0 %6649  ;;  %v14387_v29 = vpop.permute.xlu1 %6647  ;;  %v6795_v36 = vor.u32 %v6793_v45, %v19613_v13  ;;  %v11905_v13 = vld [vmem:[#allocation2 + $0x58] sm:$0xff] }
 0x3dd   : > { %19608 = vst [vmem:[#allocation58_spill] sm:$0xff] %v14385_v12  ;;  %19609 = vst [vmem:[#allocation169_spill] sm:$0xff] %v14387_v29  ;;  %v19621_v29 = vld [vmem:[#allocation50_spill] sm:$0xff]  ;;  %v6849_v6 = vshrl.u32 %v11905_v13, 16 }
 0x3de   : > { %7276 = vrot.lane.b32.xlu0 %v6768_v4, %s12109_s14  ;;  %6763 = vrot.lane.b32.xlu1 %v4870_v22, %s12108_s13  ;;  %v14407_v11 = vsel %vm4189_vm2, %v6795_v36, %v19616_v24 }
 0x3e0   : > { %v14392_v43 = vpop.permute.xlu0 %6653  ;;  %v14394_v51 = vpop.permute.xlu1 %6651 }
 0x3e1   : > { %19610 = vst [vmem:[#allocation170_spill] sm:$0xff] %v14392_v43  ;;  %19611 = vst [vmem:[#allocation171_spill] sm:$0xff] %v14394_v51  ;;  %v6829_v43 = vshll.u32 %v11903_v46, 16  ;;  %v19620_v51 = vld [vmem:[#allocation95_spill] sm:$0xff] }
 0x3e2   : > { %7280 = vrot.lane.b32.xlu0 %v6784_v30, %s12109_s14  ;;  %7278 = vrot.lane.b32.xlu1 %v6776_v57, %s12109_s14  ;;  %v11904_v30 = vld [vmem:[#allocation2 + $0x50] sm:$0xff] }
 0x3e3   : > { %v6837_v57 = vshll.u32 %v11904_v30, 16  ;;  %v6831_v36 = vrot.slane %v6829_v43, 1  ;;  %v6841_v16 = vshrl.u32 %v11904_v30, 16 }
 0x3e4   : > { %v14401_v4 = vpop.permute.xlu0 %6657  ;;  %v14403_v22 = vpop.permute.xlu1 %6655 }
 0x3e5   : > { %19614 = vst [vmem:[#allocation28_spill] sm:$0xff] %v14401_v4  ;;  %19615 = vst [vmem:[#allocation29_spill] sm:$0xff] %v14403_v22  ;;  %v6845_v4 = vshll.u32 %v11905_v13, 16  ;;  %v11906_v22 = vld [vmem:[#allocation2 + $0x40] sm:$0xff]  ;;  %v6839_v12 = vrot.slane %v6837_v57, 1  ;;  %v6865_v13 = vshrl.u32 %v11908_v63, 16 }
 0x3e6   : > { %7284 = vrot.lane.b32.xlu0 %v14407_v11, %s12109_s14  ;;  %7282 = vrot.lane.b32.xlu1 %v19617_v35, %s12109_s14  ;;  %v6825_v2 = vshrl.u32 %v11906_v22, 16  ;;  %v6835_v22 = vor.u32 %v6833_v28, %v6831_v36  ;;  %v11910_v28 = vld [vmem:[#allocation2 + $0x78] sm:$0xff] }
 0x3e7   : > { %v6847_v48 = vrot.slane %v6845_v4, 1  ;;  %v6843_v46 = vor.u32 %v6841_v16, %v6839_v12  ;;  %v6877_v30 = vshll.u32 %v11910_v28, 16 }
 0x3e8   : > { %v14413_v52 = vpop.permute.xlu0 %6661  ;;  %v14415_v45 = vpop.permute.xlu1 %6659  ;;  %v6827_v56 = vor.u32 %v6825_v2, %v19622_v23  ;;  %v19625_v2 = vld [vmem:[#allocation98_spill] sm:$0xff]  ;;  %v11909_v23 = vld [vmem:[#allocation2 + $0x70] sm:$0xff] }
 0x3e9   : > { %19618 = vst [vmem:[#allocation31_spill] sm:$0xff] %v14413_v52  ;;  %19619 = vst [vmem:[#allocation172_spill] sm:$0xff] %v14415_v45  ;;  %v6869_v57 = vshll.u32 %v11909_v23, 16  ;;  %v6851_v15 = vor.u32 %v6849_v6, %v6847_v48  ;;  %v6867_v6 = vor.u32 %v6865_v13, %v6863_v39  ;;  %v6895_v13 = vrot.slane %v6893_v38, 1  ;;  %v11916_v38 = vld [vmem:[#allocation2 + $0xa8] sm:$0xff] }
 0x3ea   : > { %7288 = vrot.lane.b32.xlu0 %v19620_v51, %s12109_s14  ;;  %7286 = vrot.lane.b32.xlu1 %v19621_v29, %s12109_s14  ;;  %v14427_v43 = vsel %vm4189_vm2, %v6827_v56, %v6831_v36  ;;  %v14438_v56 = vsel %vm4189_vm2, %v6843_v46, %v6847_v48  ;;  %v14441_v36 = vsel %vm4189_vm2, %v6835_v22, %v6839_v12  ;;  %v6873_v12 = vshrl.u32 %v11909_v23, 16  ;;  %v11913_v23 = vld [vmem:[#allocation2 + $0x90] sm:$0xff] }
 0x3eb   : > { %v6871_v16 = vrot.slane %v6869_v57, 1  ;;  %v6879_v22 = vrot.slane %v6877_v30, 1  ;;  %v6881_v57 = vshrl.u32 %v11910_v28, 16  ;;  %v6901_v30 = vshll.u32 %v11913_v23, 16  ;;  %v11915_v28 = vld [vmem:[#allocation2 + $0xa0] sm:$0xff] }
 0x3ec   : > { %v14422_v52 = vpop.permute.xlu0 %6665  ;;  %v14424_v45 = vpop.permute.xlu1 %6663  ;;  %v6921_v21 = vshrl.u32 %v11915_v28, 16 }
 0x3ed   : > { %19623 = vst [vmem:[#allocation95_spill] sm:$0xff] %v14422_v52  ;;  %19624 = vst [vmem:[#allocation50_spill] sm:$0xff] %v14424_v45  ;;  %v6855_v52 = vrot.slane %v6853_v41, 1  ;;  %v6875_v63 = vor.u32 %v6873_v12, %v6871_v16 }
 0x3ee   : > { %7292 = vrot.lane.b32.xlu0 %v14427_v43, %s12109_s14  ;;  %7290 = vrot.lane.b32.xlu1 %v19625_v2, %s12109_s14 }
 0x3ef   : > { %v6859_v41 = vor.u32 %v6857_v58, %v6855_v52  ;;  %v14455_v48 = vsel %vm4189_vm2, %v6851_v15, %v6855_v52  ;;  %v14466_v15 = vsel %vm4189_vm2, %v6875_v63, %v6879_v22  ;;  %v14469_v52 = vsel %vm4189_vm2, %v6867_v6, %v6871_v16 }
 0x3f0   : > { %v14433_v45 = vpop.permute.xlu0 %6669  ;;  %v14435_v4 = vpop.permute.xlu1 %6667  ;;  %v6897_v63 = vshrl.u32 %v11912_v27, 16  ;;  %v6905_v16 = vshrl.u32 %v11913_v23, 16  ;;  %v11917_v23 = vld [vmem:[#allocation2 + $0xb0] sm:$0xff] }
 0x3f1   : > { %19626 = vst [vmem:[#allocation94_spill] sm:$0xff] %v14433_v45  ;;  %19627 = vst [vmem:[#allocation98_spill] sm:$0xff] %v14435_v4  ;;  %v11911_v45 = vld [vmem:[#allocation2 + $0x80] sm:$0xff]  ;;  %v14452_v50 = vsel %vm4189_vm2, %v6859_v41, %v6863_v39 }
 0x3f2   : > { %7296 = vrot.lane.b32.xlu0 %v14438_v56, %s12109_s14  ;;  %7294 = vrot.lane.b32.xlu1 %v14441_v36, %s12109_s14  ;;  %v6885_v46 = vshll.u32 %v11911_v45, 16  ;;  %v6889_v39 = vshrl.u32 %v11911_v45, 16  ;;  %v6899_v9 = vor.u32 %v6897_v63, %v6895_v13  ;;  %v11918_v63 = vld [vmem:[#allocation2 + $0xb8] sm:$0xff] }
 0x3f3   : > { %v6941_v25 = vshll.u32 %v11918_v63, 16 }
 0x3f4   : > { %v14447_v4 = vpop.permute.xlu0 %6673  ;;  %v14449_v34 = vpop.permute.xlu1 %6671  ;;  %v6887_v58 = vrot.slane %v6885_v46, 1  ;;  %v6917_v46 = vshll.u32 %v11915_v28, 16  ;;  %v11919_v28 = vld [vmem:[#allocation2 + $0xc0] sm:$0xff] }
 0x3f5   : > { %19628 = vst [vmem:[#allocation173_spill] sm:$0xff] %v14447_v4  ;;  %19629 = vst [vmem:[#allocation174_spill] sm:$0xff] %v14449_v34  ;;  %v6883_v34 = vor.u32 %v6881_v57, %v6879_v22  ;;  %v6925_v22 = vshll.u32 %v11916_v38, 16 }
 0x3f6   : > { %7300 = vrot.lane.b32.xlu0 %v14452_v50, %s12109_s14  ;;  %7298 = vrot.lane.b32.xlu1 %v14455_v48, %s12109_s14  ;;  %v6891_v12 = vor.u32 %v6889_v39, %v6887_v58  ;;  %v6919_v27 = vrot.slane %v6917_v46, 1  ;;  %v6913_v39 = vshrl.u32 %v11914_v55, 16 }
 0x3f7   : > { %v14483_v57 = vsel %vm4189_vm2, %v6883_v34, %v6887_v58  ;;  %v6927_v34 = vrot.slane %v6925_v22, 1  ;;  %v6949_v22 = vshll.u32 %v11919_v28, 16 }
 0x3f8   : > { %v14461_v4 = vpop.permute.xlu0 %6677  ;;  %v14463_v41 = vpop.permute.xlu1 %6675  ;;  %v14480_v6 = vsel %vm4189_vm2, %v6891_v12, %v6895_v13  ;;  %v6915_v13 = vor.u32 %v6913_v39, %v6911_v54  ;;  %v6923_v55 = vor.u32 %v6921_v21, %v6919_v27  ;;  %v6943_v39 = vrot.slane %v6941_v25, 1  ;;  %v11922_v25 = vld [vmem:[#allocation2 + $0xd8] sm:$0xff] }
 0x3f9   : > { %19630 = vst [vmem:[#allocation175_spill] sm:$0xff] %v14461_v4  ;;  %19631 = vst [vmem:[#allocation176_spill] sm:$0xff] %v14463_v41  ;;  %v6903_v4 = vrot.slane %v6901_v30, 1 }
 0x3fa   : > { %7304 = vrot.lane.b32.xlu0 %v14466_v15, %s12109_s14  ;;  %7302 = vrot.lane.b32.xlu1 %v14469_v52, %s12109_s14 }
 0x3fb   : > { %v6907_v30 = vor.u32 %v6905_v16, %v6903_v4  ;;  %v14497_v58 = vsel %vm4189_vm2, %v6899_v9, %v6903_v4  ;;  %v6929_v16 = vshrl.u32 %v11916_v38, 16  ;;  %v14508_v9 = vsel %vm4189_vm2, %v6923_v55, %v6927_v34 }
 0x3fc   : > { %v14475_v41 = vpop.permute.xlu0 %6681  ;;  %v14477_v45 = vpop.permute.xlu1 %6679  ;;  %v14511_v4 = vsel %vm4189_vm2, %v6915_v13, %v6919_v27  ;;  %v6945_v38 = vshrl.u32 %v11918_v63, 16  ;;  %v6953_v27 = vshrl.u32 %v11919_v28, 16  ;;  %v11923_v63 = vld [vmem:[#allocation2 + $0xe0] sm:$0xff] }
 0x3fd   : > { %19632 = vst [vmem:[#allocation177_spill] sm:$0xff] %v14475_v41  ;;  %19633 = vst [vmem:[#allocation178_spill] sm:$0xff] %v14477_v45  ;;  %v6933_v41 = vshll.u32 %v11917_v23, 16  ;;  %v14494_v62 = vsel %vm4189_vm2, %v6907_v30, %v6911_v54  ;;  %v6937_v54 = vshrl.u32 %v11917_v23, 16  ;;  %v6985_v5 = vshrl.u32 %v11923_v63, 16 }
 0x3fe   : > { %7308 = vrot.lane.b32.xlu0 %v14480_v6, %s12109_s14  ;;  %7306 = vrot.lane.b32.xlu1 %v14483_v57, %s12109_s14  ;;  %v6947_v8 = vor.u32 %v6945_v38, %v6943_v39 }
 0x3ff   : > { %v6935_v46 = vrot.slane %v6933_v41, 1  ;;  %v6951_v41 = vrot.slane %v6949_v22, 1  ;;  %v6981_v22 = vshll.u32 %v11923_v63, 16  ;;  %v11927_v63 = vld [vmem:[#allocation2 + $0x100] sm:$0xff] }
 0x400   : > { %v14489_v45 = vpop.permute.xlu0 %6685  ;;  %v14491_v12 = vpop.permute.xlu1 %6683 }
 0x401   : > { %19634 = vst [vmem:[#allocation179_spill] sm:$0xff] %v14489_v45  ;;  %19635 = vst [vmem:[#allocation180_spill] sm:$0xff] %v14491_v12  ;;  %v6931_v12 = vor.u32 %v6929_v16, %v6927_v34  ;;  %v6939_v21 = vor.u32 %v6937_v54, %v6935_v46  ;;  %v6973_v34 = vshll.u32 %v11922_v25, 16  ;;  %v6955_v54 = vor.u32 %v6953_v27, %v6951_v41 }
 0x402   : > { %7312 = vrot.lane.b32.xlu0 %v14494_v62, %s12109_s14  ;;  %7310 = vrot.lane.b32.xlu1 %v14497_v58, %s12109_s14  ;;  %v6977_v27 = vshrl.u32 %v11922_v25, 16 }
 0x403   : > { %v14522_v13 = vsel %vm4189_vm2, %v6939_v21, %v6943_v39  ;;  %v14525_v16 = vsel %vm4189_vm2, %v6931_v12, %v6935_v46  ;;  %v11924_v12 = vld [vmem:[#allocation2 + $0xe8] sm:$0xff]  ;;  %v14536_v37 = vsel %vm4189_vm2, %v6955_v54, %v6959_v26  ;;  %v14539_v39 = vsel %vm4189_vm2, %v6947_v8, %v6951_v41 }
 0x404   : > { %v14503_v45 = vpop.permute.xlu0 %6689  ;;  %v14505_v30 = vpop.permute.xlu1 %6687  ;;  %v6989_v46 = vshll.u32 %v11924_v12, 16  ;;  %v6975_v38 = vrot.slane %v6973_v34, 1  ;;  %v11926_v34 = vld [vmem:[#allocation2 + $0xf8] sm:$0xff] }
 0x405   : > { %19636 = vst [vmem:[#allocation181_spill] sm:$0xff] %v14503_v45  ;;  %19637 = vst [vmem:[#allocation182_spill] sm:$0xff] %v14505_v30  ;;  %v11921_v45 = vld [vmem:[#allocation2 + $0xd0] sm:$0xff]  ;;  %v7005_v47 = vshll.u32 %v11926_v34, 16 }
 0x406   : > { %7316 = vrot.lane.b32.xlu0 %v14508_v9, %s12109_s14  ;;  %7314 = vrot.lane.b32.xlu1 %v14511_v4, %s12109_s14  ;;  %v6965_v55 = vshll.u32 %v11921_v45, 16  ;;  %v6969_v42 = vshrl.u32 %v11921_v45, 16  ;;  %v11925_v45 = vld [vmem:[#allocation2 + $0xf0] sm:$0xff]  ;;  %v6991_v8 = vrot.slane %v6989_v46, 1  ;;  %v7013_v46 = vshll.u32 %v11927_v63, 16 }
 0x408   : > { %v14517_v30 = vpop.permute.xlu0 %6693  ;;  %v14519_v23 = vpop.permute.xlu1 %6691  ;;  %v6967_v28 = vrot.slane %v6965_v55, 1 }
 0x409   : > { %19638 = vst [vmem:[#allocation183_spill] sm:$0xff] %v14517_v30  ;;  %19639 = vst [vmem:[#allocation184_spill] sm:$0xff] %v14519_v23  ;;  %v6961_v30 = vshrl.u32 %v11920_v0, 16  ;;  %v6983_v0 = vrot.slane %v6981_v22, 1  ;;  %v6993_v22 = vshrl.u32 %v11924_v12, 16 }
 0x40a   : > { %7320 = vrot.lane.b32.xlu0 %v14522_v13, %s12109_s14  ;;  %7318 = vrot.lane.b32.xlu1 %v14525_v16, %s12109_s14  ;;  %v6971_v55 = vor.u32 %v6969_v42, %v6967_v28 }
 0x40b   : > { %v6963_v31 = vor.u32 %v6961_v30, %v6959_v26  ;;  %v6979_v30 = vor.u32 %v6977_v27, %v6975_v38  ;;  %v6987_v42 = vor.u32 %v6985_v5, %v6983_v0  ;;  %v7007_v27 = vrot.slane %v7005_v47, 1  ;;  %v11929_v5 = vld [vmem:[#allocation2 + $0x110] sm:$0xff]  ;;  %v11930_v47 = vld [vmem:[#allocation2 + $0x118] sm:$0xff] }
 0x40c   : > { %v14531_v23 = vpop.permute.xlu0 %6697  ;;  %v14533_v21 = vpop.permute.xlu1 %6695  ;;  %v14550_v41 = vsel %vm4189_vm2, %v6971_v55, %v6975_v38  ;;  %v7033_v1 = vshrl.u32 %v11929_v5, 16 }
 0x40d   : > { %19640 = vst [vmem:[#allocation185_spill] sm:$0xff] %v14531_v23  ;;  %19641 = vst [vmem:[#allocation186_spill] sm:$0xff] %v14533_v21  ;;  %v6997_v21 = vshll.u32 %v11925_v45, 16  ;;  %v14553_v26 = vsel %vm4189_vm2, %v6963_v31, %v6967_v28  ;;  %v14564_v31 = vsel %vm4189_vm2, %v6987_v42, %v6991_v8  ;;  %v7001_v28 = vshrl.u32 %v11925_v45, 16 }
 0x40e   : > { %7324 = vrot.lane.b32.xlu0 %v14536_v37, %s12109_s14  ;;  %7322 = vrot.lane.b32.xlu1 %v14539_v39, %s12109_s14  ;;  %v14567_v38 = vsel %vm4189_vm2, %v6979_v30, %v6983_v0  ;;  %v7021_v23 = vshll.u32 %v11928_v33, 16  ;;  %v7009_v42 = vshrl.u32 %v11926_v34, 16  ;;  %v7017_v0 = vshrl.u32 %v11927_v63, 16  ;;  %v11931_v63 = vld [vmem:[#allocation2 + $0x120] sm:$0xff] }
 0x40f   : > { %v6999_v25 = vrot.slane %v6997_v21, 1  ;;  %v7029_v21 = vshll.u32 %v11929_v5, 16  ;;  %v11933_v5 = vld [vmem:[#allocation2 + $0x130] sm:$0xff] }
 0x410   : > { %v14545_v61 = vpop.permute.xlu0 %6701  ;;  %v14547_v54 = vpop.permute.xlu1 %6699  ;;  %v7023_v10 = vrot.slane %v7021_v23, 1  ;;  %v7011_v49 = vor.u32 %v7009_v42, %v7007_v27  ;;  %v11932_v42 = vld [vmem:[#allocation2 + $0x128] sm:$0xff] }
 0x411   : > { %19642 = vst [vmem:[#allocation187_spill] sm:$0xff] %v14545_v61  ;;  %19643 = vst [vmem:[#allocation188_spill] sm:$0xff] %v14547_v54  ;;  %v6995_v54 = vor.u32 %v6993_v22, %v6991_v8  ;;  %v7003_v12 = vor.u32 %v7001_v28, %v6999_v25  ;;  %v7037_v8 = vshll.u32 %v11930_v47, 16  ;;  %v7031_v34 = vrot.slane %v7029_v21, 1 }
 0x412   : > { %7328 = vrot.lane.b32.xlu0 %v14550_v41, %s12109_s14  ;;  %7326 = vrot.lane.b32.xlu1 %v14553_v26, %s12109_s14  ;;  %v7025_v28 = vshrl.u32 %v11928_v33, 16  ;;  %v7053_v14 = vshll.u32 %v11932_v42, 16 }
 0x413   : > { %v14578_v30 = vsel %vm4189_vm2, %v7003_v12, %v7007_v27  ;;  %v14581_v22 = vsel %vm4189_vm2, %v6995_v54, %v6999_v25  ;;  %v7039_v54 = vrot.slane %v7037_v8, 1  ;;  %v7035_v33 = vor.u32 %v7033_v1, %v7031_v34 }
 0x414   : > { %v14559_v61 = vpop.permute.xlu0 %6705  ;;  %v14561_v55 = vpop.permute.xlu1 %6703  ;;  %v7027_v27 = vor.u32 %v7025_v28, %v7023_v10  ;;  %v7061_v8 = vshll.u32 %v11933_v5, 16  ;;  %v7055_v28 = vrot.slane %v7053_v14, 1  ;;  %v11936_v14 = vld [vmem:[#allocation2 + $0x148] sm:$0xff] }
 0x415   : > { %19644 = vst [vmem:[#allocation189_spill] sm:$0xff] %v14559_v61  ;;  %19645 = vst [vmem:[#allocation190_spill] sm:$0xff] %v14561_v55  ;;  %v7015_v61 = vrot.slane %v7013_v46, 1 }
 0x416   : > { %7332 = vrot.lane.b32.xlu0 %v14564_v31, %s12109_s14  ;;  %7330 = vrot.lane.b32.xlu1 %v14567_v38, %s12109_s14 }
 0x417   : > { %v7019_v46 = vor.u32 %v7017_v0, %v7015_v61  ;;  %v14595_v25 = vsel %vm4189_vm2, %v7011_v49, %v7015_v61  ;;  %v7041_v0 = vshrl.u32 %v11930_v47, 16  ;;  %v14606_v61 = vsel %vm4189_vm2, %v7035_v33, %v7039_v54 }
 0x418   : > { %v14573_v55 = vpop.permute.xlu0 %6709  ;;  %v14575_v45 = vpop.permute.xlu1 %6707  ;;  %v14609_v49 = vsel %vm4189_vm2, %v7027_v27, %v7031_v34  ;;  %v7057_v47 = vshrl.u32 %v11932_v42, 16  ;;  %v7065_v34 = vshrl.u32 %v11933_v5, 16  ;;  %v11937_v5 = vld [vmem:[#allocation2 + $0x150] sm:$0xff] }
 0x419   : > { %19646 = vst [vmem:[#allocation191_spill] sm:$0xff] %v14573_v55  ;;  %19647 = vst [vmem:[#allocation192_spill] sm:$0xff] %v14575_v45  ;;  %v7045_v55 = vshll.u32 %v11931_v63, 16  ;;  %v14592_v23 = vsel %vm4189_vm2, %v7019_v46, %v7023_v10  ;;  %v7049_v10 = vshrl.u32 %v11931_v63, 16 }
 0x41a   : > { %7336 = vrot.lane.b32.xlu0 %v14578_v30, %s12109_s14  ;;  %7334 = vrot.lane.b32.xlu1 %v14581_v22, %s12109_s14  ;;  %v7059_v17 = vor.u32 %v7057_v47, %v7055_v28  ;;  %v11938_v47 = vld [vmem:[#allocation2 + $0x158] sm:$0xff] }
 0x41b   : > { %v7047_v21 = vrot.slane %v7045_v55, 1  ;;  %v7063_v55 = vrot.slane %v7061_v8, 1  ;;  %v7101_v7 = vshll.u32 %v11938_v47, 16 }
 0x41c   : > { %v14587_v45 = vpop.permute.xlu0 %6713  ;;  %v14589_v12 = vpop.permute.xlu1 %6711 }
 0x41d   : > { %19648 = vst [vmem:[#allocation193_spill] sm:$0xff] %v14587_v45  ;;  %19649 = vst [vmem:[#allocation194_spill] sm:$0xff] %v14589_v12  ;;  %v7043_v12 = vor.u32 %v7041_v0, %v7039_v54  ;;  %v7051_v1 = vor.u32 %v7049_v10, %v7047_v21  ;;  %v7085_v54 = vshll.u32 %v11936_v14, 16  ;;  %v7067_v42 = vor.u32 %v7065_v34, %v7063_v55 }
 0x41e   : > { %7340 = vrot.lane.b32.xlu0 %v14592_v23, %s12109_s14  ;;  %7338 = vrot.lane.b32.xlu1 %v14595_v25, %s12109_s14  ;;  %v7073_v10 = vshrl.u32 %v11934_v44, 16  ;;  %v11939_v44 = vld [vmem:[#allocation2 + $0x160] sm:$0xff]  ;;  %v7103_v60 = vrot.slane %v7101_v7, 1 }
 0x41f   : > { %v14620_v27 = vsel %vm4189_vm2, %v7051_v1, %v7055_v28  ;;  %v14623_v0 = vsel %vm4189_vm2, %v7043_v12, %v7047_v21  ;;  %v7087_v12 = vrot.slane %v7085_v54, 1  ;;  %v14634_v32 = vsel %vm4189_vm2, %v7067_v42, %v7071_v20 }
 0x420   : > { %v14601_v45 = vpop.permute.xlu0 %6717  ;;  %v14603_v46 = vpop.permute.xlu1 %6715  ;;  %v14637_v21 = vsel %vm4189_vm2, %v7059_v17, %v7063_v55  ;;  %v7075_v28 = vor.u32 %v7073_v10, %v7071_v20  ;;  %v7089_v54 = vshrl.u32 %v11936_v14, 16  ;;  %v7097_v17 = vshrl.u32 %v11937_v5, 16  ;;  %v11940_v55 = vld [vmem:[#allocation2 + $0x168] sm:$0xff] }
 0x421   : > { %19650 = vst [vmem:[#allocation195_spill] sm:$0xff] %v14601_v45  ;;  %19651 = vst [vmem:[#allocation196_spill] sm:$0xff] %v14603_v46  ;;  %v11935_v45 = vld [vmem:[#allocation2 + $0x140] sm:$0xff]  ;;  %v7117_v20 = vshll.u32 %v11940_v55, 16  ;;  %v7105_v14 = vshrl.u32 %v11938_v47, 16  ;;  %v7113_v24 = vshrl.u32 %v11939_v44, 16 }
 0x422   : > { %7344 = vrot.lane.b32.xlu0 %v14606_v61, %s12109_s14  ;;  %7342 = vrot.lane.b32.xlu1 %v14609_v49, %s12109_s14  ;;  %v7077_v33 = vshll.u32 %v11935_v45, 16  ;;  %v7081_v18 = vshrl.u32 %v11935_v45, 16  ;;  %v7091_v59 = vor.u32 %v7089_v54, %v7087_v12  ;;  %v11942_v54 = vld [vmem:[#allocation2 + $0x178] sm:$0xff] }
 0x423   : > { %v7133_v19 = vshll.u32 %v11942_v54, 16 }
 0x424   : > { %v14615_v46 = vpop.permute.xlu0 %6721  ;;  %v14617_v63 = vpop.permute.xlu1 %6719  ;;  %v7079_v8 = vrot.slane %v7077_v33, 1  ;;  %v7109_v33 = vshll.u32 %v11939_v44, 16  ;;  %v11943_v44 = vld [vmem:[#allocation2 + $0x180] sm:$0xff] }
 0x425   : > { %19652 = vst [vmem:[#allocation197_spill] sm:$0xff] %v14615_v46  ;;  %19653 = vst [vmem:[#allocation198_spill] sm:$0xff] %v14617_v63  ;;  %v7093_v46 = vshll.u32 %v11937_v5, 16  ;;  %v11941_v5 = vld [vmem:[#allocation2 + $0x170] sm:$0xff] }
 0x426   : > { %7348 = vrot.lane.b32.xlu0 %v14620_v27, %s12109_s14  ;;  %7346 = vrot.lane.b32.xlu1 %v14623_v0, %s12109_s14  ;;  %v7083_v34 = vor.u32 %v7081_v18, %v7079_v8  ;;  %v7111_v18 = vrot.slane %v7109_v33, 1 }
 0x427   : > { %v7095_v45 = vrot.slane %v7093_v46, 1 }
 0x428   : > { %v14629_v63 = vpop.permute.xlu0 %6725  ;;  %v14631_v1 = vpop.permute.xlu1 %6723  ;;  %v14648_v10 = vsel %vm4189_vm2, %v7083_v34, %v7087_v12  ;;  %v7115_v47 = vor.u32 %v7113_v24, %v7111_v18  ;;  %v11945_v24 = vld [vmem:[#allocation2 + $0x190] sm:$0xff] }
 0x429   : > { %19654 = vst [vmem:[#allocation199_spill] sm:$0xff] %v14629_v63  ;;  %19655 = vst [vmem:[#allocation200_spill] sm:$0xff] %v14631_v1  ;;  %v14651_v1 = vsel %vm4189_vm2, %v7075_v28, %v7079_v8  ;;  %v7099_v46 = vor.u32 %v7097_v17, %v7095_v45  ;;  %v7119_v8 = vrot.slane %v7117_v20, 1  ;;  %v14665_v12 = vsel %vm4189_vm2, %v7091_v59, %v7095_v45 }
 0x42a   : > { %7352 = vrot.lane.b32.xlu0 %v14634_v32, %s12109_s14  ;;  %7350 = vrot.lane.b32.xlu1 %v14637_v21, %s12109_s14  ;;  %v7107_v28 = vor.u32 %v7105_v14, %v7103_v60  ;;  %v7121_v17 = vshrl.u32 %v11940_v55, 16  ;;  %v7141_v20 = vshll.u32 %v11943_v44, 16  ;;  %v7135_v14 = vrot.slane %v7133_v19, 1  ;;  %v11946_v19 = vld [vmem:[#allocation2 + $0x198] sm:$0xff] }
 0x42b   : > { %v14662_v7 = vsel %vm4189_vm2, %v7099_v46, %v7103_v60  ;;  %v14676_v59 = vsel %vm4189_vm2, %v7115_v47, %v7119_v8  ;;  %v7129_v60 = vshrl.u32 %v11941_v5, 16  ;;  %v7137_v47 = vshrl.u32 %v11942_v54, 16 }
 0x42c   : > { %v14643_v63 = vpop.permute.xlu0 %6729  ;;  %v14645_v42 = vpop.permute.xlu1 %6727  ;;  %19660 = vst [vmem:[#allocation205_spill] sm:$0xff] %v14662_v7  ;;  %19663 = vst [vmem:[#allocation208_spill] sm:$0xff] %v14676_v59  ;;  %v14679_v45 = vsel %vm4189_vm2, %v7107_v28, %v7111_v18  ;;  %v7145_v18 = vshrl.u32 %v11943_v44, 16  ;;  %v11947_v44 = vld [vmem:[#allocation2 + $0x1a0] sm:$0xff] }
 0x42d   : > { %19656 = vst [vmem:[#allocation201_spill] sm:$0xff] %v14643_v63  ;;  %19657 = vst [vmem:[#allocation202_spill] sm:$0xff] %v14645_v42  ;;  %v7125_v63 = vshll.u32 %v11941_v5, 16 }
 0x42e   : > { %7356 = vrot.lane.b32.xlu0 %v14648_v10, %s12109_s14  ;;  %7354 = vrot.lane.b32.xlu1 %v14651_v1, %s12109_s14  ;;  %19664 = vst [vmem:[#allocation209_spill] sm:$0xff] %v14679_v45 }
 0x42f   : > { %v7127_v33 = vrot.slane %v7125_v63, 1  ;;  %v7157_v63 = vshll.u32 %v11945_v24, 16 }
 0x430   : > { %v14657_v42 = vpop.permute.xlu0 %6733  ;;  %v14659_v34 = vpop.permute.xlu1 %6731 }
 0x431   : > { %19658 = vst [vmem:[#allocation203_spill] sm:$0xff] %v14657_v42  ;;  %19659 = vst [vmem:[#allocation204_spill] sm:$0xff] %v14659_v34  ;;  %v7123_v34 = vor.u32 %v7121_v17, %v7119_v8  ;;  %v7131_v55 = vor.u32 %v7129_v60, %v7127_v33  ;;  %v7165_v8 = vshll.u32 %v11946_v19, 16  ;;  %v7159_v54 = vrot.slane %v7157_v63, 1 }
 0x432   : > { %7360 = vrot.lane.b32.xlu0 %v14662_v7, %s12109_s14  ;;  %7358 = vrot.lane.b32.xlu1 %v14665_v12, %s12109_s14  ;;  %v7139_v7 = vor.u32 %v7137_v47, %v7135_v14  ;;  %v7153_v60 = vshrl.u32 %v11944_v53, 16  ;;  %v11948_v47 = vld [vmem:[#allocation2 + $0x1a8] sm:$0xff] }
 0x433   : > { %v14690_v28 = vsel %vm4189_vm2, %v7131_v55, %v7135_v14  ;;  %v14693_v17 = vsel %vm4189_vm2, %v7123_v34, %v7127_v33  ;;  %v7167_v34 = vrot.slane %v7165_v8, 1 }
 0x434   : > { %v14671_v42 = vpop.permute.xlu0 %6737  ;;  %v14673_v46 = vpop.permute.xlu1 %6735  ;;  %19667 = vst [vmem:[#allocation212_spill] sm:$0xff] %v14690_v28  ;;  %19668 = vst [vmem:[#allocation213_spill] sm:$0xff] %v14693_v17 }
 0x435   : > { %19661 = vst [vmem:[#allocation206_spill] sm:$0xff] %v14671_v42  ;;  %19662 = vst [vmem:[#allocation207_spill] sm:$0xff] %v14673_v46  ;;  %v7143_v42 = vrot.slane %v7141_v20, 1 }
 0x436   : > { %7364 = vrot.lane.b32.xlu0 %v14676_v59, %s12109_s14  ;;  %7362 = vrot.lane.b32.xlu1 %v14679_v45, %s12109_s14  ;;  %v7151_v59 = vrot.slane %v7149_v40, 1  ;;  %v7161_v45 = vshrl.u32 %v11945_v24, 16  ;;  %v11949_v24 = vld [vmem:[#allocation2 + $0x1b0] sm:$0xff] }
 0x437   : > { %v7147_v20 = vor.u32 %v7145_v18, %v7143_v42  ;;  %v14707_v33 = vsel %vm4189_vm2, %v7139_v7, %v7143_v42  ;;  %v7169_v18 = vshrl.u32 %v11946_v19, 16  ;;  %v7189_v8 = vshll.u32 %v11949_v24, 16 }
 0x438   : > { %v14685_v46 = vpop.permute.xlu0 %6741  ;;  %v14687_v5 = vpop.permute.xlu1 %6739  ;;  %19672 = vst [vmem:[#allocation217_spill] sm:$0xff] %v14707_v33  ;;  %v7155_v14 = vor.u32 %v7153_v60, %v7151_v59  ;;  %v7163_v53 = vor.u32 %v7161_v45, %v7159_v54  ;;  %v7177_v7 = vshrl.u32 %v11947_v44, 16  ;;  %v7185_v19 = vshrl.u32 %v11948_v47, 16 }
 0x439   : > { %19665 = vst [vmem:[#allocation210_spill] sm:$0xff] %v14685_v46  ;;  %19666 = vst [vmem:[#allocation211_spill] sm:$0xff] %v14687_v5  ;;  %v7173_v46 = vshll.u32 %v11947_v44, 16  ;;  %v14704_v40 = vsel %vm4189_vm2, %v7147_v20, %v7151_v59  ;;  %v7191_v45 = vrot.slane %v7189_v8, 1 }
 0x43a   : > { %7368 = vrot.lane.b32.xlu0 %v14690_v28, %s12109_s14  ;;  %7366 = vrot.lane.b32.xlu1 %v14693_v17, %s12109_s14  ;;  %19671 = vst [vmem:[#allocation216_spill] sm:$0xff] %v14704_v40  ;;  %v7181_v28 = vshll.u32 %v11948_v47, 16  ;;  %v14718_v42 = vsel %vm4189_vm2, %v7163_v53, %v7167_v34  ;;  %v14721_v59 = vsel %vm4189_vm2, %v7155_v14, %v7159_v54  ;;  %v7193_v54 = vshrl.u32 %v11949_v24, 16  ;;  %v11953_v24 = vld [vmem:[#allocation2 + $0x1d0] sm:$0xff] }
 0x43b   : > { %v7175_v63 = vrot.slane %v7173_v46, 1  ;;  %19675 = vst [vmem:[#allocation220_spill] sm:$0xff] %v14718_v42  ;;  %19676 = vst [vmem:[#allocation221_spill] sm:$0xff] %v14721_v59 }
 0x43c   : > { %v14699_v5 = vpop.permute.xlu0 %6745  ;;  %v14701_v55 = vpop.permute.xlu1 %6743  ;;  %v7183_v60 = vrot.slane %v7181_v28, 1  ;;  %v11952_v28 = vld [vmem:[#allocation2 + $0x1c8] sm:$0xff]  ;;  %v7195_v47 = vor.u32 %v7193_v54, %v7191_v45 }
 0x43d   : > { %19669 = vst [vmem:[#allocation214_spill] sm:$0xff] %v14699_v5  ;;  %19670 = vst [vmem:[#allocation215_spill] sm:$0xff] %v14701_v55  ;;  %v7171_v55 = vor.u32 %v7169_v18, %v7167_v34  ;;  %v7179_v46 = vor.u32 %v7177_v7, %v7175_v63  ;;  %v7213_v34 = vshll.u32 %v11952_v28, 16 }
 0x43e   : > { %7372 = vrot.lane.b32.xlu0 %v14704_v40, %s12109_s14  ;;  %7370 = vrot.lane.b32.xlu1 %v14707_v33, %s12109_s14  ;;  %v11950_v40 = vld [vmem:[#allocation2 + $0x1b8] sm:$0xff] }
 0x43f   : > { %v7197_v33 = vshll.u32 %v11950_v40, 16  ;;  %v14732_v14 = vsel %vm4189_vm2, %v7179_v46, %v7183_v60  ;;  %v14735_v18 = vsel %vm4189_vm2, %v7171_v55, %v7175_v63  ;;  %v7201_v7 = vshrl.u32 %v11950_v40, 16 }
 0x440   : > { %v14713_v5 = vpop.permute.xlu0 %6749  ;;  %v14715_v20 = vpop.permute.xlu1 %6747  ;;  %19679 = vst [vmem:[#allocation224_spill] sm:$0xff] %v14732_v14  ;;  %v7215_v55 = vrot.slane %v7213_v34, 1  ;;  %v7217_v40 = vshrl.u32 %v11952_v28, 16 }
 0x441   : > { %19673 = vst [vmem:[#allocation218_spill] sm:$0xff] %v14713_v5  ;;  %19674 = vst [vmem:[#allocation219_spill] sm:$0xff] %v14715_v20  ;;  %v11951_v5 = vld [vmem:[#allocation2 + $0x1c0] sm:$0xff] }
 0x442   : > { %7376 = vrot.lane.b32.xlu0 %v14718_v42, %s12109_s14  ;;  %7374 = vrot.lane.b32.xlu1 %v14721_v59, %s12109_s14  ;;  %v7205_v53 = vshll.u32 %v11951_v5, 16  ;;  %v7199_v42 = vrot.slane %v7197_v33, 1  ;;  %v7187_v59 = vor.u32 %v7185_v19, %v7183_v60  ;;  %v7209_v17 = vshrl.u32 %v11951_v5, 16  ;;  %v11954_v19 = vld [vmem:[#allocation2 + $0x1d8] sm:$0xff]  ;;  %v11955_v5 = vld [vmem:[#allocation2 + $0x1e0] sm:$0xff] }
 0x443   : > { %v7237_v34 = vshll.u32 %v11955_v5, 16  ;;  %v7233_v28 = vshrl.u32 %v11954_v19, 16 }
 0x444   : > { %v14727_v20 = vpop.permute.xlu0 %6753  ;;  %v14729_v44 = vpop.permute.xlu1 %6751  ;;  %v7207_v8 = vrot.slane %v7205_v53, 1  ;;  %v14746_v33 = vsel %vm4189_vm2, %v7195_v47, %v7199_v42  ;;  %v14749_v63 = vsel %vm4189_vm2, %v7187_v59, %v7191_v45  ;;  %v7203_v60 = vor.u32 %v7201_v7, %v7199_v42 }
 0x445   : > { %19677 = vst [vmem:[#allocation222_spill] sm:$0xff] %v14727_v20  ;;  %19678 = vst [vmem:[#allocation223_spill] sm:$0xff] %v14729_v44  ;;  %v7221_v20 = vshll.u32 %v11953_v24, 16  ;;  %v7225_v59 = vshrl.u32 %v11953_v24, 16  ;;  %v7219_v45 = vor.u32 %v7217_v40, %v7215_v55  ;;  %v11957_v24 = vld [vmem:[#allocation2 + $0x1f0] sm:$0xff] }
 0x446   : > { %7380 = vrot.lane.b32.xlu0 %v14732_v14, %s12109_s14  ;;  %7378 = vrot.lane.b32.xlu1 %v14735_v18, %s12109_s14  ;;  %19682 = vst [vmem:[#allocation227_spill] sm:$0xff] %v14746_v33  ;;  %19683 = vst [vmem:[#allocation228_spill] sm:$0xff] %v14749_v63  ;;  %v7229_v14 = vshll.u32 %v11954_v19, 16  ;;  %v7211_v53 = vor.u32 %v7209_v17, %v7207_v8  ;;  %v14763_v7 = vsel %vm4189_vm2, %v7203_v60, %v7207_v8 }
 0x447   : > { %v7223_v54 = vrot.slane %v7221_v20, 1  ;;  %19687 = vst [vmem:[#allocation232_spill] sm:$0xff] %v14763_v7  ;;  %v7239_v20 = vrot.slane %v7237_v34, 1  ;;  %v7253_v40 = vshll.u32 %v11957_v24, 16 }
 0x448   : > { %v14741_v44 = vpop.permute.xlu0 %6757  ;;  %v14743_v46 = vpop.permute.xlu1 %6755  ;;  %v14760_v42 = vsel %vm4189_vm2, %v7211_v53, %v7215_v55 }
 0x449   : > { %19680 = vst [vmem:[#allocation225_spill] sm:$0xff] %v14741_v44  ;;  %19681 = vst [vmem:[#allocation226_spill] sm:$0xff] %v14743_v46  ;;  %v7231_v46 = vrot.slane %v7229_v14, 1  ;;  %v7227_v17 = vor.u32 %v7225_v59, %v7223_v54  ;;  %v14774_v8 = vsel %vm4189_vm2, %v7219_v45, %v7223_v54  ;;  %v7241_v14 = vshrl.u32 %v11955_v5, 16  ;;  %v11959_v45 = vld [vmem:[#allocation2 + $0x200] sm:$0xff] }
 0x44a   : > { %7384 = vrot.lane.b32.xlu0 %v14746_v33, %s12109_s14  ;;  %7382 = vrot.lane.b32.xlu1 %v14749_v63, %s12109_s14  ;;  %19686 = vst [vmem:[#allocation231_spill] sm:$0xff] %v14760_v42  ;;  %v11956_v33 = vld [vmem:[#allocation2 + $0x1e8] sm:$0xff]  ;;  %v7255_v34 = vrot.slane %v7253_v40, 1  ;;  %v7257_v5 = vshrl.u32 %v11957_v24, 16 }
 0x44b   : > { %v7245_v63 = vshll.u32 %v11956_v33, 16  ;;  %v14777_v60 = vsel %vm4189_vm2, %v7227_v17, %v7231_v46  ;;  %v7243_v19 = vor.u32 %v7241_v14, %v7239_v20  ;;  %v7249_v59 = vshrl.u32 %v11956_v33, 16 }
 0x44c   : > { %v14755_v44 = vpop.permute.xlu0 %6761  ;;  %v14757_v47 = vpop.permute.xlu1 %6759  ;;  %v7269_v17 = vshll.u32 %v11959_v45, 16  ;;  %v7259_v33 = vor.u32 %v7257_v5, %v7255_v34 }
 0x44d   : > { %19684 = vst [vmem:[#allocation229_spill] sm:$0xff] %v14755_v44  ;;  %19685 = vst [vmem:[#allocation230_spill] sm:$0xff] %v14757_v47  ;;  %v7247_v53 = vrot.slane %v7245_v63, 1  ;;  %v7235_v47 = vor.u32 %v7233_v28, %v7231_v46 }
 0x44e   : > { %7388 = vrot.lane.b32.xlu0 %v14760_v42, %s12109_s14  ;;  %7386 = vrot.lane.b32.xlu1 %v14763_v7, %s12109_s14  ;;  %v11958_v42 = vld [vmem:[#allocation2 + $0x1f8] sm:$0xff]  ;;  %v7271_v14 = vrot.slane %v7269_v17, 1 }
 0x44f   : > { %v7261_v7 = vshll.u32 %v11958_v42, 16  ;;  %v14788_v46 = vsel %vm4189_vm2, %v7243_v19, %v7247_v53  ;;  %v14791_v63 = vsel %vm4189_vm2, %v7235_v47, %v7239_v20  ;;  %v7273_v20 = vshrl.u32 %v11959_v45, 16 }
 0x450   : > { %v14769_v44 = vpop.permute.xlu0 %7276  ;;  %v14771_v55 = vpop.permute.xlu1 %6763  ;;  %19692 = vst [vmem:[#allocation237_spill] sm:$0xff] %v14788_v46  ;;  %19693 = vst [vmem:[#allocation238_spill] sm:$0xff] %v14791_v63 }
 0x451   : > { %19688 = vst [vmem:[#allocation233_spill] sm:$0xff] %v14769_v44  ;;  %19689 = vst [vmem:[#allocation234_spill] sm:$0xff] %v14771_v55  ;;  %v7263_v28 = vrot.slane %v7261_v7, 1  ;;  %v7251_v44 = vor.u32 %v7249_v59, %v7247_v53  ;;  %v7265_v7 = vshrl.u32 %v11958_v42, 16  ;;  %v14815_v17 = vor.u32 %v7273_v20, %v7271_v14 }
 0x452   : > { %7392 = vrot.lane.b32.xlu0 %v14777_v60, %s12109_s14  ;;  %7390 = vrot.lane.b32.xlu1 %v14774_v8, %s12109_s14 }
 0x453   : > { %v14802_v19 = vsel %vm4189_vm2, %v7259_v33, %v7263_v28  ;;  %v14805_v47 = vsel %vm4189_vm2, %v7251_v44, %v7255_v34  ;;  %v7267_v53 = vor.u32 %v7265_v7, %v7263_v28 }
 0x454   : > { %v14783_v55 = vpop.permute.xlu0 %7280  ;;  %v14785_v54 = vpop.permute.xlu1 %7278  ;;  %19696 = vst [vmem:[#allocation241_spill] sm:$0xff] %v14802_v19  ;;  %19697 = vst [vmem:[#allocation242_spill] sm:$0xff] %v14805_v47 }
 0x455   : > { %19690 = vst [vmem:[#allocation235_spill] sm:$0xff] %v14783_v55  ;;  %19691 = vst [vmem:[#allocation236_spill] sm:$0xff] %v14785_v54  ;;  %v14818_v33 = vsel %vm4189_vm2, %v7267_v53, %v7271_v14  ;;  %v19756_v55 = vld [vmem:[#allocation216_spill] sm:$0xff] }
 0x456   : > { %7396 = vrot.lane.b32.xlu0 %v14788_v46, %s12109_s14  ;;  %7394 = vrot.lane.b32.xlu1 %v14791_v63, %s12109_s14  ;;  %19700 = vst [vmem:[#allocation245_spill] sm:$0xff] %v14818_v33 }
 0x458   : > { %v14797_v40 = vpop.permute.xlu0 %7284  ;;  %v14799_v24 = vpop.permute.xlu1 %7282 }
 0x459   : > { %19694 = vst [vmem:[#allocation239_spill] sm:$0xff] %v14797_v40  ;;  %19695 = vst [vmem:[#allocation240_spill] sm:$0xff] %v14799_v24  ;;  %v19748_v40 = vld [vmem:[#allocation208_spill] sm:$0xff] }
 0x45a   : > { %7400 = vrot.lane.b32.xlu0 %v14802_v19, %s12109_s14  ;;  %7398 = vrot.lane.b32.xlu1 %v14805_v47, %s12109_s14 }
 0x45c   : > { %v14811_v59 = vpop.permute.xlu0 %7288  ;;  %v14813_v5 = vpop.permute.xlu1 %7286 }
 0x45d   : > { %19698 = vst [vmem:[#allocation243_spill] sm:$0xff] %v14811_v59  ;;  %19699 = vst [vmem:[#allocation244_spill] sm:$0xff] %v14813_v5 }
 0x45e   : > { %7404 = vrot.lane.b32.xlu0 %v14815_v17, %s12109_s14  ;;  %7402 = vrot.lane.b32.xlu1 %v14818_v33, %s12109_s14  ;;  %s12116_s14 = smov 48  }
 0x460   : > { %v14824_v44 = vpop.permute.xlu0 %7292  ;;  %v14826_v42 = vpop.permute.xlu1 %7290 }
 0x461   : > { %19701 = vst [vmem:[#allocation246_spill] sm:$0xff] %v14824_v44  ;;  %19702 = vst [vmem:[#allocation247_spill] sm:$0xff] %v14826_v42 }
 0x462   : > { %7424 = vrot.lane.b32.xlu0 %v19617_v35, %s12110_s15  ;;  %7422 = vrot.lane.b32.xlu1 %v19612_v3, %s12110_s15 }
 0x464   : > { %v14832_v34 = vpop.permute.xlu0 %7296  ;;  %v14834_v45 = vpop.permute.xlu1 %7294 }
 0x465   : > { %19703 = vst [vmem:[#allocation248_spill] sm:$0xff] %v14832_v34  ;;  %19704 = vst [vmem:[#allocation249_spill] sm:$0xff] %v14834_v45 }
 0x466   : > { %7428 = vrot.lane.b32.xlu0 %v19621_v29, %s12110_s15  ;;  %7426 = vrot.lane.b32.xlu1 %v14407_v11, %s12110_s15 }
 0x468   : > { %v14840_v28 = vpop.permute.xlu0 %7300  ;;  %v14842_v14 = vpop.permute.xlu1 %7298 }
 0x469   : > { %19705 = vst [vmem:[#allocation250_spill] sm:$0xff] %v14840_v28  ;;  %19706 = vst [vmem:[#allocation251_spill] sm:$0xff] %v14842_v14 }
 0x46a   : > { %7432 = vrot.lane.b32.xlu0 %v19625_v2, %s12110_s15  ;;  %7430 = vrot.lane.b32.xlu1 %v19620_v51, %s12110_s15 }
 0x46c   : > { %v14848_v3 = vpop.permute.xlu0 %7304  ;;  %v14850_v35 = vpop.permute.xlu1 %7302 }
 0x46d   : > { %19707 = vst [vmem:[#allocation252_spill] sm:$0xff] %v14848_v3  ;;  %19708 = vst [vmem:[#allocation253_spill] sm:$0xff] %v14850_v35 }
 0x46e   : > { %7436 = vrot.lane.b32.xlu0 %v14441_v36, %s12110_s15  ;;  %7434 = vrot.lane.b32.xlu1 %v14427_v43, %s12110_s15 }
 0x470   : > { %v14856_v11 = vpop.permute.xlu0 %7308  ;;  %v14858_v7 = vpop.permute.xlu1 %7306 }
 0x471   : > { %19709 = vst [vmem:[#allocation254_spill] sm:$0xff] %v14856_v11  ;;  %19710 = vst [vmem:[#allocation255_spill] sm:$0xff] %v14858_v7 }
 0x472   : > { %7440 = vrot.lane.b32.xlu0 %v14455_v48, %s12110_s15  ;;  %7438 = vrot.lane.b32.xlu1 %v14438_v56, %s12110_s15 }
 0x474   : > { %v14864_v20 = vpop.permute.xlu0 %7312  ;;  %v14866_v53 = vpop.permute.xlu1 %7310 }
 0x475   : > { %19711 = vst [vmem:[#allocation256_spill] sm:$0xff] %v14864_v20  ;;  %19712 = vst [vmem:[#allocation257_spill] sm:$0xff] %v14866_v53 }
 0x476   : > { %7444 = vrot.lane.b32.xlu0 %v14469_v52, %s12110_s15  ;;  %7442 = vrot.lane.b32.xlu1 %v14452_v50, %s12110_s15 }
 0x478   : > { %v14872_v3 = vpop.permute.xlu0 %7316  ;;  %v14874_v11 = vpop.permute.xlu1 %7314 }
 0x479   : > { %19713 = vst [vmem:[#allocation258_spill] sm:$0xff] %v14872_v3  ;;  %19714 = vst [vmem:[#allocation259_spill] sm:$0xff] %v14874_v11 }
 0x47a   : > { %7448 = vrot.lane.b32.xlu0 %v14483_v57, %s12110_s15  ;;  %7446 = vrot.lane.b32.xlu1 %v14466_v15, %s12110_s15 }
 0x47c   : > { %v14880_v7 = vpop.permute.xlu0 %7320  ;;  %v14882_v20 = vpop.permute.xlu1 %7318 }
 0x47d   : > { %19715 = vst [vmem:[#allocation260_spill] sm:$0xff] %v14880_v7  ;;  %19716 = vst [vmem:[#allocation261_spill] sm:$0xff] %v14882_v20 }
 0x47e   : > { %7452 = vrot.lane.b32.xlu0 %v14497_v58, %s12110_s15  ;;  %7450 = vrot.lane.b32.xlu1 %v14480_v6, %s12110_s15 }
 0x480   : > { %v14888_v53 = vpop.permute.xlu0 %7324  ;;  %v14890_v3 = vpop.permute.xlu1 %7322 }
 0x481   : > { %19717 = vst [vmem:[#allocation262_spill] sm:$0xff] %v14888_v53  ;;  %19718 = vst [vmem:[#allocation263_spill] sm:$0xff] %v14890_v3 }
 0x482   : > { %7456 = vrot.lane.b32.xlu0 %v14511_v4, %s12110_s15  ;;  %7454 = vrot.lane.b32.xlu1 %v14494_v62, %s12110_s15 }
 0x484   : > { %v14896_v11 = vpop.permute.xlu0 %7328  ;;  %v14898_v7 = vpop.permute.xlu1 %7326 }
 0x485   : > { %19719 = vst [vmem:[#allocation264_spill] sm:$0xff] %v14896_v11  ;;  %19720 = vst [vmem:[#allocation265_spill] sm:$0xff] %v14898_v7 }
 0x486   : > { %7460 = vrot.lane.b32.xlu0 %v14525_v16, %s12110_s15  ;;  %7458 = vrot.lane.b32.xlu1 %v14508_v9, %s12110_s15 }
 0x488   : > { %v14904_v20 = vpop.permute.xlu0 %7332  ;;  %v14906_v53 = vpop.permute.xlu1 %7330 }
 0x489   : > { %19721 = vst [vmem:[#allocation266_spill] sm:$0xff] %v14904_v20  ;;  %19722 = vst [vmem:[#allocation267_spill] sm:$0xff] %v14906_v53 }
 0x48a   : > { %7464 = vrot.lane.b32.xlu0 %v14539_v39, %s12110_s15  ;;  %7462 = vrot.lane.b32.xlu1 %v14522_v13, %s12110_s15 }
 0x48c   : > { %v14912_v3 = vpop.permute.xlu0 %7336  ;;  %v14914_v11 = vpop.permute.xlu1 %7334 }
 0x48d   : > { %19723 = vst [vmem:[#allocation268_spill] sm:$0xff] %v14912_v3  ;;  %19724 = vst [vmem:[#allocation269_spill] sm:$0xff] %v14914_v11  ;;  %v19767_v3 = vld [vmem:[#allocation227_spill] sm:$0xff] }
 0x48e   : > { %7468 = vrot.lane.b32.xlu0 %v14553_v26, %s12110_s15  ;;  %7466 = vrot.lane.b32.xlu1 %v14536_v37, %s12110_s15 }
 0x490   : > { %v14920_v7 = vpop.permute.xlu0 %7340  ;;  %v14922_v20 = vpop.permute.xlu1 %7338 }
 0x491   : > { %19725 = vst [vmem:[#allocation270_spill] sm:$0xff] %v14920_v7  ;;  %19726 = vst [vmem:[#allocation271_spill] sm:$0xff] %v14922_v20 }
 0x492   : > { %7472 = vrot.lane.b32.xlu0 %v14567_v38, %s12110_s15  ;;  %7470 = vrot.lane.b32.xlu1 %v14550_v41, %s12110_s15 }
 0x494   : > { %v14928_v53 = vpop.permute.xlu0 %7344  ;;  %v14930_v35 = vpop.permute.xlu1 %7342 }
 0x495   : > { %19727 = vst [vmem:[#allocation272_spill] sm:$0xff] %v14928_v53  ;;  %19728 = vst [vmem:[#allocation273_spill] sm:$0xff] %v14930_v35  ;;  %v19763_v53 = vld [vmem:[#allocation224_spill] sm:$0xff] }
 0x496   : > { %7476 = vrot.lane.b32.xlu0 %v14581_v22, %s12110_s15  ;;  %7474 = vrot.lane.b32.xlu1 %v14564_v31, %s12110_s15 }
 0x498   : > { %v14936_v11 = vpop.permute.xlu0 %7348  ;;  %v14938_v28 = vpop.permute.xlu1 %7346 }
 0x499   : > { %19729 = vst [vmem:[#allocation274_spill] sm:$0xff] %v14936_v11  ;;  %19730 = vst [vmem:[#allocation275_spill] sm:$0xff] %v14938_v28  ;;  %v19752_v11 = vld [vmem:[#allocation212_spill] sm:$0xff] }
 0x49a   : > { %7480 = vrot.lane.b32.xlu0 %v14595_v25, %s12110_s15  ;;  %7478 = vrot.lane.b32.xlu1 %v14578_v30, %s12110_s15 }
 0x49c   : > { %v14944_v14 = vpop.permute.xlu0 %7352  ;;  %v14946_v34 = vpop.permute.xlu1 %7350 }
 0x49d   : > { %19731 = vst [vmem:[#allocation276_spill] sm:$0xff] %v14944_v14  ;;  %19732 = vst [vmem:[#allocation277_spill] sm:$0xff] %v14946_v34  ;;  %v19744_v14 = vld [vmem:[#allocation205_spill] sm:$0xff] }
 0x49e   : > { %7484 = vrot.lane.b32.xlu0 %v14609_v49, %s12110_s15  ;;  %7482 = vrot.lane.b32.xlu1 %v14592_v23, %s12110_s15 }
 0x4a0   : > { %v14952_v45 = vpop.permute.xlu0 %7356  ;;  %v14954_v44 = vpop.permute.xlu1 %7354 }
 0x4a1   : > { %19733 = vst [vmem:[#allocation278_spill] sm:$0xff] %v14952_v45  ;;  %19734 = vst [vmem:[#allocation279_spill] sm:$0xff] %v14954_v44 }
 0x4a2   : > { %7488 = vrot.lane.b32.xlu0 %v14623_v0, %s12110_s15  ;;  %7486 = vrot.lane.b32.xlu1 %v14606_v61, %s12110_s15 }
 0x4a4   : > { %v14960_v42 = vpop.permute.xlu0 %7360  ;;  %v14962_v59 = vpop.permute.xlu1 %7358 }
 0x4a5   : > { %19735 = vst [vmem:[#allocation280_spill] sm:$0xff] %v14960_v42  ;;  %19736 = vst [vmem:[#allocation281_spill] sm:$0xff] %v14962_v59 }
 0x4a6   : > { %7492 = vrot.lane.b32.xlu0 %v14637_v21, %s12110_s15  ;;  %7490 = vrot.lane.b32.xlu1 %v14620_v27, %s12110_s15 }
 0x4a8   : > { %v14968_v5 = vpop.permute.xlu0 %7364  ;;  %v14970_v45 = vpop.permute.xlu1 %7362 }
 0x4a9   : > { %19737 = vst [vmem:[#allocation282_spill] sm:$0xff] %v14968_v5  ;;  %19738 = vst [vmem:[#allocation283_spill] sm:$0xff] %v14970_v45  ;;  %v19743_v45 = vld [vmem:[#allocation209_spill] sm:$0xff] }
 0x4aa   : > { %7496 = vrot.lane.b32.xlu0 %v14651_v1, %s12110_s15  ;;  %7494 = vrot.lane.b32.xlu1 %v14634_v32, %s12110_s15 }
 0x4ac   : > { %v14976_v44 = vpop.permute.xlu0 %7368  ;;  %v14978_v42 = vpop.permute.xlu1 %7366 }
 0x4ad   : > { %19739 = vst [vmem:[#allocation284_spill] sm:$0xff] %v14976_v44  ;;  %19740 = vst [vmem:[#allocation285_spill] sm:$0xff] %v14978_v42  ;;  %v19747_v42 = vld [vmem:[#allocation213_spill] sm:$0xff] }
 0x4ae   : > { %7500 = vrot.lane.b32.xlu0 %v14665_v12, %s12110_s15  ;;  %7498 = vrot.lane.b32.xlu1 %v14648_v10, %s12110_s15 }
 0x4b0   : > { %v14984_v59 = vpop.permute.xlu0 %7372  ;;  %v14986_v5 = vpop.permute.xlu1 %7370 }
 0x4b1   : > { %19741 = vst [vmem:[#allocation286_spill] sm:$0xff] %v14984_v59  ;;  %19742 = vst [vmem:[#allocation287_spill] sm:$0xff] %v14986_v5  ;;  %v19751_v5 = vld [vmem:[#allocation217_spill] sm:$0xff] }
 0x4b2   : > { %7504 = vrot.lane.b32.xlu0 %v19743_v45, %s12110_s15  ;;  %7502 = vrot.lane.b32.xlu1 %v19744_v14, %s12110_s15 }
 0x4b4   : > { %v14992_v34 = vpop.permute.xlu0 %7376  ;;  %v14994_v44 = vpop.permute.xlu1 %7374 }
 0x4b5   : > { %19745 = vst [vmem:[#allocation209_spill] sm:$0xff] %v14992_v34  ;;  %19746 = vst [vmem:[#allocation205_spill] sm:$0xff] %v14994_v44  ;;  %v19755_v44 = vld [vmem:[#allocation221_spill] sm:$0xff] }
 0x4b6   : > { %7508 = vrot.lane.b32.xlu0 %v19747_v42, %s12110_s15  ;;  %7506 = vrot.lane.b32.xlu1 %v19748_v40, %s12110_s15 }
 0x4b8   : > { %v15000_v24 = vpop.permute.xlu0 %7380  ;;  %v15002_v59 = vpop.permute.xlu1 %7378 }
 0x4b9   : > { %19749 = vst [vmem:[#allocation213_spill] sm:$0xff] %v15000_v24  ;;  %19750 = vst [vmem:[#allocation208_spill] sm:$0xff] %v15002_v59  ;;  %v19759_v59 = vld [vmem:[#allocation220_spill] sm:$0xff] }
 0x4ba   : > { %7512 = vrot.lane.b32.xlu0 %v19751_v5, %s12110_s15  ;;  %7510 = vrot.lane.b32.xlu1 %v19752_v11, %s12110_s15 }
 0x4bc   : > { %v15008_v28 = vpop.permute.xlu0 %7384  ;;  %v15010_v34 = vpop.permute.xlu1 %7382 }
 0x4bd   : > { %19753 = vst [vmem:[#allocation217_spill] sm:$0xff] %v15008_v28  ;;  %19754 = vst [vmem:[#allocation212_spill] sm:$0xff] %v15010_v34  ;;  %v19762_v34 = vld [vmem:[#allocation228_spill] sm:$0xff] }
 0x4be   : > { %7516 = vrot.lane.b32.xlu0 %v19755_v44, %s12110_s15  ;;  %7514 = vrot.lane.b32.xlu1 %v19756_v55, %s12110_s15 }
 0x4c0   : > { %v15016_v54 = vpop.permute.xlu0 %7388  ;;  %v15018_v24 = vpop.permute.xlu1 %7386 }
 0x4c1   : > { %19757 = vst [vmem:[#allocation221_spill] sm:$0xff] %v15016_v54  ;;  %19758 = vst [vmem:[#allocation216_spill] sm:$0xff] %v15018_v24  ;;  %v19766_v24 = vld [vmem:[#allocation232_spill] sm:$0xff] }
 0x4c2   : > { %7520 = vrot.lane.b32.xlu0 %v14735_v18, %s12110_s15  ;;  %7518 = vrot.lane.b32.xlu1 %v19759_v59, %s12110_s15 }
 0x4c4   : > { %v15024_v35 = vpop.permute.xlu0 %7392  ;;  %v15026_v28 = vpop.permute.xlu1 %7390 }
 0x4c5   : > { %19760 = vst [vmem:[#allocation220_spill] sm:$0xff] %v15024_v35  ;;  %19761 = vst [vmem:[#allocation288_spill] sm:$0xff] %v15026_v28  ;;  %v19770_v28 = vld [vmem:[#allocation231_spill] sm:$0xff] }
 0x4c6   : > { %7524 = vrot.lane.b32.xlu0 %v19762_v34, %s12110_s15  ;;  %7522 = vrot.lane.b32.xlu1 %v19763_v53, %s12110_s15 }
 0x4c8   : > { %v15032_v7 = vpop.permute.xlu0 %7396  ;;  %v15034_v54 = vpop.permute.xlu1 %7394 }
 0x4c9   : > { %19764 = vst [vmem:[#allocation224_spill] sm:$0xff] %v15032_v7  ;;  %19765 = vst [vmem:[#allocation289_spill] sm:$0xff] %v15034_v54 }
 0x4ca   : > { %7528 = vrot.lane.b32.xlu0 %v19766_v24, %s12110_s15  ;;  %7526 = vrot.lane.b32.xlu1 %v19767_v3, %s12110_s15 }
 0x4cc   : > { %v15040_v20 = vpop.permute.xlu0 %7400  ;;  %v15042_v35 = vpop.permute.xlu1 %7398 }
 0x4cd   : > { %19768 = vst [vmem:[#allocation232_spill] sm:$0xff] %v15040_v20  ;;  %19769 = vst [vmem:[#allocation227_spill] sm:$0xff] %v15042_v35 }
 0x4ce   : > { %7532 = vrot.lane.b32.xlu0 %v14774_v8, %s12110_s15  ;;  %7530 = vrot.lane.b32.xlu1 %v19770_v28, %s12110_s15 }
 0x4d0   : > { %v15048_v34 = vpop.permute.xlu0 %7404  ;;  %v15050_v7 = vpop.permute.xlu1 %7402 }
 0x4d1   : > { %19771 = vst [vmem:[#allocation231_spill] sm:$0xff] %v15048_v34  ;;  %19772 = vst [vmem:[#allocation290_spill] sm:$0xff] %v15050_v7 }
 0x4d2   : > { %7536 = vrot.lane.b32.xlu0 %v14791_v63, %s12110_s15  ;;  %7534 = vrot.lane.b32.xlu1 %v14777_v60, %s12110_s15  ;;  %v19780_v63 = vld [vmem:[#allocation8_spill] sm:$0xff] }
 0x4d4   : > { %v15056_v54 = vpop.permute.xlu0 %7424  ;;  %v15058_v20 = vpop.permute.xlu1 %7422 }
 0x4d5   : > { %19773 = vst [vmem:[#allocation291_spill] sm:$0xff] %v15056_v54  ;;  %19774 = vst [vmem:[#allocation292_spill] sm:$0xff] %v15058_v20  ;;  %v19779_v20 = vld [vmem:[#allocation32_spill] sm:$0xff] }
 0x4d6   : > { %7540 = vrot.lane.b32.xlu0 %v14805_v47, %s12110_s15  ;;  %7538 = vrot.lane.b32.xlu1 %v14788_v46, %s12110_s15  ;;  %v15079_v47 = vsel %vm4189_vm2, %v14815_v17, %v19779_v20 }
 0x4d8   : > { %v15064_v35 = vpop.permute.xlu0 %7428  ;;  %v15066_v34 = vpop.permute.xlu1 %7426 }
 0x4d9   : > { %19775 = vst [vmem:[#allocation293_spill] sm:$0xff] %v15064_v35  ;;  %19776 = vst [vmem:[#allocation294_spill] sm:$0xff] %v15066_v34  ;;  %v11960_v35 = vld [vmem:[#allocation2 + $0x210] sm:$0xff] }
 0x4da   : > { %7544 = vrot.lane.b32.xlu0 %v14818_v33, %s12110_s15  ;;  %7542 = vrot.lane.b32.xlu1 %v14802_v19, %s12110_s15  ;;  %v7419_v34 = vshrl.u32 %v11960_v35, 16 }
 0x4dc   : > { %v15072_v7 = vpop.permute.xlu0 %7432  ;;  %v15074_v54 = vpop.permute.xlu1 %7430 }
 0x4dd   : > { %19777 = vst [vmem:[#allocation295_spill] sm:$0xff] %v15072_v7  ;;  %19778 = vst [vmem:[#allocation296_spill] sm:$0xff] %v15074_v54  ;;  %v19783_v7 = vld [vmem:[#allocation7_spill] sm:$0xff] }
 0x4de   : > { %7548 = vrot.lane.b32.xlu0 %v19780_v63, %s12110_s15  ;;  %7546 = vrot.lane.b32.xlu1 %v15079_v47, %s12110_s15  ;;  %v15090_v46 = vor.u32 %v7419_v34, %v19783_v7  ;;  %v19784_v54 = vld [vmem:[#allocation51_spill] sm:$0xff] }
 0x4e0   : > { %v15085_v33 = vpop.permute.xlu0 %7436  ;;  %v15087_v19 = vpop.permute.xlu1 %7434 }
 0x4e1   : > { %19781 = vst [vmem:[#allocation32_spill] sm:$0xff] %v15085_v33  ;;  %19782 = vst [vmem:[#allocation8_spill] sm:$0xff] %v15087_v19 }
 0x4e2   : > { %7568 = vrot.lane.b32.xlu0 %v19784_v54, %s12111_s17  ;;  %7550 = vrot.lane.b32.xlu1 %v15090_v46, %s12110_s15 }
 0x4e4   : > { %v15096_v17 = vpop.permute.xlu0 %7440  ;;  %v15098_v20 = vpop.permute.xlu1 %7438 }
 0x4e5   : > { %19785 = vst [vmem:[#allocation7_spill] sm:$0xff] %v15096_v17  ;;  %19786 = vst [vmem:[#allocation51_spill] sm:$0xff] %v15098_v20  ;;  %v11972_v17 = vld [vmem:[#allocation2 + $0x68] sm:$0xff]  ;;  %v11977_v20 = vld [vmem:[#allocation2 + $0x98] sm:$0xff] }
 0x4e6   : > { %7572 = vrot.lane.b32.xlu0 %v19620_v51, %s12111_s17  ;;  %7570 = vrot.lane.b32.xlu1 %v19621_v29, %s12111_s17 }
 0x4e8   : > { %v15104_v35 = vpop.permute.xlu0 %7444  ;;  %v15106_v34 = vpop.permute.xlu1 %7442 }
 0x4e9   : > { %19787 = vst [vmem:[#allocation297_spill] sm:$0xff] %v15104_v35  ;;  %19788 = vst [vmem:[#allocation298_spill] sm:$0xff] %v15106_v34  ;;  %v11971_v34 = vld [vmem:[#allocation2 + $0x60] sm:$0xff] }
 0x4ea   : > { %7576 = vrot.lane.b32.xlu0 %v14427_v43, %s12111_s17  ;;  %7574 = vrot.lane.b32.xlu1 %v19625_v2, %s12111_s17 }
 0x4ec   : > { %v15112_v54 = vpop.permute.xlu0 %7448  ;;  %v15114_v7 = vpop.permute.xlu1 %7446 }
 0x4ed   : > { %19789 = vst [vmem:[#allocation299_spill] sm:$0xff] %v15112_v54  ;;  %19790 = vst [vmem:[#allocation300_spill] sm:$0xff] %v15114_v7 }
 0x4ee   : > { %7580 = vrot.lane.b32.xlu0 %v14438_v56, %s12111_s17  ;;  %7578 = vrot.lane.b32.xlu1 %v14441_v36, %s12111_s17 }
 0x4f0   : > { %v15120_v29 = vpop.permute.xlu0 %7452  ;;  %v15122_v51 = vpop.permute.xlu1 %7450 }
 0x4f1   : > { %19791 = vst [vmem:[#allocation301_spill] sm:$0xff] %v15120_v29  ;;  %19792 = vst [vmem:[#allocation302_spill] sm:$0xff] %v15122_v51 }
 0x4f2   : > { %7584 = vrot.lane.b32.xlu0 %v14452_v50, %s12111_s17  ;;  %7582 = vrot.lane.b32.xlu1 %v14455_v48, %s12111_s17 }
 0x4f4   : > { %v15128_v43 = vpop.permute.xlu0 %7456  ;;  %v15130_v2 = vpop.permute.xlu1 %7454 }
 0x4f5   : > { %19793 = vst [vmem:[#allocation303_spill] sm:$0xff] %v15128_v43  ;;  %19794 = vst [vmem:[#allocation304_spill] sm:$0xff] %v15130_v2 }
 0x4f6   : > { %7588 = vrot.lane.b32.xlu0 %v14466_v15, %s12111_s17  ;;  %7586 = vrot.lane.b32.xlu1 %v14469_v52, %s12111_s17 }
 0x4f8   : > { %v15136_v56 = vpop.permute.xlu0 %7460  ;;  %v15138_v36 = vpop.permute.xlu1 %7458 }
 0x4f9   : > { %19795 = vst [vmem:[#allocation305_spill] sm:$0xff] %v15136_v56  ;;  %19796 = vst [vmem:[#allocation306_spill] sm:$0xff] %v15138_v36 }
 0x4fa   : > { %7592 = vrot.lane.b32.xlu0 %v14480_v6, %s12111_s17  ;;  %7590 = vrot.lane.b32.xlu1 %v14483_v57, %s12111_s17 }
 0x4fc   : > { %v15144_v50 = vpop.permute.xlu0 %7464  ;;  %v15146_v48 = vpop.permute.xlu1 %7462 }
 0x4fd   : > { %19797 = vst [vmem:[#allocation307_spill] sm:$0xff] %v15144_v50  ;;  %19798 = vst [vmem:[#allocation308_spill] sm:$0xff] %v15146_v48 }
 0x4fe   : > { %7596 = vrot.lane.b32.xlu0 %v14494_v62, %s12111_s17  ;;  %7594 = vrot.lane.b32.xlu1 %v14497_v58, %s12111_s17 }
 0x500   : > { %v15152_v15 = vpop.permute.xlu0 %7468  ;;  %v15154_v52 = vpop.permute.xlu1 %7466 }
 0x501   : > { %19799 = vst [vmem:[#allocation309_spill] sm:$0xff] %v15152_v15  ;;  %19800 = vst [vmem:[#allocation310_spill] sm:$0xff] %v15154_v52 }
 0x502   : > { %7600 = vrot.lane.b32.xlu0 %v14508_v9, %s12111_s17  ;;  %7598 = vrot.lane.b32.xlu1 %v14511_v4, %s12111_s17 }
 0x504   : > { %v15160_v6 = vpop.permute.xlu0 %7472  ;;  %v15162_v57 = vpop.permute.xlu1 %7470 }
 0x505   : > { %19801 = vst [vmem:[#allocation311_spill] sm:$0xff] %v15160_v6  ;;  %19802 = vst [vmem:[#allocation312_spill] sm:$0xff] %v15162_v57 }
 0x506   : > { %7604 = vrot.lane.b32.xlu0 %v14522_v13, %s12111_s17  ;;  %7602 = vrot.lane.b32.xlu1 %v14525_v16, %s12111_s17 }
 0x508   : > { %v15168_v62 = vpop.permute.xlu0 %7476  ;;  %v15170_v58 = vpop.permute.xlu1 %7474 }
 0x509   : > { %19803 = vst [vmem:[#allocation313_spill] sm:$0xff] %v15168_v62  ;;  %19804 = vst [vmem:[#allocation314_spill] sm:$0xff] %v15170_v58 }
 0x50a   : > { %7608 = vrot.lane.b32.xlu0 %v14536_v37, %s12111_s17  ;;  %7606 = vrot.lane.b32.xlu1 %v14539_v39, %s12111_s17 }
 0x50c   : > { %v15176_v9 = vpop.permute.xlu0 %7480  ;;  %v15178_v4 = vpop.permute.xlu1 %7478 }
 0x50d   : > { %19805 = vst [vmem:[#allocation315_spill] sm:$0xff] %v15176_v9  ;;  %19806 = vst [vmem:[#allocation316_spill] sm:$0xff] %v15178_v4  ;;  %v19819_v9 = vld [vmem:[#allocation74_spill] sm:$0xff] }
 0x50e   : > { %7612 = vrot.lane.b32.xlu0 %v14550_v41, %s12111_s17  ;;  %7610 = vrot.lane.b32.xlu1 %v14553_v26, %s12111_s17  ;;  %v1475_v4 = vadd.s32 56, %v19819_v9 }
 0x510   : > { %v15184_v13 = vpop.permute.xlu0 %7484  ;;  %v15186_v16 = vpop.permute.xlu1 %7482  ;;  %v1657_v62 = vand.u32 31, %v1475_v4 }
 0x511   : > { %19807 = vst [vmem:[#allocation317_spill] sm:$0xff] %v15184_v13  ;;  %19808 = vst [vmem:[#allocation318_spill] sm:$0xff] %v15186_v16  ;;  %v12012_v13 = vld [vmem:[#allocation2 + $0x1a8] sm:$0xff] }
 0x512   : > { %7616 = vrot.lane.b32.xlu0 %v14564_v31, %s12111_s17  ;;  %7614 = vrot.lane.b32.xlu1 %v14567_v38, %s12111_s17  ;;  %vm4879_vm8 = vcmp.ne.s32.totalorder %v1657_v62, 31 }
 0x513   : > { %vm5287_vm11 = vmpackc.low %vm4879_vm8, %vm4879_vm8 }
 0x514   : > { %v15192_v37 = vpop.permute.xlu0 %7488  ;;  %v15194_v39 = vpop.permute.xlu1 %7486 }
 0x515   : > { %19809 = vst [vmem:[#allocation319_spill] sm:$0xff] %v15192_v37  ;;  %19810 = vst [vmem:[#allocation320_spill] sm:$0xff] %v15194_v39  ;;  %v1587_v37 = vadd.s32 952, %v19819_v9 }
 0x516   : > { %7620 = vrot.lane.b32.xlu0 %v14578_v30, %s12111_s17  ;;  %7618 = vrot.lane.b32.xlu1 %v14581_v22, %s12111_s17 }
 0x518   : > { %v15200_v41 = vpop.permute.xlu0 %7492  ;;  %v15202_v26 = vpop.permute.xlu1 %7490 }
 0x519   : > { %19811 = vst [vmem:[#allocation321_spill] sm:$0xff] %v15200_v41  ;;  %19812 = vst [vmem:[#allocation322_spill] sm:$0xff] %v15202_v26 }
 0x51a   : > { %7624 = vrot.lane.b32.xlu0 %v14592_v23, %s12111_s17  ;;  %7622 = vrot.lane.b32.xlu1 %v14595_v25, %s12111_s17 }
 0x51c   : > { %v15208_v31 = vpop.permute.xlu0 %7496  ;;  %v15210_v38 = vpop.permute.xlu1 %7494 }
 0x51d   : > { %19813 = vst [vmem:[#allocation323_spill] sm:$0xff] %v15208_v31  ;;  %19814 = vst [vmem:[#allocation324_spill] sm:$0xff] %v15210_v38  ;;  %v11986_v31 = vld [vmem:[#allocation2 + $0xd8] sm:$0xff] }
 0x51e   : > { %7628 = vrot.lane.b32.xlu0 %v14606_v61, %s12111_s17  ;;  %7626 = vrot.lane.b32.xlu1 %v14609_v49, %s12111_s17  ;;  %v1471_v61 = vadd.s32 24, %v19819_v9 }
 0x520   : > { %v15216_v30 = vpop.permute.xlu0 %7500  ;;  %v15218_v22 = vpop.permute.xlu1 %7498 }
 0x521   : > { %19815 = vst [vmem:[#allocation325_spill] sm:$0xff] %v15216_v30  ;;  %19816 = vst [vmem:[#allocation326_spill] sm:$0xff] %v15218_v22 }
 0x522   : > { %7632 = vrot.lane.b32.xlu0 %v14620_v27, %s12111_s17  ;;  %7630 = vrot.lane.b32.xlu1 %v14623_v0, %s12111_s17  ;;  %v1629_v0 = vand.u32 31, %v1471_v61  ;;  %v1487_v61 = vadd.s32 152, %v19819_v9 }
 0x524   : > { %v15224_v23 = vpop.permute.xlu0 %7504  ;;  %v15226_v25 = vpop.permute.xlu1 %7502  ;;  %vm4875_vm10 = vcmp.ne.s32.totalorder %v1629_v0, 31  ;;  %v1741_v15 = vand.u32 31, %v1487_v61 }
 0x525   : > { %19817 = vst [vmem:[#allocation327_spill] sm:$0xff] %v15224_v23  ;;  %19818 = vst [vmem:[#allocation328_spill] sm:$0xff] %v15226_v25  ;;  %v19900_v23 = vld [vmem:[#allocation96_spill] sm:$0xff] }
 0x526   : > { %7636 = vrot.lane.b32.xlu0 %v14634_v32, %s12111_s17  ;;  %7634 = vrot.lane.b32.xlu1 %v14637_v21, %s12111_s17  ;;  %vm5283_vm12 = vmpackc.low %vm4875_vm10, %vm4875_vm10  ;;  %vm15284_vm14 = vcmp.ne.s32.totalorder %v1741_v15, 31 }
 0x527   : > { %vm5299_vm15 = vmpackc.low %vm15284_vm14, %vm15284_vm14 }
 0x528   : > { %v15234_v49 = vpop.permute.xlu0 %7508  ;;  %v15236_v27 = vpop.permute.xlu1 %7506 }
 0x529   : > { %19820 = vst [vmem:[#allocation329_spill] sm:$0xff] %v15234_v49  ;;  %19821 = vst [vmem:[#allocation330_spill] sm:$0xff] %v15236_v27 }
 0x52a   : > { %7640 = vrot.lane.b32.xlu0 %v14648_v10, %s12111_s17  ;;  %7638 = vrot.lane.b32.xlu1 %v14651_v1, %s12111_s17  ;;  %v19826_v1 = vmov 0  }
 0x52b   : > { %v5423_v10 = vsel %vm5287_vm11, 65537, %v19826_v1 }
 0x52c   : > { %v15242_v58 = vpop.permute.xlu0 %7512  ;;  %v15244_v32 = vpop.permute.xlu1 %7510 }
 0x52d   : > { %19822 = vst [vmem:[#allocation331_spill] sm:$0xff] %v15242_v58  ;;  %19823 = vst [vmem:[#allocation332_spill] sm:$0xff] %v15244_v32  ;;  %v11969_v58 = vld [vmem:[#allocation2 + $0x50] sm:$0xff] }
 0x52e   : > { %7644 = vrot.lane.b32.xlu0 %v19744_v14, %s12111_s17  ;;  %7642 = vrot.lane.b32.xlu1 %v14665_v12, %s12111_s17  ;;  %v5419_v12 = vsel %vm5283_vm12, 65537, %v19826_v1 }
 0x530   : > { %v15250_v21 = vpop.permute.xlu0 %7516  ;;  %v15252_v4 = vpop.permute.xlu1 %7514 }
 0x531   : > { %19824 = vst [vmem:[#allocation333_spill] sm:$0xff] %v15250_v21  ;;  %19825 = vst [vmem:[#allocation334_spill] sm:$0xff] %v15252_v4  ;;  %v19869_v21 = vld [vmem:[#allocation245_spill] sm:$0xff]  ;;  %v11968_v4 = vld [vmem:[#allocation2 + $0x8] sm:$0xff] }
 0x532   : > { %7648 = vrot.lane.b32.xlu0 %v19748_v40, %s12111_s17  ;;  %7646 = vrot.lane.b32.xlu1 %v19743_v45, %s12111_s17  ;;  %v19829_v40 = vld [vmem:[#allocation84_spill] sm:$0xff] }
 0x533   : > { %v11464_v0 = vcombine.low %v19829_v40, %v5423_v10  ;;  %v11462_v45 = vcombine.low %v19829_v40, %v5419_v12  ;;  %v1491_v10 = vadd.s32 184, %v19819_v9 }
 0x534   : > { %v15259_v62 = vpop.permute.xlu0 %7520  ;;  %v15261_v14 = vpop.permute.xlu1 %7518 }
 0x535   : > { %19827 = vst [vmem:[#allocation335_spill] sm:$0xff] %v15259_v62  ;;  %19828 = vst [vmem:[#allocation336_spill] sm:$0xff] %v15261_v14  ;;  %v5781_v52 = vshrl.u32 %v11464_v0, 16  ;;  %v5768_v48 = vshll.u32 %v11462_v45, 16  ;;  %v1769_v15 = vand.u32 31, %v1491_v10 }
 0x536   : > { %7652 = vrot.lane.b32.xlu0 %v19752_v11, %s12111_s17  ;;  %7650 = vrot.lane.b32.xlu1 %v19747_v42, %s12111_s17  ;;  %v5765_v11 = vshrl.u32 %v11462_v45, 16 }
 0x537   : > { %vm15309_vm3 = vcmp.ne.s32.totalorder %v1769_v15, 31 }
 0x538   : > { %v15271_v6 = vpop.permute.xlu0 %7524  ;;  %v15273_v57 = vpop.permute.xlu1 %7522  ;;  %v5767_v61 = vrot.slane %v5765_v11, 7  ;;  %vm5303_vm4 = vmpackc.low %vm15309_vm3, %vm15309_vm3 }
 0x539   : > { %19830 = vst [vmem:[#allocation337_spill] sm:$0xff] %v15271_v6  ;;  %19831 = vst [vmem:[#allocation338_spill] sm:$0xff] %v15273_v57 }
 0x53a   : > { %7656 = vrot.lane.b32.xlu0 %v19756_v55, %s12111_s17  ;;  %7654 = vrot.lane.b32.xlu1 %v19751_v5, %s12111_s17  ;;  %v5783_v55 = vrot.slane %v5781_v52, 7  ;;  %v5784_v5 = vshll.u32 %v11464_v0, 16  ;;  %v5770_v52 = vor.u32 %v5768_v48, %v5767_v61  ;;  %v5435_v0 = vsel %vm5299_vm15, 65537, %v19826_v1  ;;  %v19844_v48 = vld [vmem:[#allocation90_spill] sm:$0xff] }
 0x53c   : > { %v15279_v50 = vpop.permute.xlu0 %7528  ;;  %v15281_v42 = vpop.permute.xlu1 %7526  ;;  %v5771_v15 = vsel %vm5756_vm9, %v19844_v48, %v5770_v52 }
 0x53d   : > { %19832 = vst [vmem:[#allocation339_spill] sm:$0xff] %v15279_v50  ;;  %19833 = vst [vmem:[#allocation340_spill] sm:$0xff] %v15281_v42  ;;  %vm6301_vm7 = vcmp.ne.s16.totalorder %v5771_v15, 0  ;;  %v11963_v15 = vld [vmem:[#allocation2 + $0x10] sm:$0xff] }
 0x53e   : > { %7660 = vrot.lane.b32.xlu0 %v19759_v59, %s12111_s17  ;;  %7658 = vrot.lane.b32.xlu1 %v19755_v44, %s12111_s17  ;;  %v5786_v59 = vor.u32 %v5784_v5, %v5783_v55  ;;  %v1495_v44 = vadd.s32 216, %v19819_v9 }
 0x540   : > { %v15292_v56 = vpop.permute.xlu0 %7532  ;;  %v15294_v50 = vpop.permute.xlu1 %7530  ;;  %v5787_v5 = vsel %vm5756_vm9, %v19844_v48, %v5786_v59  ;;  %v5439_v59 = vsel %vm5303_vm4, 65537, %v19826_v1 }
 0x541   : > { %19836 = vst [vmem:[#allocation341_spill] sm:$0xff] %v15292_v56  ;;  %19837 = vst [vmem:[#allocation342_spill] sm:$0xff] %v15294_v50  ;;  %v1797_v56 = vand.u32 31, %v1495_v44  ;;  %vm6303_vm6 = vcmp.ne.s16.totalorder %v5787_v5, 0 }
 0x542   : > { %7664 = vrot.lane.b32.xlu0 %v19763_v53, %s12111_s17  ;;  %7662 = vrot.lane.b32.xlu1 %v14735_v18, %s12111_s17  ;;  %v19842_v53 = vld [vmem:[#allocation228_spill] sm:$0xff]  ;;  %v19843_v18 = vld [vmem:[#allocation91_spill] sm:$0xff] }
 0x543   : > { %v5779_v10 = vsel %vm5756_vm9, %v5767_v61, %v19843_v18  ;;  %vm15337_vm8 = vcmp.ne.s32.totalorder %v1797_v56, 31  ;;  %v11472_v56 = vcombine.low %v19829_v40, %v5439_v59 }
 0x544   : > { %v15305_v45 = vpop.permute.xlu0 %7536  ;;  %v15307_v11 = vpop.permute.xlu1 %7534  ;;  %vm6302_vm5 = vcmp.ne.s16.totalorder %v5779_v10, 0  ;;  %v11961_v10 = vld [vmem:[#allocation2 + $0x18] sm:$0xff]  ;;  %vm5307_vm10 = vmpackc.low %vm15337_vm8, %vm15337_vm8 }
 0x545   : > { %19838 = vst [vmem:[#allocation343_spill] sm:$0xff] %v15305_v45  ;;  %19839 = vst [vmem:[#allocation344_spill] sm:$0xff] %v15307_v11  ;;  %v11470_v45 = vcombine.low %v19829_v40, %v5435_v0  ;;  %v6371_v5 = vsel %vm6302_vm5, %v11961_v10, 0  ;;  %v5848_v43 = vshll.u32 %v11472_v56, 16 }
 0x546   : > { %7668 = vrot.lane.b32.xlu0 %v19767_v3, %s12111_s17  ;;  %7666 = vrot.lane.b32.xlu1 %v19842_v53, %s12111_s17  ;;  %v1499_v3 = vadd.s32 248, %v19819_v9  ;;  %v15363_v59 = vrot.slane %v6371_v5, 1  ;;  %v11964_v5 = vld [vmem:[#allocation2 + $0x28] sm:$0xff] }
 0x547   : > { %v5829_v61 = vshrl.u32 %v11470_v45, 16 }
 0x548   : > { %v15328_v11 = vpop.permute.xlu0 %7540  ;;  %v15330_v53 = vpop.permute.xlu1 %7538  ;;  %v1825_v52 = vand.u32 31, %v1499_v3  ;;  %v19851_v3 = vld [vmem:[#allocation89_spill] sm:$0xff] }
 0x549   : > { %19845 = vst [vmem:[#allocation228_spill] sm:$0xff] %v15328_v11  ;;  %19846 = vst [vmem:[#allocation345_spill] sm:$0xff] %v15330_v53  ;;  %v11962_v11 = vld [vmem:[#allocation2 + $0x20] sm:$0xff]  ;;  %v15348_v53 = vsel %vm6301_vm7, %v11963_v15, 0  ;;  %v5827_v10 = vsel %vm5756_vm9, %v19851_v3, %v19843_v18  ;;  %v5831_v15 = vrot.slane %v5829_v61, 7  ;;  %vm6300_vm7 = vcmp.ne.s16.totalorder %v19843_v18, 0 }
 0x54a   : > { %7672 = vrot.lane.b32.xlu0 %v19770_v28, %s12111_s17  ;;  %7670 = vrot.lane.b32.xlu1 %v19766_v24, %s12111_s17  ;;  %v15345_v28 = vsel %vm6303_vm6, %v11962_v11, 0  ;;  %v1503_v24 = vadd.s32 280, %v19819_v9  ;;  %v5795_v11 = vsel %vm5756_vm9, %v5783_v55, %v19843_v18  ;;  %vm15366_vm11 = vcmp.ne.s32.totalorder %v1825_v52, 31  ;;  %v19856_v61 = vld [vmem:[#allocation237_spill] sm:$0xff]  ;;  %v19857_v52 = vld [vmem:[#allocation238_spill] sm:$0xff] }
 0x54b   : > { %v19132_v44 = vrot.slane %v15345_v28, 1  ;;  %v5443_v55 = vsel %vm5307_vm10, 65537, %v19826_v1  ;;  %vm6304_vm12 = vcmp.ne.s16.totalorder %v5795_v11, 0  ;;  %vm6308_vm14 = vcmp.ne.s16.totalorder %v5827_v10, 0  ;;  %vm5311_vm15 = vmpackc.low %vm15366_vm11, %vm15366_vm11 }
 0x54c   : > { %v15341_v0 = vpop.permute.xlu0 %7544  ;;  %v15343_v12 = vpop.permute.xlu1 %7542  ;;  %v1853_v42 = vand.u32 31, %v1503_v24  ;;  %v15391_v11 = vcombine.low %v19829_v40, %v5443_v55  ;;  %v15401_v6 = vsel %vm5756_vm9, %v5831_v15, %v19843_v18  ;;  %v11966_v55 = vld [vmem:[#allocation2 + $0x218] sm:$0xff]  ;;  %v19864_v57 = vrot.slane %v15348_v53, 1 }
 0x54d   : > { %19849 = vst [vmem:[#allocation346_spill] sm:$0xff] %v15341_v0  ;;  %19850 = vst [vmem:[#allocation347_spill] sm:$0xff] %v15343_v12  ;;  %v5832_v0 = vshll.u32 %v11470_v45, 16  ;;  %v5845_v45 = vshrl.u32 %v11472_v56, 16  ;;  %v15388_v24 = vsel %vm7763_vm13, %v15363_v59, %v19132_v44  ;;  %v7553_v36 = vshll.u32 %v11966_v55, 16 }
 0x54e   : > { %7676 = vrot.lane.b32.xlu0 %v14777_v60, %s12111_s17  ;;  %7674 = vrot.lane.b32.xlu1 %v14774_v8, %s12111_s17  ;;  %v1507_v60 = vadd.s32 312, %v19819_v9  ;;  %vm15403_vm3 = vcmp.ne.s32.totalorder %v1853_v42, 31  ;;  %v11967_v42 = vld [vmem:[#allocation2 + $0x220] sm:$0xff]  ;;  %v15421_v56 = vsel %vm7763_vm13, %v19864_v57, %v15363_v59  ;;  %v1511_v12 = vadd.s32 344, %v19819_v9 }
 0x54f   : > { %v5834_v3 = vor.u32 %v5832_v0, %v5831_v15  ;;  %v6373_v0 = vsel %vm6304_vm12, %v11964_v5, 0  ;;  %v19862_v5 = vld [vmem:[#allocation241_spill] sm:$0xff]  ;;  %v19863_v15 = vld [vmem:[#allocation242_spill] sm:$0xff]  ;;  %v7557_v62 = vshrl.u32 %v11966_v55, 16  ;;  %vm5315_vm4 = vmpackc.low %vm15403_vm3, %vm15403_vm3  ;;  %vm6310_vm6 = vcmp.ne.s16.totalorder %v15401_v6, 0 }
 0x550   : > { %v15371_v8 = vpop.permute.xlu0 %7548  ;;  %v15373_v50 = vpop.permute.xlu1 %7546  ;;  %v1881_v10 = vand.u32 31, %v1507_v60  ;;  %v5847_v60 = vrot.slane %v5845_v45, 7  ;;  %v15426_v2 = vrot.slane %v6373_v0, 1  ;;  %v1515_v55 = vadd.s32 376, %v19819_v9 }
 0x551   : > { %19854 = vst [vmem:[#allocation89_spill] sm:$0xff] %v15371_v8  ;;  %19855 = vst [vmem:[#allocation348_spill] sm:$0xff] %v15373_v50  ;;  %v11965_v8 = vld [vmem:[#allocation2 + $0x48] sm:$0xff]  ;;  %v5835_v45 = vsel %vm5756_vm9, %v19844_v48, %v5834_v3  ;;  %v7555_v14 = vrot.slane %v7553_v36, 1  ;;  %v7565_v3 = vshrl.u32 %v11967_v42, 16  ;;  %v6369_v44 = vsel %vm6300_vm7, %v11968_v4, 0 }
 0x552   : > { %7680 = vrot.lane.b32.xlu0 %v19856_v61, %s12111_s17  ;;  %7678 = vrot.lane.b32.xlu1 %v19857_v52, %s12111_s17  ;;  %v15397_v50 = vsel %vm6308_vm14, %v11965_v8, 0  ;;  %v5447_v8 = vsel %vm5311_vm15, 65537, %v19826_v1  ;;  %vm15432_vm5 = vcmp.ne.s32.totalorder %v1881_v10, 31  ;;  %vm6309_vm8 = vcmp.ne.s16.totalorder %v5835_v45, 0 }
 0x553   : > { %v15443_v0 = vcombine.low %v19829_v40, %v5447_v8  ;;  %v5850_v10 = vor.u32 %v5848_v43, %v5847_v60  ;;  %v5451_v8 = vsel %vm5315_vm4, 65537, %v19826_v1  ;;  %vm5319_vm10 = vmpackc.low %vm15432_vm5, %vm15432_vm5  ;;  %v1909_v43 = vand.u32 31, %v1511_v12 }
 0x554   : > { %v15393_v61 = vpop.permute.xlu0 %7568  ;;  %v15395_v52 = vpop.permute.xlu1 %7550  ;;  %v7559_v36 = vor.u32 %v7557_v62, %v7555_v14  ;;  %v15469_v7 = vsel %vm6309_vm8, %v11969_v58, 0  ;;  %v1937_v62 = vand.u32 31, %v1515_v55  ;;  %v15477_v35 = vcombine.low %v19829_v40, %v5451_v8 }
 0x555   : > { %19858 = vst [vmem:[#allocation237_spill] sm:$0xff] %v15393_v61  ;;  %19859 = vst [vmem:[#allocation238_spill] sm:$0xff] %v15395_v52  ;;  %v7561_v52 = vshll.u32 %v11967_v42, 16  ;;  %v5877_v12 = vshrl.u32 %v15443_v0, 16  ;;  %v5455_v58 = vsel %vm5319_vm10, 65537, %v19826_v1  ;;  %vm15491_vm11 = vcmp.ne.s32.totalorder %v1909_v43, 31 }
 0x556   : > { %7684 = vrot.lane.b32.xlu0 %v19862_v5, %s12111_s17  ;;  %7682 = vrot.lane.b32.xlu1 %v19863_v15, %s12111_s17  ;;  %v5861_v5 = vshrl.u32 %v15391_v11, 16  ;;  %v7764_v15 = vrot.slane %v6369_v44, 1  ;;  %vm15505_vm12 = vcmp.ne.s32.totalorder %v1937_v62, 31  ;;  %v19878_v43 = vld [vmem:[#allocation92_spill] sm:$0xff]  ;;  %v19882_v44 = vld [vmem:[#allocation93_spill] sm:$0xff]  ;;  %vm5323_vm14 = vmpackc.low %vm15491_vm11, %vm15491_vm11 }
 0x557   : > { %v7563_v51 = vrot.slane %v7561_v52, 1  ;;  %vm5327_vm5 = vmpackc.low %vm15505_vm12, %vm15505_vm12  ;;  %v11988_v61 = vld [vmem:[#allocation2 + $0xe8] sm:$0xff] }
 0x558   : > { %v15436_v57 = vpop.permute.xlu0 %7572  ;;  %v15438_v29 = vpop.permute.xlu1 %7570  ;;  %v5863_v54 = vrot.slane %v5861_v5, 7  ;;  %v5859_v5 = vsel %vm5756_vm9, %v5847_v60, %v19843_v18 }
 0x559   : > { %19867 = vst [vmem:[#allocation241_spill] sm:$0xff] %v15436_v57  ;;  %19868 = vst [vmem:[#allocation242_spill] sm:$0xff] %v15438_v29  ;;  %v7567_v4 = vor.u32 %v7565_v3, %v7563_v51  ;;  %v7564_v45 = vsel %vm4189_vm2, %v7559_v36, %v7563_v51  ;;  %v5879_v3 = vrot.slane %v5877_v12, 7  ;;  %v19879_v51 = vrot.slane %v19878_v43, 1  ;;  %v11970_v43 = vld [vmem:[#allocation2 + $0x58] sm:$0xff]  ;;  %v11992_v29 = vld [vmem:[#allocation2 + $0x108] sm:$0xff] }
 0x55a   : > { %7688 = vrot.lane.b32.xlu0 %v15079_v47, %s12111_s17  ;;  %7686 = vrot.lane.b32.xlu1 %v19869_v21, %s12111_s17  ;;  %v5864_v47 = vshll.u32 %v15391_v11, 16  ;;  %v1519_v21 = vadd.s32 408, %v19819_v9  ;;  %v7556_v11 = vsel %vm4189_vm2, %v15090_v46, %v7555_v14  ;;  %v5851_v46 = vsel %vm5756_vm9, %v19844_v48, %v5850_v10 }
 0x55b   : > { %v5880_v14 = vshll.u32 %v15443_v0, 16  ;;  %v15503_v10 = vcombine.low %v19829_v40, %v5455_v58  ;;  %v15513_v36 = vsel %vm7763_vm13, %v15426_v2, %v19879_v51  ;;  %v19883_v12 = vrot.slane %v19882_v44, 1 }
 0x55c   : > { %v15462_v52 = vpop.permute.xlu0 %7576  ;;  %v15464_v42 = vpop.permute.xlu1 %7574  ;;  %v5866_v55 = vor.u32 %v5864_v47, %v5863_v54  ;;  %v1965_v8 = vand.u32 31, %v1519_v21  ;;  %v19880_v47 = vrot.slane %v15345_v28, 1  ;;  %v5893_v58 = vshrl.u32 %v15477_v35, 16 }
 0x55d   : > { %19870 = vst [vmem:[#allocation245_spill] sm:$0xff] %v15462_v52  ;;  %19871 = vst [vmem:[#allocation349_spill] sm:$0xff] %v15464_v42  ;;  %v7781_v28 = vrot.slane %v15469_v7, 1  ;;  %vm6311_vm15 = vcmp.ne.s16.totalorder %v5851_v46, 0  ;;  %v6379_v51 = vsel %vm6310_vm6, %v11970_v43, 0  ;;  %vm6312_vm3 = vcmp.ne.s16.totalorder %v5859_v5, 0 }
 0x55e   : > { %7692 = vrot.lane.b32.xlu0 %v7556_v11, %s12111_s17  ;;  %7690 = vrot.lane.b32.xlu1 %v19780_v63, %s12111_s17  ;;  %v5875_v63 = vsel %vm5756_vm9, %v5863_v54, %v19843_v18  ;;  %v15519_v21 = vsel %vm7763_vm13, %v19880_v47, %v15426_v2  ;;  %v19881_v54 = vrot.slane %v15397_v50, 1  ;;  %v19884_v47 = vrot.slane %v15348_v53, 1 }
 0x55f   : > { %v5867_v44 = vsel %vm5756_vm9, %v19844_v48, %v5866_v55  ;;  %vm6314_vm4 = vcmp.ne.s16.totalorder %v5875_v63, 0  ;;  %vm15545_vm7 = vcmp.ne.s32.totalorder %v1965_v8, 31  ;;  %v5909_v53 = vshrl.u32 %v15503_v10, 16 }
 0x560   : > { %v15496_v32 = vpop.permute.xlu0 %7580  ;;  %v15498_v11 = vpop.permute.xlu1 %7578  ;;  %v15526_v62 = vsel %vm7763_vm13, %v19883_v12, %v19881_v54  ;;  %v7766_v54 = vsel %vm7763_vm13, %v7764_v15, %v19884_v47  ;;  %v5459_v55 = vsel %vm5323_vm14, 65537, %v19826_v1  ;;  %v1523_v12 = vadd.s32 440, %v19819_v9  ;;  %vm5331_vm6 = vmpackc.low %vm15545_vm7, %vm15545_vm7 }
 0x561   : > { %19874 = vst [vmem:[#allocation350_spill] sm:$0xff] %v15496_v32  ;;  %19875 = vst [vmem:[#allocation351_spill] sm:$0xff] %v15498_v11  ;;  %v19889_v8 = vrot.slane %v15397_v50, 1  ;;  %v7783_v47 = vrot.slane %v6379_v51, 1  ;;  %v5895_v49 = vrot.slane %v5893_v58, 7  ;;  %v6380_v60 = vsel %vm6311_vm15, %v11971_v34, 0 }
 0x562   : > { %7696 = vrot.lane.b32.xlu0 %v7567_v4, %s12111_s17  ;;  %7694 = vrot.lane.b32.xlu1 %v7564_v45, %s12111_s17  ;;  %v5882_v45 = vor.u32 %v5880_v14, %v5879_v3  ;;  %v5896_v14 = vshll.u32 %v15477_v35, 16  ;;  %v6381_v27 = vsel %vm6312_vm3, %v11972_v17, 0  ;;  %v5463_v35 = vsel %vm5327_vm5, 65537, %v19826_v1  ;;  %s12117_s17 = smov 56  }
 0x563   : > { %v15564_v43 = vsel %vm7763_vm13, %v19889_v8, %v7781_v28  ;;  %vm6313_vm8 = vcmp.ne.s16.totalorder %v5867_v44, 0  ;;  %v5891_v34 = vsel %vm5756_vm9, %v5879_v3, %v19843_v18  ;;  %v15586_v17 = vcombine.low %v19829_v40, %v5459_v55 }
 0x564   : > { %v15549_v4 = vpop.permute.xlu0 %7584  ;;  %v15551_v6 = vpop.permute.xlu1 %7582  ;;  %v1527_v5 = vadd.s32 472, %v19819_v9  ;;  %v5883_v63 = vsel %vm5756_vm9, %v19844_v48, %v5882_v45  ;;  %v15595_v0 = vrot.slane %v5909_v53, 7  ;;  %v5912_v58 = vshll.u32 %v15503_v10, 16  ;;  %v11974_v53 = vld [vmem:[#allocation2 + $0x70] sm:$0xff] }
 0x565   : > { %19887 = vst [vmem:[#allocation92_spill] sm:$0xff] %v15549_v4  ;;  %19888 = vst [vmem:[#allocation93_spill] sm:$0xff] %v15551_v6  ;;  %v11973_v4 = vld [vmem:[#allocation2 + $0x78] sm:$0xff]  ;;  %v1993_v51 = vand.u32 31, %v1523_v12  ;;  %v5898_v3 = vor.u32 %v5896_v14, %v5895_v49  ;;  %v15602_v7 = vcombine.low %v19829_v40, %v5463_v35  ;;  %v7785_v45 = vrot.slane %v6380_v60, 1 }
 0x566   : > { %7895 = vrot.lane.b32.xlu0 %v7766_v54, %s12112_s19  ;;  %7893 = vrot.lane.b32.xlu1 %v7764_v15, %s12112_s19  ;;  %v15572_v50 = vsel %vm6314_vm4, %v11973_v4, 0  ;;  %v15599_v54 = vsel %vm7763_vm13, %v7781_v28, %v7783_v47  ;;  %v5467_v4 = vsel %vm5331_vm6, 65537, %v19826_v1  ;;  %v15610_v10 = vsel %vm6313_vm8, %v11974_v53, 0 }
 0x567   : > { %v7787_v55 = vrot.slane %v6381_v27, 1  ;;  %vm6315_vm10 = vcmp.ne.s16.totalorder %v5883_v63, 0  ;;  %vm6316_vm11 = vcmp.ne.s16.totalorder %v5891_v34, 0  ;;  %v5925_v12 = vshrl.u32 %v15586_v17, 16 }
 0x568   : > { %v15589_v46 = vpop.permute.xlu0 %7588  ;;  %v15591_v15 = vpop.permute.xlu1 %7586  ;;  %v2021_v8 = vand.u32 31, %v1527_v5  ;;  %v5914_v60 = vor.u32 %v5912_v58, %v15595_v0  ;;  %v15622_v44 = vcombine.low %v19829_v40, %v5467_v4  ;;  %vm15624_vm12 = vcmp.ne.s32.totalorder %v1993_v51, 31  ;;  %v11976_v4 = vld [vmem:[#allocation2 + $0x88] sm:$0xff] }
 0x569   : > { %19890 = vst [vmem:[#allocation352_spill] sm:$0xff] %v15589_v46  ;;  %19891 = vst [vmem:[#allocation353_spill] sm:$0xff] %v15591_v15  ;;  %v15629_v53 = vsel %vm7763_vm13, %v7783_v47, %v7785_v45  ;;  %v5899_v5 = vsel %vm5756_vm9, %v19844_v48, %v5898_v3  ;;  %v5941_v28 = vshrl.u32 %v15602_v7, 16  ;;  %v15641_v58 = vsel %vm7763_vm13, %v7785_v45, %v7787_v55  ;;  %v11975_v47 = vld [vmem:[#allocation2 + $0x80] sm:$0xff] }
 0x56a   : > { %7899 = vrot.lane.b32.xlu0 %v15388_v24, %s12112_s19  ;;  %7897 = vrot.lane.b32.xlu1 %v15421_v56, %s12112_s19  ;;  %v5907_v56 = vsel %vm5756_vm9, %v5895_v49, %v19843_v18  ;;  %v7789_v49 = vrot.slane %v15610_v10, 1  ;;  %v6384_v51 = vsel %vm6315_vm10, %v11975_v47, 0  ;;  %v15645_v3 = vsel %vm6316_vm11, %v11976_v4, 0  ;;  %vm5335_vm15 = vmpackc.low %vm15624_vm12, %vm15624_vm12 }
 0x56b   : > { %vm6318_vm14 = vcmp.ne.s16.totalorder %v5907_v56, 0  ;;  %v5928_v46 = vshll.u32 %v15586_v17, 16  ;;  %vm15651_vm3 = vcmp.ne.s32.totalorder %v2021_v8, 31  ;;  %vm6317_vm4 = vcmp.ne.s16.totalorder %v5899_v5, 0 }
 0x56c   : > { %v15614_v14 = vpop.permute.xlu0 %7592  ;;  %v15616_v35 = vpop.permute.xlu1 %7590  ;;  %v5915_v34 = vsel %vm5756_vm9, %v19844_v48, %v5914_v60  ;;  %v1535_v17 = vadd.s32 536, %v19819_v9  ;;  %v15664_v47 = vsel %vm7763_vm13, %v7787_v55, %v7789_v49  ;;  %v5943_v4 = vrot.slane %v5941_v28, 7  ;;  %vm5339_vm5 = vmpackc.low %vm15651_vm3, %vm15651_vm3  ;;  %v11978_v55 = vld [vmem:[#allocation2 + $0x90] sm:$0xff] }
 0x56d   : > { %19892 = vst [vmem:[#allocation354_spill] sm:$0xff] %v15614_v14  ;;  %19893 = vst [vmem:[#allocation355_spill] sm:$0xff] %v15616_v35  ;;  %v1531_v14 = vadd.s32 504, %v19819_v9  ;;  %v5927_v35 = vrot.slane %v5925_v12, 7  ;;  %v5957_v12 = vshrl.u32 %v15622_v44, 16  ;;  %v5944_v8 = vshll.u32 %v15602_v7, 16 }
 0x56e   : > { %7903 = vrot.lane.b32.xlu0 %v15513_v36, %s12112_s19  ;;  %7901 = vrot.lane.b32.xlu1 %v15519_v21, %s12112_s19  ;;  %v7795_v60 = vrot.slane %v15645_v3, 1  ;;  %v15673_v6 = vsel %vm6318_vm14, %v11977_v20, 0  ;;  %v5471_v7 = vsel %vm5335_vm15, 65537, %v19826_v1  ;;  %v6386_v28 = vsel %vm6317_vm4, %v11978_v55, 0 }
 0x56f   : > { %v2049_v15 = vand.u32 31, %v1531_v14  ;;  %vm6319_vm7 = vcmp.ne.s16.totalorder %v5915_v34, 0  ;;  %v5923_v20 = vsel %vm5756_vm9, %v15595_v0, %v19843_v18  ;;  %v5930_v14 = vor.u32 %v5928_v46, %v5927_v35 }
 0x570   : > { %v15655_v45 = vpop.permute.xlu0 %7596  ;;  %v15657_v63 = vpop.permute.xlu1 %7594  ;;  %v5959_v27 = vrot.slane %v5957_v12, 7  ;;  %v5960_v3 = vshll.u32 %v15622_v44, 16  ;;  %v2077_v33 = vand.u32 31, %v1535_v17  ;;  %v1539_v10 = vadd.s32 568, %v19819_v9 }
 0x571   : > { %19898 = vst [vmem:[#allocation356_spill] sm:$0xff] %v15655_v45  ;;  %19899 = vst [vmem:[#allocation357_spill] sm:$0xff] %v15657_v63  ;;  %v19901_v45 = vld [vmem:[#allocation97_spill] sm:$0xff]  ;;  %v7793_v63 = vrot.slane %v6384_v51, 1  ;;  %v5946_v25 = vor.u32 %v5944_v8, %v5943_v4  ;;  %v15695_v5 = vcombine.low %v19829_v40, %v5471_v7  ;;  %v5475_v55 = vsel %vm5339_vm5, 65537, %v19826_v1 }
 0x572   : > { %7907 = vrot.lane.b32.xlu0 %v19900_v23, %s12112_s19  ;;  %7905 = vrot.lane.b32.xlu1 %v19901_v45, %s12112_s19  ;;  %vm15698_vm6 = vcmp.ne.s32.totalorder %v2049_v15, 31  ;;  %v19906_v46 = vrot.slane %v15572_v50, 1  ;;  %v7797_v15 = vrot.slane %v6386_v28, 1  ;;  %v7799_v17 = vrot.slane %v15673_v6, 1  ;;  %v11979_v8 = vld [vmem:[#allocation2 + $0xa0] sm:$0xff] }
 0x573   : > { %v15718_v7 = vsel %vm6319_vm7, %v11979_v8, 0  ;;  %vm6320_vm8 = vcmp.ne.s16.totalorder %v5923_v20, 0  ;;  %v15729_v28 = vcombine.low %v19829_v40, %v5475_v55  ;;  %vm5343_vm10 = vmpackc.low %vm15698_vm6, %vm15698_vm6  ;;  %vm15734_vm11 = vcmp.ne.s32.totalorder %v2077_v33, 31 }
 0x574   : > { %v15688_v56 = vpop.permute.xlu0 %7600  ;;  %v15690_v51 = vpop.permute.xlu1 %7598  ;;  %v15709_v0 = vsel %vm7763_vm13, %v19906_v46, %v7793_v63  ;;  %v19907_v44 = vmov %v19906_v46  ;;  %v5939_v46 = vsel %vm5756_vm9, %v5927_v35, %v19843_v18  ;;  %v2105_v34 = vand.u32 31, %v1539_v10  ;;  %vm5347_vm15 = vmpackc.low %vm15734_vm11, %vm15734_vm11 }
 0x575   : > { %19902 = vst [vmem:[#allocation96_spill] sm:$0xff] %v15688_v56  ;;  %19903 = vst [vmem:[#allocation97_spill] sm:$0xff] %v15690_v51  ;;  %v15714_v12 = vsel %vm7763_vm13, %v7789_v49, %v19907_v44  ;;  %v5931_v56 = vsel %vm5756_vm9, %v19844_v48, %v5930_v14  ;;  %v5962_v49 = vor.u32 %v5960_v3, %v5959_v27  ;;  %v5973_v3 = vshrl.u32 %v15695_v5, 16  ;;  %v11980_v44 = vld [vmem:[#allocation2 + $0xa8] sm:$0xff] }
 0x576   : > { %7911 = vrot.lane.b32.xlu0 %v15564_v43, %s12112_s19  ;;  %7909 = vrot.lane.b32.xlu1 %v15526_v62, %s12112_s19  ;;  %v15739_v14 = vsel %vm7763_vm13, %v7793_v63, %v7795_v60  ;;  %v5947_v35 = vsel %vm5756_vm9, %v19844_v48, %v5946_v25  ;;  %v1543_v55 = vadd.s32 600, %v19819_v9  ;;  %v15750_v33 = vsel %vm7763_vm13, %v7795_v60, %v7797_v15 }
 0x577   : > { %19912 = vst [vmem:[#allocation360_spill] sm:$0xff] %v15750_v33  ;;  %v7801_v10 = vrot.slane %v15718_v7, 1  ;;  %v15754_v63 = vsel %vm7763_vm13, %v7797_v15, %v7799_v17  ;;  %v15757_v25 = vsel %vm6320_vm8, %v11980_v44, 0  ;;  %vm6321_vm12 = vcmp.ne.s16.totalorder %v5931_v56, 0 }
 0x578   : > { %v15724_v51 = vpop.permute.xlu0 %7604  ;;  %v15726_v50 = vpop.permute.xlu1 %7602  ;;  %19913 = vst [vmem:[#allocation361_spill] sm:$0xff] %v15754_v63  ;;  %vm6322_vm14 = vcmp.ne.s16.totalorder %v5939_v46, 0  ;;  %v5955_v8 = vsel %vm5756_vm9, %v5943_v4, %v19843_v18  ;;  %v5479_v60 = vsel %vm5343_vm10, 65537, %v19826_v1  ;;  %vm6323_vm3 = vcmp.ne.s16.totalorder %v5947_v35, 0 }
 0x579   : > { %19908 = vst [vmem:[#allocation358_spill] sm:$0xff] %v15724_v51  ;;  %19909 = vst [vmem:[#allocation359_spill] sm:$0xff] %v15726_v50  ;;  %v5963_v7 = vsel %vm5756_vm9, %v19844_v48, %v5962_v49  ;;  %v5989_v4 = vshrl.u32 %v15729_v28, 16  ;;  %vm15777_vm4 = vcmp.ne.s32.totalorder %v2105_v34, 31  ;;  %v5971_v32 = vsel %vm5756_vm9, %v5959_v27, %v19843_v18 }
 0x57a   : > { %7915 = vrot.lane.b32.xlu0 %v15629_v53, %s12112_s19  ;;  %7913 = vrot.lane.b32.xlu1 %v15599_v54, %s12112_s19  ;;  %v5975_v51 = vrot.slane %v5973_v3, 7  ;;  %v5976_v50 = vshll.u32 %v15695_v5, 16  ;;  %v2133_v30 = vand.u32 31, %v1543_v55  ;;  %v15789_v49 = vsel %vm7763_vm13, %v7799_v17, %v7801_v10  ;;  %v11981_v5 = vld [vmem:[#allocation2 + $0xb0] sm:$0xff]  ;;  %v11982_v55 = vld [vmem:[#allocation2 + $0xb8] sm:$0xff]  ;;  %vm5351_vm7 = vmpackc.low %vm15777_vm4, %vm15777_vm4 }
 0x57b   : > { %19918 = vst [vmem:[#allocation364_spill] sm:$0xff] %v15789_v49  ;;  %v7803_v34 = vrot.slane %v15757_v25, 1  ;;  %v5483_v27 = vsel %vm5347_vm15, 65537, %v19826_v1  ;;  %v15802_v3 = vsel %vm6321_vm12, %v11981_v5, 0  ;;  %v15805_v17 = vsel %vm6322_vm14, %v11982_v55, 0 }
 0x57c   : > { %v15770_v15 = vpop.permute.xlu0 %7608  ;;  %v15772_v20 = vpop.permute.xlu1 %7606  ;;  %vm6324_vm5 = vcmp.ne.s16.totalorder %v5955_v8, 0  ;;  %vm6325_vm6 = vcmp.ne.s16.totalorder %v5963_v7, 0  ;;  %vm6326_vm8 = vcmp.ne.s16.totalorder %v5971_v32, 0  ;;  %v15817_v56 = vrot.slane %v5989_v4, 7 }
 0x57d   : > { %19914 = vst [vmem:[#allocation362_spill] sm:$0xff] %v15770_v15  ;;  %19915 = vst [vmem:[#allocation363_spill] sm:$0xff] %v15772_v20  ;;  %v15793_v15 = vcombine.low %v19829_v40, %v5479_v60  ;;  %v11983_v20 = vld [vmem:[#allocation2 + $0xc0] sm:$0xff]  ;;  %v5992_v46 = vshll.u32 %v15729_v28, 16  ;;  %v5978_v5 = vor.u32 %v5976_v50, %v5975_v51  ;;  %v15821_v35 = vcombine.low %v19829_v40, %v5483_v27 }
 0x57e   : > { %7919 = vrot.lane.b32.xlu0 %v15664_v47, %s12112_s19  ;;  %7917 = vrot.lane.b32.xlu1 %v15641_v58, %s12112_s19  ;;  %v15808_v25 = vsel %vm6323_vm3, %v11983_v20, 0  ;;  %vm15823_vm10 = vcmp.ne.s32.totalorder %v2133_v30, 31  ;;  %v1547_v44 = vadd.s32 632, %v19819_v9  ;;  %v15833_v4 = vsel %vm7763_vm13, %v7801_v10, %v7803_v34  ;;  %v11985_v10 = vld [vmem:[#allocation2 + $0xd0] sm:$0xff] }
 0x57f   : > { %19923 = vst [vmem:[#allocation367_spill] sm:$0xff] %v15833_v4  ;;  %v6005_v50 = vshrl.u32 %v15793_v15, 16  ;;  %v5487_v28 = vsel %vm5351_vm7, 65537, %v19826_v1  ;;  %v1551_v30 = vadd.s32 664, %v19819_v9  ;;  %v7805_v27 = vrot.slane %v15802_v3, 1  ;;  %vm5355_vm11 = vmpackc.low %vm15823_vm10, %vm15823_vm10 }
 0x580   : > { %v15813_v6 = vpop.permute.xlu0 %7612  ;;  %v15815_v60 = vpop.permute.xlu1 %7610  ;;  %v7807_v55 = vrot.slane %v15805_v17, 1  ;;  %v6394_v52 = vsel %vm6325_vm6, %v11985_v10, 0  ;;  %v15848_v42 = vsel %vm6326_vm8, %v11986_v31, 0  ;;  %v5987_v3 = vsel %vm5756_vm9, %v5975_v51, %v19843_v18 }
 0x581   : > { %19919 = vst [vmem:[#allocation365_spill] sm:$0xff] %v15813_v6  ;;  %19920 = vst [vmem:[#allocation366_spill] sm:$0xff] %v15815_v60  ;;  %v7809_v6 = vrot.slane %v15808_v25, 1  ;;  %v11984_v60 = vld [vmem:[#allocation2 + $0xc8] sm:$0xff]  ;;  %v5994_v17 = vor.u32 %v5992_v46, %v15817_v56  ;;  %v5979_v8 = vsel %vm5756_vm9, %v19844_v48, %v5978_v5  ;;  %v6021_v25 = vshrl.u32 %v15821_v35, 16 }
 0x582   : > { %7923 = vrot.lane.b32.xlu0 %v15709_v0, %s12112_s19  ;;  %7921 = vrot.lane.b32.xlu1 %v15714_v12, %s12112_s19  ;;  %v6393_v19 = vsel %vm6324_vm5, %v11984_v60, 0  ;;  %v15860_v7 = vcombine.low %v19829_v40, %v5487_v28  ;;  %v2161_v32 = vand.u32 31, %v1547_v44  ;;  %v6007_v31 = vrot.slane %v6005_v50, 7 }
 0x583   : > { %v6008_v51 = vshll.u32 %v15793_v15, 16  ;;  %v2189_v60 = vand.u32 31, %v1551_v30  ;;  %v1555_v46 = vadd.s32 696, %v19819_v9  ;;  %v15869_v5 = vsel %vm7763_vm13, %v7803_v34, %v7805_v27 }
 0x584   : > { %v15842_v11 = vpop.permute.xlu0 %7616  ;;  %v15844_v22 = vpop.permute.xlu1 %7614  ;;  %19926 = vst [vmem:[#allocation370_spill] sm:$0xff] %v15869_v5  ;;  %v7811_v20 = vrot.slane %v6393_v19, 1  ;;  %v7813_v10 = vrot.slane %v6394_v52, 1  ;;  %v5491_v28 = vsel %vm5355_vm11, 65537, %v19826_v1  ;;  %vm6327_vm12 = vcmp.ne.s16.totalorder %v5979_v8, 0 }
 0x585   : > { %19924 = vst [vmem:[#allocation368_spill] sm:$0xff] %v15842_v11  ;;  %19925 = vst [vmem:[#allocation369_spill] sm:$0xff] %v15844_v22  ;;  %v7815_v22 = vrot.slane %v15848_v42, 1  ;;  %v5995_v15 = vsel %vm5756_vm9, %v19844_v48, %v5994_v17  ;;  %vm6328_vm14 = vcmp.ne.s16.totalorder %v5987_v3, 0  ;;  %v6023_v50 = vrot.slane %v6021_v25, 7 }
 0x586   : > { %7927 = vrot.lane.b32.xlu0 %v15750_v33, %s12112_s19  ;;  %7925 = vrot.lane.b32.xlu1 %v15739_v14, %s12112_s19  ;;  %v6024_v30 = vshll.u32 %v15821_v35, 16  ;;  %v6037_v34 = vshrl.u32 %v15860_v7, 16  ;;  %vm15881_vm15 = vcmp.ne.s32.totalorder %v2161_v32, 31  ;;  %v6010_v52 = vor.u32 %v6008_v51, %v6007_v31 }
 0x587   : > { %v15890_v42 = vcombine.low %v19829_v40, %v5491_v28  ;;  %vm15892_vm3 = vcmp.ne.s32.totalorder %v2189_v60, 31  ;;  %v2217_v35 = vand.u32 31, %v1555_v46  ;;  %v15897_v25 = vsel %vm7763_vm13, %v7807_v55, %v7809_v6  ;;  %v11987_v60 = vld [vmem:[#allocation2 + $0xe0] sm:$0xff]  ;;  %vm5359_vm4 = vmpackc.low %vm15881_vm15, %vm15881_vm15 }
 0x588   : > { %v15872_v44 = vpop.permute.xlu0 %7620  ;;  %v15874_v11 = vpop.permute.xlu1 %7618  ;;  %19933 = vst [vmem:[#allocation373_spill] sm:$0xff] %v15897_v25  ;;  %v15900_v32 = vsel %vm7763_vm13, %v7805_v27, %v7807_v55  ;;  %v15913_v38 = vsel %vm6327_vm12, %v11987_v60, 0  ;;  %v15916_v46 = vsel %vm7763_vm13, %v7813_v10, %v7815_v22  ;;  %v15919_v27 = vsel %vm6328_vm14, %v11988_v61, 0  ;;  %vm5363_vm7 = vmpackc.low %vm15892_vm3, %vm15892_vm3 }
 0x589   : > { %19927 = vst [vmem:[#allocation371_spill] sm:$0xff] %v15872_v44  ;;  %19928 = vst [vmem:[#allocation372_spill] sm:$0xff] %v15874_v11  ;;  %v15903_v44 = vsel %vm7763_vm13, %v7811_v20, %v7813_v10  ;;  %v15906_v11 = vsel %vm7763_vm13, %v7809_v6, %v7811_v20  ;;  %v6003_v6 = vsel %vm5756_vm9, %v15817_v56, %v19843_v18  ;;  %vm6329_vm5 = vcmp.ne.s16.totalorder %v5995_v15, 0 }
 0x58a   : > { %7931 = vrot.lane.b32.xlu0 %v15789_v49, %s12112_s19  ;;  %7929 = vrot.lane.b32.xlu1 %v15754_v63, %s12112_s19  ;;  %19934 = vst [vmem:[#allocation374_spill] sm:$0xff] %v15900_v32  ;;  %19935 = vst [vmem:[#allocation375_spill] sm:$0xff] %v15903_v44  ;;  %v6026_v55 = vor.u32 %v6024_v30, %v6023_v50  ;;  %v6039_v8 = vrot.slane %v6037_v34, 7  ;;  %v6040_v20 = vshll.u32 %v15860_v7, 16  ;;  %v6053_v56 = vshrl.u32 %v15890_v42, 16 }
 0x58b   : > { %19936 = vst [vmem:[#allocation376_spill] sm:$0xff] %v15906_v11  ;;  %19939 = vst [vmem:[#allocation379_spill] sm:$0xff] %v15916_v46  ;;  %v6011_v61 = vsel %vm5756_vm9, %v19844_v48, %v6010_v52  ;;  %vm15938_vm6 = vcmp.ne.s32.totalorder %v2217_v35, 31  ;;  %v1559_v7 = vadd.s32 728, %v19819_v9  ;;  %v7817_v10 = vrot.slane %v15913_v38, 1  ;;  %v11989_v52 = vld [vmem:[#allocation2 + $0xf0] sm:$0xff] }
 0x58c   : > { %v15908_v51 = vpop.permute.xlu0 %7624  ;;  %v15910_v28 = vpop.permute.xlu1 %7622  ;;  %v7819_v30 = vrot.slane %v15919_v27, 1  ;;  %vm6330_vm8 = vcmp.ne.s16.totalorder %v6003_v6, 0  ;;  %v5495_v34 = vsel %vm5359_vm4, 65537, %v19826_v1  ;;  %v6019_v35 = vsel %vm5756_vm9, %v6007_v31, %v19843_v18  ;;  %vm5367_vm11 = vmpackc.low %vm15938_vm6, %vm15938_vm6  ;;  %v11991_v6 = vld [vmem:[#allocation2 + $0x100] sm:$0xff] }
 0x58d   : > { %19937 = vst [vmem:[#allocation377_spill] sm:$0xff] %v15908_v51  ;;  %19938 = vst [vmem:[#allocation378_spill] sm:$0xff] %v15910_v28  ;;  %v15951_v51 = vsel %vm6329_vm5, %v11989_v52, 0  ;;  %v6035_v28 = vsel %vm5756_vm9, %v6023_v50, %v19843_v18  ;;  %v5499_v38 = vsel %vm5363_vm7, 65537, %v19826_v1  ;;  %vm6331_vm10 = vcmp.ne.s16.totalorder %v6011_v61, 0  ;;  %v11996_v61 = vld [vmem:[#allocation2 + $0x128] sm:$0xff] }
 0x58e   : > { %7935 = vrot.lane.b32.xlu0 %v15869_v5, %s12112_s19  ;;  %7933 = vrot.lane.b32.xlu1 %v15833_v4, %s12112_s19  ;;  %v6027_v27 = vsel %vm5756_vm9, %v19844_v48, %v6026_v55  ;;  %v6042_v15 = vor.u32 %v6040_v20, %v6039_v8  ;;  %v6056_v52 = vshll.u32 %v15890_v42, 16  ;;  %v15973_v31 = vrot.slane %v6053_v56, 7  ;;  %v11990_v20 = vld [vmem:[#allocation2 + $0xf8] sm:$0xff] }
 0x58f   : > { %v15976_v50 = vcombine.low %v19829_v40, %v5495_v34  ;;  %v2245_v17 = vand.u32 31, %v1559_v7  ;;  %v1563_v55 = vadd.s32 760, %v19819_v9  ;;  %v15980_v42 = vsel %vm7763_vm13, %v7815_v22, %v7817_v10  ;;  %v11993_v4 = vld [vmem:[#allocation2 + $0x118] sm:$0xff] }
 0x590   : > { %v15946_v19 = vpop.permute.xlu0 %7628  ;;  %v15948_v60 = vpop.permute.xlu1 %7626  ;;  %19944 = vst [vmem:[#allocation382_spill] sm:$0xff] %v15980_v42  ;;  %v15984_v5 = vcombine.low %v19829_v40, %v5499_v38  ;;  %v7821_v34 = vrot.slane %v15951_v51, 1  ;;  %vm6332_vm12 = vcmp.ne.s16.totalorder %v6019_v35, 0  ;;  %vm6334_vm14 = vcmp.ne.s16.totalorder %v6035_v28, 0 }
 0x591   : > { %19942 = vst [vmem:[#allocation380_spill] sm:$0xff] %v15946_v19  ;;  %19943 = vst [vmem:[#allocation381_spill] sm:$0xff] %v15948_v60  ;;  %v6399_v60 = vsel %vm6330_vm8, %v11990_v20, 0  ;;  %v5503_v22 = vsel %vm5367_vm11, 65537, %v19826_v1  ;;  %v15999_v7 = vsel %vm6331_vm10, %v11991_v6, 0  ;;  %vm6333_vm15 = vcmp.ne.s16.totalorder %v6027_v27, 0 }
 0x592   : > { %7939 = vrot.lane.b32.xlu0 %v15897_v25, %s12112_s19  ;;  %7937 = vrot.lane.b32.xlu1 %v15900_v32, %s12112_s19  ;;  %v1567_v25 = vadd.s32 792, %v19819_v9  ;;  %v6043_v38 = vsel %vm5756_vm9, %v19844_v48, %v6042_v15  ;;  %v6051_v51 = vsel %vm5756_vm9, %v6039_v8, %v19843_v18  ;;  %v6058_v3 = vor.u32 %v6056_v52, %v15973_v31 }
 0x593   : > { %v6069_v20 = vshrl.u32 %v15976_v50, 16  ;;  %vm16011_vm3 = vcmp.ne.s32.totalorder %v2245_v17, 31  ;;  %v2273_v6 = vand.u32 31, %v1563_v55  ;;  %v16016_v15 = vsel %vm7763_vm13, %v7817_v10, %v7819_v30 }
 0x594   : > { %v15987_v32 = vpop.permute.xlu0 %7632  ;;  %v15989_v56 = vpop.permute.xlu1 %7630  ;;  %19949 = vst [vmem:[#allocation385_spill] sm:$0xff] %v16016_v15  ;;  %v6085_v8 = vshrl.u32 %v15984_v5, 16  ;;  %v16020_v41 = vcombine.low %v19829_v40, %v5503_v22  ;;  %v16027_v52 = vsel %vm7763_vm13, %v7819_v30, %v7821_v34  ;;  %v7823_v17 = vrot.slane %v6399_v60, 1  ;;  %v11994_v22 = vld [vmem:[#allocation2 + $0x110] sm:$0xff]  ;;  %vm5371_vm7 = vmpackc.low %vm16011_vm3, %vm16011_vm3 }
 0x595   : > { %19945 = vst [vmem:[#allocation383_spill] sm:$0xff] %v15987_v32  ;;  %19946 = vst [vmem:[#allocation384_spill] sm:$0xff] %v15989_v56  ;;  %v6401_v55 = vsel %vm6332_vm12, %v11992_v29, 0  ;;  %v16031_v10 = vsel %vm6334_vm14, %v11993_v4, 0  ;;  %v7825_v26 = vrot.slane %v15999_v7, 1  ;;  %vm6335_vm4 = vcmp.ne.s16.totalorder %v6043_v38, 0 }
 0x596   : > { %7943 = vrot.lane.b32.xlu0 %v15903_v44, %s12112_s19  ;;  %7941 = vrot.lane.b32.xlu1 %v15906_v11, %s12112_s19  ;;  %v2301_v44 = vand.u32 31, %v1567_v25  ;;  %19952 = vst [vmem:[#allocation388_spill] sm:$0xff] %v16027_v52  ;;  %v6402_v25 = vsel %vm6333_vm15, %v11994_v22, 0  ;;  %vm6336_vm5 = vcmp.ne.s16.totalorder %v6051_v51, 0  ;;  %v6059_v29 = vsel %vm5756_vm9, %v19844_v48, %v6058_v3 }
 0x597   : > { %v6071_v4 = vrot.slane %v6069_v20, 7  ;;  %v6072_v28 = vshll.u32 %v15976_v50, 16  ;;  %vm16045_vm6 = vcmp.ne.s32.totalorder %v2273_v6, 31  ;;  %v16049_v60 = vrot.slane %v6085_v8, 7 }
 0x598   : > { %v16022_v57 = vpop.permute.xlu0 %7636  ;;  %v16024_v11 = vpop.permute.xlu1 %7634  ;;  %v6088_v35 = vshll.u32 %v15984_v5, 16  ;;  %v6101_v27 = vshrl.u32 %v16020_v41, 16  ;;  %vm16053_vm8 = vcmp.ne.s32.totalorder %v2301_v44, 31  ;;  %v16062_v50 = vsel %vm7763_vm13, %v7821_v34, %v7823_v17  ;;  %vm5375_vm10 = vmpackc.low %vm16045_vm6, %vm16045_vm6 }
 0x599   : > { %19950 = vst [vmem:[#allocation386_spill] sm:$0xff] %v16022_v57  ;;  %19951 = vst [vmem:[#allocation387_spill] sm:$0xff] %v16024_v11  ;;  %v7827_v20 = vrot.slane %v6401_v55, 1  ;;  %v7831_v6 = vrot.slane %v16031_v10, 1  ;;  %v5507_v5 = vsel %vm5371_vm7, 65537, %v19826_v1  ;;  %v16072_v44 = vsel %vm7763_vm13, %v7823_v17, %v7825_v26  ;;  %v12001_v11 = vld [vmem:[#allocation2 + $0x150] sm:$0xff] }
 0x59a   : > { %7947 = vrot.lane.b32.xlu0 %v15980_v42, %s12112_s19  ;;  %7945 = vrot.lane.b32.xlu1 %v15916_v46, %s12112_s19  ;;  %19959 = vst [vmem:[#allocation391_spill] sm:$0xff] %v16062_v50  ;;  %19960 = vst [vmem:[#allocation392_spill] sm:$0xff] %v16072_v44  ;;  %v7829_v8 = vrot.slane %v6402_v25, 1  ;;  %v11995_v42 = vld [vmem:[#allocation2 + $0x120] sm:$0xff]  ;;  %v1571_v34 = vadd.s32 824, %v19819_v9  ;;  %vm6337_vm11 = vcmp.ne.s16.totalorder %v6059_v29, 0  ;;  %v6074_v38 = vor.u32 %v6072_v28, %v6071_v4 }
 0x59b   : > { %v6404_v46 = vsel %vm6335_vm4, %v11995_v42, 0  ;;  %v6405_v17 = vsel %vm6336_vm5, %v11996_v61, 0  ;;  %v6067_v42 = vsel %vm5756_vm9, %v15973_v31, %v19843_v18  ;;  %vm5379_vm12 = vmpackc.low %vm16053_vm8, %vm16053_vm8  ;;  %v6090_v55 = vor.u32 %v6088_v35, %v16049_v60 }
 0x59c   : > { %v16057_v22 = vpop.permute.xlu0 %7640  ;;  %v16059_v3 = vpop.permute.xlu1 %7638  ;;  %v16091_v10 = vrot.slane %v6101_v27, 7  ;;  %v6104_v25 = vshll.u32 %v16020_v41, 16  ;;  %v16102_v31 = vsel %vm7763_vm13, %v7827_v20, %v7829_v8  ;;  %v16105_v28 = vsel %vm7763_vm13, %v7825_v26, %v7827_v20 }
 0x59d   : > { %19957 = vst [vmem:[#allocation389_spill] sm:$0xff] %v16057_v22  ;;  %19958 = vst [vmem:[#allocation390_spill] sm:$0xff] %v16059_v3  ;;  %v7833_v7 = vrot.slane %v6404_v46, 1  ;;  %v1575_v35 = vadd.s32 856, %v19819_v9  ;;  %v7835_v27 = vrot.slane %v6405_v17, 1  ;;  %v5511_v41 = vsel %vm5375_vm10, 65537, %v19826_v1 }
 0x59e   : > { %7951 = vrot.lane.b32.xlu0 %v16027_v52, %s12112_s19  ;;  %7949 = vrot.lane.b32.xlu1 %v16016_v15, %s12112_s19  ;;  %v16095_v52 = vcombine.low %v19829_v40, %v5507_v5  ;;  %19963 = vst [vmem:[#allocation395_spill] sm:$0xff] %v16102_v31  ;;  %19964 = vst [vmem:[#allocation396_spill] sm:$0xff] %v16105_v28  ;;  %v5515_v5 = vsel %vm5379_vm12, 65537, %v19826_v1  ;;  %v2329_v15 = vand.u32 31, %v1571_v34  ;;  %v11997_v46 = vld [vmem:[#allocation2 + $0x130] sm:$0xff]  ;;  %vm6338_vm14 = vcmp.ne.s16.totalorder %v6067_v42, 0 }
 0x59f   : > { %v16120_v26 = vsel %vm7763_vm13, %v7829_v8, %v7831_v6  ;;  %v6406_v20 = vsel %vm6337_vm11, %v11997_v46, 0  ;;  %v6083_v30 = vsel %vm5756_vm9, %v6071_v4, %v19843_v18  ;;  %v6075_v17 = vsel %vm5756_vm9, %v19844_v48, %v6074_v38 }
 0x5a0   : > { %v16097_v51 = vpop.permute.xlu0 %7644  ;;  %v16099_v61 = vpop.permute.xlu1 %7642  ;;  %v6091_v34 = vsel %vm5756_vm9, %v19844_v48, %v6090_v55  ;;  %v16136_v29 = vcombine.low %v19829_v40, %v5511_v41  ;;  %v16139_v42 = vcombine.low %v19829_v40, %v5515_v5  ;;  %v2357_v4 = vand.u32 31, %v1575_v35 }
 0x5a1   : > { %19961 = vst [vmem:[#allocation393_spill] sm:$0xff] %v16097_v51  ;;  %19962 = vst [vmem:[#allocation394_spill] sm:$0xff] %v16099_v61  ;;  %v1579_v38 = vadd.s32 888, %v19819_v9  ;;  %v16143_v46 = vsel %vm7763_vm13, %v7831_v6, %v7833_v7  ;;  %v16146_v55 = vsel %vm7763_vm13, %v7833_v7, %v7835_v27  ;;  %vm16148_vm15 = vcmp.ne.s32.totalorder %v2329_v15, 31 }
 0x5a2   : > { %7955 = vrot.lane.b32.xlu0 %v16072_v44, %s12112_s19  ;;  %7953 = vrot.lane.b32.xlu1 %v16062_v50, %s12112_s19  ;;  %v6106_v44 = vor.u32 %v6104_v25, %v16091_v10  ;;  %v6117_v50 = vshrl.u32 %v16095_v52, 16  ;;  %v11998_v25 = vld [vmem:[#allocation2 + $0x138] sm:$0xff]  ;;  %v7837_v35 = vrot.slane %v6406_v20, 1  ;;  %vm6339_vm3 = vcmp.ne.s16.totalorder %v6075_v17, 0  ;;  %vm5383_vm7 = vmpackc.low %vm16148_vm15, %vm16148_vm15 }
 0x5a3   : > { %v6407_v61 = vsel %vm6338_vm14, %v11998_v25, 0  ;;  %vm6340_vm4 = vcmp.ne.s16.totalorder %v6083_v30, 0  ;;  %v6099_v6 = vsel %vm5756_vm9, %v16049_v60, %v19843_v18  ;;  %vm6341_vm5 = vcmp.ne.s16.totalorder %v6091_v34, 0 }
 0x5a4   : > { %v16131_v51 = vpop.permute.xlu0 %7648  ;;  %v16133_v8 = vpop.permute.xlu1 %7646  ;;  %v6107_v15 = vsel %vm5756_vm9, %v19844_v48, %v6106_v44  ;;  %v6119_v7 = vrot.slane %v6117_v50, 7  ;;  %v6120_v41 = vshll.u32 %v16095_v52, 16  ;;  %v6149_v20 = vshrl.u32 %v16139_v42, 16 }
 0x5a5   : > { %19965 = vst [vmem:[#allocation397_spill] sm:$0xff] %v16131_v51  ;;  %19966 = vst [vmem:[#allocation398_spill] sm:$0xff] %v16133_v8  ;;  %v6133_v8 = vshrl.u32 %v16136_v29, 16  ;;  %vm16171_vm6 = vcmp.ne.s32.totalorder %v2357_v4, 31  ;;  %v2385_v44 = vand.u32 31, %v1579_v38  ;;  %v16176_v50 = vsel %vm7763_vm13, %v7835_v27, %v7837_v35  ;;  %v12000_v4 = vld [vmem:[#allocation2 + $0x140] sm:$0xff] }
 0x5a6   : > { %7959 = vrot.lane.b32.xlu0 %v16102_v31, %s12112_s19  ;;  %7957 = vrot.lane.b32.xlu1 %v16105_v28, %s12112_s19  ;;  %v7839_v52 = vrot.slane %v6407_v61, 1  ;;  %v1583_v22 = vadd.s32 920, %v19819_v9  ;;  %v6408_v3 = vsel %vm6339_vm3, %v12000_v4, 0  ;;  %v16186_v38 = vsel %vm6341_vm5, %v12001_v11, 0  ;;  %vm5387_vm11 = vmpackc.low %vm16171_vm6, %vm16171_vm6 }
 0x5a7   : > { %vm6342_vm8 = vcmp.ne.s16.totalorder %v6099_v6, 0  ;;  %v6115_v61 = vsel %vm5756_vm9, %v16091_v10, %v19843_v18  ;;  %vm6343_vm10 = vcmp.ne.s16.totalorder %v6107_v15, 0  ;;  %v6122_v27 = vor.u32 %v6120_v41, %v6119_v7 }
 0x5a8   : > { %v16162_v5 = vpop.permute.xlu0 %7652  ;;  %v16164_v25 = vpop.permute.xlu1 %7650  ;;  %v6136_v30 = vshll.u32 %v16136_v29, 16  ;;  %v5519_v17 = vsel %vm5383_vm7, 65537, %v19826_v1  ;;  %v6135_v10 = vrot.slane %v6133_v8, 7  ;;  %v6152_v29 = vshll.u32 %v16139_v42, 16 }
 0x5a9   : > { %19969 = vst [vmem:[#allocation399_spill] sm:$0xff] %v16162_v5  ;;  %19970 = vst [vmem:[#allocation400_spill] sm:$0xff] %v16164_v25  ;;  %v11999_v5 = vld [vmem:[#allocation2 + $0x148] sm:$0xff]  ;;  %vm16208_vm12 = vcmp.ne.s32.totalorder %v2385_v44, 31  ;;  %v7841_v51 = vrot.slane %v6408_v3, 1  ;;  %v16213_v4 = vsel %vm7763_vm13, %v7837_v35, %v7839_v52  ;;  %v2413_v57 = vand.u32 31, %v1583_v22 }
 0x5aa   : > { %v6409_v25 = vsel %vm6340_vm4, %v11999_v5, 0  ;;  %7963 = vrot.lane.b32.xlu0 %v16143_v46, %s12112_s19  ;;  %7961 = vrot.lane.b32.xlu1 %v16120_v26, %s12112_s19  ;;  %v16205_v5 = vrot.slane %v6149_v20, 7  ;;  %v12002_v20 = vld [vmem:[#allocation2 + $0x158] sm:$0xff]  ;;  %v16222_v44 = vcombine.low %v19829_v40, %v5519_v17  ;;  %v5523_v22 = vsel %vm5387_vm11, 65537, %v19826_v1  ;;  %vm5391_vm15 = vmpackc.low %vm16208_vm12, %vm16208_vm12 }
 0x5ab   : > { %v7843_v8 = vrot.slane %v6409_v25, 1  ;;  %v6411_v42 = vsel %vm6342_vm8, %v12002_v20, 0  ;;  %v16231_v3 = vsel %vm7763_vm13, %v7839_v52, %v7841_v51  ;;  %v7845_v35 = vrot.slane %v16186_v38, 1 }
 0x5ac   : > { %v16201_v11 = vpop.permute.xlu0 %7656  ;;  %v16203_v34 = vpop.permute.xlu1 %7654  ;;  %vm6344_vm14 = vcmp.ne.s16.totalorder %v6115_v61, 0  ;;  %v6123_v60 = vsel %vm5756_vm9, %v19844_v48, %v6122_v27  ;;  %v6131_v52 = vsel %vm5756_vm9, %v6119_v7, %v19843_v18  ;;  %v6138_v38 = vor.u32 %v6136_v30, %v6135_v10 }
 0x5ad   : > { %19973 = vst [vmem:[#allocation401_spill] sm:$0xff] %v16201_v11  ;;  %19974 = vst [vmem:[#allocation402_spill] sm:$0xff] %v16203_v34  ;;  %v12003_v11 = vld [vmem:[#allocation2 + $0x160] sm:$0xff]  ;;  %v6154_v15 = vor.u32 %v6152_v29, %v16205_v5  ;;  %vm16252_vm3 = vcmp.ne.s32.totalorder %v2413_v57, 31  ;;  %v2441_v34 = vand.u32 31, %v1587_v37  ;;  %v16262_v7 = vsel %vm7763_vm13, %v7841_v51, %v7843_v8 }
 0x5ae   : > { %7967 = vrot.lane.b32.xlu0 %v16176_v50, %s12112_s19  ;;  %7965 = vrot.lane.b32.xlu1 %v16146_v55, %s12112_s19  ;;  %v16235_v25 = vsel %vm6343_vm10, %v12003_v11, 0  ;;  %v16250_v11 = vcombine.low %v19829_v40, %v5523_v22  ;;  %v7847_v27 = vrot.slane %v6411_v42, 1  ;;  %v6165_v30 = vshrl.u32 %v16222_v44, 16  ;;  %v12004_v22 = vld [vmem:[#allocation2 + $0x168] sm:$0xff]  ;;  %vm5395_vm7 = vmpackc.low %vm16252_vm3, %vm16252_vm3 }
 0x5af   : > { %v5527_v37 = vsel %vm5391_vm15, 65537, %v19826_v1  ;;  %v16272_v57 = vsel %vm7763_vm13, %v7843_v8, %v7845_v35  ;;  %v7849_v29 = vrot.slane %v16235_v25, 1  ;;  %vm6346_vm4 = vcmp.ne.s16.totalorder %v6131_v52, 0 }
 0x5b0   : > { %v16240_v6 = vpop.permute.xlu0 %7660  ;;  %v16242_v17 = vpop.permute.xlu1 %7658  ;;  %vm6345_vm5 = vcmp.ne.s16.totalorder %v6123_v60, 0  ;;  %v6139_v49 = vsel %vm5756_vm9, %v19844_v48, %v6138_v38  ;;  %v6147_v41 = vsel %vm5756_vm9, %v6135_v10, %v19843_v18  ;;  %v6155_v8 = vsel %vm5756_vm9, %v19844_v48, %v6154_v15 }
 0x5b1   : > { %19977 = vst [vmem:[#allocation403_spill] sm:$0xff] %v16240_v6  ;;  %19978 = vst [vmem:[#allocation404_spill] sm:$0xff] %v16242_v17  ;;  %v1591_v6 = vadd.s32 984, %v19819_v9  ;;  %v6413_v17 = vsel %vm6344_vm14, %v12004_v22, 0  ;;  %v6181_v61 = vshrl.u32 %v16250_v11, 16  ;;  %v16291_v25 = vcombine.low %v19829_v40, %v5527_v37 }
 0x5b2   : > { %7971 = vrot.lane.b32.xlu0 %v16231_v3, %s12112_s19  ;;  %7969 = vrot.lane.b32.xlu1 %v16213_v4, %s12112_s19  ;;  %vm16293_vm6 = vcmp.ne.s32.totalorder %v2441_v34, 31  ;;  %v16302_v10 = vsel %vm7763_vm13, %v7845_v35, %v7847_v27  ;;  %v7851_v15 = vrot.slane %v6413_v17, 1  ;;  %v16306_v37 = vsel %vm7763_vm13, %v7847_v27, %v7849_v29  ;;  %v12005_v34 = vld [vmem:[#allocation2 + $0x170] sm:$0xff] }
 0x5b3   : > { %v2469_v38 = vand.u32 31, %v1591_v6  ;;  %v6414_v32 = vsel %vm6345_vm5, %v12005_v34, 0  ;;  %v12006_v6 = vld [vmem:[#allocation2 + $0x178] sm:$0xff]  ;;  %v5531_v35 = vsel %vm5395_vm7, 65537, %v19826_v1  ;;  %vm6347_vm8 = vcmp.ne.s16.totalorder %v6139_v49, 0  ;;  %vm5399_vm12 = vmpackc.low %vm16293_vm6, %vm16293_vm6 }
 0x5b4   : > { %v16276_v51 = vpop.permute.xlu0 %7664  ;;  %v16278_v42 = vpop.permute.xlu1 %7662  ;;  %v6415_v19 = vsel %vm6346_vm4, %v12006_v6, 0  ;;  %vm6348_vm10 = vcmp.ne.s16.totalorder %v6147_v41, 0  ;;  %vm6349_vm11 = vcmp.ne.s16.totalorder %v6155_v8, 0  ;;  %v6183_v60 = vrot.slane %v6181_v61, 7 }
 0x5b5   : > { %19981 = vst [vmem:[#allocation405_spill] sm:$0xff] %v16276_v51  ;;  %19982 = vst [vmem:[#allocation406_spill] sm:$0xff] %v16278_v42  ;;  %v6167_v51 = vrot.slane %v6165_v30, 7  ;;  %v6168_v42 = vshll.u32 %v16222_v44, 16  ;;  %v6163_v44 = vsel %vm5756_vm9, %v16205_v5, %v19843_v18  ;;  %v6184_v52 = vshll.u32 %v16250_v11, 16  ;;  %v12007_v11 = vld [vmem:[#allocation2 + $0x180] sm:$0xff] }
 0x5b6   : > { %7975 = vrot.lane.b32.xlu0 %v16272_v57, %s12112_s19  ;;  %7973 = vrot.lane.b32.xlu1 %v16262_v7, %s12112_s19  ;;  %v6197_v20 = vshrl.u32 %v16291_v25, 16  ;;  %vm16328_vm14 = vcmp.ne.s32.totalorder %v2469_v38, 31  ;;  %v7853_v5 = vrot.slane %v6414_v32, 1  ;;  %v11518_v22 = vcombine.low %v19829_v40, %v5531_v35  ;;  %v12008_v32 = vld [vmem:[#allocation2 + $0x188] sm:$0xff]  ;;  %v12009_v35 = vld [vmem:[#allocation2 + $0x190] sm:$0xff] }
 0x5b7   : > { %v6170_v34 = vor.u32 %v6168_v42, %v6167_v51  ;;  %v16338_v61 = vsel %vm7763_vm13, %v7849_v29, %v7851_v15  ;;  %v6416_v6 = vsel %vm6347_vm8, %v12007_v11, 0  ;;  %v7855_v38 = vrot.slane %v6415_v19, 1  ;;  %vm5403_vm3 = vmpackc.low %vm16328_vm14, %vm16328_vm14 }
 0x5b8   : > { %v16316_v17 = vpop.permute.xlu0 %7668  ;;  %v16318_v30 = vpop.permute.xlu1 %7666  ;;  %v16347_v16 = vsel %vm7763_vm13, %v7851_v15, %v7853_v5  ;;  %v6417_v42 = vsel %vm6348_vm10, %v12008_v32, 0  ;;  %v6418_v29 = vsel %vm6349_vm11, %v12009_v35, 0  ;;  %vm6350_vm15 = vcmp.ne.s16.totalorder %v6163_v44, 0 }
 0x5b9   : > { %19985 = vst [vmem:[#allocation407_spill] sm:$0xff] %v16316_v17  ;;  %19986 = vst [vmem:[#allocation408_spill] sm:$0xff] %v16318_v30  ;;  %v5535_v17 = vsel %vm5399_vm12, 65537, %v19826_v1  ;;  %v6179_v49 = vsel %vm5756_vm9, %v6167_v51, %v19843_v18  ;;  %v6186_v19 = vor.u32 %v6184_v52, %v6183_v60  ;;  %v6199_v11 = vrot.slane %v6197_v20, 7 }
 0x5ba   : > { %7979 = vrot.lane.b32.xlu0 %v16306_v37, %s12112_s19  ;;  %7977 = vrot.lane.b32.xlu1 %v16302_v10, %s12112_s19  ;;  %v7857_v41 = vrot.slane %v6416_v6, 1  ;;  %v6171_v8 = vsel %vm5756_vm9, %v19844_v48, %v6170_v34  ;;  %v6213_v15 = vshrl.u32 %v11518_v22, 16  ;;  %v11520_v27 = vcombine.low %v19829_v40, %v5535_v17 }
 0x5bb   : > { %v16365_v32 = vsel %vm7763_vm13, %v7853_v5, %v7855_v38  ;;  %v7859_v51 = vrot.slane %v6417_v42, 1  ;;  %v5539_v52 = vsel %vm5403_vm3, 65537, %v19826_v1  ;;  %v7861_v6 = vrot.slane %v6418_v29, 1 }
 0x5bc   : > { %v16342_v30 = vpop.permute.xlu0 %7672  ;;  %v16344_v39 = vpop.permute.xlu1 %7670  ;;  %v16373_v35 = vsel %vm7763_vm13, %v7855_v38, %v7857_v41  ;;  %vm6352_vm4 = vcmp.ne.s16.totalorder %v6179_v49, 0  ;;  %vm6351_vm5 = vcmp.ne.s16.totalorder %v6171_v8, 0  ;;  %v6187_v17 = vsel %vm5756_vm9, %v19844_v48, %v6186_v19  ;;  %v12013_v49 = vld [vmem:[#allocation2 + $0x1b0] sm:$0xff] }
 0x5bd   : > { %19989 = vst [vmem:[#allocation409_spill] sm:$0xff] %v16342_v30  ;;  %19990 = vst [vmem:[#allocation410_spill] sm:$0xff] %v16344_v39  ;;  %v6200_v30 = vshll.u32 %v16291_v25, 16  ;;  %v12010_v39 = vld [vmem:[#allocation2 + $0x198] sm:$0xff]  ;;  %v6195_v5 = vsel %vm5756_vm9, %v6183_v60, %v19843_v18  ;;  %v6215_v38 = vrot.slane %v6213_v15, 7  ;;  %v6216_v29 = vshll.u32 %v11518_v22, 16 }
 0x5be   : > { %7983 = vrot.lane.b32.xlu0 %v16347_v16, %s12112_s19  ;;  %7981 = vrot.lane.b32.xlu1 %v16338_v61, %s12112_s19  ;;  %v6419_v34 = vsel %vm6350_vm15, %v12010_v39, 0  ;;  %v11522_v39 = vcombine.low %v19829_v40, %v5539_v52  ;;  %v16390_v19 = vsel %vm7763_vm13, %v7859_v51, %v7861_v6  ;;  %v12011_v60 = vld [vmem:[#allocation2 + $0x1a0] sm:$0xff]  ;;  %vm6353_vm7 = vcmp.ne.s16.totalorder %v6187_v17, 0 }
 0x5bf   : > { %v6202_v42 = vor.u32 %v6200_v30, %v6199_v11  ;;  %v16393_v30 = vsel %vm7763_vm13, %v7857_v41, %v7859_v51  ;;  %v7863_v56 = vrot.slane %v6419_v34, 1  ;;  %v6421_v22 = vsel %vm6352_vm4, %v12012_v13, 0 }
 0x5c0   : > { %v16368_v25 = vpop.permute.xlu0 %7676  ;;  %v16370_v20 = vpop.permute.xlu1 %7674  ;;  %vm6354_vm6 = vcmp.ne.s16.totalorder %v6195_v5, 0  ;;  %v6218_v52 = vor.u32 %v6216_v29, %v6215_v38  ;;  %v6232_v51 = vshll.u32 %v11520_v27, 16  ;;  %v6211_v63 = vsel %vm5756_vm9, %v6199_v11, %v19843_v18  ;;  %v12015_v5 = vld [vmem:[#allocation2 + $0x1c0] sm:$0xff] }
 0x5c1   : > { %19991 = vst [vmem:[#allocation411_spill] sm:$0xff] %v16368_v25  ;;  %19992 = vst [vmem:[#allocation412_spill] sm:$0xff] %v16370_v20  ;;  %v6229_v25 = vshrl.u32 %v11520_v27, 16  ;;  %v6420_v20 = vsel %vm6351_vm5, %v12011_v60, 0  ;;  %v6203_v15 = vsel %vm5756_vm9, %v19844_v48, %v6202_v42  ;;  %v16407_v13 = vsel %vm7763_vm13, %v7861_v6, %v7863_v56  ;;  %v12014_v27 = vld [vmem:[#allocation2 + $0x1b8] sm:$0xff] }
 0x5c2   : > { %7987 = vrot.lane.b32.xlu0 %v16373_v35, %s12112_s19  ;;  %7985 = vrot.lane.b32.xlu1 %v16365_v32, %s12112_s19  ;;  %v7865_v60 = vrot.slane %v6420_v20, 1  ;;  %v6422_v42 = vsel %vm6353_vm7, %v12013_v49, 0  ;;  %vm6355_vm8 = vcmp.ne.s16.totalorder %v6203_v15, 0  ;;  %v6423_v20 = vsel %vm6354_vm6, %v12014_v27, 0 }
 0x5c3   : > { %v6231_v41 = vrot.slane %v6229_v25, 7  ;;  %v7867_v25 = vrot.slane %v6421_v22, 1  ;;  %v6219_v6 = vsel %vm5756_vm9, %v19844_v48, %v6218_v52  ;;  %v6248_v11 = vshll.u32 %v11522_v39, 16 }
 0x5c4   : > { %v16385_v44 = vpop.permute.xlu0 %7680  ;;  %v16387_v8 = vpop.permute.xlu1 %7678  ;;  %v16413_v33 = vsel %vm7763_vm13, %v7863_v56, %v7865_v60  ;;  %v7869_v49 = vrot.slane %v6422_v42, 1  ;;  %vm6356_vm10 = vcmp.ne.s16.totalorder %v6211_v63, 0  ;;  %v6424_v15 = vsel %vm6355_vm8, %v12015_v5, 0  ;;  %v12016_v63 = vld [vmem:[#allocation2 + $0x1c8] sm:$0xff] }
 0x5c5   : > { %19993 = vst [vmem:[#allocation413_spill] sm:$0xff] %v16385_v44  ;;  %19994 = vst [vmem:[#allocation414_spill] sm:$0xff] %v16387_v8  ;;  %v6245_v44 = vshrl.u32 %v11522_v39, 16  ;;  %v6234_v17 = vor.u32 %v6232_v51, %v6231_v41  ;;  %v6227_v27 = vsel %vm5756_vm9, %v6215_v38, %v19843_v18  ;;  %v16433_v52 = vsel %vm7763_vm13, %v7865_v60, %v7867_v25  ;;  %v20003_v5 = vld [vmem:[#allocation110_spill] sm:$0xff] }
 0x5c6   : > { %7991 = vrot.lane.b32.xlu0 %v16390_v19, %s12112_s19  ;;  %7989 = vrot.lane.b32.xlu1 %v16393_v30, %s12112_s19  ;;  %19997 = vst [vmem:[#allocation417_spill] sm:$0xff] %v16413_v33  ;;  %v7871_v39 = vrot.slane %v6423_v20, 1  ;;  %vm6357_vm11 = vcmp.ne.s16.totalorder %v6219_v6, 0  ;;  %vm6358_vm12 = vcmp.ne.s16.totalorder %v6227_v27, 0  ;;  %v6243_v6 = vsel %vm5756_vm9, %v6231_v41, %v19843_v18 }
 0x5c7   : > { %v6247_v29 = vrot.slane %v6245_v44, 7  ;;  %v6425_v44 = vsel %vm6356_vm10, %v12016_v63, 0  ;;  %v6235_v38 = vsel %vm5756_vm9, %v19844_v48, %v6234_v17  ;;  %vm6360_vm15 = vcmp.ne.s16.totalorder %v6243_v6, 0 }
 0x5c8   : > { %v16402_v34 = vpop.permute.xlu0 %7684  ;;  %v16404_v8 = vpop.permute.xlu1 %7682  ;;  %v16452_v63 = vsel %vm7763_vm13, %v7869_v49, %v7871_v39  ;;  %v7875_v17 = vrot.slane %v6425_v44, 1  ;;  %vm6359_vm14 = vcmp.ne.s16.totalorder %v6235_v38, 0  ;;  %vm10070_vm7 = vcmask 1041408  }
 0x5c9   : > { %19995 = vst [vmem:[#allocation415_spill] sm:$0xff] %v16402_v34  ;;  %19996 = vst [vmem:[#allocation416_spill] sm:$0xff] %v16404_v8  ;;  %v20000_v34 = vld [vmem:[#allocation107_spill] sm:$0xff]  ;;  %v6250_v51 = vor.u32 %v6248_v11, %v6247_v29  ;;  %v12018_v11 = vld [vmem:[#allocation2 + $0x1d8] sm:$0xff]  ;;  %v6259_v44 = vsel %vm5756_vm9, %v6247_v29, %v19843_v18 }
 0x5ca   : > { %7995 = vrot.lane.b32.xlu0 %v16413_v33, %s12112_s19  ;;  %7993 = vrot.lane.b32.xlu1 %v16407_v13, %s12112_s19  ;;  %v6264_v8 = vshll.u32 %v20000_v34, 16  ;;  %v16430_v33 = vsel %vm7763_vm13, %v7867_v25, %v7869_v49  ;;  %v7873_v34 = vrot.slane %v6424_v15, 1  ;;  %v12017_v25 = vld [vmem:[#allocation2 + $0x1d0] sm:$0xff]  ;;  %v6427_v15 = vsel %vm6358_vm12, %v12018_v11, 0  ;;  %v12019_v49 = vld [vmem:[#allocation2 + $0x1e0] sm:$0xff] }
 0x5cb   : > { %v6426_v20 = vsel %vm6357_vm11, %v12017_v25, 0  ;;  %v6251_v41 = vsel %vm5756_vm9, %v19844_v48, %v6250_v51  ;;  %v7879_v51 = vrot.slane %v6427_v15, 1  ;;  %vm6362_vm4 = vcmp.ne.s16.totalorder %v6259_v44, 0 }
 0x5cc   : > { %v16422_v56 = vpop.permute.xlu0 %7688  ;;  %v16424_v22 = vpop.permute.xlu1 %7686  ;;  %v16472_v11 = vsel %vm7763_vm13, %v7873_v34, %v7875_v17  ;;  %vm6361_vm3 = vcmp.ne.s16.totalorder %v6251_v41, 0  ;;  %vm8621_vm12 = vcmask 97280  }
 0x5cd   : > { %19998 = vst [vmem:[#allocation418_spill] sm:$0xff] %v16422_v56  ;;  %19999 = vst [vmem:[#allocation419_spill] sm:$0xff] %v16424_v22  ;;  %v6266_v56 = vor.u32 %v6264_v8, %v20003_v5  ;;  %v16449_v22 = vsel %vm7763_vm13, %v7871_v39, %v7873_v34  ;;  %v7877_v8 = vrot.slane %v6426_v20, 1  ;;  %v6428_v39 = vsel %vm6359_vm14, %v12019_v49, 0  ;;  %v12020_v20 = vld [vmem:[#allocation2 + $0x1e8] sm:$0xff] }
 0x5ce   : > { %7999 = vrot.lane.b32.xlu0 %v16430_v33, %s12112_s19  ;;  %7997 = vrot.lane.b32.xlu1 %v16433_v52, %s12112_s19  ;;  %v6429_v6 = vsel %vm6360_vm15, %v12020_v20, 0  ;;  %v7881_v29 = vrot.slane %v6428_v39, 1  ;;  %v12022_v39 = vld [vmem:[#allocation2 + $0x1f8] sm:$0xff]  ;;  %vm8882_vm14 = vcmask 162816   ;;  %vm9013_vm15 = vcmask 195584  }
 0x5cf   : > { %v6267_v38 = vsel %vm5756_vm9, %v19844_v48, %v6266_v56  ;;  %v16469_v5 = vsel %vm7763_vm13, %v7875_v17, %v7877_v8  ;;  %v16486_v15 = vsel %vm7763_vm13, %v7877_v8, %v7879_v51  ;;  %v7883_v41 = vrot.slane %v6429_v6, 1 }
 0x5d0   : > { %v16441_v42 = vpop.permute.xlu0 %7692  ;;  %v16443_v60 = vpop.permute.xlu1 %7690  ;;  %vm6363_vm5 = vcmp.ne.s16.totalorder %v6267_v38, 0  ;;  %v16483_v17 = vsel %vm7763_vm13, %v7879_v51, %v7881_v29  ;;  %v6431_v44 = vsel %vm6362_vm4, %v12022_v39, 0  ;;  %v12023_v38 = vld [vmem:[#allocation2 + $0x200] sm:$0xff]  ;;  %vm9144_vm4 = vcmask 228352  }
 0x5d1   : > { %20001 = vst [vmem:[#allocation107_spill] sm:$0xff] %v16441_v42  ;;  %20002 = vst [vmem:[#allocation420_spill] sm:$0xff] %v16443_v60  ;;  %v6432_v20 = vsel %vm6363_vm5, %v12023_v38, 0  ;;  %v16500_v8 = vsel %vm7763_vm13, %v7881_v29, %v7883_v41  ;;  %v7887_v51 = vrot.slane %v6431_v44, 1  ;;  %v20012_v44 = vld [vmem:[#allocation116_spill] sm:$0xff]  ;;  %vm9877_vm5 = vcmask 293888  }
 0x5d2   : > { %8003 = vrot.lane.b32.xlu0 %v16449_v22, %s12112_s19  ;;  %8001 = vrot.lane.b32.xlu1 %v16452_v63, %s12112_s19  ;;  %20006 = vst [vmem:[#allocation422_spill] sm:$0xff] %v16483_v17  ;;  %20008 = vst [vmem:[#allocation424_spill] sm:$0xff] %v16500_v8  ;;  %v7889_v6 = vrot.slane %v6432_v20, 1  ;;  %v20013_v20 = vrot.slane %v20012_v44, 1 }
 0x5d4   : > { %v16460_v27 = vpop.permute.xlu0 %7696  ;;  %v16462_v25 = vpop.permute.xlu1 %7694  ;;  %v16511_v38 = vsel %vm7763_vm13, %v7887_v51, %v7889_v6  ;;  %v16527_v18 = vsel %vm7763_vm13, %v7889_v6, %v20013_v20 }
 0x5d5   : > { %20004 = vst [vmem:[#allocation110_spill] sm:$0xff] %v16460_v27  ;;  %20005 = vst [vmem:[#allocation421_spill] sm:$0xff] %v16462_v25  ;;  %v12021_v27 = vld [vmem:[#allocation2 + $0x1f0] sm:$0xff] }
 0x5d6   : > { %8007 = vrot.lane.b32.xlu0 %v16469_v5, %s12112_s19  ;;  %8005 = vrot.lane.b32.xlu1 %v16472_v11, %s12112_s19  ;;  %v6430_v34 = vsel %vm6361_vm3, %v12021_v27, 0  ;;  %20009 = vst [vmem:[#allocation425_spill] sm:$0xff] %v16511_v38  ;;  %20014 = vst [vmem:[#allocation116_spill] sm:$0xff] %v16527_v18  ;;  %vm9275_vm3 = vcmask 261120  }
 0x5d7   : > { %v7885_v25 = vrot.slane %v6430_v34, 1 }
 0x5d8   : > { %v16478_v56 = vpop.permute.xlu0 %7895  ;;  %v16480_v49 = vpop.permute.xlu1 %7893 }
 0x5d9   : > { %v16497_v60 = vsel %vm7763_vm13, %v7883_v41, %v7885_v25  ;;  %v16514_v48 = vsel %vm7763_vm13, %v7885_v25, %v7887_v51 }
 0x5da   : > { %8011 = vrot.lane.b32.xlu0 %v16483_v17, %s12112_s19  ;;  %8009 = vrot.lane.b32.xlu1 %v16486_v15, %s12112_s19  ;;  %20007 = vst [vmem:[#allocation423_spill] sm:$0xff] %v16497_v60  ;;  %20010 = vst [vmem:[#allocation426_spill] sm:$0xff] %v16514_v48  ;;  %v20095_v17 = vld [vmem:[#allocation317_spill] sm:$0xff] }
 0x5dc   : > { %v16492_v42 = vpop.permute.xlu0 %7899  ;;  %v16494_v27 = vpop.permute.xlu1 %7897 }
 0x5de   : > { %8015 = vrot.lane.b32.xlu0 %v16497_v60, %s12112_s19  ;;  %8013 = vrot.lane.b32.xlu1 %v16500_v8, %s12112_s19  ;;  %v20087_v60 = vld [vmem:[#allocation53_spill] sm:$0xff] }
 0x5e0   : > { %v16506_v39 = vpop.permute.xlu0 %7903  ;;  %v16508_v34 = vpop.permute.xlu1 %7901 }
 0x5e2   : > { %8019 = vrot.lane.b32.xlu0 %v16511_v38, %s12112_s19  ;;  %8017 = vrot.lane.b32.xlu1 %v16514_v48, %s12112_s19  ;;  %v20082_v48 = vld [vmem:[#allocation27_spill] sm:$0xff] }
 0x5e4   : > { %v16520_v29 = vpop.permute.xlu0 %7907  ;;  %v16522_v41 = vpop.permute.xlu1 %7905 }
 0x5e5   : > { %20011 = vst [vmem:[#allocation427_spill] sm:$0xff] %v16520_v29 }
 0x5e6   : > { %8029 = vrot.lane.b32.xlu0 %v15363_v59, %s12113_s26  ;;  %8021 = vrot.lane.b32.xlu1 %v16527_v18, %s12112_s19 }
 0x5e8   : > { %v16533_v25 = vpop.permute.xlu0 %7911  ;;  %v16535_v51 = vpop.permute.xlu1 %7909 }
 0x5e9   : > { %20015 = vst [vmem:[#allocation428_spill] sm:$0xff] %v16533_v25  ;;  %20016 = vst [vmem:[#allocation429_spill] sm:$0xff] %v16535_v51  ;;  %v20097_v51 = vld [vmem:[#allocation70_spill] sm:$0xff] }
 0x5ea   : > { %8033 = vrot.lane.b32.xlu0 %v15519_v21, %s12113_s26  ;;  %8031 = vrot.lane.b32.xlu1 %v15388_v24, %s12113_s26 }
 0x5ec   : > { %v16541_v44 = vpop.permute.xlu0 %7915  ;;  %v16543_v6 = vpop.permute.xlu1 %7913 }
 0x5ed   : > { %20017 = vst [vmem:[#allocation430_spill] sm:$0xff] %v16541_v44  ;;  %20018 = vst [vmem:[#allocation431_spill] sm:$0xff] %v16543_v6  ;;  %v20074_v44 = vld [vmem:[#allocation56_spill] sm:$0xff] }
 0x5ee   : > { %8037 = vrot.lane.b32.xlu0 %v19901_v45, %s12113_s26  ;;  %8035 = vrot.lane.b32.xlu1 %v15513_v36, %s12113_s26  ;;  %v20086_v6 = vld [vmem:[#allocation100_spill] sm:$0xff] }
 0x5ef   : > { %v16857_v25 = vsel %vm308_vm1, %v20087_v60, %v20086_v6  ;;  %v20096_v6 = vld [vmem:[#allocation132_spill] sm:$0xff] }
 0x5f0   : > { %v16549_v59 = vpop.permute.xlu0 %7919  ;;  %v16551_v20 = vpop.permute.xlu1 %7917 }
 0x5f1   : > { %20019 = vst [vmem:[#allocation432_spill] sm:$0xff] %v16549_v59  ;;  %20020 = vst [vmem:[#allocation433_spill] sm:$0xff] %v16551_v20  ;;  %v11893_v59 = vld [vmem:[%s18912_s2] sm:$0xff]  }
 0x5f2   : > { %8041 = vrot.lane.b32.xlu0 %v15526_v62, %s12113_s26  ;;  %8039 = vrot.lane.b32.xlu1 %v19900_v23, %s12113_s26 }
 0x5f3   : > { %11814 = vmatprep.subr.bf16.mxu1 %v11893_v59  ;;  %11680 = vmatprep.subr.bf16.mxu0 %v11893_v59 }
 0x5f4   : > { %v16557_v24 = vpop.permute.xlu0 %7923  ;;  %v16559_v21 = vpop.permute.xlu1 %7921  ;;  %11817 = vmatpush3.bf16.msra.mxu1 %v11893_v59  ;;  %11681 = vmatpush3.bf16.msra.mxu0 %v11893_v59 }
 0x5f5   : > { %20021 = vst [vmem:[#allocation434_spill] sm:$0xff] %v16557_v24  ;;  %20022 = vst [vmem:[#allocation435_spill] sm:$0xff] %v16559_v21  ;;  %v11894_v24 = vld [vmem:[%s18912_s2 + $0x8] sm:$0xff]  }
 0x5f6   : > { %8045 = vrot.lane.b32.xlu0 %v15599_v54, %s12113_s26  ;;  %8043 = vrot.lane.b32.xlu1 %v15564_v43, %s12113_s26 }
 0x5f7   : > { %11815 = vmatprep.subr.bf16.mxu1 %v11894_v24  ;;  %11682 = vmatprep.subr.bf16.mxu0 %v11894_v24 }
 0x5f8   : > { %v16568_v18 = vpop.permute.xlu0 %7927  ;;  %v16570_v20 = vpop.permute.xlu1 %7925  ;;  %11818 = vmatpush3.bf16.msra.mxu1 %v11894_v24  ;;  %11683 = vmatpush3.bf16.msra.mxu0 %v11894_v24 }
 0x5f9   : > { %20023 = vst [vmem:[#allocation436_spill] sm:$0xff] %v16568_v18  ;;  %20024 = vst [vmem:[#allocation437_spill] sm:$0xff] %v16570_v20  ;;  %v11895_v18 = vld [vmem:[%s18912_s2 + $0x10] ss:$0 sps:$4 sm:$0x33]  }
 0x5fa   : > { %8093 = vrot.lane.b32.xlu0 %v16120_v26, %s12113_s26  ;;  %8091 = vrot.lane.b32.xlu1 %v16102_v31, %s12113_s26  ;;  %v10072_v59 = vsel %vm10070_vm7, %v11895_v18, 0 }
 0x5fb   : > { %11821 = vmatprep.subr.msk.bf16.mxu1 %vm10070_vm7, %v11895_v18  ;;  %11820 = vmatprep.subr.msk.bf16.mxu0 %vm10070_vm7, %v11895_v18 }
 0x5fc   : > { %v16582_v20 = vpop.permute.xlu0 %7931  ;;  %v16584_v21 = vpop.permute.xlu1 %7929  ;;  %11819 = vmatpush3.bf16.msra.mxu1 %v10072_v59  ;;  %11685 = vmatpush3.bf16.msra.mxu0 %v10072_v59 }
 0x5fd   : > { %20025 = vst [vmem:[#allocation438_spill] sm:$0xff] %v16582_v20  ;;  %20026 = vst [vmem:[#allocation439_spill] sm:$0xff] %v16584_v21 }
 0x5fe   : > { %8089 = vrot.lane.b32.xlu0 %v16105_v28, %s12113_s26  ;;  %8227 = vrot.lane.b32.xlu1 %v16143_v46, %s12114_s6  ;;  %v20072_v28 = vld [vmem:[#allocation47_spill] sm:$0xff] }
 0x600   : > { %v16590_v31 = vpop.permute.xlu0 %7935  ;;  %v16592_v38 = vpop.permute.xlu1 %7933 }
 0x601   : > { %20027 = vst [vmem:[#allocation440_spill] sm:$0xff] %v16590_v31  ;;  %20028 = vst [vmem:[#allocation441_spill] sm:$0xff] %v16592_v38 }
 0x602   : > { %8225 = vrot.lane.b32.xlu0 %v16120_v26, %s12114_s6  ;;  %8229 = vrot.lane.b32.xlu1 %v16146_v55, %s12114_s6 }
 0x604   : > { %v16598_v24 = vpop.permute.xlu0 %7939  ;;  %v16600_v20 = vpop.permute.xlu1 %7937 }
 0x605   : > { %20029 = vst [vmem:[#allocation442_spill] sm:$0xff] %v16598_v24  ;;  %20030 = vst [vmem:[#allocation443_spill] sm:$0xff] %v16600_v20 }
 0x606   : > { %8097 = vrot.lane.b32.xlu0 %v16146_v55, %s12113_s26  ;;  %8095 = vrot.lane.b32.xlu1 %v16143_v46, %s12113_s26 }
 0x608   : > { %v16606_v18 = vpop.permute.xlu0 %7943  ;;  %v16608_v31 = vpop.permute.xlu1 %7941 }
 0x609   : > { %20031 = vst [vmem:[#allocation444_spill] sm:$0xff] %v16606_v18  ;;  %20032 = vst [vmem:[#allocation445_spill] sm:$0xff] %v16608_v31 }
 0x60a   : > { %8233 = vrot.lane.b32.xlu0 %v16213_v4, %s12114_s6  ;;  %8231 = vrot.lane.b32.xlu1 %v16176_v50, %s12114_s6 }
 0x60c   : > { %v16614_v26 = vpop.permute.xlu0 %7947  ;;  %v16616_v59 = vpop.permute.xlu1 %7945 }
 0x60d   : > { %20033 = vst [vmem:[#allocation446_spill] sm:$0xff] %v16614_v26  ;;  %20034 = vst [vmem:[#allocation447_spill] sm:$0xff] %v16616_v59 }
 0x60e   : > { %8167 = vrot.lane.b32.xlu0 %v15513_v36, %s12114_s6  ;;  %8099 = vrot.lane.b32.xlu1 %v16176_v50, %s12113_s26 }
 0x610   : > { %v16622_v46 = vpop.permute.xlu0 %7951  ;;  %v16624_v55 = vpop.permute.xlu1 %7949 }
 0x611   : > { %20035 = vst [vmem:[#allocation448_spill] sm:$0xff] %v16622_v46  ;;  %20036 = vst [vmem:[#allocation449_spill] sm:$0xff] %v16624_v55 }
 0x612   : > { %8169 = vrot.lane.b32.xlu0 %v19901_v45, %s12114_s6  ;;  %8101 = vrot.lane.b32.xlu1 %v16213_v4, %s12113_s26 }
 0x614   : > { %v16630_v18 = vpop.permute.xlu0 %7955  ;;  %v16632_v26 = vpop.permute.xlu1 %7953 }
 0x616   : > { %8165 = vrot.lane.b32.xlu0 %v15426_v2, %s12114_s6  ;;  %8235 = vrot.lane.b32.xlu1 %v16231_v3, %s12114_s6 }
 0x618   : > { %v16638_v36 = vpop.permute.xlu0 %7959  ;;  %v16640_v50 = vpop.permute.xlu1 %7957 }
 0x61a   : > { %8103 = vrot.lane.b32.xlu0 %v16231_v3, %s12113_s26  ;;  %8237 = vrot.lane.b32.xlu1 %v16262_v7, %s12114_s6 }
 0x61c   : > { %v16646_v45 = vpop.permute.xlu0 %7963  ;;  %v16648_v4 = vpop.permute.xlu1 %7961 }
 0x61e   : > { %8105 = vrot.lane.b32.xlu0 %v16262_v7, %s12113_s26  ;;  %8171 = vrot.lane.b32.xlu1 %v19900_v23, %s12114_s6 }
 0x620   : > { %v16654_v2 = vpop.permute.xlu0 %7967  ;;  %v16656_v46 = vpop.permute.xlu1 %7965 }
 0x622   : > { %8239 = vrot.lane.b32.xlu0 %v16272_v57, %s12114_s6  ;;  %8173 = vrot.lane.b32.xlu1 %v15526_v62, %s12114_s6 }
 0x624   : > { %v16662_v3 = vpop.permute.xlu0 %7971  ;;  %v16664_v55 = vpop.permute.xlu1 %7969 }
 0x626   : > { %8107 = vrot.lane.b32.xlu0 %v16272_v57, %s12113_s26  ;;  %8241 = vrot.lane.b32.xlu1 %v16302_v10, %s12114_s6 }
 0x628   : > { %v16670_v23 = vpop.permute.xlu0 %7975  ;;  %v16672_v7 = vpop.permute.xlu1 %7973 }
 0x629   : > { %20037 = vst [vmem:[#allocation450_spill] sm:$0xff] %v16670_v23  ;;  %20038 = vst [vmem:[#allocation451_spill] sm:$0xff] %v16672_v7  ;;  %v20110_v7 = vld [vmem:[#allocation76_spill] sm:$0xff] }
 0x62a   : > { %8109 = vrot.lane.b32.xlu0 %v16302_v10, %s12113_s26  ;;  %8175 = vrot.lane.b32.xlu1 %v15564_v43, %s12114_s6 }
 0x62c   : > { %v16678_v62 = vpop.permute.xlu0 %7979  ;;  %v16680_v59 = vpop.permute.xlu1 %7977 }
 0x62d   : > { %20039 = vst [vmem:[#allocation452_spill] sm:$0xff] %v16678_v62  ;;  %20040 = vst [vmem:[#allocation453_spill] sm:$0xff] %v16680_v59  ;;  %v20092_v59 = vld [vmem:[#allocation63_spill] sm:$0xff] }
 0x62e   : > { %8243 = vrot.lane.b32.xlu0 %v16306_v37, %s12114_s6  ;;  %8177 = vrot.lane.b32.xlu1 %v15599_v54, %s12114_s6 }
 0x630   : > { %v16686_v57 = vpop.permute.xlu0 %7983  ;;  %v16688_v31 = vpop.permute.xlu1 %7981 }
 0x631   : > { %20041 = vst [vmem:[#allocation454_spill] sm:$0xff] %v16686_v57  ;;  %20042 = vst [vmem:[#allocation455_spill] sm:$0xff] %v16688_v31  ;;  %v20073_v57 = vld [vmem:[#allocation80_spill] sm:$0xff] }
 0x632   : > { %8111 = vrot.lane.b32.xlu0 %v16306_v37, %s12113_s26  ;;  %8245 = vrot.lane.b32.xlu1 %v16338_v61, %s12114_s6  ;;  %v20085_v31 = vld [vmem:[#allocation60_spill] sm:$0xff] }
 0x634   : > { %v16694_v43 = vpop.permute.xlu0 %7987  ;;  %v16696_v10 = vpop.permute.xlu1 %7985 }
 0x635   : > { %20043 = vst [vmem:[#allocation456_spill] sm:$0xff] %v16694_v43  ;;  %20044 = vst [vmem:[#allocation457_spill] sm:$0xff] %v16696_v10 }
 0x636   : > { %8113 = vrot.lane.b32.xlu0 %v16338_v61, %s12113_s26  ;;  %8179 = vrot.lane.b32.xlu1 %v15629_v53, %s12114_s6 }
 0x638   : > { %v16702_v54 = vpop.permute.xlu0 %7991  ;;  %v16704_v24 = vpop.permute.xlu1 %7989 }
 0x639   : > { %20045 = vst [vmem:[#allocation458_spill] sm:$0xff] %v16702_v54  ;;  %20046 = vst [vmem:[#allocation459_spill] sm:$0xff] %v16704_v24  ;;  %v20069_v24 = vld [vmem:[#allocation25_spill] sm:$0xff] }
 0x63a   : > { %8247 = vrot.lane.b32.xlu0 %v16347_v16, %s12114_s6  ;;  %8181 = vrot.lane.b32.xlu1 %v15641_v58, %s12114_s6 }
 0x63c   : > { %v16710_v37 = vpop.permute.xlu0 %7995  ;;  %v16712_v20 = vpop.permute.xlu1 %7993 }
 0x63d   : > { %20047 = vst [vmem:[#allocation460_spill] sm:$0xff] %v16710_v37  ;;  %20048 = vst [vmem:[#allocation461_spill] sm:$0xff] %v16712_v20  ;;  %v1608_v37 = vand.u32 31, %v19819_v9 }
 0x63e   : > { %8047 = vrot.lane.b32.xlu0 %v15629_v53, %s12113_s26  ;;  %8249 = vrot.lane.b32.xlu1 %v16365_v32, %s12114_s6 }
 0x63f   : > { %vm3305_vm6 = vcmp.ne.s32.totalorder %v1608_v37, 0 }
 0x640   : > { %v16718_v61 = vpop.permute.xlu0 %7999  ;;  %v16720_v38 = vpop.permute.xlu1 %7997  ;;  %vm3713_vm8 = vmpackc.low %vm3305_vm6, %vm3305_vm6 }
 0x641   : > { %20049 = vst [vmem:[#allocation462_spill] sm:$0xff] %v16718_v61  ;;  %20050 = vst [vmem:[#allocation463_spill] sm:$0xff] %v16720_v38  ;;  %v12024_v38 = vld [vmem:[#allocation2 + $0x8] sm:$0xff] }
 0x642   : > { %8115 = vrot.lane.b32.xlu0 %v16347_v16, %s12113_s26  ;;  %8049 = vrot.lane.b32.xlu1 %v15641_v58, %s12113_s26 }
 0x644   : > { %v16727_v21 = vpop.permute.xlu0 %8003  ;;  %v16729_v20 = vpop.permute.xlu1 %8001 }
 0x645   : > { %20051 = vst [vmem:[#allocation464_spill] sm:$0xff] %v16727_v21  ;;  %20052 = vst [vmem:[#allocation465_spill] sm:$0xff] %v16729_v20 }
 0x646   : > { %8117 = vrot.lane.b32.xlu0 %v16365_v32, %s12113_s26  ;;  %8183 = vrot.lane.b32.xlu1 %v15664_v47, %s12114_s6  ;;  %v3849_v32 = vsel %vm3713_vm8, 65537, %v19826_v1 }
 0x647   : > { %v11393_v37 = vcombine.low %v3849_v32, %v19829_v40  ;;  %v16828_v40 = vsel %vm308_vm1, %v20074_v44, %v20073_v57  ;;  %v20083_v57 = vld [vmem:[#allocation185_spill] sm:$0xff] }
 0x648   : > { %v16735_v53 = vpop.permute.xlu0 %8007  ;;  %v16737_v61 = vpop.permute.xlu1 %8005 }
 0x649   : > { %20053 = vst [vmem:[#allocation466_spill] sm:$0xff] %v16735_v53  ;;  %20054 = vst [vmem:[#allocation467_spill] sm:$0xff] %v16737_v61  ;;  %v4194_v32 = vshrl.u32 %v11393_v37, 16 }
 0x64a   : > { %8251 = vrot.lane.b32.xlu0 %v16373_v35, %s12114_s6  ;;  %8185 = vrot.lane.b32.xlu1 %v15714_v12, %s12114_s6 }
 0x64c   : > { %v16743_v16 = vpop.permute.xlu0 %8011  ;;  %v16745_v58 = vpop.permute.xlu1 %8009 }
 0x64d   : > { %20055 = vst [vmem:[#allocation468_spill] sm:$0xff] %v16743_v16  ;;  %20056 = vst [vmem:[#allocation469_spill] sm:$0xff] %v16745_v58  ;;  %v4191_v16 = vshll.u32 %v11393_v37, 16 }
 0x64e   : > { %8051 = vrot.lane.b32.xlu0 %v15664_v47, %s12113_s26  ;;  %8253 = vrot.lane.b32.xlu1 %v16393_v30, %s12114_s6 }
 0x64f   : > { %v4193_v47 = vrot.slane %v4191_v16, 1 }
 0x650   : > { %v16753_v53 = vpop.permute.xlu0 %8015  ;;  %v16755_v61 = vpop.permute.xlu1 %8013 }
 0x651   : > { %20057 = vst [vmem:[#allocation470_spill] sm:$0xff] %v16753_v53  ;;  %20058 = vst [vmem:[#allocation471_spill] sm:$0xff] %v16755_v61  ;;  %vm4733_vm10 = vcmp.ne.s16.totalorder %v4193_v47, 0 }
 0x652   : > { %8119 = vrot.lane.b32.xlu0 %v16373_v35, %s12113_s26  ;;  %8053 = vrot.lane.b32.xlu1 %v15714_v12, %s12113_s26  ;;  %v4196_v12 = vor.u32 %v4194_v32, %v4193_v47  ;;  %v3236_v32 = vld [vmem:[#allocation2] sm:$0x80] }
 0x653   : > { %v4802_v20 = vsel %vm4733_vm10, %v3236_v32, 0 }
 0x654   : > { %v16761_v58 = vpop.permute.xlu0 %8019  ;;  %v16763_v21 = vpop.permute.xlu1 %8017 }
 0x655   : > { %20059 = vst [vmem:[#allocation472_spill] sm:$0xff] %v16761_v58  ;;  %20060 = vst [vmem:[#allocation473_spill] sm:$0xff] %v16763_v21 }
 0x656   : > { %8121 = vrot.lane.b32.xlu0 %v16393_v30, %s12113_s26  ;;  %8187 = vrot.lane.b32.xlu1 %v15709_v0, %s12114_s6  ;;  %v20062_v30 = vld [vmem:[#allocation30_spill] sm:$0xff] }
 0x657   : > { %v4201_v16 = vsel %vm4189_vm2, %v4196_v12, %v20062_v30  ;;  %v20064_v30 = vld [vmem:[#allocation360_spill] sm:$0xff]  ;;  %vm8490_vm2 = vcmask 64512  }
 0x658   : > { %v16769_v53 = vpop.permute.xlu0 %8029  ;;  %v16771_v61 = vpop.permute.xlu1 %8021  ;;  %vm4734_vm11 = vcmp.ne.s16.totalorder %v4201_v16, 0  ;;  %v20068_v16 = vld [vmem:[#allocation11_spill] sm:$0xff] }
 0x659   : > { %20061 = vst [vmem:[#allocation474_spill] sm:$0xff] %v16771_v61  ;;  %v4803_v12 = vsel %vm4734_vm11, %v12024_v38, 0  ;;  %v16814_v32 = vsel %vm308_vm1, %v20069_v24, %v20068_v16  ;;  %v20070_v38 = vld [vmem:[#allocation86_spill] sm:$0xff]  ;;  %v20077_v24 = vld [vmem:[#allocation417_spill] sm:$0xff]  ;;  %v20079_v16 = vld [vmem:[#allocation88_spill] sm:$0xff] }
 0x65a   : > { %8255 = vrot.lane.b32.xlu0 %v16390_v19, %s12114_s6  ;;  %8189 = vrot.lane.b32.xlu1 %v15739_v14, %s12114_s6  ;;  %v16818_v43 = vsel %vm308_vm1, %v4803_v12, %v20070_v38  ;;  %v20078_v12 = vld [vmem:[#allocation361_spill] sm:$0xff]  ;;  %v20080_v38 = vld [vmem:[#allocation55_spill] sm:$0xff] }
 0x65c   : > { %v16777_v35 = vpop.permute.xlu0 %8033  ;;  %v16779_v58 = vpop.permute.xlu1 %8031 }
 0x65e   : > { %8055 = vrot.lane.b32.xlu0 %v15709_v0, %s12113_s26  ;;  %8257 = vrot.lane.b32.xlu1 %v16407_v13, %s12114_s6 }
 0x660   : > { %v16787_v37 = vpop.permute.xlu0 %8037  ;;  %v16789_v61 = vpop.permute.xlu1 %8035 }
 0x662   : > { %8123 = vrot.lane.b32.xlu0 %v16390_v19, %s12113_s26  ;;  %8057 = vrot.lane.b32.xlu1 %v15739_v14, %s12113_s26  ;;  %v20067_v14 = vld [vmem:[#allocation78_spill] sm:$0xff] }
 0x663   : > { %v16809_v47 = vsel %vm308_vm1, %v4802_v20, %v20067_v14  ;;  %v20075_v20 = vld [vmem:[#allocation130_spill] sm:$0xff] }
 0x664   : > { %v16795_v0 = vpop.permute.xlu0 %8041  ;;  %v16797_v21 = vpop.permute.xlu1 %8039  ;;  %v20076_v14 = vld [vmem:[#allocation42_spill] sm:$0xff] }
 0x665   : > { %20063 = vst [vmem:[#allocation30_spill] sm:$0xff] %v16795_v0  ;;  %v8390_v1 = vsel %vm308_vm1, %v20076_v14, %v20075_v20  ;;  %v20084_v14 = vld [vmem:[#allocation99_spill] sm:$0xff] }
 0x666   : > { %8125 = vrot.lane.b32.xlu0 %v16407_v13, %s12113_s26  ;;  %8191 = vrot.lane.b32.xlu1 %v20064_v30, %s12114_s6  ;;  %v20071_v13 = vld [vmem:[#allocation9_spill] sm:$0xff]  ;;  %v8554_v20 = vsel %vm8490_vm2, %v8390_v1, %v20083_v57  ;;  %v16852_v62 = vsel %vm308_vm1, %v20085_v31, %v20084_v14  ;;  %v20093_v31 = vld [vmem:[#allocation131_spill] sm:$0xff]  ;;  %v20094_v14 = vld [vmem:[#allocation44_spill] sm:$0xff] }
 0x667   : > { %v16823_v10 = vsel %vm308_vm1, %v20072_v28, %v20071_v13  ;;  %v16840_v28 = vsel %vm308_vm1, %v20080_v38, %v20079_v16  ;;  %v20081_v13 = vld [vmem:[#allocation87_spill] sm:$0xff]  ;;  %v20089_v38 = vld [vmem:[#allocation45_spill] sm:$0xff]  ;;  %v8399_v23 = vsel %vm308_vm1, %v20094_v14, %v20093_v31 }
 0x668   : > { %v16803_v19 = vpop.permute.xlu0 %8045  ;;  %v16805_v54 = vpop.permute.xlu1 %8043  ;;  %v16845_v44 = vsel %vm308_vm1, %v20082_v48, %v20081_v13  ;;  %v20088_v16 = vld [vmem:[#allocation127_spill] sm:$0xff]  ;;  %v20091_v57 = vld [vmem:[#allocation129_spill] sm:$0xff] }
 0x669   : > { %20065 = vst [vmem:[#allocation360_spill] sm:$0xff] %v16803_v19  ;;  %20066 = vst [vmem:[#allocation475_spill] sm:$0xff] %v16805_v54  ;;  %v8387_v9 = vsel %vm308_vm1, %v20089_v38, %v20088_v16  ;;  %v20090_v48 = vld [vmem:[#allocation271_spill] sm:$0xff]  ;;  %v8393_v19 = vsel %vm308_vm1, %v20092_v59, %v20091_v57  ;;  %v8396_v16 = vsel %vm308_vm1, %v20097_v51, %v20096_v6  ;;  %v20098_v38 = vld [vmem:[#allocation384_spill] sm:$0xff] }
 0x66a   : > { %8259 = vrot.lane.b32.xlu0 %v20077_v24, %s12114_s6  ;;  %8193 = vrot.lane.b32.xlu1 %v20078_v12, %s12114_s6  ;;  %v8685_v13 = vsel %vm8621_vm12, %v8554_v20, %v20090_v48  ;;  %v20099_v59 = vld [vmem:[#allocation186_spill] sm:$0xff]  ;;  %v20101_v57 = vld [vmem:[#allocation133_spill] sm:$0xff] }
 0x66b   : > { %v8815_v60 = vsel %vm252_vm0, %v8685_v13, %v20095_v17  ;;  %v8552_v48 = vsel %vm8490_vm2, %v8387_v9, %v20099_v59  ;;  %v20100_v17 = vld [vmem:[#allocation188_spill] sm:$0xff]  ;;  %v20102_v31 = vld [vmem:[#allocation69_spill] sm:$0xff]  ;;  %v20104_v6 = vld [vmem:[#allocation270_spill] sm:$0xff] }
 0x66c   : > { %v8094_v8 = vpop.permute.xlu0 %8093  ;;  %v8092_v1 = vpop.permute.xlu1 %8091  ;;  %v8946_v20 = vsel %vm8882_vm14, %v8815_v60, %v20098_v38  ;;  %v8556_v13 = vsel %vm8490_vm2, %v8393_v19, %v20100_v17  ;;  %v16890_v14 = vsel %vm308_vm1, %v20102_v31, %v20101_v57  ;;  %v20105_v19 = vld [vmem:[#allocation134_spill] sm:$0xff]  ;;  %v20108_v57 = vld [vmem:[#allocation320_spill] sm:$0xff] }
 0x66d   : > { %v9077_v51 = vsel %vm9013_vm15, %v8946_v20, %v16630_v18  ;;  %v8687_v38 = vsel %vm8621_vm12, %v8556_v13, %v20104_v6  ;;  %v20106_v17 = vld [vmem:[#allocation18_spill] sm:$0xff]  ;;  %v20112_v6 = vld [vmem:[#allocation383_spill] sm:$0xff] }
 0x66e   : > { %8059 = vrot.lane.b32.xlu0 %v20064_v30, %s12113_s26  ;;  %8261 = vrot.lane.b32.xlu1 %v16433_v52, %s12114_s6  ;;  %v20103_v30 = vld [vmem:[#allocation268_spill] sm:$0xff]  ;;  %v9208_v9 = vsel %vm9144_vm4, %v9077_v51, %v8092_v1  ;;  %v16900_v18 = vsel %vm308_vm1, %v20106_v17, %v20105_v19  ;;  %v20107_v20 = vld [vmem:[#allocation318_spill] sm:$0xff]  ;;  %v8817_v31 = vsel %vm252_vm0, %v8687_v38, %v20108_v57 }
 0x66f   : > { %v8683_v60 = vsel %vm8621_vm12, %v8552_v48, %v20103_v30  ;;  %v20109_v30 = vld [vmem:[#allocation135_spill] sm:$0xff]  ;;  %v20111_v1 = vld [vmem:[#allocation380_spill] sm:$0xff]  ;;  %v8948_v19 = vsel %vm8882_vm14, %v8817_v31, %v20112_v6 }
 0x670   : > { %v8090_v59 = vpop.permute.xlu0 %8089  ;;  %v8228_v54 = vpop.permute.xlu1 %8227  ;;  %v8813_v29 = vsel %vm252_vm0, %v8683_v60, %v20107_v20  ;;  %v16910_v13 = vsel %vm308_vm1, %v20110_v7, %v20109_v30  ;;  %v20113_v60 = vld [vmem:[#allocation136_spill] sm:$0xff]  ;;  %v20115_v7 = vld [vmem:[#allocation137_spill] sm:$0xff]  ;;  %v9079_v57 = vsel %vm9013_vm15, %v8948_v19, %v16640_v50 }
 0x671   : > { %v9339_v48 = vsel %vm9275_vm3, %v9208_v9, %v8228_v54  ;;  %v8944_v51 = vsel %vm8882_vm14, %v8813_v29, %v20111_v1  ;;  %v20114_v54 = vld [vmem:[#allocation15_spill] sm:$0xff]  ;;  %v20116_v9 = vld [vmem:[#allocation68_spill] sm:$0xff]  ;;  %v20120_v19 = vld [vmem:[#allocation273_spill] sm:$0xff] }
 0x672   : > { %v9624_v17 = vshrl.u32 %v9339_v48, 16  ;;  %8127 = vrot.lane.b32.xlu0 %v20077_v24, %s12113_s26  ;;  %8061 = vrot.lane.b32.xlu1 %v20078_v12, %s12113_s26  ;;  %v16923_v38 = vsel %vm308_vm1, %v20114_v54, %v20113_v60  ;;  %v16928_v20 = vsel %vm308_vm1, %v20116_v9, %v20115_v7  ;;  %v9075_v29 = vsel %vm9013_vm15, %v8944_v51, %v16632_v26  ;;  %v20117_v24 = vld [vmem:[#allocation187_spill] sm:$0xff]  ;;  %v20118_v54 = vld [vmem:[#allocation190_spill] sm:$0xff]  ;;  %v20119_v51 = vld [vmem:[#allocation272_spill] sm:$0xff] }
 0x673   : > { %v8558_v31 = vsel %vm8490_vm2, %v8396_v16, %v20117_v24  ;;  %v9210_v12 = vsel %vm9144_vm4, %v9079_v57, %v8094_v8  ;;  %v9206_v30 = vsel %vm9144_vm4, %v9075_v29, %v8090_v59  ;;  %v8560_v7 = vsel %vm8490_vm2, %v8399_v23, %v20118_v54  ;;  %v20121_v59 = vld [vmem:[#allocation364_spill] sm:$0xff]  ;;  %v20122_v23 = vld [vmem:[#allocation319_spill] sm:$0xff] }
 0x674   : > { %v9626_v1 = vrot.slane %v9624_v17, 7  ;;  %v8226_v6 = vpop.permute.xlu0 %8225  ;;  %v8230_v60 = vpop.permute.xlu1 %8229  ;;  %v9627_v9 = vshll.u32 %v9339_v48, 16  ;;  %v8691_v50 = vsel %vm8621_vm12, %v8560_v7, %v20119_v51  ;;  %v8689_v16 = vsel %vm8621_vm12, %v8558_v31, %v20120_v19  ;;  %v20123_v17 = vld [vmem:[#allocation322_spill] sm:$0xff]  ;;  %v20126_v19 = vld [vmem:[#allocation163_spill] sm:$0xff] }
 0x675   : > { %v9337_v0 = vsel %vm9275_vm3, %v9206_v30, %v8226_v6  ;;  %v9341_v26 = vsel %vm9275_vm3, %v9210_v12, %v8230_v60  ;;  %v8819_v48 = vsel %vm252_vm0, %v8689_v16, %v20122_v23  ;;  %v8821_v29 = vsel %vm252_vm0, %v8691_v50, %v20123_v17  ;;  %v20124_v7 = vld [vmem:[#allocation138_spill] sm:$0xff]  ;;  %v20128_v50 = vld [vmem:[#allocation387_spill] sm:$0xff] }
 0x676   : > { %v9617_v8 = vshrl.u32 %v9337_v0, 16  ;;  %v9631_v57 = vshrl.u32 %v9341_v26, 16  ;;  %8129 = vrot.lane.b32.xlu0 %v16433_v52, %s12113_s26  ;;  %8195 = vrot.lane.b32.xlu1 %v20121_v59, %s12114_s6  ;;  %v9629_v24 = vor.u32 %v9627_v9, %v9626_v1  ;;  %v9620_v30 = vshll.u32 %v9337_v0, 16  ;;  %v20125_v52 = vld [vmem:[#allocation73_spill] sm:$0xff]  ;;  %v20127_v23 = vld [vmem:[#allocation386_spill] sm:$0xff] }
 0x677   : > { %v9634_v31 = vshll.u32 %v9341_v26, 16  ;;  %v16959_v51 = vsel %vm308_vm1, %v20125_v52, %v20124_v7  ;;  %v8494_v16 = vsel %vm8490_vm2, %v16818_v43, %v20126_v19  ;;  %v8952_v9 = vsel %vm8882_vm14, %v8821_v29, %v20127_v23  ;;  %v20130_v7 = vld [vmem:[#allocation139_spill] sm:$0xff]  ;;  %v20131_v43 = vld [vmem:[#allocation72_spill] sm:$0xff] }
 0x678   : > { %v9619_v12 = vrot.slane %v9617_v8, 7  ;;  %v16954_v6 = vrot.slane %v9631_v57, 7  ;;  %v8098_v60 = vpop.permute.xlu0 %8097  ;;  %v8096_v54 = vpop.permute.xlu1 %8095  ;;  %v8950_v0 = vsel %vm8882_vm14, %v8819_v48, %v20128_v50  ;;  %v20129_v57 = vld [vmem:[#allocation367_spill] sm:$0xff]  ;;  %v16979_v52 = vsel %vm308_vm1, %v20131_v43, %v20130_v7  ;;  %v20132_v29 = vld [vmem:[#allocation236_spill] sm:$0xff] }
 0x679   : > { %v8625_v48 = vsel %vm8621_vm12, %v8494_v16, %v20132_v29  ;;  %v20133_v19 = vld [vmem:[#allocation291_spill] sm:$0xff]  ;;  %v20134_v16 = vld [vmem:[#allocation140_spill] sm:$0xff]  ;;  %v20135_v29 = vld [vmem:[#allocation17_spill] sm:$0xff] }
 0x67a   : > { %v16968_v8 = vor.u32 %v9620_v30, %v9619_v12  ;;  %v9636_v26 = vor.u32 %v9634_v31, %v16954_v6  ;;  %8263 = vrot.lane.b32.xlu0 %v16430_v33, %s12114_s6  ;;  %8197 = vrot.lane.b32.xlu1 %v20129_v57, %s12114_s6  ;;  %v9630_v17 = vsel %vm5756_vm9, %v9619_v12, %v9629_v24 }
 0x67b   : > { %v9081_v30 = vsel %vm9013_vm15, %v8950_v0, %v16638_v36  ;;  %v9083_v31 = vsel %vm9013_vm15, %v8952_v9, %v16648_v4  ;;  %11746 = vmatprep.mubr.msk.bf16.mxu1 %vm9877_vm5, %v9630_v17  ;;  %v8755_v23 = vsel %vm252_vm0, %v8625_v48, %v20133_v19  ;;  %v16996_v36 = vsel %vm308_vm1, %v20135_v29, %v20134_v16  ;;  %v20136_v0 = vld [vmem:[#allocation242_spill] sm:$0xff]  ;;  %v20139_v19 = vld [vmem:[#allocation165_spill] sm:$0xff]  ;;  %v20141_v29 = vld [vmem:[#allocation167_spill] sm:$0xff] }
 0x67c   : > { %v9214_v24 = vsel %vm9144_vm4, %v9083_v31, %v8098_v60  ;;  %v9212_v12 = vsel %vm9144_vm4, %v9081_v30, %v8096_v54  ;;  %v8234_v50 = vpop.permute.xlu0 %8233  ;;  %v8232_v7 = vpop.permute.xlu1 %8231  ;;  %v9637_v43 = vsel %vm5756_vm9, %v9626_v1, %v9636_v26  ;;  %v8886_v4 = vsel %vm8882_vm14, %v8755_v23, %v20136_v0  ;;  %v20137_v60 = vld [vmem:[#allocation166_spill] sm:$0xff]  ;;  %v20138_v30 = vld [vmem:[#allocation164_spill] sm:$0xff]  ;;  %v20142_v0 = vld [vmem:[#allocation189_spill] sm:$0xff] }
 0x67d   : > { %v9345_v9 = vsel %vm9275_vm3, %v9214_v24, %v8234_v50  ;;  %v9343_v17 = vsel %vm9275_vm3, %v9212_v12, %v8232_v7  ;;  %11747 = vmatmul.mubr.msk.bf16.vlgmr.msra.gmra.mrb[0].mxu1 %vm9877_vm5, %v9637_v43  ;;  %v8496_v54 = vsel %vm8490_vm2, %v16814_v32, %v20137_v60  ;;  %v9017_v1 = vsel %vm9013_vm15, %v8886_v4, %v16478_v56  ;;  %v20140_v32 = vld [vmem:[#allocation235_spill] sm:$0xff]  ;;  %v20143_v4 = vld [vmem:[#allocation294_spill] sm:$0xff] }
 0x67e   : > { %v9645_v26 = vshrl.u32 %v9345_v9, 16  ;;  %v9638_v48 = vshrl.u32 %v9343_v17, 16  ;;  %8063 = vrot.lane.b32.xlu0 %v20121_v59, %s12113_s26  ;;  %8265 = vrot.lane.b32.xlu1 %v16452_v63, %s12114_s6  ;;  %v8492_v31 = vsel %vm8490_vm2, %v16809_v47, %v20138_v30  ;;  %v8498_v23 = vsel %vm8490_vm2, %v16828_v40, %v20139_v19  ;;  %v20147_v30 = vld [vmem:[#allocation275_spill] sm:$0xff] }
 0x67f   : > { %v8627_v24 = vsel %vm8621_vm12, %v8496_v54, %v20140_v32  ;;  %v9148_v56 = vsel %vm9144_vm4, %v9017_v1, %v16779_v58  ;;  %v9648_v59 = vshll.u32 %v9345_v9, 16  ;;  %v9641_v7 = vshll.u32 %v9343_v17, 16  ;;  %v20144_v54 = vld [vmem:[#allocation241_spill] sm:$0xff] }
 0x680   : > { %v17022_v12 = vrot.slane %v9645_v26, 7  ;;  %v9640_v50 = vrot.slane %v9638_v48, 7  ;;  %v8168_v43 = vpop.permute.xlu0 %8167  ;;  %v8100_v16 = vpop.permute.xlu1 %8099  ;;  %v17027_v47 = vsel %vm8490_vm2, %v16845_v44, %v20141_v29  ;;  %v8562_v40 = vsel %vm8490_vm2, %v16900_v18, %v20142_v0  ;;  %v20145_v44 = vld [vmem:[#allocation168_spill] sm:$0xff]  ;;  %v20146_v26 = vld [vmem:[#allocation233_spill] sm:$0xff] }
 0x681   : > { %v8757_v60 = vsel %vm252_vm0, %v8627_v24, %v20143_v4  ;;  %v9279_v58 = vsel %vm9275_vm3, %v9148_v56, %v8168_v43  ;;  %v8500_v18 = vsel %vm8490_vm2, %v16823_v10, %v20145_v44  ;;  %v8623_v48 = vsel %vm8621_vm12, %v8492_v31, %v20146_v26  ;;  %v20149_v43 = vld [vmem:[#allocation292_spill] sm:$0xff]  ;;  %v20150_v0 = vld [vmem:[#allocation321_spill] sm:$0xff] }
 0x682   : > { %v8888_v9 = vsel %vm8882_vm14, %v8757_v60, %v20144_v54  ;;  %v9650_v17 = vor.u32 %v9648_v59, %v17022_v12  ;;  %v9643_v1 = vor.u32 %v9641_v7, %v9640_v50  ;;  %8131 = vrot.lane.b32.xlu0 %v16430_v33, %s12113_s26  ;;  %8065 = vrot.lane.b32.xlu1 %v20129_v57, %s12113_s26  ;;  %v9414_v33 = vshrl.u32 %v9279_v58, 16  ;;  %v20148_v7 = vld [vmem:[#allocation192_spill] sm:$0xff]  ;;  %v20153_v60 = vld [vmem:[#allocation390_spill] sm:$0xff] }
 0x683   : > { %v8693_v19 = vsel %vm8621_vm12, %v8562_v40, %v20147_v30  ;;  %v9019_v32 = vsel %vm9013_vm15, %v8888_v9, %v16494_v27  ;;  %v8564_v31 = vsel %vm8490_vm2, %v16890_v14, %v20148_v7  ;;  %v8753_v29 = vsel %vm252_vm0, %v8623_v48, %v20149_v43  ;;  %v20151_v40 = vld [vmem:[#allocation274_spill] sm:$0xff]  ;;  %v20156_v44 = vld [vmem:[#allocation324_spill] sm:$0xff] }
 0x684   : > { %v9150_v24 = vsel %vm9144_vm4, %v9019_v32, %v16777_v35  ;;  %v8170_v56 = vpop.permute.xlu0 %8169  ;;  %v8102_v59 = vpop.permute.xlu1 %8101  ;;  %v9644_v57 = vsel %vm5756_vm9, %v16954_v6, %v9643_v1  ;;  %v9651_v10 = vsel %vm5756_vm9, %v9640_v50, %v9650_v17  ;;  %v8823_v27 = vsel %vm252_vm0, %v8693_v19, %v20150_v0  ;;  %v20152_v6 = vld [vmem:[#allocation237_spill] sm:$0xff]  ;;  %v20154_v9 = vld [vmem:[#allocation370_spill] sm:$0xff] }
 0x685   : > { %v9281_v35 = vsel %vm9275_vm3, %v9150_v24, %v8170_v56  ;;  %11750 = vmatprep.mubr.msk.bf16.mxu1 %vm9877_vm5, %v9644_v57  ;;  %v8695_v4 = vsel %vm8621_vm12, %v8564_v31, %v20151_v40  ;;  %v8884_v50 = vsel %vm8882_vm14, %v8753_v29, %v20152_v6  ;;  %v8954_v54 = vsel %vm8882_vm14, %v8823_v27, %v20153_v60  ;;  %v20155_v17 = vld [vmem:[#allocation58_spill] sm:$0xff]  ;;  %v20157_v57 = vld [vmem:[#allocation389_spill] sm:$0xff]  ;;  %v20159_v29 = vld [vmem:[#allocation191_spill] sm:$0xff] }
 0x686   : > { %v9421_v14 = vshrl.u32 %v9281_v35, 16  ;;  %8133 = vrot.lane.b32.xlu0 %v16452_v63, %s12113_s26  ;;  %8199 = vrot.lane.b32.xlu1 %v20154_v9, %s12114_s6  ;;  %v17078_v1 = vsel %vm8490_vm2, %v16857_v25, %v20155_v17  ;;  %v8825_v26 = vsel %vm252_vm0, %v8695_v4, %v20156_v44  ;;  %v9015_v48 = vsel %vm9013_vm15, %v8884_v50, %v16480_v49  ;;  %v20160_v27 = vld [vmem:[#allocation240_spill] sm:$0xff]  ;;  %v20162_v44 = vld [vmem:[#allocation239_spill] sm:$0xff] }
 0x687   : > { %v9085_v30 = vsel %vm9013_vm15, %v8954_v54, %v16646_v45  ;;  %11751 = vmatmul.mubr.msk.bf16.gmra.mrb[4].mxu1 %vm9877_vm5, %v9651_v10  ;;  %v9146_v63 = vsel %vm9144_vm4, %v9015_v48, %v16769_v53  ;;  %v9416_v19 = vrot.slane %v9414_v33, 7  ;;  %v8956_v7 = vsel %vm8882_vm14, %v8825_v26, %v20157_v57  ;;  %v20163_v26 = vld [vmem:[#allocation293_spill] sm:$0xff] }
 0x688   : > { %v9216_v32 = vsel %vm9144_vm4, %v9085_v30, %v8100_v16  ;;  %v17090_v24 = vrot.slane %v9421_v14, 7  ;;  %v8166_v25 = vpop.permute.xlu0 %8165  ;;  %v8236_v56 = vpop.permute.xlu1 %8235  ;;  %v9424_v31 = vshll.u32 %v9281_v35, 16  ;;  %v9087_v10 = vsel %vm9013_vm15, %v8956_v7, %v16656_v46  ;;  %v20158_v16 = vld [vmem:[#allocation374_spill] sm:$0xff]  ;;  %v20164_v30 = vld [vmem:[#allocation349_spill] sm:$0xff] }
 0x689   : > { %v9277_v49 = vsel %vm9275_vm3, %v9146_v63, %v8166_v25  ;;  %v9347_v45 = vsel %vm9275_vm3, %v9216_v32, %v8236_v56  ;;  %v9417_v43 = vshll.u32 %v9279_v58, 16  ;;  %v8566_v0 = vsel %vm8490_vm2, %v16923_v38, %v20159_v29  ;;  %v20161_v14 = vld [vmem:[#allocation194_spill] sm:$0xff]  ;;  %v20165_v25 = vld [vmem:[#allocation277_spill] sm:$0xff]  ;;  %v20166_v56 = vld [vmem:[#allocation296_spill] sm:$0xff] }
 0x68a   : > { %v9411_v53 = vshrl.u32 %v9277_v49, 16  ;;  %v9652_v33 = vshrl.u32 %v9347_v45, 16  ;;  %8267 = vrot.lane.b32.xlu0 %v16449_v22, %s12114_s6  ;;  %8201 = vrot.lane.b32.xlu1 %v20158_v16, %s12114_s6  ;;  %v8629_v35 = vsel %vm8621_vm12, %v8498_v23, %v20160_v27  ;;  %v9426_v40 = vor.u32 %v9424_v31, %v17090_v24  ;;  %v20168_v29 = vld [vmem:[#allocation323_spill] sm:$0xff] }
 0x68b   : > { %v9218_v46 = vsel %vm9144_vm4, %v9087_v10, %v8102_v59  ;;  %v9419_v58 = vor.u32 %v9417_v43, %v9416_v19  ;;  %v9655_v50 = vshll.u32 %v9347_v45, 16  ;;  %v8568_v17 = vsel %vm8490_vm2, %v16910_v13, %v20161_v14 }
 0x68c   : > { %v9413_v4 = vrot.slane %v9411_v53, 7  ;;  %v9654_v6 = vrot.slane %v9652_v33, 7  ;;  %v8104_v60 = vpop.permute.xlu0 %8103  ;;  %v8238_v54 = vpop.permute.xlu1 %8237  ;;  %v8631_v38 = vsel %vm8621_vm12, %v8500_v18, %v20162_v44  ;;  %v8759_v23 = vsel %vm252_vm0, %v8629_v35, %v20163_v26  ;;  %v20167_v33 = vld [vmem:[#allocation276_spill] sm:$0xff]  ;;  %v20170_v35 = vld [vmem:[#allocation394_spill] sm:$0xff] }
 0x68d   : > { %v9349_v48 = vsel %vm9275_vm3, %v9218_v46, %v8238_v54  ;;  %v8890_v59 = vsel %vm8882_vm14, %v8759_v23, %v20164_v30  ;;  %v8697_v18 = vsel %vm8621_vm12, %v8566_v0, %v20165_v25  ;;  %v8761_v57 = vsel %vm252_vm0, %v8631_v38, %v20166_v56  ;;  %v20172_v54 = vld [vmem:[#allocation326_spill] sm:$0xff]  ;;  %v20174_v30 = vld [vmem:[#allocation393_spill] sm:$0xff] }
 0x68e   : > { %v9657_v63 = vor.u32 %v9655_v50, %v9654_v6  ;;  %v9659_v32 = vshrl.u32 %v9349_v48, 16  ;;  %8067 = vrot.lane.b32.xlu0 %v20154_v9, %s12113_s26  ;;  %8269 = vrot.lane.b32.xlu1 %v16472_v11, %s12114_s6  ;;  %v9420_v13 = vsel %vm5756_vm9, %v9413_v4, %v9419_v58  ;;  %v9021_v7 = vsel %vm9013_vm15, %v8890_v59, %v16492_v42  ;;  %v20171_v4 = vld [vmem:[#allocation169_spill] sm:$0xff] }
 0x68f   : > { %11686 = vmatprep.mubr.msk.bf16.mxu0 %vm9877_vm5, %v9420_v13  ;;  %v9427_v31 = vsel %vm5756_vm9, %v9416_v19, %v9426_v40  ;;  %v9152_v9 = vsel %vm9144_vm4, %v9021_v7, %v16789_v61  ;;  %v9662_v45 = vshll.u32 %v9349_v48, 16  ;;  %v8699_v42 = vsel %vm8621_vm12, %v8568_v17, %v20167_v33  ;;  %v20169_v19 = vld [vmem:[#allocation245_spill] sm:$0xff]  ;;  %v20173_v48 = vld [vmem:[#allocation244_spill] sm:$0xff] }
 0x690   : > { %v17134_v49 = vrot.slane %v9659_v32, 7  ;;  %v8106_v10 = vpop.permute.xlu0 %8105  ;;  %11687 = vmatmul.mubr.msk.bf16.vlgmr.msra.gmra.mrb[4].mxu0 %vm9877_vm5, %v9427_v31  ;;  %v8172_v43 = vpop.permute.xlu1 %8171  ;;  %v9658_v53 = vsel %vm5756_vm9, %v17022_v12, %v9657_v63  ;;  %v8827_v0 = vsel %vm252_vm0, %v8697_v18, %v20168_v29  ;;  %v8892_v27 = vsel %vm8882_vm14, %v8761_v57, %v20169_v19  ;;  %v20177_v18 = vld [vmem:[#allocation295_spill] sm:$0xff] }
 0x691   : > { %v9283_v61 = vsel %vm9275_vm3, %v9152_v9, %v8172_v43  ;;  %11754 = vmatprep.mubr.msk.bf16.mxu1 %vm9877_vm5, %v9658_v53  ;;  %v8958_v40 = vsel %vm8882_vm14, %v8827_v0, %v20170_v35  ;;  %v9023_v46 = vsel %vm9013_vm15, %v8892_v27, %v16508_v34  ;;  %v8504_v50 = vsel %vm8490_vm2, %v16840_v28, %v20171_v4  ;;  %v20178_v53 = vld [vmem:[#allocation196_spill] sm:$0xff]  ;;  %v20180_v29 = vld [vmem:[#allocation351_spill] sm:$0xff]  ;;  %v20182_v35 = vld [vmem:[#allocation278_spill] sm:$0xff] }
 0x692   : > { %v9664_v12 = vor.u32 %v9662_v45, %v17134_v49  ;;  %v9428_v58 = vshrl.u32 %v9283_v61, 16  ;;  %8135 = vrot.lane.b32.xlu0 %v16449_v22, %s12113_s26  ;;  %8069 = vrot.lane.b32.xlu1 %v20158_v16, %s12113_s26  ;;  %v8829_v14 = vsel %vm252_vm0, %v8699_v42, %v20172_v54  ;;  %v9089_v17 = vsel %vm9013_vm15, %v8958_v40, %v16654_v2 }
 0x693   : > { %v9154_v34 = vsel %vm9144_vm4, %v9023_v46, %v16787_v37  ;;  %v9220_v44 = vsel %vm9144_vm4, %v9089_v17, %v8104_v60  ;;  %v9431_v22 = vshll.u32 %v9283_v61, 16  ;;  %v8633_v28 = vsel %vm8621_vm12, %v17027_v47, %v20173_v48  ;;  %v20175_v47 = vld [vmem:[#allocation373_spill] sm:$0xff]  ;;  %v20183_v46 = vld [vmem:[#allocation279_spill] sm:$0xff] }
 0x694   : > { %v9430_v38 = vrot.slane %v9428_v58, 7  ;;  %v8240_v26 = vpop.permute.xlu0 %8239  ;;  %v8174_v23 = vpop.permute.xlu1 %8173  ;;  %v9665_v16 = vsel %vm5756_vm9, %v9654_v6, %v9664_v12  ;;  %v8960_v59 = vsel %vm8882_vm14, %v8829_v14, %v20174_v30  ;;  %v20176_v6 = vld [vmem:[#allocation193_spill] sm:$0xff]  ;;  %v8763_v56 = vsel %vm252_vm0, %v8633_v28, %v20177_v18  ;;  %v20184_v58 = vld [vmem:[#allocation8_spill] sm:$0xff] }
 0x695   : > { %v9351_v2 = vsel %vm9275_vm3, %v9220_v44, %v8240_v26  ;;  %v9285_v63 = vsel %vm9275_vm3, %v9154_v34, %v8174_v23  ;;  %11755 = vmatmul.mubr.msk.bf16.gmra.mrb[8].mxu1 %vm9877_vm5, %v9665_v16  ;;  %v9091_v37 = vsel %vm9013_vm15, %v8960_v59, %v16664_v55  ;;  %v8570_v25 = vsel %vm8490_vm2, %v16959_v51, %v20176_v6  ;;  %v20179_v51 = vld [vmem:[#allocation243_spill] sm:$0xff]  ;;  %v20186_v23 = vld [vmem:[#allocation350_spill] sm:$0xff] }
 0x696   : > { %v9433_v60 = vor.u32 %v9431_v22, %v9430_v38  ;;  %v9666_v32 = vshrl.u32 %v9351_v2, 16  ;;  %v9435_v13 = vshrl.u32 %v9285_v63, 16  ;;  %8137 = vrot.lane.b32.xlu0 %v16472_v11, %s12113_s26  ;;  %8203 = vrot.lane.b32.xlu1 %v20175_v47, %s12114_s6  ;;  %v9222_v57 = vsel %vm9144_vm4, %v9091_v37, %v8106_v10  ;;  %v20185_v22 = vld [vmem:[#allocation325_spill] sm:$0xff]  ;;  %v20188_v59 = vld [vmem:[#allocation171_spill] sm:$0xff] }
 0x697   : > { %v9669_v7 = vshll.u32 %v9351_v2, 16  ;;  %v9438_v9 = vshll.u32 %v9285_v63, 16  ;;  %v8572_v33 = vsel %vm8490_vm2, %v16928_v20, %v20178_v53  ;;  %v8635_v42 = vsel %vm8621_vm12, %v8504_v50, %v20179_v51  ;;  %v20181_v20 = vld [vmem:[#allocation376_spill] sm:$0xff] }
 0x698   : > { %v9668_v55 = vrot.slane %v9666_v32, 7  ;;  %v17187_v31 = vrot.slane %v9435_v13, 7  ;;  %v8108_v45 = vpop.permute.xlu0 %8107  ;;  %v8242_v43 = vpop.permute.xlu1 %8241  ;;  %v9434_v11 = vsel %vm5756_vm9, %v17090_v24, %v9433_v60  ;;  %v8894_v10 = vsel %vm8882_vm14, %v8763_v56, %v20180_v29  ;;  %v20189_v63 = vld [vmem:[#allocation328_spill] sm:$0xff] }
 0x699   : > { %v9353_v0 = vsel %vm9275_vm3, %v9222_v57, %v8242_v43  ;;  %11690 = vmatprep.mubr.msk.bf16.mxu0 %vm9877_vm5, %v9434_v11  ;;  %v9025_v19 = vsel %vm9013_vm15, %v8894_v10, %v16506_v39  ;;  %v8703_v40 = vsel %vm8621_vm12, %v8572_v33, %v20182_v35  ;;  %v8701_v12 = vsel %vm8621_vm12, %v8570_v25, %v20183_v46  ;;  %v20191_v57 = vld [vmem:[#allocation247_spill] sm:$0xff] }
 0x69a   : > { %v9671_v27 = vor.u32 %v9669_v7, %v9668_v55  ;;  %v9440_v24 = vor.u32 %v9438_v9, %v17187_v31  ;;  %v9673_v61 = vshrl.u32 %v9353_v0, 16  ;;  %8271 = vrot.lane.b32.xlu0 %v16469_v5, %s12114_s6  ;;  %8205 = vrot.lane.b32.xlu1 %v20181_v20, %s12114_s6  ;;  %v8765_v4 = vsel %vm252_vm0, %v8635_v42, %v20184_v58  ;;  %v20192_v7 = vld [vmem:[#allocation397_spill] sm:$0xff]  ;;  %v20195_v42 = vld [vmem:[#allocation32_spill] sm:$0xff] }
 0x69b   : > { %v9156_v39 = vsel %vm9144_vm4, %v9025_v19, %v16797_v21  ;;  %v9676_v54 = vshll.u32 %v9353_v0, 16  ;;  %v8831_v26 = vsel %vm252_vm0, %v8701_v12, %v20185_v22  ;;  %v8896_v16 = vsel %vm8882_vm14, %v8765_v4, %v20186_v23  ;;  %v20187_v21 = vld [vmem:[#allocation398_spill] sm:$0xff]  ;;  %v20198_v12 = vld [vmem:[#allocation93_spill] sm:$0xff]  ;;  %v20203_v23 = vld [vmem:[#allocation51_spill] sm:$0xff] }
 0x69c   : > { %v17215_v50 = vrot.slane %v9673_v61, 7  ;;  %v8110_v14 = vpop.permute.xlu0 %8109  ;;  %v8176_v17 = vpop.permute.xlu1 %8175  ;;  %v9441_v34 = vsel %vm5756_vm9, %v9430_v38, %v9440_v24  ;;  %v9672_v44 = vsel %vm5756_vm9, %v17134_v49, %v9671_v27  ;;  %v8962_v28 = vsel %vm8882_vm14, %v8831_v26, %v20187_v21  ;;  %v20202_v22 = vld [vmem:[#allocation281_spill] sm:$0xff] }
 0x69d   : > { %v9287_v48 = vsel %vm9275_vm3, %v9156_v39, %v8176_v17  ;;  %11691 = vmatmul.mubr.msk.bf16.gmra.mrb[8].mxu0 %vm9877_vm5, %v9441_v34  ;;  %11758 = vmatprep.mubr.msk.bf16.mxu1 %vm9877_vm5, %v9672_v44  ;;  %v9027_v38 = vsel %vm9013_vm15, %v8896_v16, %v16522_v41  ;;  %v8508_v2 = vsel %vm8490_vm2, %v16852_v62, %v20188_v59  ;;  %v20190_v41 = vld [vmem:[#allocation30_spill] sm:$0xff]  ;;  %v20199_v39 = vld [vmem:[#allocation427_spill] sm:$0xff]  ;;  %v20201_v34 = vld [vmem:[#allocation280_spill] sm:$0xff] }
 0x69e   : > { %v9678_v49 = vor.u32 %v9676_v54, %v17215_v50  ;;  %v9442_v30 = vshrl.u32 %v9287_v48, 16  ;;  %8071 = vrot.lane.b32.xlu0 %v20175_v47, %s12113_s26  ;;  %8273 = vrot.lane.b32.xlu1 %v16486_v15, %s12114_s6  ;;  %v8833_v37 = vsel %vm252_vm0, %v8703_v40, %v20189_v63  ;;  %v9093_v60 = vsel %vm9013_vm15, %v8962_v28, %v16662_v3 }
 0x69f   : > { %v9158_v32 = vsel %vm9144_vm4, %v9027_v38, %v20190_v41  ;;  %v9224_v13 = vsel %vm9144_vm4, %v9093_v60, %v8108_v45  ;;  %v9445_v47 = vshll.u32 %v9287_v48, 16  ;;  %v8637_v62 = vsel %vm8621_vm12, %v17078_v1, %v20191_v57  ;;  %v20193_v45 = vld [vmem:[#allocation451_spill] sm:$0xff]  ;;  %v20211_v57 = vld [vmem:[#allocation330_spill] sm:$0xff] }
 0x6a0   : > { %v9444_v6 = vrot.slane %v9442_v30, 7  ;;  %v8244_v25 = vpop.permute.xlu0 %8243  ;;  %v8178_v18 = vpop.permute.xlu1 %8177  ;;  %v9679_v56 = vsel %vm5756_vm9, %v9668_v55, %v9678_v49  ;;  %v8964_v9 = vsel %vm8882_vm14, %v8833_v37, %v20192_v7  ;;  %v20194_v1 = vld [vmem:[#allocation195_spill] sm:$0xff]  ;;  %v8767_v29 = vsel %vm252_vm0, %v8637_v62, %v20195_v42  ;;  %v20206_v37 = vld [vmem:[#allocation92_spill] sm:$0xff]  ;;  %v20212_v7 = vld [vmem:[#allocation450_spill] sm:$0xff] }
 0x6a1   : > { %v9355_v3 = vsel %vm9275_vm3, %v9224_v13, %v8244_v25  ;;  %v9289_v43 = vsel %vm9275_vm3, %v9158_v32, %v8178_v18  ;;  %11759 = vmatmul.mubr.msk.bf16.gmra.mrb[12].mxu1 %vm9877_vm5, %v9679_v56  ;;  %v9095_v11 = vsel %vm9013_vm15, %v8964_v9, %v20193_v45  ;;  %v8574_v55 = vsel %vm8490_vm2, %v16996_v36, %v20194_v1  ;;  %v20197_v36 = vld [vmem:[#allocation246_spill] sm:$0xff]  ;;  %v20204_v48 = vld [vmem:[#allocation475_spill] sm:$0xff]  ;;  %v20207_v32 = vld [vmem:[#allocation400_spill] sm:$0xff] }
 0x6a2   : > { %v9447_v53 = vor.u32 %v9445_v47, %v9444_v6  ;;  %v9680_v33 = vshrl.u32 %v9355_v3, 16  ;;  %v9449_v51 = vshrl.u32 %v9289_v43, 16  ;;  %8139 = vrot.lane.b32.xlu0 %v16469_v5, %s12113_s26  ;;  %8073 = vrot.lane.b32.xlu1 %v20181_v20, %s12113_s26  ;;  %v9226_v10 = vsel %vm9144_vm4, %v9095_v11, %v8110_v14  ;;  %v20196_v20 = vld [vmem:[#allocation198_spill] sm:$0xff]  ;;  %v20208_v47 = vld [vmem:[#allocation429_spill] sm:$0xff]  ;;  %v20210_v56 = vld [vmem:[#allocation379_spill] sm:$0xff] }
 0x6a3   : > { %v9683_v0 = vshll.u32 %v9355_v3, 16  ;;  %v9452_v24 = vshll.u32 %v9289_v43, 16  ;;  %v8576_v40 = vsel %vm8490_vm2, %v16979_v52, %v20196_v20  ;;  %v8639_v46 = vsel %vm8621_vm12, %v8508_v2, %v20197_v36  ;;  %v20200_v52 = vld [vmem:[#allocation375_spill] sm:$0xff]  ;;  %v20209_v18 = vld [vmem:[#allocation422_spill] sm:$0xff]  ;;  %v20213_v3 = vld [vmem:[#allocation360_spill] sm:$0xff] }
 0x6a4   : > { %v9682_v19 = vrot.slane %v9680_v33, 7  ;;  %v17267_v27 = vrot.slane %v9449_v51, 7  ;;  %v8112_v61 = vpop.permute.xlu0 %8111  ;;  %v8246_v35 = vpop.permute.xlu1 %8245  ;;  %v9448_v5 = vsel %vm5756_vm9, %v17187_v31, %v9447_v53  ;;  %v8898_v58 = vsel %vm8882_vm14, %v8767_v29, %v20198_v12  ;;  %v20205_v2 = vld [vmem:[#allocation327_spill] sm:$0xff] }
 0x6a5   : > { %v9357_v4 = vsel %vm9275_vm3, %v9226_v10, %v8246_v35  ;;  %11694 = vmatprep.mubr.msk.bf16.mxu0 %vm9877_vm5, %v9448_v5  ;;  %v9029_v54 = vsel %vm9013_vm15, %v8898_v58, %v20199_v39  ;;  %v8707_v44 = vsel %vm8621_vm12, %v8576_v40, %v20201_v34  ;;  %v8705_v26 = vsel %vm8621_vm12, %v8574_v55, %v20202_v22  ;;  %v20214_v55 = vld [vmem:[#allocation399_spill] sm:$0xff] }
 0x6a6   : > { %v9685_v14 = vor.u32 %v9683_v0, %v9682_v19  ;;  %v9454_v31 = vor.u32 %v9452_v24, %v17267_v27  ;;  %v9687_v17 = vshrl.u32 %v9357_v4, 16  ;;  %8141 = vrot.lane.b32.xlu0 %v16486_v15, %s12113_s26  ;;  %8207 = vrot.lane.b32.xlu1 %v20200_v52, %s12114_s6  ;;  %v8769_v16 = vsel %vm252_vm0, %v8639_v46, %v20203_v23  ;;  %v20215_v0 = vld [vmem:[#allocation453_spill] sm:$0xff] }
 0x6a7   : > { %v9160_v21 = vsel %vm9144_vm4, %v9029_v54, %v20204_v48  ;;  %v9690_v38 = vshll.u32 %v9357_v4, 16  ;;  %v8835_v63 = vsel %vm252_vm0, %v8705_v26, %v20205_v2  ;;  %v8900_v60 = vsel %vm8882_vm14, %v8769_v16, %v20206_v37  ;;  %v20217_v54 = vld [vmem:[#allocation102_spill] sm:$0xff]  ;;  %v20222_v2 = vld [vmem:[#allocation101_spill] sm:$0xff] }
 0x6a8   : > { %v9689_v28 = vrot.slane %v9687_v17, 7  ;;  %v8114_v49 = vpop.permute.xlu0 %8113  ;;  %v8180_v30 = vpop.permute.xlu1 %8179  ;;  %v9455_v15 = vsel %vm5756_vm9, %v9444_v6, %v9454_v31  ;;  %v9686_v59 = vsel %vm5756_vm9, %v17215_v50, %v9685_v14  ;;  %v8966_v13 = vsel %vm8882_vm14, %v8835_v63, %v20207_v32  ;;  %v20218_v14 = vld [vmem:[#allocation24_spill] sm:$0xff]  ;;  %v20221_v16 = vld [vmem:[#allocation74_spill] sm:$0xff]  ;;  %v20223_v63 = vld [vmem:[#allocation59_spill] sm:$0xff] }
 0x6a9   : > { %v9291_v41 = vsel %vm9275_vm3, %v9160_v21, %v8180_v30  ;;  %11695 = vmatmul.mubr.msk.bf16.gmra.mrb[12].mxu0 %vm9877_vm5, %v9455_v15  ;;  %11762 = vmatprep.mubr.msk.bf16.mxu1 %vm9877_vm5, %v9686_v59  ;;  %v9031_v6 = vsel %vm9013_vm15, %v8900_v60, %v20208_v47  ;;  %v8837_v62 = vsel %vm252_vm0, %v8707_v44, %v20211_v57  ;;  %v1603_v48 = vadd.s32 1080, %v20221_v16  ;;  %v20224_v60 = vld [vmem:[#allocation141_spill] sm:$0xff]  ;;  %v20230_v57 = vld [vmem:[#allocation382_spill] sm:$0xff] }
 0x6aa   : > { %v9692_v25 = vor.u32 %v9690_v38, %v9689_v28  ;;  %v9456_v50 = vshrl.u32 %v9291_v41, 16  ;;  %8275 = vrot.lane.b32.xlu0 %v20209_v18, %s12114_s6  ;;  %8209 = vrot.lane.b32.xlu1 %v20210_v56, %s12114_s6  ;;  %v9097_v9 = vsel %vm9013_vm15, %v8966_v13, %v20212_v7  ;;  %v9162_v43 = vsel %vm9144_vm4, %v9031_v6, %v20213_v3  ;;  %v20226_v13 = vld [vmem:[#allocation7_spill] sm:$0xff]  ;;  %v20227_v6 = vld [vmem:[#allocation142_spill] sm:$0xff] }
 0x6ab   : > { %v9228_v45 = vsel %vm9144_vm4, %v9097_v9, %v8112_v61  ;;  %v9459_v53 = vshll.u32 %v9291_v41, 16  ;;  %v8968_v42 = vsel %vm8882_vm14, %v8837_v62, %v20214_v55  ;;  %v8324_v31 = vsel %vm308_vm1, %v20218_v14, %v20217_v54  ;;  %v20225_v41 = vld [vmem:[#allocation77_spill] sm:$0xff]  ;;  %v20242_v14 = vld [vmem:[#allocation423_spill] sm:$0xff] }
 0x6ac   : > { %v9458_v11 = vrot.slane %v9456_v50, 7  ;;  %v8248_v33 = vpop.permute.xlu0 %8247  ;;  %v8182_v51 = vpop.permute.xlu1 %8181  ;;  %v9693_v1 = vsel %vm5756_vm9, %v9682_v19, %v9692_v25  ;;  %v9099_v24 = vsel %vm9013_vm15, %v8968_v42, %v20215_v0  ;;  %v20216_v19 = vld [vmem:[#allocation424_spill] sm:$0xff]  ;;  %v8327_v37 = vsel %vm308_vm1, %v20223_v63, %v20222_v2  ;;  %v20228_v25 = vld [vmem:[#allocation39_spill] sm:$0xff]  ;;  %v20231_v62 = vld [vmem:[#allocation29_spill] sm:$0xff] }
 0x6ad   : > { %v9359_v29 = vsel %vm9275_vm3, %v9228_v45, %v8248_v33  ;;  %v9293_v10 = vsel %vm9275_vm3, %v9162_v43, %v8182_v51  ;;  %11763 = vmatmul.mubr.msk.bf16.gmra.mrb[16].mxu1 %vm9877_vm5, %v9693_v1  ;;  %v9230_v20 = vsel %vm9144_vm4, %v9099_v24, %v8114_v49  ;;  %v8429_v32 = vsel %vm308_vm1, %v20225_v41, %v20224_v60  ;;  %v20232_v9 = vld [vmem:[#allocation197_spill] sm:$0xff]  ;;  %v20233_v43 = vld [vmem:[#allocation428_spill] sm:$0xff]  ;;  %v20235_v51 = vld [vmem:[#allocation283_spill] sm:$0xff] }
 0x6ae   : > { %v9461_v35 = vor.u32 %v9459_v53, %v9458_v11  ;;  %v9694_v61 = vshrl.u32 %v9359_v29, 16  ;;  %v9463_v5 = vshrl.u32 %v9293_v10, 16  ;;  %8075 = vrot.lane.b32.xlu0 %v20200_v52, %s12113_s26  ;;  %8277 = vrot.lane.b32.xlu1 %v20216_v19, %s12114_s6  ;;  %v9697_v40 = vshll.u32 %v9359_v29, 16  ;;  %v20219_v52 = vld [vmem:[#allocation170_spill] sm:$0xff]  ;;  %v20234_v53 = vld [vmem:[#allocation248_spill] sm:$0xff]  ;;  %v20249_v63 = vld [vmem:[#allocation401_spill] sm:$0xff] }
 0x6af   : > { %v9466_v12 = vshll.u32 %v9293_v10, 16  ;;  %v8510_v34 = vsel %vm8490_vm2, %v8324_v31, %v20219_v52  ;;  %v8426_v50 = vsel %vm308_vm1, %v20228_v25, %v20227_v6  ;;  %v8512_v7 = vsel %vm8490_vm2, %v8327_v37, %v20231_v62  ;;  %v20236_v0 = vld [vmem:[#allocation200_spill] sm:$0xff]  ;;  %v20243_v31 = vld [vmem:[#allocation385_spill] sm:$0xff] }
 0x6b0   : > { %v9696_v36 = vrot.slane %v9694_v61, 7  ;;  %v17333_v46 = vrot.slane %v9463_v5, 7  ;;  %v8048_v58 = vpop.permute.xlu0 %8047  ;;  %v8250_v4 = vpop.permute.xlu1 %8249  ;;  %v9462_v39 = vsel %vm5756_vm9, %v17267_v27, %v9461_v35  ;;  %v20220_v27 = vld [vmem:[#allocation249_spill] sm:$0xff]  ;;  %v8578_v3 = vsel %vm8490_vm2, %v8426_v50, %v20232_v9  ;;  %v20237_v35 = vld [vmem:[#allocation298_spill] sm:$0xff] }
 0x6b1   : > { %v9361_v17 = vsel %vm9275_vm3, %v9230_v20, %v8250_v4  ;;  %11698 = vmatprep.mubr.msk.bf16.mxu0 %vm9877_vm5, %v9462_v39  ;;  %v8641_v23 = vsel %vm8621_vm12, %v8510_v34, %v20220_v27  ;;  %v8643_v33 = vsel %vm8621_vm12, %v8512_v7, %v20234_v53  ;;  %v8709_v1 = vsel %vm8621_vm12, %v8578_v3, %v20235_v51  ;;  %v20238_v5 = vld [vmem:[#allocation329_spill] sm:$0xff]  ;;  %v20245_v34 = vld [vmem:[#allocation431_spill] sm:$0xff]  ;;  %v20253_v50 = vld [vmem:[#allocation26_spill] sm:$0xff] }
 0x6b2   : > { %v9699_v44 = vor.u32 %v9697_v40, %v9696_v36  ;;  %v9468_v22 = vor.u32 %v9466_v12, %v17333_v46  ;;  %v9701_v26 = vshrl.u32 %v9361_v17, 16  ;;  %8143 = vrot.lane.b32.xlu0 %v20209_v18, %s12113_s26  ;;  %8077 = vrot.lane.b32.xlu1 %v20210_v56, %s12113_s26  ;;  %v9704_v38 = vshll.u32 %v9361_v17, 16  ;;  %v20239_v40 = vld [vmem:[#allocation282_spill] sm:$0xff]  ;;  %v20244_v17 = vld [vmem:[#allocation332_spill] sm:$0xff] }
 0x6b3   : > { %v8771_v47 = vsel %vm252_vm0, %v8641_v23, %v20226_v13  ;;  %v8580_v24 = vsel %vm8490_vm2, %v8429_v32, %v20236_v0  ;;  %v8773_v61 = vsel %vm252_vm0, %v8643_v33, %v20237_v35  ;;  %v20250_v32 = vld [vmem:[#allocation455_spill] sm:$0xff]  ;;  %v20267_v27 = vld [vmem:[#allocation388_spill] sm:$0xff] }
 0x6b4   : > { %v17352_v21 = vrot.slane %v9701_v26, 7  ;;  %v8116_v49 = vpop.permute.xlu0 %8115  ;;  %v8050_v30 = vpop.permute.xlu1 %8049  ;;  %v9469_v15 = vsel %vm5756_vm9, %v9458_v11, %v9468_v22  ;;  %v9700_v59 = vsel %vm5756_vm9, %v9689_v28, %v9699_v44  ;;  %v20229_v28 = vld [vmem:[#allocation353_spill] sm:$0xff]  ;;  %v2553_v11 = vand.u32 31, %v1603_v48  ;;  %v20246_v22 = vld [vmem:[#allocation452_spill] sm:$0xff]  ;;  %v20258_v0 = vld [vmem:[#allocation143_spill] sm:$0xff] }
 0x6b5   : > { %11699 = vmatmul.mubr.msk.bf16.gmra.mrb[16].mxu0 %vm9877_vm5, %v9469_v15  ;;  %11766 = vmatprep.mubr.msk.bf16.mxu1 %vm9877_vm5, %v9700_v59  ;;  %v8902_v18 = vsel %vm8882_vm14, %v8771_v47, %v20229_v28  ;;  %v8711_v12 = vsel %vm8621_vm12, %v8580_v24, %v20239_v40  ;;  %v20259_v24 = vld [vmem:[#allocation41_spill] sm:$0xff] }
 0x6b6   : > { %v9706_v56 = vor.u32 %v9704_v38, %v17352_v21  ;;  %8145 = vrot.lane.b32.xlu0 %v20216_v19, %s12113_s26  ;;  %8211 = vrot.lane.b32.xlu1 %v20230_v57, %s12114_s6  ;;  %v9033_v45 = vsel %vm9013_vm15, %v8902_v18, %v20233_v43  ;;  %v8839_v19 = vsel %vm252_vm0, %v8709_v1, %v20238_v5  ;;  %vm17412_vm7 = vcmp.ne.s32.totalorder %v2553_v11, 31 }
 0x6b7   : > { %v9164_v55 = vsel %vm9144_vm4, %v9033_v45, %v8048_v58  ;;  %v20240_v58 = vld [vmem:[#allocation352_spill] sm:$0xff]  ;;  %v8841_v52 = vsel %vm252_vm0, %v8711_v12, %v20244_v17  ;;  %vm5415_vm6 = vmpackc.low %vm17412_vm7, %vm17412_vm7  ;;  %v8435_v35 = vsel %vm308_vm1, %v20259_v24, %v20258_v0  ;;  %v20284_v0 = vld [vmem:[#allocation91_spill] sm:$0xff]  ;;  %vm10870_vm7 = vcmask 851712  }
 0x6b8   : > { %v8118_v42 = vpop.permute.xlu0 %8117  ;;  %v8184_v29 = vpop.permute.xlu1 %8183  ;;  %v9707_v10 = vsel %vm5756_vm9, %v9696_v36, %v9706_v56  ;;  %v8904_v4 = vsel %vm8882_vm14, %v8773_v61, %v20240_v58  ;;  %v20241_v36 = vld [vmem:[#allocation402_spill] sm:$0xff]  ;;  %v8972_v37 = vsel %vm8882_vm14, %v8841_v52, %v20249_v63  ;;  %v20254_v45 = vld [vmem:[#allocation28_spill] sm:$0xff]  ;;  %v20260_v61 = vld [vmem:[#allocation251_spill] sm:$0xff] }
 0x6b9   : > { %v9295_v20 = vsel %vm9275_vm3, %v9164_v55, %v8184_v29  ;;  %11767 = vmatmul.mubr.msk.bf16.gmra.mrb[20].mxu1 %vm9877_vm5, %v9707_v10  ;;  %v8970_v39 = vsel %vm8882_vm14, %v8839_v19, %v20241_v36  ;;  %v9035_v44 = vsel %vm9013_vm15, %v8904_v4, %v20245_v34  ;;  %v9103_v13 = vsel %vm9013_vm15, %v8972_v37, %v20250_v32  ;;  %v20257_v29 = vld [vmem:[#allocation52_spill] sm:$0xff]  ;;  %v20271_v63 = vld [vmem:[#allocation430_spill] sm:$0xff]  ;;  %v20273_v32 = vld [vmem:[#allocation285_spill] sm:$0xff] }
 0x6ba   : > { %v9470_v54 = vshrl.u32 %v9295_v20, 16  ;;  %8279 = vrot.lane.b32.xlu0 %v20242_v14, %s12114_s6  ;;  %8213 = vrot.lane.b32.xlu1 %v20243_v31, %s12114_s6  ;;  %v9101_v26 = vsel %vm9013_vm15, %v8970_v39, %v20246_v22  ;;  %v9166_v48 = vsel %vm9144_vm4, %v9035_v44, %v8050_v30  ;;  %v9473_v15 = vshll.u32 %v9295_v20, 16  ;;  %v20252_v30 = vld [vmem:[#allocation104_spill] sm:$0xff]  ;;  %v20262_v39 = vld [vmem:[#allocation14_spill] sm:$0xff]  ;;  %v20266_v22 = vld [vmem:[#allocation355_spill] sm:$0xff] }
 0x6bb   : > { %v9232_v23 = vsel %vm9144_vm4, %v9101_v26, %v8116_v49  ;;  %v20251_v49 = vld [vmem:[#allocation426_spill] sm:$0xff]  ;;  %v8330_v28 = vsel %vm308_vm1, %v20253_v50, %v20252_v30  ;;  %v9234_v18 = vsel %vm9144_vm4, %v9103_v13, %v8118_v42  ;;  %v20255_v55 = vmov 0   ;;  %v20261_v36 = vld [vmem:[#allocation144_spill] sm:$0xff]  ;;  %v20285_v24 = vld [vmem:[#allocation111_spill] sm:$0xff] }
 0x6bc   : > { %v9472_v38 = vrot.slane %v9470_v54, 7  ;;  %v8252_v59 = vpop.permute.xlu0 %8251  ;;  %v8186_v2 = vpop.permute.xlu1 %8185  ;;  %v8514_v11 = vsel %vm8490_vm2, %v8330_v28, %v20254_v45  ;;  %v5551_v42 = vsel %vm5415_vm6, 65537, %v20255_v55  ;;  %v8432_v54 = vsel %vm308_vm1, %v20262_v39, %v20261_v36  ;;  %v20264_v17 = vld [vmem:[#allocation84_spill] sm:$0xff]  ;;  %v20275_v28 = vld [vmem:[#allocation331_spill] sm:$0xff]  ;;  %v20277_v45 = vld [vmem:[#allocation354_spill] sm:$0xff] }
 0x6bd   : > { %v9363_v60 = vsel %vm9275_vm3, %v9232_v23, %v8252_v59  ;;  %v9297_v41 = vsel %vm9275_vm3, %v9166_v48, %v8186_v2  ;;  %v8645_v5 = vsel %vm8621_vm12, %v8514_v11, %v20260_v61  ;;  %v11528_v52 = vcombine.low %v20264_v17, %v5551_v42  ;;  %v20265_v34 = vld [vmem:[#allocation172_spill] sm:$0xff]  ;;  %v20268_v23 = vld [vmem:[#allocation199_spill] sm:$0xff]  ;;  %v20270_v59 = vld [vmem:[#allocation250_spill] sm:$0xff] }
 0x6be   : > { %v9475_v47 = vor.u32 %v9473_v15, %v9472_v38  ;;  %v9708_v6 = vshrl.u32 %v9363_v60, 16  ;;  %v9477_v25 = vshrl.u32 %v9297_v41, 16  ;;  %8079 = vrot.lane.b32.xlu0 %v20230_v57, %s12113_s26  ;;  %8281 = vrot.lane.b32.xlu1 %v20251_v49, %s12114_s6  ;;  %v9711_v56 = vshll.u32 %v9363_v60, 16  ;;  %v20272_v60 = vld [vmem:[#allocation284_spill] sm:$0xff]  ;;  %v20282_v42 = vld [vmem:[#allocation433_spill] sm:$0xff] }
 0x6bf   : > { %v9480_v9 = vshll.u32 %v9297_v41, 16  ;;  %v8582_v48 = vsel %vm8490_vm2, %v8432_v54, %v20268_v23  ;;  %v20274_v30 = vld [vmem:[#allocation300_spill] sm:$0xff]  ;;  %v20286_v17 = vld [vmem:[#allocation457_spill] sm:$0xff]  ;;  %vm10891_vm6 = vcmask 917312  }
 0x6c0   : > { %v9710_v62 = vrot.slane %v9708_v6, 7  ;;  %v17435_v7 = vrot.slane %v9477_v25, 7  ;;  %v8052_v3 = vpop.permute.xlu0 %8051  ;;  %v8254_v57 = vpop.permute.xlu1 %8253  ;;  %v9476_v43 = vsel %vm5756_vm9, %v17333_v46, %v9475_v47  ;;  %v20256_v46 = vld [vmem:[#allocation103_spill] sm:$0xff]  ;;  %v8713_v13 = vsel %vm8621_vm12, %v8582_v48, %v20273_v32  ;;  %v20278_v11 = vld [vmem:[#allocation404_spill] sm:$0xff] }
 0x6c1   : > { %v9365_v53 = vsel %vm9275_vm3, %v9234_v18, %v8254_v57  ;;  %11702 = vmatprep.mubr.msk.bf16.mxu0 %vm9877_vm5, %v9476_v43  ;;  %v8333_v10 = vsel %vm308_vm1, %v20257_v29, %v20256_v46  ;;  %v8843_v18 = vsel %vm252_vm0, %v8713_v13, %v20275_v28  ;;  %v20276_v57 = vld [vmem:[#allocation334_spill] sm:$0xff] }
 0x6c2   : > { %v9713_v33 = vor.u32 %v9711_v56, %v9710_v62  ;;  %v9482_v51 = vor.u32 %v9480_v9, %v17435_v7  ;;  %v9715_v1 = vshrl.u32 %v9365_v53, 16  ;;  %8147 = vrot.lane.b32.xlu0 %v20242_v14, %s12113_s26  ;;  %8081 = vrot.lane.b32.xlu1 %v20243_v31, %s12113_s26  ;;  %v9718_v20 = vshll.u32 %v9365_v53, 16  ;;  %v20263_v14 = vld [vmem:[#allocation297_spill] sm:$0xff]  ;;  %v20283_v29 = vld [vmem:[#allocation454_spill] sm:$0xff] }
 0x6c3   : > { %v8775_v31 = vsel %vm252_vm0, %v8645_v5, %v20263_v14  ;;  %v8516_v44 = vsel %vm8490_vm2, %v8333_v10, %v20265_v34  ;;  %v6293_v9 = vshrl.u32 %v11528_v52, 16 }
 0x6c4   : > { %v17457_v19 = vrot.slane %v9715_v1, 7  ;;  %v8120_v40 = vpop.permute.xlu0 %8119  ;;  %v8054_v12 = vpop.permute.xlu1 %8053  ;;  %v9483_v58 = vsel %vm5756_vm9, %v9472_v38, %v9482_v51  ;;  %v9714_v4 = vsel %vm5756_vm9, %v17352_v21, %v9713_v33  ;;  %v8906_v26 = vsel %vm8882_vm14, %v8775_v31, %v20266_v22  ;;  %v20269_v38 = vld [vmem:[#allocation202_spill] sm:$0xff]  ;;  %v20279_v33 = vld [vmem:[#allocation425_spill] sm:$0xff]  ;;  %v20280_v51 = vld [vmem:[#allocation391_spill] sm:$0xff] }
 0x6c5   : > { %11703 = vmatmul.mubr.msk.bf16.gmra.mrb[20].mxu0 %vm9877_vm5, %v9483_v58  ;;  %11770 = vmatprep.mubr.msk.bf16.mxu1 %vm9877_vm5, %v9714_v4  ;;  %v8584_v15 = vsel %vm8490_vm2, %v8435_v35, %v20269_v38  ;;  %v8647_v2 = vsel %vm8621_vm12, %v8516_v44, %v20270_v59  ;;  %v9037_v37 = vsel %vm9013_vm15, %v8906_v26, %v20271_v63  ;;  %v20281_v1 = vld [vmem:[#allocation403_spill] sm:$0xff]  ;;  %v17522_v14 = vrot.slane %v6293_v9, 7  ;;  %v20289_v63 = vld [vmem:[#allocation48_spill] sm:$0xff] }
 0x6c6   : > { %v9720_v21 = vor.u32 %v9718_v20, %v17457_v19  ;;  %8149 = vrot.lane.b32.xlu0 %v20251_v49, %s12113_s26  ;;  %8215 = vrot.lane.b32.xlu1 %v20267_v27, %s12114_s6  ;;  %v8715_v41 = vsel %vm8621_vm12, %v8584_v15, %v20272_v60  ;;  %v9168_v47 = vsel %vm9144_vm4, %v9037_v37, %v8052_v3  ;;  %v6296_v31 = vshll.u32 %v11528_v52, 16  ;;  %v12025_v9 = vld [vmem:[#allocation2 + $0x218] sm:$0xff] }
 0x6c7   : > { %v8777_v50 = vsel %vm252_vm0, %v8647_v2, %v20274_v30  ;;  %v8845_v43 = vsel %vm252_vm0, %v8715_v41, %v20276_v57  ;;  %v6291_v35 = vsel %vm5756_vm9, %v20285_v24, %v20284_v0  ;;  %v20288_v2 = vld [vmem:[#allocation106_spill] sm:$0xff]  ;;  %v20290_v41 = vld [vmem:[#allocation31_spill] sm:$0xff]  ;;  %v20293_v30 = vld [vmem:[#allocation145_spill] sm:$0xff]  ;;  %vm6368_vm11 = vcmp.ne.s16.totalorder %v17522_v14, 0 }
 0x6c8   : > { %v8122_v6 = vpop.permute.xlu0 %8121  ;;  %v8188_v25 = vpop.permute.xlu1 %8187  ;;  %v9721_v49 = vsel %vm5756_vm9, %v9710_v62, %v9720_v21  ;;  %v8908_v3 = vsel %vm8882_vm14, %v8777_v50, %v20277_v45  ;;  %v8974_v62 = vsel %vm8882_vm14, %v8843_v18, %v20278_v11  ;;  %v8976_v55 = vsel %vm8882_vm14, %v8845_v43, %v20281_v1  ;;  %v20294_v50 = vld [vmem:[#allocation71_spill] sm:$0xff]  ;;  %v20295_v18 = vld [vmem:[#allocation253_spill] sm:$0xff] }
 0x6c9   : > { %v9299_v56 = vsel %vm9275_vm3, %v9168_v47, %v8188_v25  ;;  %11771 = vmatmul.mubr.msk.bf16.gmra.mrb[24].mxu1 %vm9877_vm5, %v9721_v49  ;;  %v9039_v46 = vsel %vm9013_vm15, %v8908_v3, %v20282_v42  ;;  %v9105_v10 = vsel %vm9013_vm15, %v8974_v62, %v20283_v29  ;;  %v9107_v34 = vsel %vm9013_vm15, %v8976_v55, %v20286_v17  ;;  %v20292_v25 = vld [vmem:[#allocation62_spill] sm:$0xff]  ;;  %v20298_v55 = vld [vmem:[#allocation299_spill] sm:$0xff]  ;;  %v20301_v24 = vld [vmem:[#allocation357_spill] sm:$0xff] }
 0x6ca   : > { %v9484_v53 = vshrl.u32 %v9299_v56, 16  ;;  %8283 = vrot.lane.b32.xlu0 %v20279_v33, %s12114_s6  ;;  %8217 = vrot.lane.b32.xlu1 %v20280_v51, %s12114_s6  ;;  %v9236_v61 = vsel %vm9144_vm4, %v9105_v10, %v8120_v40  ;;  %v9170_v5 = vsel %vm9144_vm4, %v9039_v46, %v8054_v12  ;;  %v9487_v58 = vshll.u32 %v9299_v56, 16  ;;  %v20287_v40 = vld [vmem:[#allocation116_spill] sm:$0xff]  ;;  %v20299_v46 = vld [vmem:[#allocation90_spill] sm:$0xff] }
 0x6cb   : > { %v9238_v12 = vsel %vm9144_vm4, %v9107_v34, %v8122_v6  ;;  %vm6366_vm8 = vcmp.ne.s16.totalorder %v6291_v35, 0  ;;  %v6298_v60 = vor.u32 %v6296_v31, %v17522_v14  ;;  %v8441_v28 = vsel %vm308_vm1, %v20294_v50, %v20293_v30  ;;  %v20300_v10 = vld [vmem:[#allocation50_spill] sm:$0xff]  ;;  %v20306_v31 = vld [vmem:[#allocation432_spill] sm:$0xff]  ;;  %v20307_v34 = vld [vmem:[#allocation287_spill] sm:$0xff] }
 0x6cc   : > { %v9486_v20 = vrot.slane %v9484_v53, 7  ;;  %v8256_v4 = vpop.permute.xlu0 %8255  ;;  %v8190_v36 = vpop.permute.xlu1 %8189  ;;  %v17557_v57 = vsel %vm6366_vm8, %v12025_v9, 0  ;;  %v12026_v50 = vld [vmem:[#allocation2 + $0x220] sm:$0xff]  ;;  %vm19185_vm8 = vcmask 982912  }
 0x6cd   : > { %v9367_v39 = vsel %vm9275_vm3, %v9236_v61, %v8256_v4  ;;  %v9301_v54 = vsel %vm9275_vm3, %v9170_v5, %v8190_v36  ;;  %v6299_v29 = vsel %vm5756_vm9, %v20299_v46, %v6298_v60  ;;  %v20302_v61 = vld [vmem:[#allocation392_spill] sm:$0xff]  ;;  %v8027_v5 = vrot.slane %v17557_v57, 1  ;;  %v20319_v46 = vld [vmem:[#allocation117_spill] sm:$0xff] }
 0x6ce   : > { %v9489_v44 = vor.u32 %v9487_v58, %v9486_v20  ;;  %v9722_v22 = vshrl.u32 %v9367_v39, 16  ;;  %v9491_v26 = vshrl.u32 %v9301_v54, 16  ;;  %8083 = vrot.lane.b32.xlu0 %v20267_v27, %s12113_s26  ;;  %8285 = vrot.lane.b32.xlu1 %v20287_v40, %s12114_s6  ;;  %v9725_v21 = vshll.u32 %v9367_v39, 16  ;;  %v20304_v4 = vld [vmem:[#allocation204_spill] sm:$0xff] }
 0x6cf   : > { %v9494_v52 = vshll.u32 %v9301_v54, 16  ;;  %v8336_v27 = vsel %vm308_vm1, %v20289_v63, %v20288_v2  ;;  %v8588_v36 = vsel %vm8490_vm2, %v8441_v28, %v20304_v4  ;;  %v20305_v39 = vld [vmem:[#allocation252_spill] sm:$0xff]  ;;  %vm6367_vm10 = vcmp.ne.s16.totalorder %v6299_v29, 0  ;;  %v20310_v2 = vld [vmem:[#allocation333_spill] sm:$0xff] }
 0x6d0   : > { %v9724_v23 = vrot.slane %v9722_v22, 7  ;;  %v17531_v48 = vrot.slane %v9491_v26, 7  ;;  %v8056_v38 = vpop.permute.xlu0 %8055  ;;  %v8258_v15 = vpop.permute.xlu1 %8257  ;;  %v9490_v59 = vsel %vm5756_vm9, %v17435_v7, %v9489_v44  ;;  %v8518_v32 = vsel %vm8490_vm2, %v8336_v27, %v20290_v41  ;;  %v20291_v7 = vld [vmem:[#allocation105_spill] sm:$0xff]  ;;  %v20312_v60 = vld [vmem:[#allocation356_spill] sm:$0xff]  ;;  %v20313_v41 = vld [vmem:[#allocation406_spill] sm:$0xff] }
 0x6d1   : > { %v9369_v37 = vsel %vm9275_vm3, %v9238_v12, %v8258_v15  ;;  %11706 = vmatprep.mubr.msk.bf16.mxu0 %vm9877_vm5, %v9490_v59  ;;  %v8339_v49 = vsel %vm308_vm1, %v20292_v25, %v20291_v7  ;;  %v8649_v56 = vsel %vm8621_vm12, %v8518_v32, %v20295_v18  ;;  %v20309_v15 = vld [vmem:[#allocation302_spill] sm:$0xff]  ;;  %v20316_v7 = vld [vmem:[#allocation435_spill] sm:$0xff]  ;;  %v6436_v28 = vsel %vm6367_vm10, %v12026_v50, 0 }
 0x6d2   : > { %v9727_v13 = vor.u32 %v9725_v21, %v9724_v23  ;;  %v9496_v47 = vor.u32 %v9494_v52, %v17531_v48  ;;  %v9729_v6 = vshrl.u32 %v9369_v37, 16  ;;  %8151 = vrot.lane.b32.xlu0 %v20279_v33, %s12113_s26  ;;  %8085 = vrot.lane.b32.xlu1 %v20280_v51, %s12113_s26  ;;  %v9732_v45 = vshll.u32 %v9369_v37, 16  ;;  %v20296_v33 = vld [vmem:[#allocation146_spill] sm:$0xff]  ;;  %v20297_v51 = vld [vmem:[#allocation16_spill] sm:$0xff] }
 0x6d3   : > { %v8438_v1 = vsel %vm308_vm1, %v20297_v51, %v20296_v33  ;;  %v8779_v42 = vsel %vm252_vm0, %v8649_v56, %v20298_v55  ;;  %v8520_v0 = vsel %vm8490_vm2, %v8339_v49, %v20300_v10  ;;  %v20308_v21 = vld [vmem:[#allocation286_spill] sm:$0xff]  ;;  %v20311_v37 = vld [vmem:[#allocation336_spill] sm:$0xff]  ;;  %v20318_v51 = vld [vmem:[#allocation405_spill] sm:$0xff]  ;;  %v20320_v29 = vrot.slane %v20319_v46, 1 }
 0x6d4   : > { %v17559_v43 = vrot.slane %v9729_v6, 7  ;;  %v8124_v3 = vpop.permute.xlu0 %8123  ;;  %v8058_v11 = vpop.permute.xlu1 %8057  ;;  %v9497_v62 = vsel %vm5756_vm9, %v9486_v20, %v9496_v47  ;;  %v9728_v53 = vsel %vm5756_vm9, %v17457_v19, %v9727_v13  ;;  %v8910_v19 = vsel %vm8882_vm14, %v8779_v42, %v20301_v24  ;;  %v20303_v20 = vld [vmem:[#allocation201_spill] sm:$0xff]  ;;  %v20314_v47 = vld [vmem:[#allocation120_spill] sm:$0xff]  ;;  %v4871_v33 = vld [vmem:[#allocation2 + $0x228] sm:$0x1] }
 0x6d5   : > { %11707 = vmatmul.mubr.msk.bf16.gmra.mrb[24].mxu0 %vm9877_vm5, %v9497_v62  ;;  %11774 = vmatprep.mubr.msk.bf16.mxu1 %vm9877_vm5, %v9728_v53  ;;  %v8586_v58 = vsel %vm8490_vm2, %v8438_v1, %v20303_v20  ;;  %v8651_v54 = vsel %vm8621_vm12, %v8520_v0, %v20305_v39  ;;  %v9041_v17 = vsel %vm9013_vm15, %v8910_v19, %v20306_v31  ;;  %v20315_v6 = vld [vmem:[#allocation396_spill] sm:$0xff]  ;;  %v20321_v10 = vld [vmem:[#allocation459_spill] sm:$0xff]  ;;  %v6437_v4 = vsel %vm6368_vm11, %v4871_v33, 0 }
 0x6d6   : > { %v9734_v35 = vor.u32 %v9732_v45, %v17559_v43  ;;  %8153 = vrot.lane.b32.xlu0 %v20287_v40, %s12113_s26  ;;  %8219 = vrot.lane.b32.xlu1 %v20302_v61, %s12114_s6  ;;  %v8717_v44 = vsel %vm8621_vm12, %v8586_v58, %v20307_v34  ;;  %v9172_v22 = vsel %vm9144_vm4, %v9041_v17, %v8056_v38  ;;  %v20317_v49 = vld [vmem:[#allocation456_spill] sm:$0xff]  ;;  %v8161_v58 = vrot.slane %v6436_v28, 1 }
 0x6d7   : > { %v8719_v52 = vsel %vm8621_vm12, %v8588_v36, %v20308_v21  ;;  %v8781_v59 = vsel %vm252_vm0, %v8651_v54, %v20309_v15  ;;  %v8847_v63 = vsel %vm252_vm0, %v8717_v44, %v20310_v2  ;;  %v20322_v44 = vld [vmem:[#allocation109_spill] sm:$0xff]  ;;  %v20325_v15 = vld [vmem:[#allocation395_spill] sm:$0xff]  ;;  %vm19184_vm10 = vcmask 1048512  }
 0x6d8   : > { %v8126_v26 = vpop.permute.xlu0 %8125  ;;  %v8192_v40 = vpop.permute.xlu1 %8191  ;;  %v9735_v12 = vsel %vm5756_vm9, %v9724_v23, %v9734_v35  ;;  %v8849_v38 = vsel %vm252_vm0, %v8719_v52, %v20311_v37  ;;  %v8912_v23 = vsel %vm8882_vm14, %v8781_v59, %v20312_v60  ;;  %v8978_v32 = vsel %vm8882_vm14, %v8847_v63, %v20313_v41 }
 0x6d9   : > { %v9303_v27 = vsel %vm9275_vm3, %v9172_v22, %v8192_v40  ;;  %11775 = vmatmul.mubr.msk.bf16.gmra.mrb[28].mxu1 %vm9877_vm5, %v9735_v12  ;;  %v9043_v25 = vsel %vm9013_vm15, %v8912_v23, %v20316_v7  ;;  %v9109_v30 = vsel %vm9013_vm15, %v8978_v32, %v20317_v49  ;;  %v8980_v1 = vsel %vm8882_vm14, %v8849_v38, %v20318_v51  ;;  %v20324_v40 = vld [vmem:[#allocation95_spill] sm:$0xff]  ;;  %v20327_v32 = vld [vmem:[#allocation108_spill] sm:$0xff] }
 0x6da   : > { %v9498_v13 = vshrl.u32 %v9303_v27, 16  ;;  %8287 = vrot.lane.b32.xlu0 %v20314_v47, %s12114_s6  ;;  %8221 = vrot.lane.b32.xlu1 %v20315_v6, %s12114_s6  ;;  %v9240_v18 = vsel %vm9144_vm4, %v9109_v30, %v8124_v3  ;;  %v9174_v56 = vsel %vm9144_vm4, %v9043_v25, %v8058_v11  ;;  %v9501_v45 = vshll.u32 %v9303_v27, 16  ;;  %v20329_v6 = vld [vmem:[#allocation147_spill] sm:$0xff]  ;;  %v20332_v49 = vld [vmem:[#allocation148_spill] sm:$0xff]  ;;  %v20333_v30 = vld [vmem:[#allocation37_spill] sm:$0xff] }
 0x6db   : > { %v8028_v3 = vsel %vm7763_vm13, %v20320_v29, %v8027_v5  ;;  %v9111_v11 = vsel %vm9013_vm15, %v8980_v1, %v20321_v10  ;;  %v8162_v2 = vsel %vm7763_vm13, %v8027_v5, %v8161_v58  ;;  %v8163_v63 = vrot.slane %v6437_v4, 1  ;;  %v20330_v7 = vld [vmem:[#allocation79_spill] sm:$0xff]  ;;  %v20331_v5 = vld [vmem:[#allocation301_spill] sm:$0xff]  ;;  %v20338_v1 = vld [vmem:[#allocation254_spill] sm:$0xff] }
 0x6dc   : > { %v9500_v9 = vrot.slane %v9498_v13, 7  ;;  %v8260_v62 = vpop.permute.xlu0 %8259  ;;  %v8194_v53 = vpop.permute.xlu1 %8193  ;;  %v9242_v35 = vsel %vm9144_vm4, %v9111_v11, %v8126_v26  ;;  %v20328_v13 = vld [vmem:[#allocation54_spill] sm:$0xff]  ;;  %v8447_v57 = vsel %vm308_vm1, %v20330_v7, %v20329_v6  ;;  %v8444_v50 = vsel %vm308_vm1, %v20333_v30, %v20332_v49 }
 0x6dd   : > { %v9371_v55 = vsel %vm9275_vm3, %v9240_v18, %v8260_v62  ;;  %v9305_v42 = vsel %vm9275_vm3, %v9174_v56, %v8194_v53  ;;  %v20335_v56 = vld [vmem:[#allocation98_spill] sm:$0xff]  ;;  %v8164_v51 = vsel %vm7763_vm13, %v8161_v58, %v8163_v63  ;;  %vm10702_vm13 = vcmask 326912  }
 0x6de   : > { %v9503_v0 = vor.u32 %v9501_v45, %v9500_v9  ;;  %v9736_v24 = vshrl.u32 %v9371_v55, 16  ;;  %v9505_v19 = vshrl.u32 %v9305_v42, 16  ;;  %8087 = vrot.lane.b32.xlu0 %v20302_v61, %s12113_s26  ;;  %8289 = vrot.lane.b32.xlu1 %v8028_v3, %s12114_s6  ;;  %v9739_v20 = vshll.u32 %v9371_v55, 16  ;;  %v20323_v61 = vld [vmem:[#allocation22_spill] sm:$0xff]  ;;  %v20336_v45 = vld [vmem:[#allocation203_spill] sm:$0xff] }
 0x6df   : > { %v9508_v54 = vshll.u32 %v9305_v42, 16  ;;  %v8342_v22 = vsel %vm308_vm1, %v20323_v61, %v20322_v44  ;;  %v8590_v62 = vsel %vm8490_vm2, %v8444_v50, %v20336_v45  ;;  %v20337_v53 = vld [vmem:[#allocation434_spill] sm:$0xff]  ;;  %v20339_v42 = vld [vmem:[#allocation205_spill] sm:$0xff] }
 0x6e0   : > { %v9738_v36 = vrot.slane %v9736_v24, 7  ;;  %v17637_v39 = vrot.slane %v9505_v19, 7  ;;  %v8060_v31 = vpop.permute.xlu0 %8059  ;;  %v8262_v17 = vpop.permute.xlu1 %8261  ;;  %v9504_v34 = vsel %vm5756_vm9, %v17531_v48, %v9503_v0  ;;  %v8522_v14 = vsel %vm8490_vm2, %v8342_v22, %v20324_v40  ;;  %v20326_v48 = vld [vmem:[#allocation255_spill] sm:$0xff]  ;;  %v20341_v19 = vld [vmem:[#allocation304_spill] sm:$0xff]  ;;  %v20346_v22 = vld [vmem:[#allocation338_spill] sm:$0xff] }
 0x6e1   : > { %v9373_v26 = vsel %vm9275_vm3, %v9242_v35, %v8262_v17  ;;  %11710 = vmatprep.mubr.msk.bf16.mxu0 %vm9877_vm5, %v9504_v34  ;;  %v8653_v59 = vsel %vm8621_vm12, %v8522_v14, %v20326_v48  ;;  %v8721_v46 = vsel %vm8621_vm12, %v8590_v62, %v20339_v42  ;;  %v20340_v0 = vld [vmem:[#allocation207_spill] sm:$0xff]  ;;  %v20344_v17 = vld [vmem:[#allocation96_spill] sm:$0xff]  ;;  %v20347_v40 = vld [vmem:[#allocation437_spill] sm:$0xff] }
 0x6e2   : > { %v9741_v12 = vor.u32 %v9739_v20, %v9738_v36  ;;  %v9510_v21 = vor.u32 %v9508_v54, %v17637_v39  ;;  %v9743_v52 = vshrl.u32 %v9373_v26, 16  ;;  %8223 = vrot.lane.b32.xlu0 %v20325_v15, %s12114_s6  ;;  %8155 = vrot.lane.b32.xlu1 %v20314_v47, %s12113_s26  ;;  %v9746_v37 = vshll.u32 %v9373_v26, 16  ;;  %v20342_v20 = vld [vmem:[#allocation335_spill] sm:$0xff]  ;;  %v20343_v54 = vld [vmem:[#allocation209_spill] sm:$0xff]  ;;  %v20353_v45 = vld [vmem:[#allocation94_spill] sm:$0xff] }
 0x6e3   : > { %v8345_v47 = vsel %vm308_vm1, %v20328_v13, %v20327_v32  ;;  %v8783_v25 = vsel %vm252_vm0, %v8653_v59, %v20331_v5  ;;  %v8592_v24 = vsel %vm8490_vm2, %v8447_v57, %v20340_v0  ;;  %v8851_v58 = vsel %vm252_vm0, %v8721_v46, %v20342_v20  ;;  %v20350_v13 = vld [vmem:[#allocation461_spill] sm:$0xff]  ;;  %v20358_v20 = vld [vmem:[#allocation150_spill] sm:$0xff] }
 0x6e4   : > { %v17658_v27 = vrot.slane %v9743_v52, 7  ;;  %v8128_v38 = vpop.permute.xlu0 %8127  ;;  %v8062_v60 = vpop.permute.xlu1 %8061  ;;  %v9511_v23 = vsel %vm5756_vm9, %v9500_v9, %v9510_v21  ;;  %v9742_v41 = vsel %vm5756_vm9, %v17559_v43, %v9741_v12  ;;  %v20334_v43 = vld [vmem:[#allocation97_spill] sm:$0xff]  ;;  %v8524_v9 = vsel %vm8490_vm2, %v8345_v47, %v20335_v56  ;;  %v20348_v12 = vld [vmem:[#allocation458_spill] sm:$0xff] }
 0x6e5   : > { %11711 = vmatmul.mubr.msk.bf16.gmra.mrb[28].mxu0 %vm9877_vm5, %v9511_v23  ;;  %11778 = vmatprep.mubr.msk.bf16.mxu1 %vm9877_vm5, %v9742_v41  ;;  %v8914_v28 = vsel %vm8882_vm14, %v8783_v25, %v20334_v43  ;;  %v8655_v55 = vsel %vm8621_vm12, %v8524_v9, %v20338_v1  ;;  %v20354_v1 = vld [vmem:[#allocation257_spill] sm:$0xff] }
 0x6e6   : > { %v9748_v18 = vor.u32 %v9746_v37, %v17658_v27  ;;  %8291 = vrot.lane.b32.xlu0 %v8162_v2, %s12114_s6  ;;  %8157 = vrot.lane.b32.xlu1 %v8028_v3, %s12113_s26  ;;  %v9045_v33 = vsel %vm9013_vm15, %v8914_v28, %v20337_v53  ;;  %v8785_v35 = vsel %vm252_vm0, %v8655_v55, %v20341_v19  ;;  %v20349_v37 = vld [vmem:[#allocation407_spill] sm:$0xff]  ;;  %v20351_v28 = vld [vmem:[#allocation113_spill] sm:$0xff]  ;;  %s217_s26 = sand.u32 1, %s12081_s21  }
 0x6e7   : > { %v9176_v29 = vsel %vm9144_vm4, %v9045_v33, %v8060_v31  ;;  %v8723_v31 = vsel %vm8621_vm12, %v8592_v24, %v20343_v54  ;;  %v8916_v34 = vsel %vm8882_vm14, %v8785_v35, %v20344_v17  ;;  %v20356_v24 = vld [vmem:[#allocation112_spill] sm:$0xff]  ;;  %v20357_v19 = vld [vmem:[#allocation57_spill] sm:$0xff]  ;;  %v20360_v54 = vld [vmem:[#allocation359_spill] sm:$0xff]  ;;  %s11385_s8 = sshll.u32 %s217_s26, 6 }
 0x6e8   : > { %v8130_v3 = vpop.permute.xlu0 %8129  ;;  %v8196_v10 = vpop.permute.xlu1 %8195  ;;  %v9749_v11 = vsel %vm5756_vm9, %v9738_v36, %v9748_v18  ;;  %v20345_v36 = vld [vmem:[#allocation408_spill] sm:$0xff]  ;;  %v8853_v26 = vsel %vm252_vm0, %v8723_v31, %v20346_v22  ;;  %v9047_v14 = vsel %vm9013_vm15, %v8916_v34, %v20347_v40  ;;  %v20352_v18 = vld [vmem:[#allocation46_spill] sm:$0xff]  ;;  %v8351_v35 = vsel %vm308_vm1, %v20357_v19, %v20356_v24  ;;  %v20361_v17 = vld [vmem:[#allocation149_spill] sm:$0xff]  ;;  %s18246_s10 = scalar_lea.vmem [#allocation4], %s11385_s8  ;;  %s12118_s8 = smov 64  }
 0x6e9   : > { %v9307_v4 = vsel %vm9275_vm3, %v9176_v29, %v8196_v10  ;;  %11779 = vmatmul.mubr.msk.bf16.gmra.mrb[32].mxu1 %vm9877_vm5, %v9749_v11  ;;  %v8982_v44 = vsel %vm8882_vm14, %v8851_v58, %v20345_v36  ;;  %v9178_v15 = vsel %vm9144_vm4, %v9047_v14, %v8062_v60  ;;  %v8984_v23 = vsel %vm8882_vm14, %v8853_v26, %v20349_v37  ;;  %v20355_v11 = vld [vmem:[#allocation303_spill] sm:$0xff]  ;;  %v20359_v58 = vld [vmem:[#allocation12_spill] sm:$0xff]  ;;  %v20364_v22 = vld [vmem:[#allocation206_spill] sm:$0xff] }
 0x6ea   : > { %v9512_v61 = vshrl.u32 %v9307_v4, 16  ;;  %8293 = vrot.lane.b32.xlu1 %v8164_v51, %s12114_s6  ;;  %v9113_v21 = vsel %vm9013_vm15, %v8982_v44, %v20348_v12  ;;  %v9515_v59 = vshll.u32 %v9307_v4, 16  ;;  %v9115_v47 = vsel %vm9013_vm15, %v8984_v23, %v20350_v13  ;;  %v20362_v34 = vld [vmem:[#allocation40_spill] sm:$0xff]  ;;  %v20363_v44 = vld [vmem:[#allocation174_spill] sm:$0xff]  ;;  %v20368_v37 = vld [vmem:[#allocation211_spill] sm:$0xff] }
 0x6eb   : > { %v9244_v52 = vsel %vm9144_vm4, %v9113_v21, %v8128_v38  ;;  %v9246_v38 = vsel %vm9144_vm4, %v9115_v47, %v8130_v3  ;;  %v8348_v56 = vsel %vm308_vm1, %v20352_v18, %v20351_v28  ;;  %v8450_v4 = vsel %vm308_vm1, %v20359_v58, %v20358_v20  ;;  %v20365_v40 = vld [vmem:[#allocation436_spill] sm:$0xff]  ;;  %v20370_v13 = vld [vmem:[#allocation337_spill] sm:$0xff]  ;;  %v20375_v28 = vld [vmem:[#allocation439_spill] sm:$0xff] }
 0x6ec   : > { %v9514_v48 = vrot.slane %v9512_v61, 7  ;;  %v8264_v2 = vpop.permute.xlu0 %8263  ;;  %v8198_v63 = vpop.permute.xlu1 %8197  ;;  %v8526_v62 = vsel %vm8490_vm2, %v8348_v56, %v20353_v45  ;;  %v8453_v36 = vsel %vm308_vm1, %v20362_v34, %v20361_v17  ;;  %v8528_v61 = vsel %vm8490_vm2, %v8351_v35, %v20363_v44  ;;  %v20366_v12 = vld [vmem:[#allocation256_spill] sm:$0xff]  ;;  %v20379_v17 = vld [vmem:[#allocation115_spill] sm:$0xff] }
 0x6ed   : > { %v9375_v41 = vsel %vm9275_vm3, %v9244_v52, %v8264_v2  ;;  %v9309_v32 = vsel %vm9275_vm3, %v9178_v15, %v8198_v63  ;;  %v8657_v55 = vsel %vm8621_vm12, %v8526_v62, %v20354_v1  ;;  %v8594_v26 = vsel %vm8490_vm2, %v8450_v4, %v20364_v22  ;;  %v20367_v52 = vld [vmem:[#allocation208_spill] sm:$0xff]  ;;  %v20380_v34 = vld [vmem:[#allocation23_spill] sm:$0xff] }
 0x6ee   : > { %v9517_v6 = vor.u32 %v9515_v59, %v9514_v48  ;;  %v9750_v7 = vshrl.u32 %v9375_v41, 16  ;;  %v9519_v57 = vshrl.u32 %v9309_v32, 16  ;;  %v9753_v60 = vshll.u32 %v9375_v41, 16  ;;  %v20369_v41 = vld [vmem:[#allocation306_spill] sm:$0xff]  ;;  %v20376_v56 = vld [vmem:[#allocation460_spill] sm:$0xff] }
 0x6ef   : > { %v9522_v49 = vshll.u32 %v9309_v32, 16  ;;  %v8787_v0 = vsel %vm252_vm0, %v8657_v55, %v20355_v11  ;;  %v8659_v21 = vsel %vm8621_vm12, %v8528_v61, %v20366_v12  ;;  %v8725_v15 = vsel %vm8621_vm12, %v8594_v26, %v20367_v52  ;;  %v20377_v55 = vld [vmem:[#allocation409_spill] sm:$0xff]  ;;  %v20378_v11 = vld [vmem:[#allocation463_spill] sm:$0xff] }
 0x6f0   : > { %v9752_v5 = vrot.slane %v9750_v7, 7  ;;  %v17724_v25 = vrot.slane %v9519_v57, 7  ;;  %v8064_v30 = vpop.permute.xlu0 %8063  ;;  %v8266_v50 = vpop.permute.xlu1 %8265  ;;  %v9518_v43 = vsel %vm5756_vm9, %v17637_v39, %v9517_v6  ;;  %v8918_v31 = vsel %vm8882_vm14, %v8787_v0, %v20360_v54  ;;  %v20371_v7 = vld [vmem:[#allocation213_spill] sm:$0xff]  ;;  %v20382_v12 = vld [vmem:[#allocation259_spill] sm:$0xff] }
 0x6f1   : > { %v9377_v9 = vsel %vm9275_vm3, %v9246_v38, %v8266_v50  ;;  %11714 = vmatprep.mubr.msk.bf16.mxu0 %vm9877_vm5, %v9518_v43  ;;  %v9049_v14 = vsel %vm9013_vm15, %v8918_v31, %v20365_v40  ;;  %v8596_v23 = vsel %vm8490_vm2, %v8453_v36, %v20368_v37  ;;  %v8789_v32 = vsel %vm252_vm0, %v8659_v21, %v20369_v41  ;;  %v20372_v38 = vld [vmem:[#allocation358_spill] sm:$0xff]  ;;  %v20374_v50 = vld [vmem:[#allocation340_spill] sm:$0xff]  ;;  %v20381_v61 = vld [vmem:[#allocation173_spill] sm:$0xff] }
 0x6f2   : > { %v9755_v53 = vor.u32 %v9753_v60, %v9752_v5  ;;  %v9524_v33 = vor.u32 %v9522_v49, %v17724_v25  ;;  %v9757_v51 = vshrl.u32 %v9377_v9, 16  ;;  %v9760_v39 = vshll.u32 %v9377_v9, 16  ;;  %v20385_v41 = vld [vmem:[#allocation49_spill] sm:$0xff] }
 0x6f3   : > { %v8855_v47 = vsel %vm252_vm0, %v8725_v15, %v20370_v13  ;;  %v8727_v57 = vsel %vm8621_vm12, %v8596_v23, %v20371_v7  ;;  %v8920_v60 = vsel %vm8882_vm14, %v8789_v32, %v20372_v38  ;;  %v8354_v36 = vsel %vm308_vm1, %v20380_v34, %v20379_v17  ;;  %v20384_v23 = vld [vmem:[#allocation114_spill] sm:$0xff]  ;;  %v20386_v13 = vld [vmem:[#allocation152_spill] sm:$0xff]  ;;  %v20388_v7 = vld [vmem:[#allocation363_spill] sm:$0xff] }
 0x6f4   : > { %v17738_v42 = vrot.slane %v9757_v51, 7  ;;  %v8132_v46 = vpop.permute.xlu0 %8131  ;;  %v8066_v29 = vpop.permute.xlu1 %8065  ;;  %v9525_v3 = vsel %vm5756_vm9, %v9514_v48, %v9524_v33  ;;  %v9756_v10 = vsel %vm5756_vm9, %v17658_v27, %v9755_v53  ;;  %v9180_v48 = vsel %vm9144_vm4, %v9049_v14, %v8064_v30  ;;  %v20389_v38 = vld [vmem:[#allocation151_spill] sm:$0xff]  ;;  %v20403_v17 = vld [vmem:[#allocation441_spill] sm:$0xff] }
 0x6f5   : > { %11715 = vmatmul.mubr.msk.bf16.gmra.mrb[32].mxu0 %vm9877_vm5, %v9525_v3  ;;  %11782 = vmatprep.mubr.msk.bf16.mxu1 %vm9877_vm5, %v9756_v10  ;;  %v8857_v43 = vsel %vm252_vm0, %v8727_v57, %v20374_v50  ;;  %v9051_v18 = vsel %vm9013_vm15, %v8920_v60, %v20375_v28  ;;  %v8530_v22 = vsel %vm8490_vm2, %v8354_v36, %v20381_v61  ;;  %v20390_v60 = vld [vmem:[#allocation75_spill] sm:$0xff]  ;;  %v20392_v50 = vld [vmem:[#allocation210_spill] sm:$0xff] }
 0x6f6   : > { %v9762_v27 = vor.u32 %v9760_v39, %v17738_v42  ;;  %v9182_v62 = vsel %vm9144_vm4, %v9051_v18, %v8066_v29  ;;  %v8988_v39 = vsel %vm8882_vm14, %v8857_v43, %v20377_v55  ;;  %v8661_v21 = vsel %vm8621_vm12, %v8530_v22, %v20382_v12  ;;  %v20393_v28 = vld [vmem:[#allocation438_spill] sm:$0xff]  ;;  %v20396_v55 = vld [vmem:[#allocation215_spill] sm:$0xff] }
 0x6f7   : > { %v9119_v0 = vsel %vm9013_vm15, %v8988_v39, %v20378_v11  ;;  %v8357_v32 = vsel %vm308_vm1, %v20385_v41, %v20384_v23  ;;  %v20398_v11 = vld [vmem:[#allocation339_spill] sm:$0xff]  ;;  %v20404_v36 = vld [vmem:[#allocation462_spill] sm:$0xff] }
 0x6f8   : > { %v8134_v59 = vpop.permute.xlu0 %8133  ;;  %v8200_v2 = vpop.permute.xlu1 %8199  ;;  %v9763_v63 = vsel %vm5756_vm9, %v9752_v5, %v9762_v27  ;;  %v20373_v5 = vld [vmem:[#allocation410_spill] sm:$0xff] }
 0x6f9   : > { %v9311_v6 = vsel %vm9275_vm3, %v9180_v48, %v8200_v2  ;;  %11783 = vmatmul.mubr.msk.bf16.gmra.mrb[36].mxu1 %vm9877_vm5, %v9763_v63  ;;  %v8986_v49 = vsel %vm8882_vm14, %v8855_v47, %v20373_v5  ;;  %v20383_v63 = vld [vmem:[#allocation305_spill] sm:$0xff]  ;;  %v20387_v47 = vld [vmem:[#allocation36_spill] sm:$0xff]  ;;  %v8459_v5 = vsel %vm308_vm1, %v20390_v60, %v20389_v38  ;;  %v20407_v38 = vld [vmem:[#allocation119_spill] sm:$0xff] }
 0x6fa   : > { %v9526_v30 = vshrl.u32 %v9311_v6, 16  ;;  %v9117_v9 = vsel %vm9013_vm15, %v8986_v49, %v20376_v56  ;;  %v9529_v33 = vshll.u32 %v9311_v6, 16  ;;  %v8791_v37 = vsel %vm252_vm0, %v8661_v21, %v20383_v63  ;;  %v20391_v49 = vld [vmem:[#allocation176_spill] sm:$0xff]  ;;  %v20394_v56 = vld [vmem:[#allocation258_spill] sm:$0xff]  ;;  %v20405_v21 = vld [vmem:[#allocation411_spill] sm:$0xff] }
 0x6fb   : > { %v9248_v45 = vsel %vm9144_vm4, %v9117_v9, %v8132_v46  ;;  %v9250_v46 = vsel %vm9144_vm4, %v9119_v0, %v8134_v59  ;;  %v8456_v6 = vsel %vm308_vm1, %v20387_v47, %v20386_v13  ;;  %v8922_v57 = vsel %vm8882_vm14, %v8791_v37, %v20388_v7  ;;  %v20406_v63 = vld [vmem:[#allocation465_spill] sm:$0xff]  ;;  %v20408_v60 = vld [vmem:[#allocation20_spill] sm:$0xff] }
 0x6fc   : > { %v9528_v53 = vrot.slane %v9526_v30, 7  ;;  %v8268_v51 = vpop.permute.xlu0 %8267  ;;  %v8202_v1 = vpop.permute.xlu1 %8201  ;;  %v8532_v30 = vsel %vm8490_vm2, %v8357_v32, %v20391_v49  ;;  %v8598_v43 = vsel %vm8490_vm2, %v8456_v6, %v20392_v50  ;;  %v9053_v18 = vsel %vm9013_vm15, %v8922_v57, %v20393_v28 }
 0x6fd   : > { %v9379_v3 = vsel %vm9275_vm3, %v9248_v45, %v8268_v51  ;;  %v9313_v10 = vsel %vm9275_vm3, %v9182_v62, %v8202_v1  ;;  %v8663_v9 = vsel %vm8621_vm12, %v8532_v30, %v20394_v56  ;;  %v20395_v45 = vld [vmem:[#allocation212_spill] sm:$0xff]  ;;  %v8600_v39 = vsel %vm8490_vm2, %v8459_v5, %v20396_v55  ;;  %v20409_v30 = vld [vmem:[#allocation175_spill] sm:$0xff]  ;;  %v20410_v56 = vld [vmem:[#allocation261_spill] sm:$0xff] }
 0x6fe   : > { %v9531_v24 = vor.u32 %v9529_v33, %v9528_v53  ;;  %v9764_v19 = vshrl.u32 %v9379_v3, 16  ;;  %v9533_v35 = vshrl.u32 %v9313_v10, 16  ;;  %v9767_v29 = vshll.u32 %v9379_v3, 16  ;;  %v20397_v3 = vld [vmem:[#allocation308_spill] sm:$0xff] }
 0x6ff   : > { %v9536_v4 = vshll.u32 %v9313_v10, 16  ;;  %v8729_v62 = vsel %vm8621_vm12, %v8598_v43, %v20395_v45  ;;  %v8793_v10 = vsel %vm252_vm0, %v8663_v9, %v20397_v3  ;;  %v8360_v5 = vsel %vm308_vm1, %v20408_v60, %v20407_v38  ;;  %v20413_v3 = vld [vmem:[#allocation66_spill] sm:$0xff]  ;;  %v20431_v38 = vld [vmem:[#allocation443_spill] sm:$0xff] }
 0x700   : > { %v9766_v20 = vrot.slane %v9764_v19, 7  ;;  %v17800_v58 = vrot.slane %v9533_v35, 7  ;;  %v8068_v54 = vpop.permute.xlu0 %8067  ;;  %v8270_v31 = vpop.permute.xlu1 %8269  ;;  %v9532_v27 = vsel %vm5756_vm9, %v17724_v25, %v9531_v24  ;;  %v8859_v0 = vsel %vm252_vm0, %v8729_v62, %v20398_v11  ;;  %v20399_v19 = vld [vmem:[#allocation217_spill] sm:$0xff]  ;;  %v20414_v11 = vld [vmem:[#allocation154_spill] sm:$0xff] }
 0x701   : > { %v9381_v44 = vsel %vm9275_vm3, %v9250_v46, %v8270_v31  ;;  %11718 = vmatprep.mubr.msk.bf16.mxu0 %vm9877_vm5, %v9532_v27  ;;  %v8731_v35 = vsel %vm8621_vm12, %v8600_v39, %v20399_v19  ;;  %v20400_v46 = vld [vmem:[#allocation362_spill] sm:$0xff]  ;;  %v8534_v50 = vsel %vm8490_vm2, %v8360_v5, %v20409_v30  ;;  %v20432_v5 = vld [vmem:[#allocation464_spill] sm:$0xff] }
 0x702   : > { %v9769_v26 = vor.u32 %v9767_v29, %v9766_v20  ;;  %v9538_v40 = vor.u32 %v9536_v4, %v17800_v58  ;;  %v9771_v14 = vshrl.u32 %v9381_v44, 16  ;;  %v9774_v25 = vshll.u32 %v9381_v44, 16  ;;  %v20402_v31 = vld [vmem:[#allocation342_spill] sm:$0xff] }
 0x703   : > { %v8924_v29 = vsel %vm8882_vm14, %v8793_v10, %v20400_v46  ;;  %v8861_v27 = vsel %vm252_vm0, %v8731_v35, %v20402_v31  ;;  %v8665_v9 = vsel %vm8621_vm12, %v8534_v50, %v20410_v56  ;;  %v20412_v39 = vld [vmem:[#allocation118_spill] sm:$0xff]  ;;  %v20417_v46 = vld [vmem:[#allocation153_spill] sm:$0xff] }
 0x704   : > { %v17814_v52 = vrot.slane %v9771_v14, 7  ;;  %v8136_v15 = vpop.permute.xlu0 %8135  ;;  %v8070_v48 = vpop.permute.xlu1 %8069  ;;  %v9539_v59 = vsel %vm5756_vm9, %v9528_v53, %v9538_v40  ;;  %v9770_v2 = vsel %vm5756_vm9, %v17738_v42, %v9769_v26  ;;  %v9184_v53 = vsel %vm9144_vm4, %v9053_v18, %v8068_v54  ;;  %v20416_v19 = vld [vmem:[#allocation366_spill] sm:$0xff] }
 0x705   : > { %11719 = vmatmul.mubr.msk.bf16.gmra.mrb[36].mxu0 %vm9877_vm5, %v9539_v59  ;;  %11786 = vmatprep.mubr.msk.bf16.mxu1 %vm9877_vm5, %v9770_v2  ;;  %v9055_v34 = vsel %vm9013_vm15, %v8924_v29, %v20403_v17  ;;  %v8363_v10 = vsel %vm308_vm1, %v20413_v3, %v20412_v39  ;;  %v20418_v29 = vld [vmem:[#allocation38_spill] sm:$0xff]  ;;  %v20421_v17 = vld [vmem:[#allocation440_spill] sm:$0xff] }
 0x706   : > { %v9776_v42 = vor.u32 %v9774_v25, %v17814_v52  ;;  %v9186_v22 = vsel %vm9144_vm4, %v9055_v34, %v8070_v48  ;;  %v8992_v25 = vsel %vm8882_vm14, %v8861_v27, %v20405_v21  ;;  %v20420_v31 = vld [vmem:[#allocation214_spill] sm:$0xff]  ;;  %v20424_v21 = vld [vmem:[#allocation219_spill] sm:$0xff] }
 0x707   : > { %v9123_v37 = vsel %vm9013_vm15, %v8992_v25, %v20406_v63  ;;  %v20426_v63 = vld [vmem:[#allocation341_spill] sm:$0xff] }
 0x708   : > { %v8138_v33 = vpop.permute.xlu0 %8137  ;;  %v8204_v51 = vpop.permute.xlu1 %8203  ;;  %v9777_v1 = vsel %vm5756_vm9, %v9766_v20, %v9776_v42  ;;  %v20401_v20 = vld [vmem:[#allocation412_spill] sm:$0xff] }
 0x709   : > { %v9315_v24 = vsel %vm9275_vm3, %v9184_v53, %v8204_v51  ;;  %11787 = vmatmul.mubr.msk.bf16.gmra.mrb[40].mxu1 %vm9877_vm5, %v9777_v1  ;;  %v8990_v4 = vsel %vm8882_vm14, %v8859_v0, %v20401_v20  ;;  %v20411_v1 = vld [vmem:[#allocation307_spill] sm:$0xff]  ;;  %v20415_v0 = vld [vmem:[#allocation13_spill] sm:$0xff]  ;;  %v8465_v20 = vsel %vm308_vm1, %v20418_v29, %v20417_v46  ;;  %v20435_v46 = vld [vmem:[#allocation122_spill] sm:$0xff] }
 0x70a   : > { %v9540_v54 = vshrl.u32 %v9315_v24, 16  ;;  %v9121_v44 = vsel %vm9013_vm15, %v8990_v4, %v20404_v36  ;;  %v9543_v40 = vshll.u32 %v9315_v24, 16  ;;  %v8795_v55 = vsel %vm252_vm0, %v8665_v9, %v20411_v1  ;;  %v20419_v4 = vld [vmem:[#allocation178_spill] sm:$0xff]  ;;  %v20422_v36 = vld [vmem:[#allocation260_spill] sm:$0xff]  ;;  %v20433_v9 = vld [vmem:[#allocation413_spill] sm:$0xff] }
 0x70b   : > { %v9252_v61 = vsel %vm9144_vm4, %v9121_v44, %v8136_v15  ;;  %v9254_v15 = vsel %vm9144_vm4, %v9123_v37, %v8138_v33  ;;  %v8462_v24 = vsel %vm308_vm1, %v20415_v0, %v20414_v11  ;;  %v8926_v35 = vsel %vm8882_vm14, %v8795_v55, %v20416_v19  ;;  %v20434_v1 = vld [vmem:[#allocation467_spill] sm:$0xff]  ;;  %v20436_v29 = vld [vmem:[#allocation65_spill] sm:$0xff] }
 0x70c   : > { %v9542_v26 = vrot.slane %v9540_v54, 7  ;;  %v8272_v14 = vpop.permute.xlu0 %8271  ;;  %v8206_v12 = vpop.permute.xlu1 %8205  ;;  %v8536_v54 = vsel %vm8490_vm2, %v8363_v10, %v20419_v4  ;;  %v8602_v27 = vsel %vm8490_vm2, %v8462_v24, %v20420_v31  ;;  %v9057_v34 = vsel %vm9013_vm15, %v8926_v35, %v20421_v17 }
 0x70d   : > { %v9383_v59 = vsel %vm9275_vm3, %v9252_v61, %v8272_v14  ;;  %v9317_v2 = vsel %vm9275_vm3, %v9186_v22, %v8206_v12  ;;  %v8667_v44 = vsel %vm8621_vm12, %v8536_v54, %v20422_v36  ;;  %v20423_v61 = vld [vmem:[#allocation216_spill] sm:$0xff]  ;;  %v8604_v25 = vsel %vm8490_vm2, %v8465_v20, %v20424_v21  ;;  %v20437_v54 = vld [vmem:[#allocation177_spill] sm:$0xff]  ;;  %v20438_v36 = vld [vmem:[#allocation263_spill] sm:$0xff] }
 0x70e   : > { %v9545_v23 = vor.u32 %v9543_v40, %v9542_v26  ;;  %v9778_v41 = vshrl.u32 %v9383_v59, 16  ;;  %v9547_v32 = vshrl.u32 %v9317_v2, 16  ;;  %v9781_v48 = vshll.u32 %v9383_v59, 16  ;;  %v20425_v59 = vld [vmem:[#allocation310_spill] sm:$0xff] }
 0x70f   : > { %v9550_v6 = vshll.u32 %v9317_v2, 16  ;;  %v8733_v22 = vsel %vm8621_vm12, %v8602_v27, %v20423_v61  ;;  %v8797_v2 = vsel %vm252_vm0, %v8667_v44, %v20425_v59  ;;  %v8366_v20 = vsel %vm308_vm1, %v20436_v29, %v20435_v46  ;;  %v20441_v59 = vld [vmem:[#allocation61_spill] sm:$0xff] }
 0x710   : > { %v9780_v13 = vrot.slane %v9778_v41, 7  ;;  %v17876_v47 = vrot.slane %v9547_v32, 7  ;;  %v8072_v7 = vpop.permute.xlu0 %8071  ;;  %v8274_v57 = vpop.permute.xlu1 %8273  ;;  %v9546_v42 = vsel %vm5756_vm9, %v17800_v58, %v9545_v23  ;;  %v8863_v37 = vsel %vm252_vm0, %v8733_v22, %v20426_v63  ;;  %v20427_v41 = vld [vmem:[#allocation221_spill] sm:$0xff]  ;;  %v20442_v63 = vld [vmem:[#allocation156_spill] sm:$0xff] }
 0x711   : > { %v9385_v49 = vsel %vm9275_vm3, %v9254_v15, %v8274_v57  ;;  %11722 = vmatprep.mubr.msk.bf16.mxu0 %vm9877_vm5, %v9546_v42  ;;  %v8735_v32 = vsel %vm8621_vm12, %v8604_v25, %v20427_v41  ;;  %v20428_v15 = vld [vmem:[#allocation365_spill] sm:$0xff]  ;;  %v20430_v57 = vld [vmem:[#allocation344_spill] sm:$0xff]  ;;  %v8538_v31 = vsel %vm8490_vm2, %v8366_v20, %v20437_v54  ;;  %v20460_v20 = vld [vmem:[#allocation466_spill] sm:$0xff] }
 0x712   : > { %v9783_v43 = vor.u32 %v9781_v48, %v9780_v13  ;;  %v9552_v28 = vor.u32 %v9550_v6, %v17876_v47  ;;  %v9785_v18 = vshrl.u32 %v9385_v49, 16  ;;  %v9788_v58 = vshll.u32 %v9385_v49, 16  ;;  %v20440_v25 = vld [vmem:[#allocation121_spill] sm:$0xff] }
 0x713   : > { %v8928_v48 = vsel %vm8882_vm14, %v8797_v2, %v20428_v15  ;;  %v8865_v42 = vsel %vm252_vm0, %v8735_v32, %v20430_v57  ;;  %v8669_v44 = vsel %vm8621_vm12, %v8538_v31, %v20438_v36  ;;  %v8369_v2 = vsel %vm308_vm1, %v20441_v59, %v20440_v25  ;;  %v20444_v41 = vld [vmem:[#allocation369_spill] sm:$0xff]  ;;  %v20445_v15 = vld [vmem:[#allocation155_spill] sm:$0xff]  ;;  %v20448_v57 = vld [vmem:[#allocation218_spill] sm:$0xff] }
 0x714   : > { %v17890_v45 = vrot.slane %v9785_v18, 7  ;;  %v8140_v62 = vpop.permute.xlu0 %8139  ;;  %v8074_v53 = vpop.permute.xlu1 %8073  ;;  %v9553_v33 = vsel %vm5756_vm9, %v9542_v26, %v9552_v28  ;;  %v9784_v51 = vsel %vm5756_vm9, %v17814_v52, %v9783_v43  ;;  %v9188_v26 = vsel %vm9144_vm4, %v9057_v34, %v8072_v7  ;;  %v20459_v46 = vld [vmem:[#allocation445_spill] sm:$0xff] }
 0x715   : > { %11723 = vmatmul.mubr.msk.bf16.gmra.mrb[40].mxu0 %vm9877_vm5, %v9553_v33  ;;  %11790 = vmatprep.mubr.msk.bf16.mxu1 %vm9877_vm5, %v9784_v51  ;;  %v9059_v60 = vsel %vm9013_vm15, %v8928_v48, %v20431_v38  ;;  %v20446_v48 = vld [vmem:[#allocation83_spill] sm:$0xff]  ;;  %v20449_v38 = vld [vmem:[#allocation442_spill] sm:$0xff] }
 0x716   : > { %v9790_v52 = vor.u32 %v9788_v58, %v17890_v45  ;;  %v9190_v50 = vsel %vm9144_vm4, %v9059_v60, %v8074_v53  ;;  %v8996_v58 = vsel %vm8882_vm14, %v8865_v42, %v20433_v9  ;;  %v20452_v9 = vld [vmem:[#allocation223_spill] sm:$0xff] }
 0x717   : > { %v9127_v55 = vsel %vm9013_vm15, %v8996_v58, %v20434_v1  ;;  %v20454_v1 = vld [vmem:[#allocation343_spill] sm:$0xff] }
 0x718   : > { %v8142_v40 = vpop.permute.xlu0 %8141  ;;  %v8208_v14 = vpop.permute.xlu1 %8207  ;;  %v9791_v12 = vsel %vm5756_vm9, %v9780_v13, %v9790_v52  ;;  %v20429_v13 = vld [vmem:[#allocation414_spill] sm:$0xff] }
 0x719   : > { %v9319_v23 = vsel %vm9275_vm3, %v9188_v26, %v8208_v14  ;;  %11791 = vmatmul.mubr.msk.bf16.gmra.mrb[44].mxu1 %vm9877_vm5, %v9791_v12  ;;  %v8994_v6 = vsel %vm8882_vm14, %v8863_v37, %v20429_v13  ;;  %v20439_v12 = vld [vmem:[#allocation309_spill] sm:$0xff]  ;;  %v20443_v37 = vld [vmem:[#allocation10_spill] sm:$0xff]  ;;  %v8471_v13 = vsel %vm308_vm1, %v20446_v48, %v20445_v15  ;;  %v20463_v15 = vld [vmem:[#allocation124_spill] sm:$0xff] }
 0x71a   : > { %v9554_v7 = vshrl.u32 %v9319_v23, 16  ;;  %v9125_v49 = vsel %vm9013_vm15, %v8994_v6, %v20432_v5  ;;  %v9557_v28 = vshll.u32 %v9319_v23, 16  ;;  %v8799_v21 = vsel %vm252_vm0, %v8669_v44, %v20439_v12  ;;  %v20447_v6 = vld [vmem:[#allocation180_spill] sm:$0xff]  ;;  %v20450_v5 = vld [vmem:[#allocation262_spill] sm:$0xff]  ;;  %v20461_v44 = vld [vmem:[#allocation415_spill] sm:$0xff] }
 0x71b   : > { %v9256_v30 = vsel %vm9144_vm4, %v9125_v49, %v8140_v62  ;;  %v9258_v62 = vsel %vm9144_vm4, %v9127_v55, %v8142_v40  ;;  %v8468_v23 = vsel %vm308_vm1, %v20443_v37, %v20442_v63  ;;  %v8930_v32 = vsel %vm8882_vm14, %v8799_v21, %v20444_v41  ;;  %v20462_v12 = vld [vmem:[#allocation469_spill] sm:$0xff] }
 0x71c   : > { %v9556_v43 = vrot.slane %v9554_v7, 7  ;;  %v8276_v18 = vpop.permute.xlu0 %8275  ;;  %v8210_v56 = vpop.permute.xlu1 %8209  ;;  %v8540_v7 = vsel %vm8490_vm2, %v8369_v2, %v20447_v6  ;;  %v8606_v42 = vsel %vm8490_vm2, %v8468_v23, %v20448_v57  ;;  %v9061_v60 = vsel %vm9013_vm15, %v8930_v32, %v20449_v38  ;;  %v20464_v48 = vld [vmem:[#allocation21_spill] sm:$0xff] }
 0x71d   : > { %v9387_v33 = vsel %vm9275_vm3, %v9256_v30, %v8276_v18  ;;  %v9321_v51 = vsel %vm9275_vm3, %v9190_v50, %v8210_v56  ;;  %v8671_v49 = vsel %vm8621_vm12, %v8540_v7, %v20450_v5  ;;  %v20451_v30 = vld [vmem:[#allocation288_spill] sm:$0xff]  ;;  %v8608_v58 = vsel %vm8490_vm2, %v8471_v13, %v20452_v9  ;;  %v20465_v7 = vld [vmem:[#allocation179_spill] sm:$0xff]  ;;  %v20466_v5 = vld [vmem:[#allocation265_spill] sm:$0xff] }
 0x71e   : > { %v9559_v39 = vor.u32 %v9557_v28, %v9556_v43  ;;  %v9792_v3 = vshrl.u32 %v9387_v33, 16  ;;  %v9561_v10 = vshrl.u32 %v9321_v51, 16  ;;  %v9795_v53 = vshll.u32 %v9387_v33, 16  ;;  %v20453_v33 = vld [vmem:[#allocation312_spill] sm:$0xff] }
 0x71f   : > { %v9564_v24 = vshll.u32 %v9321_v51, 16  ;;  %v8737_v50 = vsel %vm8621_vm12, %v8606_v42, %v20451_v30  ;;  %v8801_v51 = vsel %vm252_vm0, %v8671_v49, %v20453_v33  ;;  %v8372_v13 = vsel %vm308_vm1, %v20464_v48, %v20463_v15  ;;  %v20469_v33 = vld [vmem:[#allocation64_spill] sm:$0xff]  ;;  %v20487_v15 = vld [vmem:[#allocation447_spill] sm:$0xff] }
 0x720   : > { %v9794_v11 = vrot.slane %v9792_v3, 7  ;;  %v17952_v0 = vrot.slane %v9561_v10, 7  ;;  %v8076_v19 = vpop.permute.xlu0 %8075  ;;  %v8278_v35 = vpop.permute.xlu1 %8277  ;;  %v9560_v52 = vsel %vm5756_vm9, %v17876_v47, %v9559_v39  ;;  %v8867_v55 = vsel %vm252_vm0, %v8737_v50, %v20454_v1  ;;  %v20455_v3 = vld [vmem:[#allocation220_spill] sm:$0xff]  ;;  %v20470_v1 = vld [vmem:[#allocation158_spill] sm:$0xff] }
 0x721   : > { %v9389_v4 = vsel %vm9275_vm3, %v9258_v62, %v8278_v35  ;;  %11726 = vmatprep.mubr.msk.bf16.mxu0 %vm9877_vm5, %v9560_v52  ;;  %v8739_v10 = vsel %vm8621_vm12, %v8608_v58, %v20455_v3  ;;  %v20456_v62 = vld [vmem:[#allocation368_spill] sm:$0xff]  ;;  %v20458_v35 = vld [vmem:[#allocation345_spill] sm:$0xff]  ;;  %v8542_v57 = vsel %vm8490_vm2, %v8372_v13, %v20465_v7  ;;  %v20468_v58 = vld [vmem:[#allocation123_spill] sm:$0xff] }
 0x722   : > { %v9797_v27 = vor.u32 %v9795_v53, %v9794_v11  ;;  %v9566_v17 = vor.u32 %v9564_v24, %v17952_v0  ;;  %v9799_v34 = vshrl.u32 %v9389_v4, 16  ;;  %v9802_v47 = vshll.u32 %v9389_v4, 16  ;;  %v20472_v3 = vld [vmem:[#allocation372_spill] sm:$0xff] }
 0x723   : > { %v8932_v53 = vsel %vm8882_vm14, %v8801_v51, %v20456_v62  ;;  %v8869_v52 = vsel %vm252_vm0, %v8739_v10, %v20458_v35  ;;  %v8673_v49 = vsel %vm8621_vm12, %v8542_v57, %v20466_v5  ;;  %v8375_v51 = vsel %vm308_vm1, %v20469_v33, %v20468_v58  ;;  %v20473_v62 = vld [vmem:[#allocation157_spill] sm:$0xff]  ;;  %v20476_v35 = vld [vmem:[#allocation222_spill] sm:$0xff]  ;;  %v20488_v13 = vld [vmem:[#allocation468_spill] sm:$0xff] }
 0x724   : > { %v17966_v61 = vrot.slane %v9799_v34, 7  ;;  %v8144_v22 = vpop.permute.xlu0 %8143  ;;  %v8078_v26 = vpop.permute.xlu1 %8077  ;;  %v9567_v40 = vsel %vm5756_vm9, %v9556_v43, %v9566_v17  ;;  %v9798_v14 = vsel %vm5756_vm9, %v17890_v45, %v9797_v27  ;;  %v9192_v43 = vsel %vm9144_vm4, %v9061_v60, %v8076_v19 }
 0x725   : > { %11727 = vmatmul.mubr.msk.bf16.gmra.mrb[44].mxu0 %vm9877_vm5, %v9567_v40  ;;  %11794 = vmatprep.mubr.msk.bf16.mxu1 %vm9877_vm5, %v9798_v14  ;;  %v9063_v29 = vsel %vm9013_vm15, %v8932_v53, %v20459_v46  ;;  %v20474_v53 = vld [vmem:[#allocation82_spill] sm:$0xff]  ;;  %v20477_v46 = vld [vmem:[#allocation444_spill] sm:$0xff] }
 0x726   : > { %v9804_v45 = vor.u32 %v9802_v47, %v17966_v61  ;;  %v9194_v31 = vsel %vm9144_vm4, %v9063_v29, %v8078_v26  ;;  %v9000_v47 = vsel %vm8882_vm14, %v8869_v52, %v20461_v44  ;;  %v20480_v44 = vld [vmem:[#allocation226_spill] sm:$0xff] }
 0x727   : > { %v9131_v21 = vsel %vm9013_vm15, %v9000_v47, %v20462_v12  ;;  %v20482_v12 = vld [vmem:[#allocation228_spill] sm:$0xff] }
 0x728   : > { %v8146_v28 = vpop.permute.xlu0 %8145  ;;  %v8212_v18 = vpop.permute.xlu1 %8211  ;;  %v9805_v56 = vsel %vm5756_vm9, %v9794_v11, %v9804_v45  ;;  %v20457_v11 = vld [vmem:[#allocation416_spill] sm:$0xff] }
 0x729   : > { %v9323_v39 = vsel %vm9275_vm3, %v9192_v43, %v8212_v18  ;;  %11795 = vmatmul.mubr.msk.bf16.gmra.mrb[48].mxu1 %vm9877_vm5, %v9805_v56  ;;  %v8998_v24 = vsel %vm8882_vm14, %v8867_v55, %v20457_v11  ;;  %v20467_v56 = vld [vmem:[#allocation311_spill] sm:$0xff]  ;;  %v20471_v55 = vld [vmem:[#allocation81_spill] sm:$0xff]  ;;  %v8477_v11 = vsel %vm308_vm1, %v20474_v53, %v20473_v62  ;;  %v20491_v62 = vld [vmem:[#allocation126_spill] sm:$0xff] }
 0x72a   : > { %v9568_v19 = vshrl.u32 %v9323_v39, 16  ;;  %v9129_v4 = vsel %vm9013_vm15, %v8998_v24, %v20460_v20  ;;  %v9571_v17 = vshll.u32 %v9323_v39, 16  ;;  %v8803_v9 = vsel %vm252_vm0, %v8673_v49, %v20467_v56  ;;  %v20475_v24 = vld [vmem:[#allocation182_spill] sm:$0xff]  ;;  %v20478_v20 = vld [vmem:[#allocation264_spill] sm:$0xff]  ;;  %v20490_v56 = vld [vmem:[#allocation471_spill] sm:$0xff] }
 0x72b   : > { %v9260_v54 = vsel %vm9144_vm4, %v9129_v4, %v8144_v22  ;;  %v9262_v22 = vsel %vm9144_vm4, %v9131_v21, %v8146_v28  ;;  %v8474_v39 = vsel %vm308_vm1, %v20471_v55, %v20470_v1  ;;  %v8934_v10 = vsel %vm8882_vm14, %v8803_v9, %v20472_v3  ;;  %v20489_v49 = vld [vmem:[#allocation418_spill] sm:$0xff]  ;;  %v20492_v53 = vld [vmem:[#allocation43_spill] sm:$0xff] }
 0x72c   : > { %v9570_v27 = vrot.slane %v9568_v19, 7  ;;  %v8280_v34 = vpop.permute.xlu0 %8279  ;;  %v8214_v36 = vpop.permute.xlu1 %8213  ;;  %v8544_v19 = vsel %vm8490_vm2, %v8375_v51, %v20475_v24  ;;  %v8610_v52 = vsel %vm8490_vm2, %v8474_v39, %v20476_v35  ;;  %v9065_v29 = vsel %vm9013_vm15, %v8934_v10, %v20477_v46 }
 0x72d   : > { %v9391_v40 = vsel %vm9275_vm3, %v9260_v54, %v8280_v34  ;;  %v9325_v14 = vsel %vm9275_vm3, %v9194_v31, %v8214_v36  ;;  %v8675_v4 = vsel %vm8621_vm12, %v8544_v19, %v20478_v20  ;;  %v20479_v54 = vld [vmem:[#allocation289_spill] sm:$0xff]  ;;  %v8612_v47 = vsel %vm8490_vm2, %v8477_v11, %v20480_v44  ;;  %v20494_v20 = vld [vmem:[#allocation267_spill] sm:$0xff] }
 0x72e   : > { %v9573_v25 = vor.u32 %v9571_v17, %v9570_v27  ;;  %v9806_v59 = vshrl.u32 %v9391_v40, 16  ;;  %v9575_v2 = vshrl.u32 %v9325_v14, 16  ;;  %v9809_v26 = vshll.u32 %v9391_v40, 16  ;;  %v20481_v40 = vld [vmem:[#allocation314_spill] sm:$0xff]  ;;  %v20493_v19 = vld [vmem:[#allocation181_spill] sm:$0xff] }
 0x72f   : > { %v9578_v23 = vshll.u32 %v9325_v14, 16  ;;  %v8741_v31 = vsel %vm8621_vm12, %v8610_v52, %v20479_v54  ;;  %v8805_v14 = vsel %vm252_vm0, %v8675_v4, %v20481_v40  ;;  %v8378_v11 = vsel %vm308_vm1, %v20492_v53, %v20491_v62  ;;  %v20497_v40 = vld [vmem:[#allocation67_spill] sm:$0xff]  ;;  %v20516_v53 = vld [vmem:[#allocation449_spill] sm:$0xff] }
 0x730   : > { %v9808_v63 = vrot.slane %v9806_v59, 7  ;;  %v18028_v37 = vrot.slane %v9575_v2, 7  ;;  %v8080_v41 = vpop.permute.xlu0 %8079  ;;  %v8282_v32 = vpop.permute.xlu1 %8281  ;;  %v9574_v45 = vsel %vm5756_vm9, %v17952_v0, %v9573_v25  ;;  %v8871_v21 = vsel %vm252_vm0, %v8741_v31, %v20482_v12  ;;  %v20483_v59 = vld [vmem:[#allocation224_spill] sm:$0xff] }
 0x731   : > { %v9393_v6 = vsel %vm9275_vm3, %v9262_v22, %v8282_v32  ;;  %11730 = vmatprep.mubr.msk.bf16.mxu0 %vm9877_vm5, %v9574_v45  ;;  %v8743_v2 = vsel %vm8621_vm12, %v8612_v47, %v20483_v59  ;;  %v20484_v22 = vld [vmem:[#allocation371_spill] sm:$0xff]  ;;  %v8546_v35 = vsel %vm8490_vm2, %v8378_v11, %v20493_v19  ;;  %v20496_v47 = vld [vmem:[#allocation125_spill] sm:$0xff]  ;;  %v20498_v12 = vld [vmem:[#allocation160_spill] sm:$0xff] }
 0x732   : > { %v9811_v42 = vor.u32 %v9809_v26, %v9808_v63  ;;  %v9580_v38 = vor.u32 %v9578_v23, %v18028_v37  ;;  %v9813_v60 = vshrl.u32 %v9393_v6, 16  ;;  %v9816_v0 = vshll.u32 %v9393_v6, 16  ;;  %v20486_v32 = vld [vmem:[#allocation347_spill] sm:$0xff]  ;;  %v20500_v59 = vld [vmem:[#allocation378_spill] sm:$0xff] }
 0x733   : > { %v8936_v26 = vsel %vm8882_vm14, %v8805_v14, %v20484_v22  ;;  %v8873_v45 = vsel %vm252_vm0, %v8743_v2, %v20486_v32  ;;  %v8677_v4 = vsel %vm8621_vm12, %v8546_v35, %v20494_v20  ;;  %v8381_v14 = vsel %vm308_vm1, %v20497_v40, %v20496_v47  ;;  %v20501_v22 = vld [vmem:[#allocation184_spill] sm:$0xff]  ;;  %v20520_v40 = vld [vmem:[#allocation107_spill] sm:$0xff] }
 0x734   : > { %v18042_v30 = vrot.slane %v9813_v60, 7  ;;  %v8148_v50 = vpop.permute.xlu0 %8147  ;;  %v8082_v43 = vpop.permute.xlu1 %8081  ;;  %v9581_v28 = vsel %vm5756_vm9, %v9570_v27, %v9580_v38  ;;  %v9812_v18 = vsel %vm5756_vm9, %v17966_v61, %v9811_v42  ;;  %v9196_v27 = vsel %vm9144_vm4, %v9065_v29, %v8080_v41 }
 0x735   : > { %11731 = vmatmul.mubr.msk.bf16.gmra.mrb[48].mxu0 %vm9877_vm5, %v9581_v28  ;;  %11798 = vmatprep.mubr.msk.bf16.mxu1 %vm9877_vm5, %v9812_v18  ;;  %v9067_v48 = vsel %vm9013_vm15, %v8936_v26, %v20487_v15  ;;  %v8548_v26 = vsel %vm8490_vm2, %v8381_v14, %v20501_v22 }
 0x736   : > { %v9818_v61 = vor.u32 %v9816_v0, %v18042_v30  ;;  %v9198_v57 = vsel %vm9144_vm4, %v9067_v48, %v8082_v43  ;;  %v9004_v0 = vsel %vm8882_vm14, %v8873_v45, %v20489_v49  ;;  %v20504_v45 = vld [vmem:[#allocation266_spill] sm:$0xff]  ;;  %v20505_v48 = vld [vmem:[#allocation227_spill] sm:$0xff]  ;;  %v20508_v49 = vld [vmem:[#allocation316_spill] sm:$0xff] }
 0x737   : > { %v9135_v9 = vsel %vm9013_vm15, %v9004_v0, %v20490_v56  ;;  %v8679_v15 = vsel %vm8621_vm12, %v8548_v26, %v20504_v45  ;;  %v20523_v45 = vld [vmem:[#allocation162_spill] sm:$0xff] }
 0x738   : > { %v8150_v17 = vpop.permute.xlu0 %8149  ;;  %v8216_v34 = vpop.permute.xlu1 %8215  ;;  %v9819_v36 = vsel %vm5756_vm9, %v9808_v63, %v9818_v61  ;;  %v20485_v63 = vld [vmem:[#allocation419_spill] sm:$0xff]  ;;  %v8809_v0 = vsel %vm252_vm0, %v8679_v15, %v20508_v49  ;;  %v20524_v15 = vld [vmem:[#allocation85_spill] sm:$0xff] }
 0x739   : > { %v9327_v25 = vsel %vm9275_vm3, %v9196_v27, %v8216_v34  ;;  %11799 = vmatmul.mubr.msk.bf16.gmra.mrb[52].mxu1 %vm9877_vm5, %v9819_v36  ;;  %v9002_v23 = vsel %vm8882_vm14, %v8871_v21, %v20485_v63  ;;  %v20495_v36 = vld [vmem:[#allocation313_spill] sm:$0xff]  ;;  %v20499_v21 = vld [vmem:[#allocation35_spill] sm:$0xff] }
 0x73a   : > { %v9582_v41 = vshrl.u32 %v9327_v25, 16  ;;  %v9133_v6 = vsel %vm9013_vm15, %v9002_v23, %v20488_v13  ;;  %v9585_v38 = vshll.u32 %v9327_v25, 16  ;;  %v8807_v44 = vsel %vm252_vm0, %v8677_v4, %v20495_v36  ;;  %v20502_v63 = vld [vmem:[#allocation225_spill] sm:$0xff] }
 0x73b   : > { %v9264_v7 = vsel %vm9144_vm4, %v9133_v6, %v8148_v50  ;;  %v9266_v50 = vsel %vm9144_vm4, %v9135_v9, %v8150_v17  ;;  %v8480_v25 = vsel %vm308_vm1, %v20499_v21, %v20498_v12  ;;  %v8938_v2 = vsel %vm8882_vm14, %v8807_v44, %v20500_v59  ;;  %v20510_v9 = vld [vmem:[#allocation230_spill] sm:$0xff]  ;;  %v20521_v21 = vld [vmem:[#allocation269_spill] sm:$0xff] }
 0x73c   : > { %v9584_v42 = vrot.slane %v9582_v41, 7  ;;  %v8284_v60 = vpop.permute.xlu0 %8283  ;;  %v8218_v5 = vpop.permute.xlu1 %8217  ;;  %v8614_v23 = vsel %vm8490_vm2, %v8480_v25, %v20502_v63  ;;  %v20503_v41 = vld [vmem:[#allocation446_spill] sm:$0xff]  ;;  %v20522_v59 = vld [vmem:[#allocation473_spill] sm:$0xff] }
 0x73d   : > { %v9395_v28 = vsel %vm9275_vm3, %v9264_v7, %v8284_v60  ;;  %v9329_v18 = vsel %vm9275_vm3, %v9198_v57, %v8218_v5  ;;  %v9069_v32 = vsel %vm9013_vm15, %v8938_v2, %v20503_v41  ;;  %v8745_v13 = vsel %vm8621_vm12, %v8614_v23, %v20505_v48  ;;  %v20507_v60 = vld [vmem:[#allocation33_spill] sm:$0xff] }
 0x73e   : > { %v9587_v58 = vor.u32 %v9585_v38, %v9584_v42  ;;  %v9820_v33 = vshrl.u32 %v9395_v28, 16  ;;  %v9589_v51 = vshrl.u32 %v9329_v18, 16  ;;  %v9823_v43 = vshll.u32 %v9395_v28, 16  ;;  %v20506_v38 = vld [vmem:[#allocation159_spill] sm:$0xff]  ;;  %v20509_v28 = vld [vmem:[#allocation346_spill] sm:$0xff] }
 0x73f   : > { %v9592_v39 = vshll.u32 %v9329_v18, 16  ;;  %v8483_v5 = vsel %vm308_vm1, %v20507_v60, %v20506_v38  ;;  %v8875_v18 = vsel %vm252_vm0, %v8745_v13, %v20509_v28  ;;  %v8486_v48 = vsel %vm308_vm1, %v20524_v15, %v20523_v45  ;;  %v20525_v13 = vld [vmem:[#allocation315_spill] sm:$0xff]  ;;  %v20526_v60 = vld [vmem:[#allocation381_spill] sm:$0xff]  ;;  %v20539_v45 = vld [vmem:[#allocation474_spill] sm:$0xff] }
 0x740   : > { %v9822_v1 = vrot.slane %v9820_v33, 7  ;;  %v18104_v55 = vrot.slane %v9589_v51, 7  ;;  %v8084_v3 = vpop.permute.xlu0 %8083  ;;  %v8286_v10 = vpop.permute.xlu1 %8285  ;;  %v9588_v61 = vsel %vm5756_vm9, %v18028_v37, %v9587_v58  ;;  %v8616_v58 = vsel %vm8490_vm2, %v8483_v5, %v20510_v9  ;;  %v20511_v33 = vld [vmem:[#allocation377_spill] sm:$0xff] }
 0x741   : > { %v9397_v24 = vsel %vm9275_vm3, %v9266_v50, %v8286_v10  ;;  %11734 = vmatprep.mubr.msk.bf16.mxu0 %vm9877_vm5, %v9588_v61  ;;  %v9200_v6 = vsel %vm9144_vm4, %v9069_v32, %v8084_v3  ;;  %v8940_v51 = vsel %vm8882_vm14, %v8809_v0, %v20511_v33  ;;  %v20512_v50 = vld [vmem:[#allocation420_spill] sm:$0xff]  ;;  %v20514_v3 = vld [vmem:[#allocation19_spill] sm:$0xff] }
 0x742   : > { %v9825_v52 = vor.u32 %v9823_v43, %v9822_v1  ;;  %v9594_v46 = vor.u32 %v9592_v39, %v18104_v55  ;;  %v9827_v29 = vshrl.u32 %v9397_v24, 16  ;;  %v9830_v37 = vshll.u32 %v9397_v24, 16  ;;  %v20513_v39 = vld [vmem:[#allocation128_spill] sm:$0xff]  ;;  %v20517_v24 = vld [vmem:[#allocation470_spill] sm:$0xff] }
 0x743   : > { %v9006_v43 = vsel %vm8882_vm14, %v8875_v18, %v20512_v50  ;;  %v8384_v10 = vsel %vm308_vm1, %v20514_v3, %v20513_v39  ;;  %v20515_v61 = vld [vmem:[#allocation232_spill] sm:$0xff]  ;;  %v9071_v11 = vsel %vm9013_vm15, %v8940_v51, %v20516_v53  ;;  %v20527_v18 = vld [vmem:[#allocation229_spill] sm:$0xff]  ;;  %v20529_v51 = vld [vmem:[#allocation290_spill] sm:$0xff] }
 0x744   : > { %v18118_v54 = vrot.slane %v9827_v29, 7  ;;  %v8152_v31 = vpop.permute.xlu0 %8151  ;;  %v8086_v27 = vpop.permute.xlu1 %8085  ;;  %v9595_v17 = vsel %vm5756_vm9, %v9584_v42, %v9594_v46  ;;  %v9826_v34 = vsel %vm5756_vm9, %v18042_v30, %v9825_v52  ;;  %v8747_v62 = vsel %vm8621_vm12, %v8616_v58, %v20515_v61 }
 0x745   : > { %11735 = vmatmul.mubr.msk.bf16.gmra.mrb[52].mxu0 %vm9877_vm5, %v9595_v17  ;;  %11802 = vmatprep.mubr.msk.bf16.mxu1 %vm9877_vm5, %v9826_v34  ;;  %v9137_v19 = vsel %vm9013_vm15, %v9006_v43, %v20517_v24  ;;  %v9202_v52 = vsel %vm9144_vm4, %v9071_v11, %v8086_v27  ;;  %v20519_v34 = vld [vmem:[#allocation348_spill] sm:$0xff] }
 0x746   : > { %v9832_v30 = vor.u32 %v9830_v37, %v18118_v54  ;;  %v9268_v35 = vsel %vm9144_vm4, %v9137_v19, %v8152_v31  ;;  %v20518_v37 = vld [vmem:[#allocation183_spill] sm:$0xff]  ;;  %v8877_v36 = vsel %vm252_vm0, %v8747_v62, %v20519_v34  ;;  %v20531_v19 = vld [vmem:[#allocation421_spill] sm:$0xff] }
 0x747   : > { %v8550_v17 = vsel %vm8490_vm2, %v8384_v10, %v20518_v37  ;;  %v9008_v14 = vsel %vm8882_vm14, %v8877_v36, %v20520_v40  ;;  %v20530_v10 = vld [vmem:[#allocation89_spill] sm:$0xff] }
 0x748   : > { %v8154_v7 = vpop.permute.xlu0 %8153  ;;  %v8220_v57 = vpop.permute.xlu1 %8219  ;;  %v9833_v42 = vsel %vm5756_vm9, %v9822_v1, %v9832_v30  ;;  %v8681_v25 = vsel %vm8621_vm12, %v8550_v17, %v20521_v21  ;;  %v9139_v2 = vsel %vm9013_vm15, %v9008_v14, %v20522_v59  ;;  %v20535_v17 = vld [vmem:[#allocation234_spill] sm:$0xff]  ;;  %v20536_v14 = vld [vmem:[#allocation231_spill] sm:$0xff] }
 0x749   : > { %v9331_v56 = vsel %vm9275_vm3, %v9200_v6, %v8220_v57  ;;  %11803 = vmatmul.mubr.msk.bf16.gmra.mrb[56].mxu1 %vm9877_vm5, %v9833_v42  ;;  %v8811_v6 = vsel %vm252_vm0, %v8681_v25, %v20525_v13  ;;  %v9270_v57 = vsel %vm9144_vm4, %v9139_v2, %v8154_v7  ;;  %v20528_v7 = vld [vmem:[#allocation448_spill] sm:$0xff]  ;;  %v20537_v25 = vld [vmem:[#allocation238_spill] sm:$0xff] }
 0x74a   : > { %v9596_v1 = vshrl.u32 %v9331_v56, 16  ;;  %v9599_v29 = vshll.u32 %v9331_v56, 16  ;;  %v8942_v5 = vsel %vm8882_vm14, %v8811_v6, %v20526_v60  ;;  %v8618_v56 = vsel %vm8490_vm2, %v8486_v48, %v20527_v18 }
 0x74b   : > { %v9073_v9 = vsel %vm9013_vm15, %v8942_v5, %v20528_v7  ;;  %v8749_v50 = vsel %vm8621_vm12, %v8618_v56, %v20529_v51 }
 0x74c   : > { %v9598_v46 = vrot.slane %v9596_v1, 7  ;;  %v8288_v20 = vpop.permute.xlu0 %8287  ;;  %v8222_v4 = vpop.permute.xlu1 %8221  ;;  %v8879_v61 = vsel %vm252_vm0, %v8749_v50, %v20530_v10 }
 0x74d   : > { %v9399_v44 = vsel %vm9275_vm3, %v9268_v35, %v8288_v20  ;;  %v9333_v47 = vsel %vm9275_vm3, %v9202_v52, %v8222_v4  ;;  %v9010_v35 = vsel %vm8882_vm14, %v8879_v61, %v20531_v19  ;;  %v20534_v20 = vld [vmem:[#allocation472_spill] sm:$0xff] }
 0x74e   : > { %v9601_v31 = vor.u32 %v9599_v29, %v9598_v46  ;;  %v9834_v12 = vshrl.u32 %v9399_v44, 16  ;;  %v9603_v27 = vshrl.u32 %v9333_v47, 16  ;;  %v9837_v30 = vshll.u32 %v9399_v44, 16 }
 0x74f   : > { %v9606_v63 = vshll.u32 %v9333_v47, 16  ;;  %v9141_v4 = vsel %vm9013_vm15, %v9010_v35, %v20534_v20 }
 0x750   : > { %v9836_v22 = vrot.slane %v9834_v12, 7  ;;  %v18186_v26 = vrot.slane %v9603_v27, 7  ;;  %v8088_v23 = vpop.permute.xlu0 %8087  ;;  %v18188_v41 = vpop.f32.mrb[0].mxu1  ;;  %v9602_v32 = vsel %vm5756_vm9, %v18104_v55, %v9601_v31 }
 0x751   : > { %v8290_v42 = vpop.permute.xlu1 %8289  ;;  %11738 = vmatprep.mubr.msk.bf16.mxu0 %vm9877_vm5, %v9602_v32  ;;  %v18199_v38 = vpop.f32.mrb[1].mxu1  ;;  %v9204_v43 = vsel %vm9144_vm4, %v9073_v9, %v8088_v23  ;;  %v20538_v23 = vld [vmem:[#allocation110_spill] sm:$0xff] }
 0x752   : > { %v9839_v49 = vor.u32 %v9837_v30, %v9836_v22  ;;  %v9608_v55 = vor.u32 %v9606_v63, %v18186_v26  ;;  %v9401_v0 = vsel %vm9275_vm3, %v9270_v57, %v8290_v42  ;;  %v18205_v28 = vpop.f32.mrb[2].mxu1 }
 0x753   : > { %v9841_v58 = vshrl.u32 %v9401_v0, 16  ;;  %v18212_v33 = vpop.f32.mrb[3].mxu1  ;;  %v9844_v53 = vshll.u32 %v9401_v0, 16 }
 0x754   : > { %v8224_v1 = vpop.permute.xlu0 %8223  ;;  %v9609_v39 = vsel %vm5756_vm9, %v9598_v46, %v9608_v55  ;;  %v9840_v3 = vsel %vm5756_vm9, %v18118_v54, %v9839_v49  ;;  %v20532_v46 = vld [vmem:[#allocation161_spill] sm:$0xff]  ;;  %v20533_v54 = vld [vmem:[#allocation34_spill] sm:$0xff] }
 0x755   : > { %v9843_v62 = vrot.slane %v9841_v58, 7  ;;  %v9335_v11 = vsel %vm9275_vm3, %v9204_v43, %v8224_v1  ;;  %v8156_v24 = vpop.permute.xlu1 %8155  ;;  %11739 = vmatmul.mubr.msk.bf16.gmra.mrb[56].mxu0 %vm9877_vm5, %v9609_v39  ;;  %11806 = vmatprep.mubr.msk.bf16.mxu1 %vm9877_vm5, %v9840_v3  ;;  %v8489_v29 = vsel %vm308_vm1, %v20533_v54, %v20532_v46  ;;  %vm10660_vm1 = vcmask 195712  }
 0x756   : > { %v9610_v52 = vshrl.u32 %v9335_v11, 16  ;;  %v8620_v34 = vsel %vm8490_vm2, %v8489_v29, %v20535_v17  ;;  %v9613_v44 = vshll.u32 %v9335_v11, 16  ;;  %v9272_v47 = vsel %vm9144_vm4, %v9141_v4, %v8156_v24 }
 0x757   : > { %v9846_v37 = vor.u32 %v9844_v53, %v9843_v62  ;;  %v8751_v31 = vsel %vm8621_vm12, %v8620_v34, %v20536_v14  ;;  %vm10744_vm12 = vcmask 458112  }
 0x758   : > { %v9612_v36 = vrot.slane %v9610_v52, 7  ;;  %v8292_v40 = vpop.permute.xlu0 %8291  ;;  %v8881_v59 = vsel %vm252_vm0, %v8751_v31, %v20537_v25  ;;  %vm10639_vm0 = vcmask 130112  }
 0x759   : > { %v9403_v12 = vsel %vm9275_vm3, %v9272_v47, %v8292_v40  ;;  %v8158_v27 = vpop.permute.xlu1 %8157  ;;  %v9847_v21 = vsel %vm5756_vm9, %v9836_v22, %v9846_v37  ;;  %v9012_v32 = vsel %vm8882_vm14, %v8881_v59, %v20538_v23  ;;  %vm10765_vm14 = vcmask 523712  }
 0x75a   : > { %v9615_v2 = vor.u32 %v9613_v44, %v9612_v36  ;;  %v9848_v30 = vshrl.u32 %v9403_v12, 16  ;;  %v11752_v63 = vpop.f32.mrb[4].mxu1  ;;  %11807 = vmatmul.mubr.msk.bf16.gmra.mrb[60].mxu1 %vm9877_vm5, %v9847_v21  ;;  %v9143_v15 = vsel %vm9013_vm15, %v9012_v32, %v20539_v45  ;;  %v9851_v13 = vshll.u32 %v9403_v12, 16 }
 0x75b   : > { %10940 = vst.msk [vmem:[%s18246_s10 + $0x28] sm:$0xff] %vm8490_vm2, %v11752_v63  ;;  %v10364_v22 = vpop.f32.mrb[5].mxu1  ;;  %v9274_v42 = vsel %vm9144_vm4, %v9143_v15, %v8158_v27  ;;  %v9623_v49 = vsel %vm5756_vm9, %v9612_v36, %v16968_v8  ;;  %vm10786_vm15 = vcmask 589312   ;;  %vm10828_vm4 = vcmask 720512  }
 0x75c   : > { %v9850_v48 = vrot.slane %v9848_v30, 7  ;;  %10938 = vst.msk [vmem:[%s18246_s10 + $0x8] sm:$0xff] %vm8490_vm2, %v10364_v22  ;;  %v11753_v6 = vpop.f32.mrb[6].mxu1  ;;  %v9616_v57 = vsel %vm5756_vm9, %v18186_v26, %v9615_v2 }
 0x75d   : > { %10941 = vst.msk [vmem:[%s18246_s10 + $0x38] sm:$0xff] %vm8490_vm2, %v11753_v6  ;;  %v10367_v60 = vpop.f32.mrb[7].mxu1  ;;  %v8294_v5 = vpop.permute.xlu1 %8293  ;;  %11742 = vmatprep.mubr.msk.bf16.mxu0 %vm9877_vm5, %v9616_v57 }
 0x75e   : > { %v9853_v55 = vor.u32 %v9851_v13, %v9850_v48  ;;  %10939 = vst.msk [vmem:[%s18246_s10 + $0x18] sm:$0xff] %vm8490_vm2, %v10367_v60  ;;  %v9405_v0 = vsel %vm9275_vm3, %v9274_v42, %v8294_v5  ;;  %11743 = vmatmul.mubr.msk.bf16.gmra.mrb[60].mxu0 %vm9877_vm5, %v9623_v49  ;;  %vm10807_vm3 = vcmask 654912  }
 0x75f   : > { %v9855_v26 = vshrl.u32 %v9405_v0, 16  ;;  %v9858_v7 = vshll.u32 %v9405_v0, 16 }
 0x760   : > { %v9854_v18 = vsel %vm5756_vm9, %v9843_v62, %v9853_v55 }
 0x761   : > { %v9857_v56 = vrot.slane %v9855_v26, 7  ;;  %11810 = vmatprep.mubr.msk.bf16.mxu1 %vm9877_vm5, %v9854_v18 }
 0x763   : > { %v9860_v9 = vor.u32 %v9858_v7, %v9857_v56  ;;  %v11688_v58 = vpop.f32.mrb[4].mxu0 }
 0x764   : > { %10621 = vst.msk [vmem:[%s18246_s10 + $0x20] sm:$0xff] %vm8490_vm2, %v11688_v58  ;;  %v10108_v8 = vpop.f32.mrb[5].mxu0 }
 0x765   : > { %10619 = vst.msk [vmem:[%s18246_s10] sm:$0xff] %vm8490_vm2, %v10108_v8  ;;  %v11689_v51 = vpop.f32.mrb[6].mxu0  ;;  %v9861_v50 = vsel %vm5756_vm9, %v9850_v48, %v9860_v9  ;;  %vm10681_vm9 = vcmask 261312  }
 0x766   : > { %10622 = vst.msk [vmem:[%s18246_s10 + $0x30] sm:$0xff] %vm8490_vm2, %v11689_v51  ;;  %11811 = vmatmul.mubr.msk.bf16.gmra.mrb[64].mxu1 %vm9877_vm5, %v9861_v50  ;;  %v10111_v43 = vpop.f32.mrb[7].mxu0  ;;  %vm10849_vm5 = vcmask 786112  }
 0x767   : > { %10620 = vst.msk [vmem:[%s18246_s10 + $0x10] sm:$0xff] %vm8490_vm2, %v10111_v43  ;;  %vm10723_vm2 = vcmask 392512  }
 0x768   : > { %v18278_v1 = vpop.f32.mrb[8].mxu1 }
 0x769   : > { %v18280_v39 = vpop.f32.mrb[9].mxu1 }
 0x76a   : > { %v18282_v3 = vpop.f32.mrb[10].mxu1 }
 0x76b   : > { %v18284_v10 = vpop.f32.mrb[11].mxu1 }
 0x770   : > { %v11692_v61 = vpop.f32.mrb[8].mxu0 }
 0x771   : > { %v10124_v62 = vpop.f32.mrb[9].mxu0 }
 0x772   : > { %10627 = vrot.lane.b32.xlu0 %v10124_v62, %s12108_s13  ;;  %v11693_v53 = vpop.f32.mrb[10].mxu0 }
 0x773   : > { %v10127_v11 = vpop.f32.mrb[11].mxu0 }
 0x774   : > { %v18287_v24 = vpop.f32.mrb[12].mxu1  ;;  %10629 = vrot.lane.b32.xlu1 %v10127_v11, %s12108_s13 }
 0x775   : > { %v18290_v19 = vpop.f32.mrb[13].mxu1 }
 0x776   : > { %10631 = vrot.lane.b32.xlu0 %v11692_v61, %s12108_s13  ;;  %v18293_v35 = vpop.f32.mrb[14].mxu1 }
 0x777   : > { %v18295_v52 = vpop.f32.mrb[15].mxu1 }
 0x778   : > { %10633 = vrot.lane.b32.xlu1 %v11693_v53, %s12108_s13 }
 0x77c   : > { %v11696_v46 = vpop.f32.mrb[12].mxu0 }
 0x77d   : > { %v10140_v54 = vpop.f32.mrb[13].mxu0 }
 0x77e   : > { %10648 = vrot.lane.b32.xlu0 %v10140_v54, %s12110_s15  ;;  %v11697_v29 = vpop.f32.mrb[14].mxu0 }
 0x77f   : > { %v10143_v20 = vpop.f32.mrb[15].mxu0 }
 0x780   : > { %v18299_v4 = vpop.f32.mrb[16].mxu1  ;;  %10650 = vrot.lane.b32.xlu1 %v10143_v20, %s12110_s15 }
 0x781   : > { %v18302_v37 = vpop.f32.mrb[17].mxu1 }
 0x782   : > { %10652 = vrot.lane.b32.xlu0 %v11696_v46, %s12110_s15  ;;  %v18305_v17 = vpop.f32.mrb[18].mxu1 }
 0x783   : > { %v18307_v34 = vpop.f32.mrb[19].mxu1 }
 0x784   : > { %10654 = vrot.lane.b32.xlu1 %v11697_v29, %s12110_s15 }
 0x788   : > { %v11700_v36 = vpop.f32.mrb[16].mxu0 }
 0x789   : > { %v10156_v44 = vpop.f32.mrb[17].mxu0 }
 0x78a   : > { %10669 = vrot.lane.b32.xlu0 %v10156_v44, %s12112_s19  ;;  %v11701_v47 = vpop.f32.mrb[18].mxu0 }
 0x78b   : > { %v10159_v40 = vpop.f32.mrb[19].mxu0 }
 0x78c   : > { %10671 = vrot.lane.b32.xlu1 %v10159_v40, %s12112_s19  ;;  %v18312_v14 = vpop.f32.mrb[20].mxu1 }
 0x78d   : > { %v18314_v31 = vpop.f32.mrb[21].mxu1 }
 0x78e   : > { %10673 = vrot.lane.b32.xlu0 %v11700_v36, %s12112_s19  ;;  %v18317_v12 = vpop.f32.mrb[22].mxu1 }
 0x78f   : > { %v18319_v27 = vpop.f32.mrb[23].mxu1 }
 0x790   : > { %10675 = vrot.lane.b32.xlu1 %v11701_v47, %s12112_s19 }
 0x798   : > { %v11704_v21 = vpop.f32.mrb[20].mxu0 }
 0x799   : > { %v10172_v25 = vpop.f32.mrb[21].mxu0 }
 0x79a   : > { %10690 = vrot.lane.b32.xlu0 %v10172_v25, %s12114_s6  ;;  %v11705_v59 = vpop.f32.mrb[22].mxu0 }
 0x79b   : > { %v10175_v2 = vpop.f32.mrb[23].mxu0 }
 0x79c   : > { %10692 = vrot.lane.b32.xlu1 %v10175_v2, %s12114_s6  ;;  %v18324_v30 = vpop.f32.mrb[24].mxu1 }
 0x79d   : > { %v18326_v63 = vpop.f32.mrb[25].mxu1 }
 0x79e   : > { %10694 = vrot.lane.b32.xlu0 %v11704_v21, %s12114_s6  ;;  %v18329_v23 = vpop.f32.mrb[26].mxu1 }
 0x79f   : > { %v18331_v32 = vpop.f32.mrb[27].mxu1 }
 0x7a0   : > { %10696 = vrot.lane.b32.xlu1 %v11705_v59, %s12114_s6 }
 0x7a8   : > { %v11708_v22 = vpop.f32.mrb[24].mxu0 }
 0x7a9   : > { %v10188_v45 = vpop.f32.mrb[25].mxu0 }
 0x7aa   : > { %10711 = vrot.lane.b32.xlu0 %v10188_v45, %s12115_s12  ;;  %v11709_v15 = vpop.f32.mrb[26].mxu0 }
 0x7ab   : > { %v10191_v48 = vpop.f32.mrb[27].mxu0 }
 0x7ac   : > { %10713 = vrot.lane.b32.xlu1 %v10191_v48, %s12115_s12  ;;  %v18336_v13 = vpop.f32.mrb[28].mxu1 }
 0x7ad   : > { %v18338_v6 = vpop.f32.mrb[29].mxu1 }
 0x7ae   : > { %10715 = vrot.lane.b32.xlu0 %v11708_v22, %s12115_s12  ;;  %v18341_v57 = vpop.f32.mrb[30].mxu1 }
 0x7af   : > { %v18343_v42 = vpop.f32.mrb[31].mxu1 }
 0x7b0   : > { %10717 = vrot.lane.b32.xlu1 %v11709_v15, %s12115_s12 }
 0x7b8   : > { %v11712_v60 = vpop.f32.mrb[28].mxu0 }
 0x7b9   : > { %v10204_v5 = vpop.f32.mrb[29].mxu0 }
 0x7ba   : > { %10732 = vrot.lane.b32.xlu0 %v10204_v5, %s12116_s14  ;;  %v11713_v49 = vpop.f32.mrb[30].mxu0 }
 0x7bb   : > { %v10207_v55 = vpop.f32.mrb[31].mxu0 }
 0x7bc   : > { %10734 = vrot.lane.b32.xlu1 %v10207_v55, %s12116_s14  ;;  %v18348_v0 = vpop.f32.mrb[32].mxu1 }
 0x7bd   : > { %v18350_v26 = vpop.f32.mrb[33].mxu1 }
 0x7be   : > { %10736 = vrot.lane.b32.xlu0 %v11712_v60, %s12116_s14  ;;  %v18353_v18 = vpop.f32.mrb[34].mxu1 }
 0x7bf   : > { %v18355_v56 = vpop.f32.mrb[35].mxu1 }
 0x7c0   : > { %10738 = vrot.lane.b32.xlu1 %v11713_v49, %s12116_s14 }
 0x7c8   : > { %v11716_v7 = vpop.f32.mrb[32].mxu0 }
 0x7c9   : > { %v10220_v9 = vpop.f32.mrb[33].mxu0 }
 0x7ca   : > { %10753 = vrot.lane.b32.xlu0 %v10220_v9, %s12117_s17  ;;  %v11717_v58 = vpop.f32.mrb[34].mxu0 }
 0x7cb   : > { %v10223_v8 = vpop.f32.mrb[35].mxu0 }
 0x7cc   : > { %10755 = vrot.lane.b32.xlu1 %v10223_v8, %s12117_s17  ;;  %v18360_v51 = vpop.f32.mrb[36].mxu1 }
 0x7cd   : > { %v18362_v50 = vpop.f32.mrb[37].mxu1 }
 0x7ce   : > { %10757 = vrot.lane.b32.xlu0 %v11716_v7, %s12117_s17  ;;  %v18365_v43 = vpop.f32.mrb[38].mxu1 }
 0x7cf   : > { %v18367_v61 = vpop.f32.mrb[39].mxu1 }
 0x7d0   : > { %10759 = vrot.lane.b32.xlu1 %v11717_v58, %s12117_s17 }
 0x7d8   : > { %v11720_v62 = vpop.f32.mrb[36].mxu0 }
 0x7d9   : > { %v10236_v53 = vpop.f32.mrb[37].mxu0 }
 0x7da   : > { %10774 = vrot.lane.b32.xlu0 %v10236_v53, %s12118_s8  ;;  %v11721_v11 = vpop.f32.mrb[38].mxu0 }
 0x7db   : > { %v10239_v46 = vpop.f32.mrb[39].mxu0 }
 0x7dc   : > { %10776 = vrot.lane.b32.xlu1 %v10239_v46, %s12118_s8  ;;  %v18372_v54 = vpop.f32.mrb[40].mxu1 }
 0x7dd   : > { %v18374_v29 = vpop.f32.mrb[41].mxu1 }
 0x7de   : > { %10778 = vrot.lane.b32.xlu0 %v11720_v62, %s12118_s8  ;;  %v18377_v20 = vpop.f32.mrb[42].mxu1 }
 0x7df   : > { %v18379_v36 = vpop.f32.mrb[43].mxu1 }
 0x7e0   : > { %10780 = vrot.lane.b32.xlu1 %v11721_v11, %s12118_s8 }
 0x7e4   : > { %v10628_v44 = vpop.permute.xlu0 %10627 }
 0x7e5   : > { %10640 = vst.msk [vmem:[%s18246_s10] sm:$0xff] %vm10639_vm0, %v10628_v44 }
 0x7e6   : > { %v10630_v47 = vpop.permute.xlu1 %10629 }
 0x7e7   : > { %10641 = vst.msk [vmem:[%s18246_s10 + $0x10] sm:$0xff] %vm10639_vm0, %v10630_v47 }
 0x7e8   : > { %v10632_v40 = vpop.permute.xlu0 %10631  ;;  %v11724_v21 = vpop.f32.mrb[40].mxu0 }
 0x7e9   : > { %10642 = vst.msk [vmem:[%s18246_s10 + $0x20] sm:$0xff] %vm10639_vm0, %v10632_v40  ;;  %v10252_v25 = vpop.f32.mrb[41].mxu0 }
 0x7ea   : > { %10795 = vrot.lane.b32.xlu0 %v10252_v25, %s12106_s11  ;;  %v11725_v59 = vpop.f32.mrb[42].mxu0  ;;  %v10634_v2 = vpop.permute.xlu1 %10633 }
 0x7eb   : > { %10643 = vst.msk [vmem:[%s18246_s10 + $0x30] sm:$0xff] %vm10639_vm0, %v10634_v2  ;;  %v10255_v22 = vpop.f32.mrb[43].mxu0 }
 0x7ec   : > { %10797 = vrot.lane.b32.xlu1 %v10255_v22, %s12106_s11  ;;  %v18392_v45 = vpop.f32.mrb[44].mxu1 }
 0x7ed   : > { %v18394_v15 = vpop.f32.mrb[45].mxu1 }
 0x7ee   : > { %10799 = vrot.lane.b32.xlu0 %v11724_v21, %s12106_s11  ;;  %v18397_v48 = vpop.f32.mrb[46].mxu1 }
 0x7ef   : > { %v18399_v60 = vpop.f32.mrb[47].mxu1 }
 0x7f0   : > { %v10649_v5 = vpop.permute.xlu0 %10648  ;;  %10801 = vrot.lane.b32.xlu1 %v11725_v59, %s12106_s11 }
 0x7f1   : > { %10661 = vst.msk [vmem:[%s18246_s10] sm:$0xff] %vm10660_vm1, %v10649_v5 }
 0x7f2   : > { %v10651_v49 = vpop.permute.xlu1 %10650 }
 0x7f3   : > { %10662 = vst.msk [vmem:[%s18246_s10 + $0x10] sm:$0xff] %vm10660_vm1, %v10651_v49 }
 0x7f4   : > { %v10653_v55 = vpop.permute.xlu0 %10652 }
 0x7f5   : > { %10663 = vst.msk [vmem:[%s18246_s10 + $0x20] sm:$0xff] %vm10660_vm1, %v10653_v55 }
 0x7f6   : > { %v10655_v7 = vpop.permute.xlu1 %10654 }
 0x7f7   : > { %10664 = vst.msk [vmem:[%s18246_s10 + $0x30] sm:$0xff] %vm10660_vm1, %v10655_v7 }
 0x7f8   : > { %v11728_v9 = vpop.f32.mrb[44].mxu0 }
 0x7f9   : > { %v10268_v58 = vpop.f32.mrb[45].mxu0 }
 0x7fa   : > { %10816 = vrot.lane.b32.xlu0 %v10268_v58, %s12104_s9  ;;  %v11729_v8 = vpop.f32.mrb[46].mxu0 }
 0x7fb   : > { %v10271_v62 = vpop.f32.mrb[47].mxu0 }
 0x7fc   : > { %v10670_v53 = vpop.permute.xlu0 %10669  ;;  %10818 = vrot.lane.b32.xlu1 %v10271_v62, %s12104_s9  ;;  %v18412_v11 = vpop.f32.mrb[48].mxu1 }
 0x7fd   : > { %10682 = vst.msk [vmem:[%s18246_s10] sm:$0xff] %vm10681_vm9, %v10670_v53  ;;  %v18416_v46 = vpop.f32.mrb[49].mxu1 }
 0x7fe   : > { %10820 = vrot.lane.b32.xlu0 %v11728_v9, %s12104_s9  ;;  %v18419_v44 = vpop.f32.mrb[50].mxu1  ;;  %v10672_v47 = vpop.permute.xlu1 %10671 }
 0x7ff   : > { %10683 = vst.msk [vmem:[%s18246_s10 + $0x10] sm:$0xff] %vm10681_vm9, %v10672_v47  ;;  %v18423_v40 = vpop.f32.mrb[51].mxu1 }
 0x800   : > { %v10674_v21 = vpop.permute.xlu0 %10673  ;;  %10822 = vrot.lane.b32.xlu1 %v11729_v8, %s12104_s9 }
 0x801   : > { %10684 = vst.msk [vmem:[%s18246_s10 + $0x20] sm:$0xff] %vm10681_vm9, %v10674_v21 }
 0x802   : > { %v10676_v25 = vpop.permute.xlu1 %10675 }
 0x803   : > { %10685 = vst.msk [vmem:[%s18246_s10 + $0x30] sm:$0xff] %vm10681_vm9, %v10676_v25 }
 0x808   : > { %v11732_v59 = vpop.f32.mrb[48].mxu0 }
 0x809   : > { %v10284_v2 = vpop.f32.mrb[49].mxu0 }
 0x80a   : > { %10837 = vrot.lane.b32.xlu0 %v10284_v2, %s12102_s7  ;;  %v11733_v22 = vpop.f32.mrb[50].mxu0 }
 0x80b   : > { %v10287_v5 = vpop.f32.mrb[51].mxu0 }
 0x80c   : > { %v10691_v49 = vpop.permute.xlu0 %10690  ;;  %10839 = vrot.lane.b32.xlu1 %v10287_v5, %s12102_s7  ;;  %v18432_v55 = vpop.f32.mrb[52].mxu1 }
 0x80d   : > { %10703 = vst.msk [vmem:[%s18246_s10] sm:$0xff] %vm10702_vm13, %v10691_v49  ;;  %v18436_v7 = vpop.f32.mrb[53].mxu1 }
 0x80e   : > { %10841 = vrot.lane.b32.xlu0 %v11732_v59, %s12102_s7  ;;  %v18439_v9 = vpop.f32.mrb[54].mxu1  ;;  %v10693_v58 = vpop.permute.xlu1 %10692 }
 0x80f   : > { %10704 = vst.msk [vmem:[%s18246_s10 + $0x10] sm:$0xff] %vm10702_vm13, %v10693_v58  ;;  %v18443_v8 = vpop.f32.mrb[55].mxu1 }
 0x810   : > { %v10695_v62 = vpop.permute.xlu0 %10694  ;;  %10843 = vrot.lane.b32.xlu1 %v11733_v22, %s12102_s7 }
 0x811   : > { %10705 = vst.msk [vmem:[%s18246_s10 + $0x20] sm:$0xff] %vm10702_vm13, %v10695_v62 }
 0x812   : > { %v10697_v53 = vpop.permute.xlu1 %10696 }
 0x813   : > { %10706 = vst.msk [vmem:[%s18246_s10 + $0x30] sm:$0xff] %vm10702_vm13, %v10697_v53 }
 0x818   : > { %v11736_v47 = vpop.f32.mrb[52].mxu0 }
 0x819   : > { %v10300_v21 = vpop.f32.mrb[53].mxu0 }
 0x81a   : > { %10858 = vrot.lane.b32.xlu0 %v10300_v21, %s12100_s27  ;;  %v11737_v25 = vpop.f32.mrb[54].mxu0 }
 0x81b   : > { %v10303_v59 = vpop.f32.mrb[55].mxu0 }
 0x81c   : > { %v10712_v2 = vpop.permute.xlu0 %10711  ;;  %10860 = vrot.lane.b32.xlu1 %v10303_v59, %s12100_s27  ;;  %v18452_v5 = vpop.f32.mrb[56].mxu1 }
 0x81d   : > { %20540 = vst [vmem:[#allocation78_spill] sm:$0xff] %v18452_v5  ;;  %10724 = vst.msk [vmem:[%s18246_s10] sm:$0xff] %vm10723_vm2, %v10712_v2  ;;  %v18456_v22 = vpop.f32.mrb[57].mxu1 }
 0x81e   : > { %10862 = vrot.lane.b32.xlu0 %v11736_v47, %s12100_s27  ;;  %v18459_v49 = vpop.f32.mrb[58].mxu1  ;;  %v10714_v58 = vpop.permute.xlu1 %10713 }
 0x81f   : > { %20541 = vst [vmem:[#allocation11_spill] sm:$0xff] %v18459_v49  ;;  %10725 = vst.msk [vmem:[%s18246_s10 + $0x10] sm:$0xff] %vm10723_vm2, %v10714_v58  ;;  %v18463_v62 = vpop.f32.mrb[59].mxu1 }
 0x820   : > { %v10716_v53 = vpop.permute.xlu0 %10715  ;;  %10864 = vrot.lane.b32.xlu1 %v11737_v25, %s12100_s27 }
 0x821   : > { %10726 = vst.msk [vmem:[%s18246_s10 + $0x20] sm:$0xff] %vm10723_vm2, %v10716_v53 }
 0x822   : > { %v10718_v21 = vpop.permute.xlu1 %10717 }
 0x823   : > { %10727 = vst.msk [vmem:[%s18246_s10 + $0x30] sm:$0xff] %vm10723_vm2, %v10718_v21 }
 0x828   : > { %v11740_v59 = vpop.f32.mrb[56].mxu0 }
 0x829   : > { %v10316_v2 = vpop.f32.mrb[57].mxu0 }
 0x82a   : > { %10879 = vrot.lane.b32.xlu0 %v10316_v2, %s12098_s24  ;;  %v11741_v47 = vpop.f32.mrb[58].mxu0 }
 0x82b   : > { %v10319_v16 = vpop.f32.mrb[59].mxu0 }
 0x82c   : > { %v10733_v58 = vpop.permute.xlu0 %10732  ;;  %10881 = vrot.lane.b32.xlu1 %v10319_v16, %s12098_s24 }
 0x82d   : > { %10745 = vst.msk [vmem:[%s18246_s10] sm:$0xff] %vm10744_vm12, %v10733_v58  ;;  %v18474_v25 = vpop.f32.mrb[60].mxu1 }
 0x82e   : > { %20542 = vst [vmem:[#allocation25_spill] sm:$0xff] %v18474_v25  ;;  %v18476_v53 = vpop.f32.mrb[61].mxu1  ;;  %10883 = vrot.lane.b32.xlu0 %v11740_v59, %s12098_s24  ;;  %v10735_v21 = vpop.permute.xlu1 %10734 }
 0x82f   : > { %v18479_v49 = vpop.f32.mrb[62].mxu1  ;;  %10746 = vst.msk [vmem:[%s18246_s10 + $0x10] sm:$0xff] %vm10744_vm12, %v10735_v21 }
 0x830   : > { %20543 = vst [vmem:[#allocation86_spill] sm:$0xff] %v18479_v49  ;;  %v18483_v2 = vpop.f32.mrb[63].mxu1  ;;  %v10737_v5 = vpop.permute.xlu0 %10736  ;;  %10885 = vrot.lane.b32.xlu1 %v11741_v47, %s12098_s24 }
 0x831   : > { %10747 = vst.msk [vmem:[%s18246_s10 + $0x20] sm:$0xff] %vm10744_vm12, %v10737_v5  ;;  %v11744_v16 = vpop.f32.mrb[60].mxu0 }
 0x832   : > { %v10332_v58 = vpop.f32.mrb[61].mxu0  ;;  %v10739_v25 = vpop.permute.xlu1 %10738 }
 0x833   : > { %10748 = vst.msk [vmem:[%s18246_s10 + $0x30] sm:$0xff] %vm10744_vm12, %v10739_v25  ;;  %10900 = vrot.lane.b32.xlu0 %v10332_v58, %s12096_s18  ;;  %v11745_v59 = vpop.f32.mrb[62].mxu0 }
 0x834   : > { %v10335_v49 = vpop.f32.mrb[63].mxu0 }
 0x835   : > { %10902 = vrot.lane.b32.xlu1 %v10335_v49, %s12096_s18 }
 0x837   : > { %10904 = vrot.lane.b32.xlu0 %v11744_v16, %s12096_s18 }
 0x839   : > { %v18493_v21 = vpop.f32.mrb[64].mxu1  ;;  %10906 = vrot.lane.b32.xlu1 %v11745_v59, %s12096_s18 }
 0x83a   : > { %v18496_v5 = vpop.f32.mrb[65].mxu1 }
 0x83b   : > { %v18498_v47 = vpop.f32.mrb[66].mxu1  ;;  %10921 = vrot.lane.b32.xlu0 %v18199_v38, %s12094_s16 }
 0x83c   : > { %v18502_v25 = vpop.f32.mrb[67].mxu1  ;;  %v10754_v58 = vpop.permute.xlu0 %10753 }
 0x83d   : > { %10766 = vst.msk [vmem:[%s18246_s10] sm:$0xff] %vm10765_vm14, %v10754_v58  ;;  %10923 = vrot.lane.b32.xlu1 %v18212_v33, %s12094_s16 }
 0x83e   : > { %v10756_v49 = vpop.permute.xlu1 %10755 }
 0x83f   : > { %10767 = vst.msk [vmem:[%s18246_s10 + $0x10] sm:$0xff] %vm10765_vm14, %v10756_v49  ;;  %10925 = vrot.lane.b32.xlu0 %v18188_v41, %s12094_s16 }
 0x840   : > { %v10758_v16 = vpop.permute.xlu0 %10757 }
 0x841   : > { %10768 = vst.msk [vmem:[%s18246_s10 + $0x20] sm:$0xff] %vm10765_vm14, %v10758_v16  ;;  %10927 = vrot.lane.b32.xlu1 %v18205_v28, %s12094_s16 }
 0x842   : > { %v10760_v38 = vpop.permute.xlu1 %10759 }
 0x843   : > { %10769 = vst.msk [vmem:[%s18246_s10 + $0x30] sm:$0xff] %vm10765_vm14, %v10760_v38  ;;  %10946 = vrot.lane.b32.xlu0 %v18280_v39, %s12108_s13 }
 0x845   : > { %10948 = vrot.lane.b32.xlu1 %v18284_v10, %s12108_s13 }
 0x847   : > { %10950 = vrot.lane.b32.xlu0 %v18278_v1, %s12108_s13 }
 0x849   : > { %10952 = vrot.lane.b32.xlu1 %v18282_v3, %s12108_s13 }
 0x84b   : > { %10966 = vrot.lane.b32.xlu0 %v18290_v19, %s12110_s15 }
 0x84c   : > { %v10775_v41 = vpop.permute.xlu0 %10774 }
 0x84d   : > { %10787 = vst.msk [vmem:[%s18246_s10] sm:$0xff] %vm10786_vm15, %v10775_v41  ;;  %10968 = vrot.lane.b32.xlu1 %v18295_v52, %s12110_s15 }
 0x84e   : > { %v10777_v28 = vpop.permute.xlu1 %10776 }
 0x84f   : > { %10788 = vst.msk [vmem:[%s18246_s10 + $0x10] sm:$0xff] %vm10786_vm15, %v10777_v28  ;;  %10970 = vrot.lane.b32.xlu0 %v18287_v24, %s12110_s15 }
 0x850   : > { %v10779_v33 = vpop.permute.xlu0 %10778 }
 0x851   : > { %10789 = vst.msk [vmem:[%s18246_s10 + $0x20] sm:$0xff] %vm10786_vm15, %v10779_v33  ;;  %10972 = vrot.lane.b32.xlu1 %v18293_v35, %s12110_s15 }
 0x852   : > { %v10781_v1 = vpop.permute.xlu1 %10780 }
 0x853   : > { %10790 = vst.msk [vmem:[%s18246_s10 + $0x30] sm:$0xff] %vm10786_vm15, %v10781_v1  ;;  %10986 = vrot.lane.b32.xlu0 %v18302_v37, %s12112_s19 }
 0x855   : > { %10988 = vrot.lane.b32.xlu1 %v18307_v34, %s12112_s19 }
 0x857   : > { %10990 = vrot.lane.b32.xlu0 %v18299_v4, %s12112_s19 }
 0x859   : > { %10992 = vrot.lane.b32.xlu1 %v18305_v17, %s12112_s19 }
 0x85b   : > { %11006 = vrot.lane.b32.xlu0 %v18314_v31, %s12114_s6 }
 0x85c   : > { %v10796_v39 = vpop.permute.xlu0 %10795 }
 0x85d   : > { %10808 = vst.msk [vmem:[%s18246_s10] sm:$0xff] %vm10807_vm3, %v10796_v39  ;;  %11008 = vrot.lane.b32.xlu1 %v18319_v27, %s12114_s6 }
 0x85e   : > { %v10798_v3 = vpop.permute.xlu1 %10797 }
 0x85f   : > { %10809 = vst.msk [vmem:[%s18246_s10 + $0x10] sm:$0xff] %vm10807_vm3, %v10798_v3  ;;  %11010 = vrot.lane.b32.xlu0 %v18312_v14, %s12114_s6 }
 0x860   : > { %v10800_v10 = vpop.permute.xlu0 %10799 }
 0x861   : > { %10810 = vst.msk [vmem:[%s18246_s10 + $0x20] sm:$0xff] %vm10807_vm3, %v10800_v10  ;;  %11012 = vrot.lane.b32.xlu1 %v18317_v12, %s12114_s6  ;;  %s12119_s6 = smov [#allocation4]  }
 0x862   : > { %v10802_v24 = vpop.permute.xlu1 %10801 }
 0x863   : > { %10811 = vst.msk [vmem:[%s18246_s10 + $0x30] sm:$0xff] %vm10807_vm3, %v10802_v24  ;;  %11026 = vrot.lane.b32.xlu0 %v18326_v63, %s12115_s12 }
 0x865   : > { %11028 = vrot.lane.b32.xlu1 %v18331_v32, %s12115_s12 }
 0x867   : > { %11030 = vrot.lane.b32.xlu0 %v18324_v30, %s12115_s12 }
 0x869   : > { %11032 = vrot.lane.b32.xlu1 %v18329_v23, %s12115_s12  ;;  %s12031_s12 = sshll.u32 %s12119_s6, 4  ;;  %s12032_s12 = int_to_ptr.vmem [resolvable:$false] %s12031_s12 }
 0x86b   : > { %11046 = vrot.lane.b32.xlu0 %v18338_v6, %s12116_s14 }
 0x86c   : > { %v10817_v19 = vpop.permute.xlu0 %10816 }
 0x86d   : > { %10829 = vst.msk [vmem:[%s18246_s10] sm:$0xff] %vm10828_vm4, %v10817_v19  ;;  %11048 = vrot.lane.b32.xlu1 %v18343_v42, %s12116_s14 }
 0x86e   : > { %v10819_v35 = vpop.permute.xlu1 %10818 }
 0x86f   : > { %10830 = vst.msk [vmem:[%s18246_s10 + $0x10] sm:$0xff] %vm10828_vm4, %v10819_v35  ;;  %11050 = vrot.lane.b32.xlu0 %v18336_v13, %s12116_s14 }
 0x870   : > { %v10821_v52 = vpop.permute.xlu0 %10820 }
 0x871   : > { %10831 = vst.msk [vmem:[%s18246_s10 + $0x20] sm:$0xff] %vm10828_vm4, %v10821_v52  ;;  %11052 = vrot.lane.b32.xlu1 %v18341_v57, %s12116_s14  ;;  %v20544_v57 = vld [vmem:[#allocation78_spill] sm:$0xff]  ;;  %s12033_s14 = scalar_lea.vmem %s12032_s12, 2048 }
 0x872   : > { %v10823_v4 = vpop.permute.xlu1 %10822 }
 0x873   : > { %10832 = vst.msk [vmem:[%s18246_s10 + $0x30] sm:$0xff] %vm10828_vm4, %v10823_v4  ;;  %11066 = vrot.lane.b32.xlu0 %v18350_v26, %s12117_s17  ;;  %v20545_v26 = vld [vmem:[#allocation11_spill] sm:$0xff] }
 0x875   : > { %11068 = vrot.lane.b32.xlu1 %v18355_v56, %s12117_s17 }
 0x877   : > { %11070 = vrot.lane.b32.xlu0 %v18348_v0, %s12117_s17 }
 0x879   : > { %11072 = vrot.lane.b32.xlu1 %v18353_v18, %s12117_s17 }
 0x87b   : > { %11086 = vrot.lane.b32.xlu0 %v18362_v50, %s12118_s8 }
 0x87c   : > { %v10838_v37 = vpop.permute.xlu0 %10837 }
 0x87d   : > { %10850 = vst.msk [vmem:[%s18246_s10] sm:$0xff] %vm10849_vm5, %v10838_v37  ;;  %11088 = vrot.lane.b32.xlu1 %v18367_v61, %s12118_s8  ;;  %v20547_v61 = vld [vmem:[#allocation25_spill] sm:$0xff] }
 0x87e   : > { %v10840_v17 = vpop.permute.xlu1 %10839 }
 0x87f   : > { %10851 = vst.msk [vmem:[%s18246_s10 + $0x10] sm:$0xff] %vm10849_vm5, %v10840_v17  ;;  %11090 = vrot.lane.b32.xlu0 %v18360_v51, %s12118_s8  ;;  %v20546_v51 = vld [vmem:[#allocation74_spill] sm:$0xff] }
 0x880   : > { %v10842_v34 = vpop.permute.xlu0 %10841  ;;  %v11254_v50 = vsub.s32 0, %v20546_v51 }
 0x881   : > { %10852 = vst.msk [vmem:[%s18246_s10 + $0x20] sm:$0xff] %vm10849_vm5, %v10842_v34  ;;  %11092 = vrot.lane.b32.xlu1 %v18365_v43, %s12118_s8  ;;  %v18688_v43 = vld [vmem:[%s18913_s3] sm:$0x3] }
 0x882   : > { %v10844_v14 = vpop.permute.xlu1 %10843 }
 0x883   : > { %10853 = vst.msk [vmem:[%s18246_s10 + $0x30] sm:$0xff] %vm10849_vm5, %v10844_v14  ;;  %11106 = vrot.lane.b32.xlu0 %v18374_v29, %s12106_s11 }
 0x885   : > { %11108 = vrot.lane.b32.xlu1 %v18379_v36, %s12106_s11  ;;  %v11255_v36 = vrot.slane %v18688_v43, %v11254_v50 }
 0x887   : > { %11110 = vrot.lane.b32.xlu0 %v18372_v54, %s12106_s11 }
 0x889   : > { %11112 = vrot.lane.b32.xlu1 %v18377_v20, %s12106_s11  ;;  %v20548_v20 = vld [vmem:[#allocation86_spill] sm:$0xff] }
 0x88b   : > { %11126 = vrot.lane.b32.xlu0 %v18394_v15, %s12104_s9 }
 0x88c   : > { %v10859_v31 = vpop.permute.xlu0 %10858 }
 0x88d   : > { %10871 = vst.msk [vmem:[%s18246_s10] sm:$0xff] %vm10870_vm7, %v10859_v31  ;;  %11128 = vrot.lane.b32.xlu1 %v18399_v60, %s12104_s9 }
 0x88e   : > { %v10861_v12 = vpop.permute.xlu1 %10860 }
 0x88f   : > { %10872 = vst.msk [vmem:[%s18246_s10 + $0x10] sm:$0xff] %vm10870_vm7, %v10861_v12  ;;  %11130 = vrot.lane.b32.xlu0 %v18392_v45, %s12104_s9 }
 0x890   : > { %v10863_v27 = vpop.permute.xlu0 %10862 }
 0x891   : > { %10873 = vst.msk [vmem:[%s18246_s10 + $0x20] sm:$0xff] %vm10870_vm7, %v10863_v27  ;;  %11132 = vrot.lane.b32.xlu1 %v18397_v48, %s12104_s9 }
 0x892   : > { %v10865_v30 = vpop.permute.xlu1 %10864 }
 0x893   : > { %10874 = vst.msk [vmem:[%s18246_s10 + $0x30] sm:$0xff] %vm10870_vm7, %v10865_v30  ;;  %11146 = vrot.lane.b32.xlu0 %v18416_v46, %s12102_s7 }
 0x895   : > { %11148 = vrot.lane.b32.xlu1 %v18423_v40, %s12102_s7 }
 0x897   : > { %11150 = vrot.lane.b32.xlu0 %v18412_v11, %s12102_s7 }
 0x899   : > { %11152 = vrot.lane.b32.xlu1 %v18419_v44, %s12102_s7 }
 0x89b   : > { %11166 = vrot.lane.b32.xlu0 %v18436_v7, %s12100_s27 }
 0x89c   : > { %v10880_v63 = vpop.permute.xlu0 %10879 }
 0x89d   : > { %10892 = vst.msk [vmem:[%s18246_s10] sm:$0xff] %vm10891_vm6, %v10880_v63  ;;  %11168 = vrot.lane.b32.xlu1 %v18443_v8, %s12100_s27 }
 0x89e   : > { %v10882_v23 = vpop.permute.xlu1 %10881 }
 0x89f   : > { %10893 = vst.msk [vmem:[%s18246_s10 + $0x10] sm:$0xff] %vm10891_vm6, %v10882_v23  ;;  %11170 = vrot.lane.b32.xlu0 %v18432_v55, %s12100_s27 }
 0x8a0   : > { %v10884_v32 = vpop.permute.xlu0 %10883 }
 0x8a1   : > { %10894 = vst.msk [vmem:[%s18246_s10 + $0x20] sm:$0xff] %vm10891_vm6, %v10884_v32  ;;  %11172 = vrot.lane.b32.xlu1 %v18439_v9, %s12100_s27  ;;  %s11270_s27 = sld [smem:[#allocation3]] }
 0x8a2   : > { %v10886_v13 = vpop.permute.xlu1 %10885 }
 0x8a3   : > { %10895 = vst.msk [vmem:[%s18246_s10 + $0x30] sm:$0xff] %vm10891_vm6, %v10886_v13  ;;  %11186 = vrot.lane.b32.xlu0 %v18456_v22, %s12098_s24 }
 0x8a5   : > { %v10901_v6 = vpop.permute.xlu0 %10900  ;;  %11188 = vrot.lane.b32.xlu1 %v18463_v62, %s12098_s24 }
 0x8a6   : > { %10913 = vst.msk [vmem:[%s18246_s10] sm:$0xff] %vm19185_vm8, %v10901_v6 }
 0x8a7   : > { %11190 = vrot.lane.b32.xlu0 %v20544_v57, %s12098_s24  ;;  %v10903_v42 = vpop.permute.xlu1 %10902  ;;  %v18703_v15 = vstv %s11270_s27 }
 0x8a8   : > { %10914 = vst.msk [vmem:[%s18246_s10 + $0x10] sm:$0xff] %vm19185_vm8, %v10903_v42 }
 0x8a9   : > { %v10905_v0 = vpop.permute.xlu0 %10904  ;;  %11192 = vrot.lane.b32.xlu1 %v20545_v26, %s12098_s24 }
 0x8aa   : > { %10915 = vst.msk [vmem:[%s18246_s10 + $0x20] sm:$0xff] %vm19185_vm8, %v10905_v0 }
 0x8ab   : > { %11206 = vrot.lane.b32.xlu0 %v18476_v53, %s12096_s18  ;;  %v10907_v18 = vpop.permute.xlu1 %10906 }
 0x8ac   : > { %10916 = vst.msk [vmem:[%s18246_s10 + $0x30] sm:$0xff] %vm19185_vm8, %v10907_v18 }
 0x8ad   : > { %v10922_v56 = vpop.permute.xlu0 %10921  ;;  %11208 = vrot.lane.b32.xlu1 %v18483_v2, %s12096_s18 }
 0x8ae   : > { %10934 = vst.msk [vmem:[%s18246_s10] sm:$0xff] %vm19184_vm10, %v10922_v56 }
 0x8af   : > { %11210 = vrot.lane.b32.xlu0 %v20547_v61, %s12096_s18  ;;  %v10924_v54 = vpop.permute.xlu1 %10923 }
 0x8b0   : > { %10935 = vst.msk [vmem:[%s18246_s10 + $0x10] sm:$0xff] %vm19184_vm10, %v10924_v54 }
 0x8b1   : > { %v10926_v29 = vpop.permute.xlu0 %10925  ;;  %11212 = vrot.lane.b32.xlu1 %v20548_v20, %s12096_s18  ;;  %s11319_s18 = sshll.u32 %s18246_s10, 4  ;;  %s18863_s18 = int_to_ptr.vmem [resolvable:$true] %s11319_s18 }
 0x8b2   : > { %10936 = vst.msk [vmem:[%s18246_s10 + $0x20] sm:$0xff] %vm19184_vm10, %v10926_v29  ;;  %s12027_s19 = scalar_lea.vmem %s18863_s18, 1024  ;;  %p12034_p0 = scmp.lt.s32.totalorder %s18863_s18, %s12032_s12 }
 0x8b3   : > { %11226 = vrot.lane.b32.xlu0 %v18496_v5, %s12094_s16  ;;  %v10928_v45 = vpop.permute.xlu1 %10927  ;;  %p12028_p11 = scmp.ne.s32.totalorder %s18863_s18, %s12027_s19  ;;  %p12035_p1 = scmp.lt.s32.totalorder %s12033_s14, %s12027_s19 }
 0x8b4   : > { %10937 = vst.msk [vmem:[%s18246_s10 + $0x30] sm:$0xff] %vm19184_vm10, %v10928_v45 }
 0x8b5   : > { %v11242_v48 = vld [vmem:[%s18246_s10] sm:$0xff]  ;;  %v10947_v60 = vpop.permute.xlu0 %10946  ;;  %11228 = vrot.lane.b32.xlu1 %v18502_v25, %s12094_s16  ;;  %p12029_p12 = pnand %p12028_p11, %p12192_p5  ;;  %p12036_p2 = por %p12035_p1, %p12034_p0 }
 0x8b6   : > { %v11262_v11 = vadd.f32 %v11255_v36, %v11242_v48  ;;  %10958 = vst.msk [vmem:[%s18246_s10 + $0x8] sm:$0xff] %vm10639_vm0, %v10947_v60 }
 0x8b7   : > { %v11244_v46 = vld [vmem:[%s18246_s10 + $0x10] sm:$0xff]  ;;  %11230 = vrot.lane.b32.xlu0 %v18493_v21, %s12094_s16  ;;  %v10949_v44 = vpop.permute.xlu1 %10948  ;;  %p12030_p13 = pneg %p12029_p12 }
 0x8b8   : > { %vm11271_vm11 = vcmp.gt.f32.partialorder %v11262_v11, 0.0  ;;  %v11280_v40 = vmul.f32 %v18703_v15, %v11262_v11  ;;  %v11264_v55 = vadd.f32 %v11255_v36, %v11244_v46  ;;  %10959 = vst.msk [vmem:[%s18246_s10 + $0x18] sm:$0xff] %vm10639_vm0, %v10949_v44 }
 0x8b9   : > { %v11246_v7 = vld [vmem:[%s18246_s10 + $0x20] sm:$0xff]  ;;  %v10951_v9 = vpop.permute.xlu0 %10950  ;;  %11232 = vrot.lane.b32.xlu1 %v18498_v47, %s12094_s16  ;;  %s11603_s16 = sshll.u32 %s12175_s4, 10  ;;  %s18868_s4 = scalar_lea.sflag [#allocation5], %s217_s26 }
 0x8ba   : > { %v11288_v8 = vsel %vm11271_vm11, %v11262_v11, %v11280_v40  ;;  %vm11273_vm10 = vcmp.gt.f32.partialorder %v11264_v55, 0.0  ;;  %v11282_v22 = vmul.f32 %v18703_v15, %v11264_v55  ;;  %v11266_v62 = vadd.f32 %v11255_v36, %v11246_v7  ;;  %10960 = vst.msk [vmem:[%s18246_s10 + $0x28] sm:$0xff] %vm10639_vm0, %v10951_v9  ;;  %s18860_s13 = scalar_lea.hbm %s18915_s5, %s11603_s16  ;;  %p12037_p3 = pnand %p12036_p2, %p12030_p13 }
 0x8bb   : > { %11296 = vst [vmem:[%s18246_s10] sm:$0xff] %v11288_v8  ;;  %v11248_v53 = vld [vmem:[%s18246_s10 + $0x30] sm:$0xff]  ;;  %v10953_v2 = vpop.permute.xlu1 %10952 }
 0x8bc   : > { %v11290_v59 = vsel %vm11273_vm10, %v11264_v55, %v11282_v22  ;;  %vm11275_vm8 = vcmp.gt.f32.partialorder %v11266_v62, 0.0  ;;  %v11284_v21 = vmul.f32 %v18703_v15, %v11266_v62  ;;  %v11268_v5 = vadd.f32 %v11255_v36, %v11248_v53  ;;  %10961 = vst.msk [vmem:[%s18246_s10 + $0x38] sm:$0xff] %vm10639_vm0, %v10953_v2 }
 0x8bd   : > { %11298 = vst [vmem:[%s18246_s10 + $0x10] sm:$0xff] %v11290_v59  ;;  %v10967_v47 = vpop.permute.xlu0 %10966  ;;  %vm20549_vm0 = vcmask 982912   ;;  %v11258_v53 = vsub.s32 1, %v20546_v51 }
 0x8be   : > { %v11292_v25 = vsel %vm11275_vm8, %v11266_v62, %v11284_v21  ;;  %vm11277_vm11 = vcmp.gt.f32.partialorder %v11268_v5, 0.0  ;;  %v11286_v58 = vmul.f32 %v18703_v15, %v11268_v5  ;;  %10978 = vst.msk [vmem:[%s18246_s10 + $0x8] sm:$0xff] %vm10660_vm1, %v10967_v47 }
 0x8bf   : > { %11300 = vst [vmem:[%s18246_s10 + $0x20] sm:$0xff] %v11292_v25  ;;  %v10969_v49 = vpop.permute.xlu1 %10968  ;;  %v11259_v21 = vrot.slane %v18688_v43, %v11258_v53 }
 0x8c0   : > { %v11294_v16 = vsel %vm11277_vm11, %v11268_v5, %v11286_v58  ;;  %10979 = vst.msk [vmem:[%s18246_s10 + $0x18] sm:$0xff] %vm10660_vm1, %v10969_v49 }
 0x8c1   : > { %11302 = vst [vmem:[%s18246_s10 + $0x30] sm:$0xff] %v11294_v16  ;;  %v10971_v38 = vpop.permute.xlu0 %10970 }
 0x8c2   : > { %10980 = vst.msk [vmem:[%s18246_s10 + $0x28] sm:$0xff] %vm10660_vm1, %v10971_v38 }
 0x8c3   : > { %v10973_v41 = vpop.permute.xlu1 %10972 }
 0x8c4   : > { %10981 = vst.msk [vmem:[%s18246_s10 + $0x38] sm:$0xff] %vm10660_vm1, %v10973_v41  ;;  %vm20550_vm1 = vmmov %vm20549_vm0 }
 0x8c5   : > { %v10987_v28 = vpop.permute.xlu0 %10986 }
 0x8c6   : > { %10998 = vst.msk [vmem:[%s18246_s10 + $0x8] sm:$0xff] %vm10681_vm9, %v10987_v28 }
 0x8c7   : > { %v10989_v33 = vpop.permute.xlu1 %10988 }
 0x8c8   : > { %10999 = vst.msk [vmem:[%s18246_s10 + $0x18] sm:$0xff] %vm10681_vm9, %v10989_v33 }
 0x8c9   : > { %v10991_v1 = vpop.permute.xlu0 %10990 }
 0x8ca   : > { %11000 = vst.msk [vmem:[%s18246_s10 + $0x28] sm:$0xff] %vm10681_vm9, %v10991_v1 }
 0x8cb   : > { %v10993_v39 = vpop.permute.xlu1 %10992 }
 0x8cc   : > { %11001 = vst.msk [vmem:[%s18246_s10 + $0x38] sm:$0xff] %vm10681_vm9, %v10993_v39  ;;  %vm20551_vm9 = vmmov %vm20549_vm0 }
 0x8cd   : > { %v11007_v3 = vpop.permute.xlu0 %11006 }
 0x8ce   : > { %11018 = vst.msk [vmem:[%s18246_s10 + $0x8] sm:$0xff] %vm10702_vm13, %v11007_v3 }
 0x8cf   : > { %v11009_v10 = vpop.permute.xlu1 %11008 }
 0x8d0   : > { %11019 = vst.msk [vmem:[%s18246_s10 + $0x18] sm:$0xff] %vm10702_vm13, %v11009_v10 }
 0x8d1   : > { %v11011_v24 = vpop.permute.xlu0 %11010 }
 0x8d2   : > { %11020 = vst.msk [vmem:[%s18246_s10 + $0x28] sm:$0xff] %vm10702_vm13, %v11011_v24 }
 0x8d3   : > { %v11013_v19 = vpop.permute.xlu1 %11012 }
 0x8d4   : > { %11021 = vst.msk [vmem:[%s18246_s10 + $0x38] sm:$0xff] %vm10702_vm13, %v11013_v19  ;;  %vm20552_vm13 = vmmov %vm20549_vm0 }
 0x8d5   : > { %v11027_v35 = vpop.permute.xlu0 %11026 }
 0x8d6   : > { %11038 = vst.msk [vmem:[%s18246_s10 + $0x8] sm:$0xff] %vm10723_vm2, %v11027_v35 }
 0x8d7   : > { %v11029_v52 = vpop.permute.xlu1 %11028 }
 0x8d8   : > { %11039 = vst.msk [vmem:[%s18246_s10 + $0x18] sm:$0xff] %vm10723_vm2, %v11029_v52 }
 0x8d9   : > { %v11031_v4 = vpop.permute.xlu0 %11030 }
 0x8da   : > { %11040 = vst.msk [vmem:[%s18246_s10 + $0x28] sm:$0xff] %vm10723_vm2, %v11031_v4 }
 0x8db   : > { %v11033_v37 = vpop.permute.xlu1 %11032 }
 0x8dc   : > { %11041 = vst.msk [vmem:[%s18246_s10 + $0x38] sm:$0xff] %vm10723_vm2, %v11033_v37  ;;  %vm20553_vm2 = vcmask 1048512  }
 0x8dd   : > { %v11047_v17 = vpop.permute.xlu0 %11046 }
 0x8de   : > { %11058 = vst.msk [vmem:[%s18246_s10 + $0x8] sm:$0xff] %vm10744_vm12, %v11047_v17 }
 0x8df   : > { %v11049_v34 = vpop.permute.xlu1 %11048 }
 0x8e0   : > { %11059 = vst.msk [vmem:[%s18246_s10 + $0x18] sm:$0xff] %vm10744_vm12, %v11049_v34 }
 0x8e1   : > { %v11051_v14 = vpop.permute.xlu0 %11050 }
 0x8e2   : > { %11060 = vst.msk [vmem:[%s18246_s10 + $0x28] sm:$0xff] %vm10744_vm12, %v11051_v14 }
 0x8e3   : > { %v11053_v31 = vpop.permute.xlu1 %11052 }
 0x8e4   : > { %11061 = vst.msk [vmem:[%s18246_s10 + $0x38] sm:$0xff] %vm10744_vm12, %v11053_v31  ;;  %vm20554_vm12 = vmmov %vm20553_vm2 }
 0x8e5   : > { %v11067_v12 = vpop.permute.xlu0 %11066 }
 0x8e6   : > { %11078 = vst.msk [vmem:[%s18246_s10 + $0x8] sm:$0xff] %vm10765_vm14, %v11067_v12 }
 0x8e7   : > { %v11069_v27 = vpop.permute.xlu1 %11068 }
 0x8e8   : > { %11079 = vst.msk [vmem:[%s18246_s10 + $0x18] sm:$0xff] %vm10765_vm14, %v11069_v27 }
 0x8e9   : > { %v11071_v30 = vpop.permute.xlu0 %11070 }
 0x8ea   : > { %11080 = vst.msk [vmem:[%s18246_s10 + $0x28] sm:$0xff] %vm10765_vm14, %v11071_v30 }
 0x8eb   : > { %v11073_v63 = vpop.permute.xlu1 %11072 }
 0x8ec   : > { %11081 = vst.msk [vmem:[%s18246_s10 + $0x38] sm:$0xff] %vm10765_vm14, %v11073_v63  ;;  %vm20555_vm14 = vmmov %vm20553_vm2 }
 0x8ed   : > { %v11087_v23 = vpop.permute.xlu0 %11086 }
 0x8ee   : > { %11098 = vst.msk [vmem:[%s18246_s10 + $0x8] sm:$0xff] %vm10786_vm15, %v11087_v23 }
 0x8ef   : > { %v11089_v32 = vpop.permute.xlu1 %11088 }
 0x8f0   : > { %11099 = vst.msk [vmem:[%s18246_s10 + $0x18] sm:$0xff] %vm10786_vm15, %v11089_v32 }
 0x8f1   : > { %v11091_v13 = vpop.permute.xlu0 %11090 }
 0x8f2   : > { %11100 = vst.msk [vmem:[%s18246_s10 + $0x28] sm:$0xff] %vm10786_vm15, %v11091_v13 }
 0x8f3   : > { %v11093_v6 = vpop.permute.xlu1 %11092 }
 0x8f4   : > { %11101 = vst.msk [vmem:[%s18246_s10 + $0x38] sm:$0xff] %vm10786_vm15, %v11093_v6  ;;  %vm20556_vm15 = vmmov %vm20553_vm2 }
 0x8f5   : > { %v11107_v57 = vpop.permute.xlu0 %11106 }
 0x8f6   : > { %11118 = vst.msk [vmem:[%s18246_s10 + $0x8] sm:$0xff] %vm10807_vm3, %v11107_v57 }
 0x8f7   : > { %v11109_v42 = vpop.permute.xlu1 %11108 }
 0x8f8   : > { %11119 = vst.msk [vmem:[%s18246_s10 + $0x18] sm:$0xff] %vm10807_vm3, %v11109_v42 }
 0x8f9   : > { %v11111_v0 = vpop.permute.xlu0 %11110 }
 0x8fa   : > { %11120 = vst.msk [vmem:[%s18246_s10 + $0x28] sm:$0xff] %vm10807_vm3, %v11111_v0 }
 0x8fb   : > { %v11113_v26 = vpop.permute.xlu1 %11112 }
 0x8fc   : > { %11121 = vst.msk [vmem:[%s18246_s10 + $0x38] sm:$0xff] %vm10807_vm3, %v11113_v26 }
 0x8fd   : > { %v11127_v18 = vpop.permute.xlu0 %11126 }
 0x8fe   : > { %11138 = vst.msk [vmem:[%s18246_s10 + $0x8] sm:$0xff] %vm10828_vm4, %v11127_v18 }
 0x8ff   : > { %v11129_v56 = vpop.permute.xlu1 %11128 }
 0x900   : > { %11139 = vst.msk [vmem:[%s18246_s10 + $0x18] sm:$0xff] %vm10828_vm4, %v11129_v56 }
 0x901   : > { %v11131_v50 = vpop.permute.xlu0 %11130 }
 0x902   : > { %11140 = vst.msk [vmem:[%s18246_s10 + $0x28] sm:$0xff] %vm10828_vm4, %v11131_v50 }
 0x903   : > { %v11133_v61 = vpop.permute.xlu1 %11132 }
 0x904   : > { %11141 = vst.msk [vmem:[%s18246_s10 + $0x38] sm:$0xff] %vm10828_vm4, %v11133_v61 }
 0x905   : > { %v11147_v54 = vpop.permute.xlu0 %11146 }
 0x906   : > { %11158 = vst.msk [vmem:[%s18246_s10 + $0x8] sm:$0xff] %vm10849_vm5, %v11147_v54 }
 0x907   : > { %v11149_v29 = vpop.permute.xlu1 %11148 }
 0x908   : > { %11159 = vst.msk [vmem:[%s18246_s10 + $0x18] sm:$0xff] %vm10849_vm5, %v11149_v29 }
 0x909   : > { %v11151_v20 = vpop.permute.xlu0 %11150 }
 0x90a   : > { %11160 = vst.msk [vmem:[%s18246_s10 + $0x28] sm:$0xff] %vm10849_vm5, %v11151_v20 }
 0x90b   : > { %v11153_v36 = vpop.permute.xlu1 %11152 }
 0x90c   : > { %11161 = vst.msk [vmem:[%s18246_s10 + $0x38] sm:$0xff] %vm10849_vm5, %v11153_v36 }
 0x90d   : > { %v11167_v45 = vpop.permute.xlu0 %11166 }
 0x90e   : > { %11178 = vst.msk [vmem:[%s18246_s10 + $0x8] sm:$0xff] %vm10870_vm7, %v11167_v45 }
 0x90f   : > { %v11169_v48 = vpop.permute.xlu1 %11168 }
 0x910   : > { %11179 = vst.msk [vmem:[%s18246_s10 + $0x18] sm:$0xff] %vm10870_vm7, %v11169_v48 }
 0x911   : > { %v11171_v60 = vpop.permute.xlu0 %11170 }
 0x912   : > { %11180 = vst.msk [vmem:[%s18246_s10 + $0x28] sm:$0xff] %vm10870_vm7, %v11171_v60 }
 0x913   : > { %v11173_v11 = vpop.permute.xlu1 %11172 }
 0x914   : > { %11181 = vst.msk [vmem:[%s18246_s10 + $0x38] sm:$0xff] %vm10870_vm7, %v11173_v11 }
 0x915   : > { %v11187_v46 = vpop.permute.xlu0 %11186 }
 0x916   : > { %11198 = vst.msk [vmem:[%s18246_s10 + $0x8] sm:$0xff] %vm10891_vm6, %v11187_v46 }
 0x917   : > { %v11189_v44 = vpop.permute.xlu1 %11188 }
 0x918   : > { %11199 = vst.msk [vmem:[%s18246_s10 + $0x18] sm:$0xff] %vm10891_vm6, %v11189_v44 }
 0x919   : > { %v11191_v40 = vpop.permute.xlu0 %11190 }
 0x91a   : > { %11200 = vst.msk [vmem:[%s18246_s10 + $0x28] sm:$0xff] %vm10891_vm6, %v11191_v40 }
 0x91b   : > { %v11193_v55 = vpop.permute.xlu1 %11192 }
 0x91c   : > { %11201 = vst.msk [vmem:[%s18246_s10 + $0x38] sm:$0xff] %vm10891_vm6, %v11193_v55 }
 0x91d   : > { %v11207_v7 = vpop.permute.xlu0 %11206 }
 0x91e   : > { %11218 = vst.msk [vmem:[%s18246_s10 + $0x8] sm:$0xff] %vm20549_vm0, %v11207_v7 }
 0x91f   : > { %v11209_v9 = vpop.permute.xlu1 %11208 }
 0x920   : > { %11219 = vst.msk [vmem:[%s18246_s10 + $0x18] sm:$0xff] %vm20550_vm1, %v11209_v9 }
 0x921   : > { %v11211_v8 = vpop.permute.xlu0 %11210 }
 0x922   : > { %11220 = vst.msk [vmem:[%s18246_s10 + $0x28] sm:$0xff] %vm20551_vm9, %v11211_v8 }
 0x923   : > { %v11213_v22 = vpop.permute.xlu1 %11212 }
 0x924   : > { %11221 = vst.msk [vmem:[%s18246_s10 + $0x38] sm:$0xff] %vm20552_vm13, %v11213_v22 }
 0x925   : > { %v11227_v62 = vpop.permute.xlu0 %11226 }
 0x926   : > { %11238 = vst.msk [vmem:[%s18246_s10 + $0x8] sm:$0xff] %vm20553_vm2, %v11227_v62 }
 0x927   : > { %v11229_v2 = vpop.permute.xlu1 %11228 }
 0x928   : > { %11239 = vst.msk [vmem:[%s18246_s10 + $0x18] sm:$0xff] %vm20554_vm12, %v11229_v2 }
 0x929   : > { %v11231_v59 = vpop.permute.xlu0 %11230 }
 0x92a   : > { %11240 = vst.msk [vmem:[%s18246_s10 + $0x28] sm:$0xff] %vm20555_vm14, %v11231_v59 }
 0x92b   : > { %v11233_v5 = vpop.permute.xlu1 %11232 }
 0x92c   : > { %11241 = vst.msk [vmem:[%s18246_s10 + $0x38] sm:$0xff] %vm20556_vm15, %v11233_v5 }
 0x92d   : > { %v11243_v47 = vld [vmem:[%s18246_s10 + $0x8] sm:$0xff] }
 0x92e   : > { %v11263_v25 = vadd.f32 %v11259_v21, %v11243_v47 }
 0x92f   : > { %v11245_v58 = vld [vmem:[%s18246_s10 + $0x18] sm:$0xff] }
 0x930   : > { %vm11272_vm3 = vcmp.gt.f32.partialorder %v11263_v25, 0.0  ;;  %v11281_v51 = vmul.f32 %v18703_v15, %v11263_v25  ;;  %v11265_v49 = vadd.f32 %v11259_v21, %v11245_v58 }
 0x931   : > { %v11247_v16 = vld [vmem:[%s18246_s10 + $0x28] sm:$0xff] }
 0x932   : > { %v11289_v38 = vsel %vm11272_vm3, %v11263_v25, %v11281_v51  ;;  %vm11274_vm4 = vcmp.gt.f32.partialorder %v11265_v49, 0.0  ;;  %v11283_v43 = vmul.f32 %v18703_v15, %v11265_v49  ;;  %v11267_v41 = vadd.f32 %v11259_v21, %v11247_v16 }
 0x933   : > { %11297 = vst [vmem:[%s18246_s10 + $0x8] sm:$0xff] %v11289_v38  ;;  %v11249_v28 = vld [vmem:[%s18246_s10 + $0x38] sm:$0xff] }
 0x934   : > { %v11291_v33 = vsel %vm11274_vm4, %v11265_v49, %v11283_v43  ;;  %vm11276_vm5 = vcmp.gt.f32.partialorder %v11267_v41, 0.0  ;;  %v11285_v1 = vmul.f32 %v18703_v15, %v11267_v41  ;;  %v11269_v39 = vadd.f32 %v11259_v21, %v11249_v28 }
 0x935   : > { %11299 = vst [vmem:[%s18246_s10 + $0x18] sm:$0xff] %v11291_v33 }
 0x936   : > { %v11293_v3 = vsel %vm11276_vm5, %v11267_v41, %v11285_v1  ;;  %vm11278_vm7 = vcmp.gt.f32.partialorder %v11269_v39, 0.0  ;;  %v11287_v10 = vmul.f32 %v18703_v15, %v11269_v39 }
 0x937   : > { %11301 = vst [vmem:[%s18246_s10 + $0x28] sm:$0xff] %v11293_v3 }
 0x938   : > { %v11295_v24 = vsel %vm11278_vm7, %v11269_v39, %v11287_v10 }
 0x939   : > { %11303 = vst [vmem:[%s18246_s10 + $0x38] sm:$0xff] %v11295_v24 }
 0x93a   : > { %12040 = shalt.err (!%p12037_p3)
}
 0x93b   : > { %s12041_s26 = scalar_lea.hbm %s18860_s13, 1024  ;;  %s12045_s8 = scalar_lea.hbm %s18915_s5, 2048 }
 0x93c   : > { %p12042_p4 = scmp.ne.s32.totalorder %s18860_s13, %s12041_s26  ;;  %p12046_p9 = scmp.lt.u32.totalorder %s18860_s13, %s18915_s5 }
 0x93d   : > { %p12047_p10 = scmp.lt.u32.totalorder %s12045_s8, %s12041_s26  ;;  %p12049_p12 = scmp.lt.u32.totalorder %s12041_s26, %s18860_s13 }
 0x93e   : > { %p12043_p7 = pnand %p12042_p4, %p12192_p5 }
 0x93f   : > { %p12048_p11 = por %p12047_p10, %p12046_p9 }
 0x940   : > { %p12044_p8 = pneg %p12043_p7 }
 0x941   : > { %p12050_p13 = por %p12049_p12, %p12048_p11 }
 0x943   : > { %p12051_p0 = pnand %p12050_p13, %p12044_p8 }
 0x945   : > { %12054 = shalt.err (!%p12051_p0)
}
 0x946   : > { %s12120_s7 = smov 256  }
 0x947   : > { %11822 = dma.vmem_to_hbm [thread:$0]  (%p12192_p5), %s18863_s18, 1024, %s18860_s13, %s18868_s4, %s12120_s7, %s12120_s7, %s12110_s15  }
 0x948 PF: > { %p11828_p1 = scmp.ge.s32.totalorder %s12089_s23, 2  ;;  %s11334_s16 = sand.u32 1, %s12077_s20  }
 0x949   : > { %s11335_s9 = scalar_lea.sflag [#allocation5], %s11334_s16 }
 0x94a   : > { %p11825_p2 = pnand %p11828_p1, %p12196_p6 }
 0x94c   : > { %12072 = dma.done.wait (!%p11825_p2), %s11335_s9, 1024  }
 0x94d   : > { %12074 = vsyncadd (!%p11825_p2), %s11335_s9, 4294966272  ;;  %p16_p3 = scmp.ge.s32.totalorder %s12179_s25, 4   ;;  %s20557_s20 = smov %s12081_s21 }
 0x94e   : > { %s20558_s21 = smov %s12085_s22  ;;  %s20559_s22 = smov %s12190_s28 }
 0x94f   : > { %s20560_s23 = smov %s12179_s25  ;;  %18 = sbr.rel (!%p16_p3) target bundleno = 5 (0x5), region = 75 }
 0x956   :  { %11340 = vsyncpa [#allocation5], 1 }
 0x957   :  { %11342 = vsyncpa [#allocation5 + $0x1], 1 }

</bundles_post_ra>
